<compile_context>
chip_gen: v7x
topology: tpu7x:2x2x1
jax: 0.10.0
libtpu: 0.0.40
codegen_flags: <defaults>
</compile_context>

<pallas_src>
import jax
import jax.numpy as jnp
from jax import lax
from jax.experimental import pallas as pl
from jax.experimental.pallas import tpu as pltpu

LANE = 128
HID = 512                   # RND head width (lane multiple)
FEAT = 7 * 7 * 64           # 3136 flattened conv features (full last dim -> legal block)


def _round_up(x, m):
    return ((x + m - 1) // m) * m


def _vmem_limit_bytes():
    """~75% of physical VMEM: ~96 MiB on v5e/v6e (128 MiB), ~48 MiB on v7x (64 MiB)."""
    cap = 64 * 1024 * 1024
    try:
        info = pltpu.get_tpu_info()
        cap = int(getattr(info, "vmem_capacity_bytes", cap) or cap)
    except Exception:
        pass
    return cap - cap // 4


# ----------------------------------------------------------------------------
# Fused dense-head kernel (predictor 3-layer MLP + target linear + MSE rows)
# ----------------------------------------------------------------------------
def rnd_heads_kernel(fp_ref, ft_ref, w1_ref, w2_ref, w3_ref, wt_ref, bias_ref,
                     pred_ref, targ_ref, mse_ref):
    """One batch tile: bf16 features x bf16 weights on the MXU, f32 accumulation.

    fp/ft: [tb, FEAT] bf16.  bias_ref: [4, HID] f32 rows = (b1, b2, b3, bt).
    Outputs: pred/targ [tb, HID] bf16, mse [tb, LANE] f32 (per-row sum((t-y)^2)
    broadcast over lanes -> lane-dense unmasked stores).
    """
    b1 = bias_ref[0:1, :]
    b2 = bias_ref[1:2, :]
    b3 = bias_ref[2:3, :]
    bt = bias_ref[3:4, :]

    # ----- target head: single linear ---------------------------------------
    t = jnp.dot(ft_ref[...], wt_ref[...], preferred_element_type=jnp.float32) + bt

    # ----- predictor head: Linear -> ReLU -> Linear -> ReLU -> Linear -------
    h = jnp.dot(fp_ref[...], w1_ref[...], preferred_element_type=jnp.float32)
    h = jnp.maximum(h + b1, 0.0).astype(w2_ref.dtype)
    h = jnp.dot(h, w2_ref[...], preferred_element_type=jnp.float32)
    h = jnp.maximum(h + b2, 0.0).astype(w3_ref.dtype)
    y = jnp.dot(h, w3_ref[...], preferred_element_type=jnp.float32) + b3

    pred_ref[...] = y.astype(pred_ref.dtype)
    targ_ref[...] = t.astype(targ_ref.dtype)

    # ----- fused MSE partials (free VPU/XLU filler under the MXU body) ------
    d = t - y
    ssd = jnp.sum(d * d, axis=-1, keepdims=True)              # [tb, 1] f32
    mse_ref[...] = jnp.broadcast_to(ssd, mse_ref.shape)


def rnd_heads(feat_pred, feat_targ, params, *, tile_b=512):
    """Fused dense heads: bf16 [B, FEAT] x2 -> (pred bf16, targ bf16, reward f32)."""
    B = feat_pred.shape[0]

    # >=2 grid steps (v7x: shard over both TCs; also lets input DMA pipeline),
    # tile chosen so batch-pad overshoot stays < 8 rows.
    nsteps = max(pl.cdiv(B, tile_b), 2)
    tb = _round_up(pl.cdiv(B, nsteps), 8)
    b_pad = tb * nsteps

    def prep_feat(f):
        f = f.astype(jnp.bfloat16)                       # no-op: trunk already emits bf16
        return jnp.pad(f, ((0, b_pad - B), (0, 0)))

    fp = prep_feat(feat_pred)
    ft = prep_feat(feat_targ)

    # bf16 weights (MXU peak, halves weight DMA); biases stacked f32 (4, HID).
    w1 = params["w1"].astype(jnp.bfloat16)
    w2 = params["w2"].astype(jnp.bfloat16)
    w3 = params["w3"].astype(jnp.bfloat16)
    wt = params["wt"].astype(jnp.bfloat16)
    bias = jnp.concatenate(
        [params["b1"], params["b2"], params["b3"], params["bt"]], axis=0
    ).astype(jnp.float32)                                # (4, HID)

    grid = (nsteps,)
    feat_spec = pl.BlockSpec((tb, FEAT), lambda i: (i, 0))
    head_spec = pl.BlockSpec((tb, HID), lambda i: (i, 0))
    mse_spec = pl.BlockSpec((tb, LANE), lambda i: (i, 0))

    def resident(shape):
        # Constant index_map + single buffer: fetched once, VMEM-resident, no
        # second copy (saves ~7.4 MiB of VMEM vs default double-buffering).
        return pl.BlockSpec(shape, lambda i: (0, 0), pipeline_mode=pl.Buffered(1))

    flops = 2 * b_pad * (2 * FEAT * HID + 2 * HID * HID)
    bytes_accessed = int(
        (fp.size + ft.size) * 2
        + (w1.size + w2.size + w3.size + wt.size) * 2
        + bias.size * 4
        + 2 * b_pad * HID * 2            # pred/targ bf16 writeback
        + b_pad * LANE * 4)              # mse rows

    # TODO(synk): for very small B on v5e, a K grid axis over FEAT would hide the
    # one-shot resident-weight DMA behind compute; omitted (amortized at larger B).
    pred, targ, mse_rows = pl.pallas_call(
        rnd_heads_kernel,
        out_shape=(jax.ShapeDtypeStruct((b_pad, HID), jnp.bfloat16),
                   jax.ShapeDtypeStruct((b_pad, HID), jnp.bfloat16),
                   jax.ShapeDtypeStruct((b_pad, LANE), jnp.float32)),
        grid=grid,
        in_specs=[
            feat_spec, feat_spec,
            resident((FEAT, HID)),       # w1
            resident((HID, HID)),        # w2
            resident((HID, HID)),        # w3
            resident((FEAT, HID)),       # wt
            resident((4, HID)),          # stacked biases
        ],
        out_specs=(head_spec, head_spec, mse_spec),
        compiler_params=pltpu.CompilerParams(
            dimension_semantics=("parallel",),          # v7x: batch over both TCs
            vmem_limit_bytes=_vmem_limit_bytes(),
        ),
        cost_estimate=pl.CostEstimate(
            flops=flops, transcendentals=0, bytes_accessed=bytes_accessed),
    )(fp, ft, w1, w2, w3, wt, bias)

    reward = jnp.sum(mse_rows[:B, 0]) / jnp.float32(B * HID)   # mean over B*512
    return pred[:B], targ[:B], reward


# ----------------------------------------------------------------------------
# Conv trunks (XLA): both trunks merged into one set of NHWC grouped convs
# ----------------------------------------------------------------------------
def conv_trunks_fused(x, params):
    """Both trunks as one conv stack; returns bf16 torch-flatten-order features.

    x: [B, 1, 84, 84] (NCHW) -> (feat_pred, feat_targ), each [B, 3136] bf16.
    """
    # TODO(synk): the conv trunk itself stays on lax.conv (XLA); an im2col Pallas
    # conv kernel is a follow-up.
    mp, tp = params["model_conv"], params["target_conv"]
    dn = ("NHWC", "HWIO", "NHWC")

    def hwio(w_pred, w_targ):
        w = jnp.concatenate([w_pred, w_targ], axis=0)     # (2*O, I, KH, KW) OIHW
        return jnp.transpose(w, (2, 3, 1, 0))             # -> (KH, KW, I, 2*O)

    k1 = hwio(mp["c1_w"], tp["c1_w"]); kb1 = jnp.concatenate([mp["c1_b"], tp["c1_b"]])
    k2 = hwio(mp["c2_w"], tp["c2_w"]); kb2 = jnp.concatenate([mp["c2_b"], tp["c2_b"]])
    k3 = hwio(mp["c3_w"], tp["c3_w"]); kb3 = jnp.concatenate([mp["c3_b"], tp["c3_b"]])

    h = jnp.transpose(x, (0, 2, 3, 1))                    # NCHW -> NHWC
    h = lax.conv_general_dilated(h, k1, (4, 4), "VALID", dimension_numbers=dn)
    h = jax.nn.leaky_relu(h + kb1[None, None, None, :])
    h = lax.conv_general_dilated(h, k2, (2, 2), "VALID", dimension_numbers=dn,
                                 feature_group_count=2)
    h = jax.nn.leaky_relu(h + kb2[None, None, None, :])
    h = lax.conv_general_dilated(h, k3, (1, 1), "VALID", dimension_numbers=dn,
                                 feature_group_count=2)
    h = jax.nn.leaky_relu(h + kb3[None, None, None, :])   # (B, 7, 7, 128)

    B = x.shape[0]

    def flat(feat_nhwc):
        # torch's x.view(B, -1) flattens NCHW -> (C, H, W) order per sample.
        return jnp.transpose(feat_nhwc, (0, 3, 1, 2)).reshape(B, FEAT).astype(jnp.bfloat16)

    return flat(h[..., :64]), flat(h[..., 64:])


def conv_trunk_ref(x, p):
    """Reference trunk (separate, NCHW, f32) — used only for correctness checks."""
    dn = ("NCHW", "OIHW", "NCHW")
    h = lax.conv_general_dilated(x, p["c1_w"], (4, 4), "VALID", dimension_numbers=dn)
    h = jax.nn.leaky_relu(h + p["c1_b"][None, :, None, None])
    h = lax.conv_general_dilated(h, p["c2_w"], (2, 2), "VALID", dimension_numbers=dn)
    h = jax.nn.leaky_relu(h + p["c2_b"][None, :, None, None])
    h = lax.conv_general_dilated(h, p["c3_w"], (1, 1), "VALID", dimension_numbers=dn)
    h = jax.nn.leaky_relu(h + p["c3_b"][None, :, None, None])
    return h.reshape(x.shape[0], -1)


def rnd_forward(next_obs, params, *, tile_b=512):
    """RNDModel.forward: scalar MSE between target and predictor features."""
    feat_pred, feat_targ = conv_trunks_fused(next_obs, params)
    pred, targ, reward = rnd_heads(feat_pred, feat_targ, params, tile_b=tile_b)
    return reward, (pred, targ)


# ----------------------------------------------------------------------------
# Parameter init
# ----------------------------------------------------------------------------
def init_params(key):
    """Deterministic init.
    TODO(synk): PyTorch uses orthogonal(sqrt(2)) init; we use normal(sqrt(2/fan_in))
    with zero biases — forward-equivalent in structure, not weight-for-weight."""
    ks = list(jax.random.split(key, 10))
    it = iter(ks)

    def conv(k, c_out, c_in, kh, kw):
        fan_in = c_in * kh * kw
        w = jax.random.normal(k, (c_out, c_in, kh, kw), jnp.float32) * jnp.sqrt(2.0 / fan_in)
        return w, jnp.zeros((c_out,), jnp.float32)

    def linear(k, fan_in, fan_out):
        w = jax.random.normal(k, (fan_in, fan_out), jnp.float32) * jnp.sqrt(2.0 / fan_in)
        return w, jnp.zeros((1, fan_out), jnp.float32)

    def trunk():
        c1w, c1b = conv(next(it), 32, 1, 8, 8)
        c2w, c2b = conv(next(it), 64, 32, 4, 4)
        c3w, c3b = conv(next(it), 64, 64, 3, 3)
        return dict(c1_w=c1w, c1_b=c1b, c2_w=c2w, c2_b=c2b, c3_w=c3w, c3_b=c3b)

    model_conv = trunk()
    target_conv = trunk()
    w1, b1 = linear(next(it), FEAT, HID)
    w2, b2 = linear(next(it), HID, HID)
    w3, b3 = linear(next(it), HID, HID)
    wt, bt = linear(next(it), FEAT, HID)
    return dict(model_conv=model_conv, target_conv=target_conv,
                w1=w1, b1=b1, w2=w2, b2=b2, w3=w3, b3=b3, wt=wt, bt=bt)


if __name__ == "__main__":
    key = jax.random.PRNGKey(0)
    k_x, k_p = jax.random.split(key)

    B = 2
    next_obs = jax.random.normal(k_x, (B, 1, 84, 84), dtype=jnp.float32)
    params = init_params(k_p)

    reward, (pred, targ) = jax.jit(rnd_forward)(next_obs, params)
    jax.block_until_ready(reward)

    # ---- reference: separate NCHW trunks + plain JAX heads (same bf16/f32 math) ----
    bf = lambda a: a.astype(jnp.bfloat16)
    fp_r = bf(conv_trunk_ref(next_obs, params["model_conv"]))
    ft_r = bf(conv_trunk_ref(next_obs, params["target_conv"]))

    t_ref = jnp.dot(ft_r, bf(params["wt"]), preferred_element_type=jnp.float32) + params["bt"]
    h = jnp.dot(fp_r, bf(params["w1"]), preferred_element_type=jnp.float32) + params["b1"]
    h = jnp.maximum(h, 0.0)
    h = jnp.dot(bf(h), bf(params["w2"]), preferred_element_type=jnp.float32) + params["b2"]
    h = jnp.maximum(h, 0.0)
    p_ref = jnp.dot(bf(h), bf(params["w3"]), preferred_element_type=jnp.float32) + params["b3"]
    reward_ref = jnp.mean((t_ref - p_ref) ** 2)

    assert pred.shape == (B, HID) and targ.shape == (B, HID)
    assert jnp.allclose(targ.astype(jnp.float32), t_ref, atol=5e-2, rtol=5e-2)
    assert jnp.allclose(pred.astype(jnp.float32), p_ref, atol=5e-2, rtol=5e-2)
    assert jnp.allclose(reward, reward_ref, atol=5e-3, rtol=2e-2)
    print("KERNEL_OK")
</pallas_src>

<mosaic_0001>
module attributes {stable_mosaic.version = 11 : i64} {
  func.func @rnd_heads_kernel(%arg0: i32, %arg1: memref<8x3136xbf16, #tpu.memory_space<vmem>>, %arg2: memref<8x3136xbf16, #tpu.memory_space<vmem>>, %arg3: memref<3136x512xbf16, #tpu.memory_space<vmem>>, %arg4: memref<512x512xbf16, #tpu.memory_space<vmem>>, %arg5: memref<512x512xbf16, #tpu.memory_space<vmem>>, %arg6: memref<3136x512xbf16, #tpu.memory_space<vmem>>, %arg7: memref<4x512xf32, #tpu.memory_space<vmem>>, %arg8: memref<8x512xbf16, #tpu.memory_space<vmem>>, %arg9: memref<8x512xbf16, #tpu.memory_space<vmem>>, %arg10: memref<8x128xf32, #tpu.memory_space<vmem>>) attributes {dimension_semantics = [#tpu.dimension_semantics<parallel>], iteration_bounds = array<i64: 2>, scalar_prefetch = 0 : i64, scratch_operands = 0 : i64, tpu.core_type = #tpu.core_type<tc>, window_params = [{transform_indices = @transform_0, window_bounds = array<i64: 8, 3136>}, {transform_indices = @transform_1, window_bounds = array<i64: 8, 3136>}, {pipeline_mode = #tpu.pipeline_mode<synchronous>, transform_indices = @transform_2, window_bounds = array<i64: 3136, 512>}, {pipeline_mode = #tpu.pipeline_mode<synchronous>, transform_indices = @transform_3, window_bounds = array<i64: 512, 512>}, {pipeline_mode = #tpu.pipeline_mode<synchronous>, transform_indices = @transform_4, window_bounds = array<i64: 512, 512>}, {pipeline_mode = #tpu.pipeline_mode<synchronous>, transform_indices = @transform_5, window_bounds = array<i64: 3136, 512>}, {pipeline_mode = #tpu.pipeline_mode<synchronous>, transform_indices = @transform_6, window_bounds = array<i64: 4, 512>}, {transform_indices = @transform_7, window_bounds = array<i64: 8, 512>}, {transform_indices = @transform_8, window_bounds = array<i64: 8, 512>}, {transform_indices = @transform_9, window_bounds = array<i64: 8, 128>}]} {
    %c0 = arith.constant 0 : index
    %c0_0 = arith.constant 0 : index
    %0 = vector.load %arg7[%c0, %c0_0] : memref<4x512xf32, #tpu.memory_space<vmem>>, vector<1x512xf32>
    %c1 = arith.constant 1 : index
    %c0_1 = arith.constant 0 : index
    %1 = vector.load %arg7[%c1, %c0_1] : memref<4x512xf32, #tpu.memory_space<vmem>>, vector<1x512xf32>
    %c2 = arith.constant 2 : index
    %c0_2 = arith.constant 0 : index
    %2 = vector.load %arg7[%c2, %c0_2] : memref<4x512xf32, #tpu.memory_space<vmem>>, vector<1x512xf32>
    %c3 = arith.constant 3 : index
    %c0_3 = arith.constant 0 : index
    %3 = vector.load %arg7[%c3, %c0_3] : memref<4x512xf32, #tpu.memory_space<vmem>>, vector<1x512xf32>
    %c0_4 = arith.constant 0 : index
    %c0_5 = arith.constant 0 : index
    %4 = vector.load %arg2[%c0_4, %c0_5] : memref<8x3136xbf16, #tpu.memory_space<vmem>>, vector<8x3136xbf16>
    %c0_6 = arith.constant 0 : index
    %c0_7 = arith.constant 0 : index
    %5 = vector.load %arg6[%c0_6, %c0_7] : memref<3136x512xbf16, #tpu.memory_space<vmem>>, vector<3136x512xbf16>
    %cst = arith.constant dense<0.000000e+00> : vector<8x512xf32>
    %6 = tpu.matmul %4, %5, %cst {dimension_numbers = #tpu.dot_dimension_numbers<[1], [0], [0], [1], [0, 0, 1, 1], [], []>} : vector<8x3136xbf16>, vector<3136x512xbf16>, vector<8x512xf32> -> vector<8x512xf32>
    %7 = vector.broadcast %3 : vector<1x512xf32> to vector<8x512xf32>
    %8 = arith.addf %6, %7 : vector<8x512xf32>
    %c0_8 = arith.constant 0 : index
    %c0_9 = arith.constant 0 : index
    %9 = vector.load %arg1[%c0_8, %c0_9] : memref<8x3136xbf16, #tpu.memory_space<vmem>>, vector<8x3136xbf16>
    %c0_10 = arith.constant 0 : index
    %c0_11 = arith.constant 0 : index
    %10 = vector.load %arg3[%c0_10, %c0_11] : memref<3136x512xbf16, #tpu.memory_space<vmem>>, vector<3136x512xbf16>
    %cst_12 = arith.constant dense<0.000000e+00> : vector<8x512xf32>
    %11 = tpu.matmul %9, %10, %cst_12 {dimension_numbers = #tpu.dot_dimension_numbers<[1], [0], [0], [1], [0, 0, 1, 1], [], []>} : vector<8x3136xbf16>, vector<3136x512xbf16>, vector<8x512xf32> -> vector<8x512xf32>
    %12 = vector.broadcast %0 : vector<1x512xf32> to vector<8x512xf32>
    %13 = arith.addf %11, %12 : vector<8x512xf32>
    %cst_13 = arith.constant 0.000000e+00 : f32
    %14 = vector.broadcast %cst_13 : f32 to vector<8x512xf32>
    %15 = arith.maximumf %13, %14 : vector<8x512xf32>
    %16 = arith.truncf %15 : vector<8x512xf32> to vector<8x512xbf16>
    %c0_14 = arith.constant 0 : index
    %c0_15 = arith.constant 0 : index
    %17 = vector.load %arg4[%c0_14, %c0_15] : memref<512x512xbf16, #tpu.memory_space<vmem>>, vector<512x512xbf16>
    %cst_16 = arith.constant dense<0.000000e+00> : vector<8x512xf32>
    %18 = tpu.matmul %16, %17, %cst_16 {dimension_numbers = #tpu.dot_dimension_numbers<[1], [0], [0], [1], [0, 0, 1, 1], [], []>} : vector<8x512xbf16>, vector<512x512xbf16>, vector<8x512xf32> -> vector<8x512xf32>
    %19 = vector.broadcast %1 : vector<1x512xf32> to vector<8x512xf32>
    %20 = arith.addf %18, %19 : vector<8x512xf32>
    %cst_17 = arith.constant 0.000000e+00 : f32
    %21 = vector.broadcast %cst_17 : f32 to vector<8x512xf32>
    %22 = arith.maximumf %20, %21 : vector<8x512xf32>
    %23 = arith.truncf %22 : vector<8x512xf32> to vector<8x512xbf16>
    %c0_18 = arith.constant 0 : index
    %c0_19 = arith.constant 0 : index
    %24 = vector.load %arg5[%c0_18, %c0_19] : memref<512x512xbf16, #tpu.memory_space<vmem>>, vector<512x512xbf16>
    %cst_20 = arith.constant dense<0.000000e+00> : vector<8x512xf32>
    %25 = tpu.matmul %23, %24, %cst_20 {dimension_numbers = #tpu.dot_dimension_numbers<[1], [0], [0], [1], [0, 0, 1, 1], [], []>} : vector<8x512xbf16>, vector<512x512xbf16>, vector<8x512xf32> -> vector<8x512xf32>
    %26 = vector.broadcast %2 : vector<1x512xf32> to vector<8x512xf32>
    %27 = arith.addf %25, %26 : vector<8x512xf32>
    %28 = arith.truncf %27 : vector<8x512xf32> to vector<8x512xbf16>
    %c0_21 = arith.constant 0 : index
    %c0_22 = arith.constant 0 : index
    %29 = vector.load %arg8[%c0_21, %c0_22] : memref<8x512xbf16, #tpu.memory_space<vmem>>, vector<8x512xbf16>
    tpu.vector_store %arg8[%c0_21, %c0_22], %28 {strides = array<i32>} : memref<8x512xbf16, #tpu.memory_space<vmem>>, vector<8x512xbf16>,
    %30 = arith.truncf %8 : vector<8x512xf32> to vector<8x512xbf16>
    %c0_23 = arith.constant 0 : index
    %c0_24 = arith.constant 0 : index
    %31 = vector.load %arg9[%c0_23, %c0_24] : memref<8x512xbf16, #tpu.memory_space<vmem>>, vector<8x512xbf16>
    tpu.vector_store %arg9[%c0_23, %c0_24], %30 {strides = array<i32>} : memref<8x512xbf16, #tpu.memory_space<vmem>>, vector<8x512xbf16>,
    %32 = arith.subf %8, %27 : vector<8x512xf32>
    %33 = arith.mulf %32, %32 : vector<8x512xf32>
    %cst_25 = arith.constant dense<0.000000e+00> : vector<8xf32>
    %34 = vector.multi_reduction <add>, %33, %cst_25 [1] : vector<8x512xf32> to vector<8xf32>
    %35 = vector.shape_cast %34 : vector<8xf32> to vector<8x1xf32>
    %36 = vector.shape_cast %35 : vector<8x1xf32> to vector<8x1xf32>
    %37 = vector.broadcast %36 : vector<8x1xf32> to vector<8x128xf32>
    %c0_26 = arith.constant 0 : index
    %c0_27 = arith.constant 0 : index
    %38 = vector.load %arg10[%c0_26, %c0_27] : memref<8x128xf32, #tpu.memory_space<vmem>>, vector<8x128xf32>
    tpu.vector_store %arg10[%c0_26, %c0_27], %37 {strides = array<i32>} : memref<8x128xf32, #tpu.memory_space<vmem>>, vector<8x128xf32>,
    return
  }
  func.func @transform_0(%arg0: i32) -> (i32, i32) {
    %c0_i32 = arith.constant 0 : i32
    %c0_i32_0 = arith.constant 0 : i32
    return %arg0, %c0_i32 : i32, i32
  }
  func.func @transform_1(%arg0: i32) -> (i32, i32) {
    %c0_i32 = arith.constant 0 : i32
    %c0_i32_0 = arith.constant 0 : i32
    return %arg0, %c0_i32 : i32, i32
  }
  func.func @transform_2(%arg0: i32) -> (i32, i32) {
    %c0_i32 = arith.constant 0 : i32
    %c0_i32_0 = arith.constant 0 : i32
    %c0_i32_1 = arith.constant 0 : i32
    return %c0_i32, %c0_i32_0 : i32, i32
  }
  func.func @transform_3(%arg0: i32) -> (i32, i32) {
    %c0_i32 = arith.constant 0 : i32
    %c0_i32_0 = arith.constant 0 : i32
    %c0_i32_1 = arith.constant 0 : i32
    return %c0_i32, %c0_i32_0 : i32, i32
  }
  func.func @transform_4(%arg0: i32) -> (i32, i32) {
    %c0_i32 = arith.constant 0 : i32
    %c0_i32_0 = arith.constant 0 : i32
    %c0_i32_1 = arith.constant 0 : i32
    return %c0_i32, %c0_i32_0 : i32, i32
  }
  func.func @transform_5(%arg0: i32) -> (i32, i32) {
    %c0_i32 = arith.constant 0 : i32
    %c0_i32_0 = arith.constant 0 : i32
    %c0_i32_1 = arith.constant 0 : i32
    return %c0_i32, %c0_i32_0 : i32, i32
  }
  func.func @transform_6(%arg0: i32) -> (i32, i32) {
    %c0_i32 = arith.constant 0 : i32
    %c0_i32_0 = arith.constant 0 : i32
    %c0_i32_1 = arith.constant 0 : i32
    return %c0_i32, %c0_i32_0 : i32, i32
  }
  func.func @transform_7(%arg0: i32) -> (i32, i32) {
    %c0_i32 = arith.constant 0 : i32
    %c0_i32_0 = arith.constant 0 : i32
    return %arg0, %c0_i32 : i32, i32
  }
  func.func @transform_8(%arg0: i32) -> (i32, i32) {
    %c0_i32 = arith.constant 0 : i32
    %c0_i32_0 = arith.constant 0 : i32
    return %arg0, %c0_i32 : i32, i32
  }
  func.func @transform_9(%arg0: i32) -> (i32, i32) {
    %c0_i32 = arith.constant 0 : i32
    %c0_i32_0 = arith.constant 0 : i32
    return %arg0, %c0_i32 : i32, i32
  }
}

</mosaic_0001>

<bundles_post_ra>
// kernel: rnd_forward.1
= control target key start
LH: loop header
LB: loop body
LE: loop exit
PB: predicated region body
PF: predicated region fallthrough
CT: control target
= control target key end

     0   :  { %s19260_s30 = smov 0   ;;  %s25021_s0 = inlined_call_operand.vmem [shape: bf16[16,3136], index: 0, kind: input, shape index: {}]   ;;  %s25022_s1 = inlined_call_operand.vmem [shape: bf16[16,3136], index: 1, kind: input, shape index: {}]   ;;  %s25023_s2 = inlined_call_operand.vmem [shape: bf16[3136,512], index: 2, kind: input, shape index: {}]   ;;  %s25024_s3 = inlined_call_operand.vmem [shape: bf16[512,512], index: 3, kind: input, shape index: {}]   ;;  %s25025_s4 = inlined_call_operand.vmem [shape: bf16[512,512], index: 4, kind: input, shape index: {}]   ;;  %s25026_s5 = inlined_call_operand.vmem [shape: bf16[3136,512], index: 5, kind: input, shape index: {}]   ;;  %s25027_s6 = inlined_call_operand.vmem [shape: f32[4,512], index: 6, kind: input, shape index: {}]   ;;  %s25028_s7 = inlined_call_operand.vmem [shape: bf16[16,512], index: 7, kind: output, shape index: {0}]   ;;  %s25029_s8 = inlined_call_operand.vmem [shape: bf16[16,512], index: 8, kind: output, shape index: {1}]   ;;  %s25030_s9 = inlined_call_operand.vmem [shape: f32[16,128], index: 9, kind: output, shape index: {2}]  }
   0x1 LB: > { %s14276_s10 = sadd.s32 4294967295, %s19207_s30   ;;  %p14280_p0 = scmp.ge.s32.totalorder %s19207_s30, 1  ;;  %s19207_s30 = sphi %s19260_s30, %s20_s30  }
   0x2   : > { %p302_p1 = scmp.lt.s32.totalorder %s19207_s30, 3 }
   0x4   : > { %p303_p2 = pnand %p14280_p0, %p302_p1 }
   0x5   : > { %v16415_v0 = vld [vmem:[%s25026_s5 + $0x4] ss:$16 sps:$4 sm:$0xff] (!%p303_p2)   ;;  %v16417_v1 = vld [vmem:[%s25026_s5 + $0xc] ss:$16 sps:$4 sm:$0xff] (!%p303_p2)   ;;  %v16419_v2 = vld [vmem:[%s25026_s5] ss:$16 sps:$4 sm:$0xff] (!%p303_p2)  }
   0x6   : > { %306 = sbr.rel (%p303_p2) target bundleno = 2510 (0x9ce), region = 48  ;;  %5213 = vmatprep.subr.bf16.mxu0 (!%p303_p2), %v16415_v0  ;;  %v16420_v3 = vld [vmem:[%s25026_s5 + $0x8] ss:$16 sps:$4 sm:$0xff] (!%p303_p2)   ;;  %5746 = vmatprep.subr.bf16.mxu1 (!%p303_p2), %v16417_v1  ;;  %v16421_v4 = vld [vmem:[%s25026_s5 + $0x24] ss:$16 sps:$4 sm:$0xff] (!%p303_p2)   ;;  %p352_p3 = scmp.lt.s32.totalorder (!%p303_p2), %s14276_s10, 1 }
   0x7   : > { %5214 = vmatpush1.bf16.msra.mxu0 (!%p303_p2), %v16419_v2  ;;  %5747 = vmatpush1.bf16.msra.mxu1 (!%p303_p2), %v16420_v3  ;;  %v16423_v5 = vld [vmem:[%s25026_s5 + $0x2c] ss:$16 sps:$4 sm:$0xff] (!%p303_p2)   ;;  %v16425_v6 = vld [vmem:[%s25026_s5 + $0x20] ss:$16 sps:$4 sm:$0xff] (!%p303_p2)   ;;  %v16426_v7 = vld [vmem:[%s25026_s5 + $0x28] ss:$16 sps:$4 sm:$0xff] (!%p303_p2)  }
   0x8   : > { %5215 = vmatprep.subr.bf16.mxu0 (!%p303_p2), %v16421_v4  ;;  %5748 = vmatprep.subr.bf16.mxu1 (!%p303_p2), %v16423_v5  ;;  %v16427_v8 = vld [vmem:[%s25026_s5 + $0x44] ss:$16 sps:$4 sm:$0xff] (!%p303_p2)   ;;  %v16429_v9 = vld [vmem:[%s25026_s5 + $0x4c] ss:$16 sps:$4 sm:$0xff] (!%p303_p2)   ;;  %v16431_v10 = vld [vmem:[%s25026_s5 + $0x40] ss:$16 sps:$4 sm:$0xff] (!%p303_p2)  }
   0x9   : > { %v16432_v11 = vld [vmem:[%s25026_s5 + $0x48] ss:$16 sps:$4 sm:$0xff] (!%p303_p2)   ;;  %v16433_v12 = vld [vmem:[%s25026_s5 + $0x64] ss:$16 sps:$4 sm:$0xff] (!%p303_p2)   ;;  %v16435_v13 = vld [vmem:[%s25026_s5 + $0x6c] ss:$16 sps:$4 sm:$0xff] (!%p303_p2)  }
   0xa   : > { %v16437_v14 = vld [vmem:[%s25026_s5 + $0x60] ss:$16 sps:$4 sm:$0xff] (!%p303_p2)   ;;  %v16438_v15 = vld [vmem:[%s25026_s5 + $0x68] ss:$16 sps:$4 sm:$0xff] (!%p303_p2)   ;;  %v16439_v16 = vld [vmem:[%s25026_s5 + $0x84] ss:$16 sps:$4 sm:$0xff] (!%p303_p2)  }
   0xb   : > { %5216 = vmatpush1.bf16.msra.mxu0 (!%p303_p2), %v16425_v6  ;;  %5749 = vmatpush1.bf16.msra.mxu1 (!%p303_p2), %v16426_v7  ;;  %v16441_v17 = vld [vmem:[%s25026_s5 + $0x8c] ss:$16 sps:$4 sm:$0xff] (!%p303_p2)   ;;  %v16443_v18 = vld [vmem:[%s25026_s5 + $0x80] ss:$16 sps:$4 sm:$0xff] (!%p303_p2)   ;;  %v16444_v19 = vld [vmem:[%s25026_s5 + $0x88] ss:$16 sps:$4 sm:$0xff] (!%p303_p2)  }
   0xc   : > { %5217 = vmatprep.subr.bf16.mxu0 (!%p303_p2), %v16427_v8  ;;  %5750 = vmatprep.subr.bf16.mxu1 (!%p303_p2), %v16429_v9  ;;  %v16445_v20 = vld [vmem:[%s25026_s5 + $0xa4] ss:$16 sps:$4 sm:$0xff] (!%p303_p2)   ;;  %v16447_v21 = vld [vmem:[%s25026_s5 + $0xac] ss:$16 sps:$4 sm:$0xff] (!%p303_p2)   ;;  %v16449_v22 = vld [vmem:[%s25026_s5 + $0xa0] ss:$16 sps:$4 sm:$0xff] (!%p303_p2)  }
   0xd   : > { %v16450_v23 = vld [vmem:[%s25026_s5 + $0xa8] ss:$16 sps:$4 sm:$0xff]   ;;  %v16451_v24 = vld [vmem:[%s25026_s5 + $0xc4] ss:$16 sps:$4 sm:$0xff]   ;;  %v16453_v25 = vld [vmem:[%s25026_s5 + $0xcc] ss:$16 sps:$4 sm:$0xff]  }
   0xe   : > { %v16455_v26 = vld [vmem:[%s25026_s5 + $0xc0] ss:$16 sps:$4 sm:$0xff]   ;;  %v16456_v27 = vld [vmem:[%s25026_s5 + $0xc8] ss:$16 sps:$4 sm:$0xff]   ;;  %v16457_v28 = vld [vmem:[%s25026_s5 + $0xe4] ss:$16 sps:$4 sm:$0xff]  }
   0xf   : > { %5218 = vmatpush1.bf16.msra.mxu0 %v16431_v10  ;;  %5751 = vmatpush1.bf16.msra.mxu1 %v16432_v11  ;;  %v16459_v29 = vld [vmem:[%s25026_s5 + $0xec] ss:$16 sps:$4 sm:$0xff]   ;;  %v16461_v30 = vld [vmem:[%s25026_s5 + $0xe0] ss:$16 sps:$4 sm:$0xff]   ;;  %v16462_v31 = vld [vmem:[%s25026_s5 + $0xe8] ss:$16 sps:$4 sm:$0xff]  }
  0x10   : > { %5219 = vmatprep.subr.bf16.mxu0 %v16433_v12  ;;  %5752 = vmatprep.subr.bf16.mxu1 %v16435_v13  ;;  %v16463_v32 = vld [vmem:[%s25026_s5 + $0x104] ss:$16 sps:$4 sm:$0xff]   ;;  %v16465_v33 = vld [vmem:[%s25026_s5 + $0x10c] ss:$16 sps:$4 sm:$0xff]   ;;  %v16467_v34 = vld [vmem:[%s25026_s5 + $0x100] ss:$16 sps:$4 sm:$0xff]  }
  0x11   : > { %v16468_v35 = vld [vmem:[%s25026_s5 + $0x108] ss:$16 sps:$4 sm:$0xff]   ;;  %s25032_s10 = smov (!%p352_p3, %s14276_s10), 1  ;;  %v16469_v36 = vld [vmem:[%s25026_s5 + $0x124] ss:$16 sps:$4 sm:$0xff]   ;;  %vm5209_vm0 = vcmask 523264  }
  0x12   : > { %v16471_v37 = vld [vmem:[%s25026_s5 + $0x12c] ss:$16 sps:$4 sm:$0xff]   ;;  %v16473_v38 = vld [vmem:[%s25026_s5 + $0x120] ss:$16 sps:$4 sm:$0xff]   ;;  %s16405_s13 = smul.u32 100, %s25032_s10  ;;  %s16175_s18 = sshll.u32 %s25032_s10, 4 }
  0x13   : > { %5220 = vmatpush1.bf16.msra.mxu0 %v16437_v14  ;;  %5753 = vmatpush1.bf16.msra.mxu1 %v16438_v15  ;;  %v16474_v39 = vld [vmem:[%s25026_s5 + $0x128] ss:$16 sps:$4 sm:$0xff]   ;;  %v16475_v40 = vld [vmem:[%s25026_s5 + $0x144] ss:$16 sps:$4 sm:$0xff]   ;;  %v16477_v41 = vld [vmem:[%s25026_s5 + $0x14c] ss:$16 sps:$4 sm:$0xff]   ;;  %s371_s24 = scalar_lea.vmem %s25029_s8, %s16175_s18  ;;  %s366_s12 = scalar_lea.vmem %s25028_s7, %s16175_s18 }
  0x14   : > { %5221 = vmatprep.subr.bf16.mxu0 %v16439_v16  ;;  %5754 = vmatprep.subr.bf16.mxu1 %v16441_v17  ;;  %v16479_v42 = vld [vmem:[%s25026_s5 + $0x140] ss:$16 sps:$4 sm:$0xff]   ;;  %v16480_v43 = vld [vmem:[%s25026_s5 + $0x148] ss:$16 sps:$4 sm:$0xff]   ;;  %s19412_s26 = scalar_lea.vmem %s25022_s1, %s16405_s13  ;;  %v16481_v44 = vld [vmem:[%s25026_s5 + $0x164] ss:$16 sps:$4 sm:$0xff]   ;;  %s21716_s28 = scalar_lea.vmem %s25021_s0, %s16405_s13 }
  0x15   : > { %v16483_v45 = vld [vmem:[%s25026_s5 + $0x16c] ss:$16 sps:$4 sm:$0xff]   ;;  %v384_v46 = vld [vmem:[%s19412_s26] sm:$0xff]  ;;  %v16486_v49 = vld [vmem:[%s25026_s5 + $0x168] ss:$16 sps:$4 sm:$0xff]   ;;  %s14287_s18 = sshll.u32 %s25032_s10, 3 }
  0x16   : > { %v16485_v47 = vld [vmem:[%s25026_s5 + $0x160] ss:$16 sps:$4 sm:$0xff]   ;;  %v14292_v48 = vcombine.high %v384_v46, %v384_v46  ;;  %v16487_v50 = vld [vmem:[%s25026_s5 + $0x184] ss:$16 sps:$4 sm:$0xff]   ;;  %v16489_v51 = vld [vmem:[%s25026_s5 + $0x18c] ss:$16 sps:$4 sm:$0xff]   ;;  %v14291_v4 = vcombine.low %v384_v46, %v384_v46  ;;  %s375_s16 = scalar_lea.vmem %s25030_s9, %s14287_s18 }
  0x17   : > { %5222 = vmatpush1.bf16.msra.mxu0 %v16443_v18  ;;  %5755 = vmatpush1.bf16.msra.mxu1 %v16444_v19  ;;  %v16491_v52 = vld [vmem:[%s25026_s5 + $0x180] ss:$16 sps:$4 sm:$0xff]   ;;  %v16492_v53 = vld [vmem:[%s25026_s5 + $0x188] ss:$16 sps:$4 sm:$0xff]   ;;  %v16493_v54 = vld [vmem:[%s25026_s5 + $0x1a4] ss:$16 sps:$4 sm:$0xff]  }
  0x18   : > { %5223 = vmatprep.subr.bf16.mxu0 %v16445_v20  ;;  %5756 = vmatprep.subr.bf16.mxu1 %v16447_v21  ;;  %v16495_v55 = vld [vmem:[%s25026_s5 + $0x1ac] ss:$16 sps:$4 sm:$0xff]   ;;  %v16497_v56 = vld [vmem:[%s25026_s5 + $0x1a0] ss:$16 sps:$4 sm:$0xff]   ;;  %v16498_v57 = vld [vmem:[%s25026_s5 + $0x1a8] ss:$16 sps:$4 sm:$0xff]  }
  0x19   : > { %5245 = vmatprep.mubr.bf16.mxu0 %v14292_v48  ;;  %5778 = vmatprep.mubr.bf16.mxu1 %v14292_v48  ;;  %v16499_v58 = vld [vmem:[%s25026_s5 + $0x1c4] ss:$16 sps:$4 sm:$0xff]   ;;  %v16501_v59 = vld [vmem:[%s25026_s5 + $0x1cc] ss:$16 sps:$4 sm:$0xff]   ;;  %v16503_v60 = vld [vmem:[%s25026_s5 + $0x1c0] ss:$16 sps:$4 sm:$0xff]  }
  0x1a   : > { %v16504_v61 = vld [vmem:[%s25026_s5 + $0x1c8] ss:$16 sps:$4 sm:$0xff]   ;;  %v16505_v62 = vld [vmem:[%s25026_s5 + $0x1e4] ss:$16 sps:$4 sm:$0xff]   ;;  %v16507_v63 = vld [vmem:[%s25026_s5 + $0x1ec] ss:$16 sps:$4 sm:$0xff]  }
  0x1b   : > { %5224 = vmatpush1.bf16.msra.mxu0 %v16449_v22  ;;  %5757 = vmatpush1.bf16.msra.mxu1 %v16450_v23  ;;  %v16509_v0 = vld [vmem:[%s25026_s5 + $0x1e0] ss:$16 sps:$4 sm:$0xff]   ;;  %v16510_v1 = vld [vmem:[%s25026_s5 + $0x1e8] ss:$16 sps:$4 sm:$0xff]   ;;  %v16515_v2 = vld [vmem:[%s25026_s5 + $0x204] ss:$16 sps:$4 sm:$0xff]  }
  0x1c   : > { %5225 = vmatprep.subr.bf16.mxu0 %v16451_v24  ;;  %5758 = vmatprep.subr.bf16.mxu1 %v16453_v25  ;;  %v16518_v3 = vld [vmem:[%s25026_s5 + $0x20c] ss:$16 sps:$4 sm:$0xff]   ;;  %v16513_v5 = vld [vmem:[%s25026_s5 + $0x200] ss:$16 sps:$4 sm:$0xff]   ;;  %v16516_v6 = vld [vmem:[%s25026_s5 + $0x208] ss:$16 sps:$4 sm:$0xff]  }
  0x1d   : > { %v16521_v7 = vld [vmem:[%s25026_s5 + $0x224] ss:$16 sps:$4 sm:$0xff]   ;;  %v16524_v8 = vld [vmem:[%s25026_s5 + $0x22c] ss:$16 sps:$4 sm:$0xff]   ;;  %v16519_v9 = vld [vmem:[%s25026_s5 + $0x220] ss:$16 sps:$4 sm:$0xff]  }
  0x1e   : > { %v16522_v10 = vld [vmem:[%s25026_s5 + $0x228] ss:$16 sps:$4 sm:$0xff]   ;;  %v16527_v11 = vld [vmem:[%s25026_s5 + $0x244] ss:$16 sps:$4 sm:$0xff]   ;;  %v16530_v12 = vld [vmem:[%s25026_s5 + $0x24c] ss:$16 sps:$4 sm:$0xff]  }
  0x1f   : > { %5226 = vmatpush1.bf16.msra.mxu0 %v16455_v26  ;;  %5759 = vmatpush1.bf16.msra.mxu1 %v16456_v27  ;;  %v16525_v13 = vld [vmem:[%s25026_s5 + $0x240] ss:$16 sps:$4 sm:$0xff]   ;;  %v16528_v14 = vld [vmem:[%s25026_s5 + $0x248] ss:$16 sps:$4 sm:$0xff]   ;;  %v16533_v15 = vld [vmem:[%s25026_s5 + $0x264] ss:$16 sps:$4 sm:$0xff]  }
  0x20   : > { %5227 = vmatprep.subr.bf16.mxu0 %v16457_v28  ;;  %5760 = vmatprep.subr.bf16.mxu1 %v16459_v29  ;;  %v16536_v16 = vld [vmem:[%s25026_s5 + $0x26c] ss:$16 sps:$4 sm:$0xff]   ;;  %v16531_v17 = vld [vmem:[%s25026_s5 + $0x260] ss:$16 sps:$4 sm:$0xff]   ;;  %v16534_v18 = vld [vmem:[%s25026_s5 + $0x268] ss:$16 sps:$4 sm:$0xff]  }
  0x21   : > { %v16539_v19 = vld [vmem:[%s25026_s5 + $0x284] ss:$16 sps:$4 sm:$0xff]   ;;  %v16542_v20 = vld [vmem:[%s25026_s5 + $0x28c] ss:$16 sps:$4 sm:$0xff]   ;;  %v16537_v21 = vld [vmem:[%s25026_s5 + $0x280] ss:$16 sps:$4 sm:$0xff]  }
  0x22   : > { %v16540_v22 = vld [vmem:[%s25026_s5 + $0x288] ss:$16 sps:$4 sm:$0xff]   ;;  %v16545_v23 = vld [vmem:[%s25026_s5 + $0x2a4] ss:$16 sps:$4 sm:$0xff]   ;;  %v16548_v24 = vld [vmem:[%s25026_s5 + $0x2ac] ss:$16 sps:$4 sm:$0xff]  }
  0x23   : > { %5228 = vmatpush1.bf16.msra.mxu0 %v16461_v30  ;;  %5761 = vmatpush1.bf16.msra.mxu1 %v16462_v31  ;;  %v16543_v25 = vld [vmem:[%s25026_s5 + $0x2a0] ss:$16 sps:$4 sm:$0xff]   ;;  %v16546_v26 = vld [vmem:[%s25026_s5 + $0x2a8] ss:$16 sps:$4 sm:$0xff]   ;;  %v16551_v27 = vld [vmem:[%s25026_s5 + $0x2c4] ss:$16 sps:$4 sm:$0xff]  }
  0x24   : > { %5229 = vmatprep.subr.bf16.mxu0 %v16463_v32  ;;  %5762 = vmatprep.subr.bf16.mxu1 %v16465_v33  ;;  %v16554_v28 = vld [vmem:[%s25026_s5 + $0x2cc] ss:$16 sps:$4 sm:$0xff]   ;;  %v16549_v31 = vld [vmem:[%s25026_s5 + $0x2c0] ss:$16 sps:$4 sm:$0xff]   ;;  %v16552_v32 = vld [vmem:[%s25026_s5 + $0x2c8] ss:$16 sps:$4 sm:$0xff]  }
  0x25   : > { %v19554_v29 = vld [vmem:[%s19412_s26 + $0x8] sm:$0xff]  ;;  %v16557_v33 = vld [vmem:[%s25026_s5 + $0x2e4] ss:$16 sps:$4 sm:$0xff]  }
  0x26   : > { %v14294_v30 = vcombine.high %v19554_v29, %v19554_v29  ;;  %v16578_v46 = vld [vmem:[%s25026_s5 + $0x34c] ss:$16 sps:$4 sm:$0xff]   ;;  %v16576_v48 = vld [vmem:[%s25026_s5 + $0x348] ss:$16 sps:$4 sm:$0xff]  }
  0x27   : > { %5230 = vmatpush1.bf16.msra.mxu0 %v16467_v34  ;;  %5763 = vmatpush1.bf16.msra.mxu1 %v16468_v35  ;;  %v16560_v34 = vld [vmem:[%s25026_s5 + $0x2ec] ss:$16 sps:$4 sm:$0xff]   ;;  %v16555_v35 = vld [vmem:[%s25026_s5 + $0x2e0] ss:$16 sps:$4 sm:$0xff]  }
  0x28   : > { %5231 = vmatprep.subr.bf16.mxu0 %v16469_v36  ;;  %5764 = vmatprep.subr.bf16.mxu1 %v16471_v37  ;;  %v16558_v36 = vld [vmem:[%s25026_s5 + $0x2e8] ss:$16 sps:$4 sm:$0xff]   ;;  %v16563_v37 = vld [vmem:[%s25026_s5 + $0x304] ss:$16 sps:$4 sm:$0xff]  }
  0x2b   : > { %5232 = vmatpush1.bf16.msra.mxu0 %v16473_v38  ;;  %5765 = vmatpush1.bf16.msra.mxu1 %v16474_v39  ;;  %v16566_v38 = vld [vmem:[%s25026_s5 + $0x30c] ss:$16 sps:$4 sm:$0xff]   ;;  %v16561_v39 = vld [vmem:[%s25026_s5 + $0x300] ss:$16 sps:$4 sm:$0xff]  }
  0x2c   : > { %5233 = vmatprep.subr.bf16.mxu0 %v16475_v40  ;;  %5766 = vmatprep.subr.bf16.mxu1 %v16477_v41  ;;  %v16564_v40 = vld [vmem:[%s25026_s5 + $0x308] ss:$16 sps:$4 sm:$0xff]   ;;  %v16569_v41 = vld [vmem:[%s25026_s5 + $0x324] ss:$16 sps:$4 sm:$0xff]  }
  0x2f   : > { %5234 = vmatpush1.bf16.msra.mxu0 %v16479_v42  ;;  %5767 = vmatpush1.bf16.msra.mxu1 %v16480_v43  ;;  %v16572_v42 = vld [vmem:[%s25026_s5 + $0x32c] ss:$16 sps:$4 sm:$0xff]   ;;  %v16567_v43 = vld [vmem:[%s25026_s5 + $0x320] ss:$16 sps:$4 sm:$0xff]  }
  0x30   : > { %5235 = vmatprep.subr.bf16.mxu0 %v16481_v44  ;;  %5768 = vmatprep.subr.bf16.mxu1 %v16483_v45  ;;  %v16570_v44 = vld [vmem:[%s25026_s5 + $0x328] ss:$16 sps:$4 sm:$0xff]   ;;  %v16575_v45 = vld [vmem:[%s25026_s5 + $0x344] ss:$16 sps:$4 sm:$0xff]  }
  0x33   : > { %5236 = vmatpush1.bf16.msra.mxu0 %v16485_v47  ;;  %5769 = vmatpush1.bf16.msra.mxu1 %v16486_v49  ;;  %v16573_v47 = vld [vmem:[%s25026_s5 + $0x340] ss:$16 sps:$4 sm:$0xff]   ;;  %v16581_v49 = vld [vmem:[%s25026_s5 + $0x364] ss:$16 sps:$4 sm:$0xff]  }
  0x34   : > { %5237 = vmatprep.subr.bf16.mxu0 %v16487_v50  ;;  %5770 = vmatprep.subr.bf16.mxu1 %v16489_v51  ;;  %v16584_v50 = vld [vmem:[%s25026_s5 + $0x36c] ss:$16 sps:$4 sm:$0xff]   ;;  %v16579_v51 = vld [vmem:[%s25026_s5 + $0x360] ss:$16 sps:$4 sm:$0xff]  }
  0x37   : > { %5238 = vmatpush1.bf16.msra.mxu0 %v16491_v52  ;;  %5771 = vmatpush1.bf16.msra.mxu1 %v16492_v53  ;;  %v16582_v52 = vld [vmem:[%s25026_s5 + $0x368] ss:$16 sps:$4 sm:$0xff]   ;;  %v16587_v53 = vld [vmem:[%s25026_s5 + $0x384] ss:$16 sps:$4 sm:$0xff]  }
  0x38   : > { %5239 = vmatprep.subr.bf16.mxu0 %v16493_v54  ;;  %5772 = vmatprep.subr.bf16.mxu1 %v16495_v55  ;;  %v16590_v54 = vld [vmem:[%s25026_s5 + $0x38c] ss:$16 sps:$4 sm:$0xff]   ;;  %v16585_v55 = vld [vmem:[%s25026_s5 + $0x380] ss:$16 sps:$4 sm:$0xff]  }
  0x3b   : > { %5240 = vmatpush1.bf16.msra.mxu0 %v16497_v56  ;;  %5773 = vmatpush1.bf16.msra.mxu1 %v16498_v57  ;;  %v16588_v56 = vld [vmem:[%s25026_s5 + $0x388] ss:$16 sps:$4 sm:$0xff]   ;;  %v16593_v57 = vld [vmem:[%s25026_s5 + $0x3a4] ss:$16 sps:$4 sm:$0xff]  }
  0x3c   : > { %5241 = vmatprep.subr.bf16.mxu0 %v16499_v58  ;;  %5774 = vmatprep.subr.bf16.mxu1 %v16501_v59  ;;  %v16596_v58 = vld [vmem:[%s25026_s5 + $0x3ac] ss:$16 sps:$4 sm:$0xff]   ;;  %v16591_v59 = vld [vmem:[%s25026_s5 + $0x3a0] ss:$16 sps:$4 sm:$0xff]  }
  0x3f   : > { %5242 = vmatpush1.bf16.msra.mxu0 %v16503_v60  ;;  %5775 = vmatpush1.bf16.msra.mxu1 %v16504_v61  ;;  %v16594_v60 = vld [vmem:[%s25026_s5 + $0x3a8] ss:$16 sps:$4 sm:$0xff]   ;;  %v16599_v61 = vld [vmem:[%s25026_s5 + $0x3c4] ss:$16 sps:$4 sm:$0xff]  }
  0x40   : > { %5243 = vmatprep.subr.bf16.mxu0 %v16505_v62  ;;  %5776 = vmatprep.subr.bf16.mxu1 %v16507_v63  ;;  %v16602_v62 = vld [vmem:[%s25026_s5 + $0x3cc] ss:$16 sps:$4 sm:$0xff]   ;;  %v16597_v63 = vld [vmem:[%s25026_s5 + $0x3c0] ss:$16 sps:$4 sm:$0xff]  }
  0x43   : > { %5244 = vmatpush1.bf16.msra.mxu0 %v16509_v0  ;;  %5777 = vmatpush1.bf16.msra.mxu1 %v16510_v1  ;;  %v16600_v0 = vld [vmem:[%s25026_s5 + $0x3c8] ss:$16 sps:$4 sm:$0xff]   ;;  %v16605_v1 = vld [vmem:[%s25026_s5 + $0x3e4] ss:$16 sps:$4 sm:$0xff]  }
  0x44   : > { %5254 = vmatprep.subr.bf16.mxu0 %v16515_v2  ;;  %5787 = vmatprep.subr.bf16.mxu1 %v16518_v3  ;;  %v16608_v2 = vld [vmem:[%s25026_s5 + $0x3ec] ss:$16 sps:$4 sm:$0xff]   ;;  %v16603_v3 = vld [vmem:[%s25026_s5 + $0x3e0] ss:$16 sps:$4 sm:$0xff]  }
  0x46   : > { %5246 = vmatmul.mubr.bf16.vlgmr.msra.gmra.mrb[0].mxu0 %v14291_v4  ;;  %5779 = vmatmul.mubr.bf16.vlgmr.msra.gmra.mrb[0].mxu1 %v14291_v4  ;;  %v16606_v4 = vld [vmem:[%s25026_s5 + $0x3e8] ss:$16 sps:$4 sm:$0xff]  }
  0x47   : > { %5255 = vmatpush1.bf16.msra.mxu0 %v16513_v5  ;;  %5788 = vmatpush1.bf16.msra.mxu1 %v16516_v6  ;;  %v16613_v5 = vld [vmem:[%s25026_s5 + $0x404] ss:$16 sps:$4 sm:$0xff]   ;;  %v16616_v6 = vld [vmem:[%s25026_s5 + $0x40c] ss:$16 sps:$4 sm:$0xff]  }
  0x48   : > { %5256 = vmatprep.subr.bf16.mxu0 %v16521_v7  ;;  %5789 = vmatprep.subr.bf16.mxu1 %v16524_v8  ;;  %v14293_v7 = vcombine.low %v19554_v29, %v19554_v29  ;;  %v16611_v8 = vld [vmem:[%s25026_s5 + $0x400] ss:$16 sps:$4 sm:$0xff]   ;;  %v16646_v29 = vld [vmem:[%s25026_s5 + $0x4ac] ss:$16 sps:$4 sm:$0xff]  }
  0x49   : > { %5286 = vmatprep.mubr.bf16.mxu0 %v14294_v30  ;;  %5819 = vmatprep.mubr.bf16.mxu1 %v14294_v30  ;;  %v16641_v30 = vld [vmem:[%s25026_s5 + $0x4a0] ss:$16 sps:$4 sm:$0xff]  }
  0x4b   : > { %5257 = vmatpush1.bf16.msra.mxu0 %v16519_v9  ;;  %5790 = vmatpush1.bf16.msra.mxu1 %v16522_v10  ;;  %v16614_v9 = vld [vmem:[%s25026_s5 + $0x408] ss:$16 sps:$4 sm:$0xff]   ;;  %v16619_v10 = vld [vmem:[%s25026_s5 + $0x424] ss:$16 sps:$4 sm:$0xff]  }
  0x4c   : > { %5258 = vmatprep.subr.bf16.mxu0 %v16527_v11  ;;  %5791 = vmatprep.subr.bf16.mxu1 %v16530_v12  ;;  %v19690_v11 = vld [vmem:[%s19412_s26 + $0x10] sm:$0xff]  ;;  %v16622_v12 = vld [vmem:[%s25026_s5 + $0x42c] ss:$16 sps:$4 sm:$0xff]  }
  0x4f   : > { %5259 = vmatpush1.bf16.msra.mxu0 %v16525_v13  ;;  %5792 = vmatpush1.bf16.msra.mxu1 %v16528_v14  ;;  %v14296_v13 = vcombine.high %v19690_v11, %v19690_v11  ;;  %v16617_v14 = vld [vmem:[%s25026_s5 + $0x420] ss:$16 sps:$4 sm:$0xff]  }
  0x50   : > { %5260 = vmatprep.subr.bf16.mxu0 %v16533_v15  ;;  %5793 = vmatprep.subr.bf16.mxu1 %v16536_v16  ;;  %v16620_v15 = vld [vmem:[%s25026_s5 + $0x428] ss:$16 sps:$4 sm:$0xff]   ;;  %v16625_v16 = vld [vmem:[%s25026_s5 + $0x444] ss:$16 sps:$4 sm:$0xff]  }
  0x53   : > { %5261 = vmatpush1.bf16.msra.mxu0 %v16531_v17  ;;  %5794 = vmatpush1.bf16.msra.mxu1 %v16534_v18  ;;  %v16628_v17 = vld [vmem:[%s25026_s5 + $0x44c] ss:$16 sps:$4 sm:$0xff]   ;;  %v16623_v18 = vld [vmem:[%s25026_s5 + $0x440] ss:$16 sps:$4 sm:$0xff]  }
  0x54   : > { %5262 = vmatprep.subr.bf16.mxu0 %v16539_v19  ;;  %5795 = vmatprep.subr.bf16.mxu1 %v16542_v20  ;;  %v16626_v19 = vld [vmem:[%s25026_s5 + $0x448] ss:$16 sps:$4 sm:$0xff]   ;;  %v16631_v20 = vld [vmem:[%s25026_s5 + $0x464] ss:$16 sps:$4 sm:$0xff]  }
  0x57   : > { %5263 = vmatpush1.bf16.msra.mxu0 %v16537_v21  ;;  %5796 = vmatpush1.bf16.msra.mxu1 %v16540_v22  ;;  %v16634_v21 = vld [vmem:[%s25026_s5 + $0x46c] ss:$16 sps:$4 sm:$0xff]   ;;  %v16629_v22 = vld [vmem:[%s25026_s5 + $0x460] ss:$16 sps:$4 sm:$0xff]  }
  0x58   : > { %5264 = vmatprep.subr.bf16.mxu0 %v16545_v23  ;;  %5797 = vmatprep.subr.bf16.mxu1 %v16548_v24  ;;  %v16632_v23 = vld [vmem:[%s25026_s5 + $0x468] ss:$16 sps:$4 sm:$0xff]   ;;  %v16637_v24 = vld [vmem:[%s25026_s5 + $0x484] ss:$16 sps:$4 sm:$0xff]  }
  0x5b   : > { %5265 = vmatpush1.bf16.msra.mxu0 %v16543_v25  ;;  %5798 = vmatpush1.bf16.msra.mxu1 %v16546_v26  ;;  %v16640_v25 = vld [vmem:[%s25026_s5 + $0x48c] ss:$16 sps:$4 sm:$0xff]   ;;  %v16635_v26 = vld [vmem:[%s25026_s5 + $0x480] ss:$16 sps:$4 sm:$0xff]  }
  0x5c   : > { %5266 = vmatprep.subr.bf16.mxu0 %v16551_v27  ;;  %5799 = vmatprep.subr.bf16.mxu1 %v16554_v28  ;;  %v16638_v27 = vld [vmem:[%s25026_s5 + $0x488] ss:$16 sps:$4 sm:$0xff]   ;;  %v16643_v28 = vld [vmem:[%s25026_s5 + $0x4a4] ss:$16 sps:$4 sm:$0xff]  }
  0x5f   : > { %5267 = vmatpush1.bf16.msra.mxu0 %v16549_v31  ;;  %5800 = vmatpush1.bf16.msra.mxu1 %v16552_v32  ;;  %v16644_v31 = vld [vmem:[%s25026_s5 + $0x4a8] ss:$16 sps:$4 sm:$0xff]   ;;  %v16649_v32 = vld [vmem:[%s25026_s5 + $0x4c4] ss:$16 sps:$4 sm:$0xff]  }
  0x60   : > { %5268 = vmatprep.subr.bf16.mxu0 %v16557_v33  ;;  %5801 = vmatprep.subr.bf16.mxu1 %v16560_v34  ;;  %v16652_v33 = vld [vmem:[%s25026_s5 + $0x4cc] ss:$16 sps:$4 sm:$0xff]   ;;  %v16647_v34 = vld [vmem:[%s25026_s5 + $0x4c0] ss:$16 sps:$4 sm:$0xff]  }
  0x63   : > { %5269 = vmatpush1.bf16.msra.mxu0 %v16555_v35  ;;  %5802 = vmatpush1.bf16.msra.mxu1 %v16558_v36  ;;  %v16650_v35 = vld [vmem:[%s25026_s5 + $0x4c8] ss:$16 sps:$4 sm:$0xff]   ;;  %v16655_v36 = vld [vmem:[%s25026_s5 + $0x4e4] ss:$16 sps:$4 sm:$0xff]  }
  0x64   : > { %5270 = vmatprep.subr.bf16.mxu0 %v16563_v37  ;;  %5803 = vmatprep.subr.bf16.mxu1 %v16566_v38  ;;  %v16658_v37 = vld [vmem:[%s25026_s5 + $0x4ec] ss:$16 sps:$4 sm:$0xff]   ;;  %v16653_v38 = vld [vmem:[%s25026_s5 + $0x4e0] ss:$16 sps:$4 sm:$0xff]  }
  0x67   : > { %5271 = vmatpush1.bf16.msra.mxu0 %v16561_v39  ;;  %5804 = vmatpush1.bf16.msra.mxu1 %v16564_v40  ;;  %v16656_v39 = vld [vmem:[%s25026_s5 + $0x4e8] ss:$16 sps:$4 sm:$0xff]   ;;  %v16661_v40 = vld [vmem:[%s25026_s5 + $0x504] ss:$16 sps:$4 sm:$0xff]  }
  0x68   : > { %5272 = vmatprep.subr.bf16.mxu0 %v16569_v41  ;;  %5805 = vmatprep.subr.bf16.mxu1 %v16572_v42  ;;  %v16664_v41 = vld [vmem:[%s25026_s5 + $0x50c] ss:$16 sps:$4 sm:$0xff]   ;;  %v16659_v42 = vld [vmem:[%s25026_s5 + $0x500] ss:$16 sps:$4 sm:$0xff]  }
  0x6b   : > { %5273 = vmatpush1.bf16.msra.mxu0 %v16567_v43  ;;  %5806 = vmatpush1.bf16.msra.mxu1 %v16570_v44  ;;  %v16662_v43 = vld [vmem:[%s25026_s5 + $0x508] ss:$16 sps:$4 sm:$0xff]   ;;  %v16667_v44 = vld [vmem:[%s25026_s5 + $0x524] ss:$16 sps:$4 sm:$0xff]  }
  0x6c   : > { %5274 = vmatprep.subr.bf16.mxu0 %v16575_v45  ;;  %5807 = vmatprep.subr.bf16.mxu1 %v16578_v46  ;;  %v16670_v45 = vld [vmem:[%s25026_s5 + $0x52c] ss:$16 sps:$4 sm:$0xff]   ;;  %v16665_v46 = vld [vmem:[%s25026_s5 + $0x520] ss:$16 sps:$4 sm:$0xff]  }
  0x6f   : > { %5275 = vmatpush1.bf16.msra.mxu0 %v16573_v47  ;;  %5808 = vmatpush1.bf16.msra.mxu1 %v16576_v48  ;;  %v16668_v47 = vld [vmem:[%s25026_s5 + $0x528] ss:$16 sps:$4 sm:$0xff]   ;;  %v16673_v48 = vld [vmem:[%s25026_s5 + $0x544] ss:$16 sps:$4 sm:$0xff]  }
  0x70   : > { %5276 = vmatprep.subr.bf16.mxu0 %v16581_v49  ;;  %5809 = vmatprep.subr.bf16.mxu1 %v16584_v50  ;;  %v16676_v49 = vld [vmem:[%s25026_s5 + $0x54c] ss:$16 sps:$4 sm:$0xff]   ;;  %v16671_v50 = vld [vmem:[%s25026_s5 + $0x540] ss:$16 sps:$4 sm:$0xff]  }
  0x73   : > { %5277 = vmatpush1.bf16.msra.mxu0 %v16579_v51  ;;  %5810 = vmatpush1.bf16.msra.mxu1 %v16582_v52  ;;  %v16674_v51 = vld [vmem:[%s25026_s5 + $0x548] ss:$16 sps:$4 sm:$0xff]   ;;  %v16679_v52 = vld [vmem:[%s25026_s5 + $0x564] ss:$16 sps:$4 sm:$0xff]  }
  0x74   : > { %5278 = vmatprep.subr.bf16.mxu0 %v16587_v53  ;;  %5811 = vmatprep.subr.bf16.mxu1 %v16590_v54  ;;  %v16682_v53 = vld [vmem:[%s25026_s5 + $0x56c] ss:$16 sps:$4 sm:$0xff]   ;;  %v16677_v54 = vld [vmem:[%s25026_s5 + $0x560] ss:$16 sps:$4 sm:$0xff]  }
  0x77   : > { %5279 = vmatpush1.bf16.msra.mxu0 %v16585_v55  ;;  %5812 = vmatpush1.bf16.msra.mxu1 %v16588_v56  ;;  %v16680_v55 = vld [vmem:[%s25026_s5 + $0x568] ss:$16 sps:$4 sm:$0xff]   ;;  %v16685_v56 = vld [vmem:[%s25026_s5 + $0x584] ss:$16 sps:$4 sm:$0xff]  }
  0x78   : > { %5280 = vmatprep.subr.bf16.mxu0 %v16593_v57  ;;  %5813 = vmatprep.subr.bf16.mxu1 %v16596_v58  ;;  %v16688_v57 = vld [vmem:[%s25026_s5 + $0x58c] ss:$16 sps:$4 sm:$0xff]   ;;  %v16683_v58 = vld [vmem:[%s25026_s5 + $0x580] ss:$16 sps:$4 sm:$0xff]  }
  0x7b   : > { %5281 = vmatpush1.bf16.msra.mxu0 %v16591_v59  ;;  %5814 = vmatpush1.bf16.msra.mxu1 %v16594_v60  ;;  %v16686_v59 = vld [vmem:[%s25026_s5 + $0x588] ss:$16 sps:$4 sm:$0xff]   ;;  %v16691_v60 = vld [vmem:[%s25026_s5 + $0x5a4] ss:$16 sps:$4 sm:$0xff]  }
  0x7c   : > { %5282 = vmatprep.subr.bf16.mxu0 %v16599_v61  ;;  %5815 = vmatprep.subr.bf16.mxu1 %v16602_v62  ;;  %v16694_v61 = vld [vmem:[%s25026_s5 + $0x5ac] ss:$16 sps:$4 sm:$0xff]   ;;  %v16689_v62 = vld [vmem:[%s25026_s5 + $0x5a0] ss:$16 sps:$4 sm:$0xff]  }
  0x7f   : > { %5283 = vmatpush1.bf16.msra.mxu0 %v16597_v63  ;;  %5816 = vmatpush1.bf16.msra.mxu1 %v16600_v0  ;;  %v16692_v63 = vld [vmem:[%s25026_s5 + $0x5a8] ss:$16 sps:$4 sm:$0xff]   ;;  %v16697_v0 = vld [vmem:[%s25026_s5 + $0x5c4] ss:$16 sps:$4 sm:$0xff]  }
  0x80   : > { %5284 = vmatprep.subr.bf16.mxu0 %v16605_v1  ;;  %5817 = vmatprep.subr.bf16.mxu1 %v16608_v2  ;;  %v16700_v1 = vld [vmem:[%s25026_s5 + $0x5cc] ss:$16 sps:$4 sm:$0xff]   ;;  %v16695_v2 = vld [vmem:[%s25026_s5 + $0x5c0] ss:$16 sps:$4 sm:$0xff]  }
  0x83   : > { %5285 = vmatpush1.bf16.msra.mxu0 %v16603_v3  ;;  %5818 = vmatpush1.bf16.msra.mxu1 %v16606_v4  ;;  %v16698_v3 = vld [vmem:[%s25026_s5 + $0x5c8] ss:$16 sps:$4 sm:$0xff]   ;;  %v16703_v4 = vld [vmem:[%s25026_s5 + $0x5e4] ss:$16 sps:$4 sm:$0xff]  }
  0x84   : > { %5295 = vmatprep.subr.bf16.mxu0 %v16613_v5  ;;  %5828 = vmatprep.subr.bf16.mxu1 %v16616_v6  ;;  %v16706_v5 = vld [vmem:[%s25026_s5 + $0x5ec] ss:$16 sps:$4 sm:$0xff]   ;;  %v16701_v6 = vld [vmem:[%s25026_s5 + $0x5e0] ss:$16 sps:$4 sm:$0xff]  }
  0x86   : > { %5287 = vmatmul.mubr.bf16.vlgmr.msra.gmra.mrb[0].mxu0 %v14293_v7  ;;  %5820 = vmatmul.mubr.bf16.vlgmr.msra.gmra.mrb[0].mxu1 %v14293_v7  ;;  %v16704_v7 = vld [vmem:[%s25026_s5 + $0x5e8] ss:$16 sps:$4 sm:$0xff]  }
  0x87   : > { %5296 = vmatpush1.bf16.msra.mxu0 %v16611_v8  ;;  %5829 = vmatpush1.bf16.msra.mxu1 %v16614_v9  ;;  %v16711_v8 = vld [vmem:[%s25026_s5 + $0x604] ss:$16 sps:$4 sm:$0xff]   ;;  %v16714_v9 = vld [vmem:[%s25026_s5 + $0x60c] ss:$16 sps:$4 sm:$0xff]  }
  0x88   : > { %5297 = vmatprep.subr.bf16.mxu0 %v16619_v10  ;;  %5830 = vmatprep.subr.bf16.mxu1 %v16622_v12  ;;  %v16709_v10 = vld [vmem:[%s25026_s5 + $0x600] ss:$16 sps:$4 sm:$0xff]   ;;  %v14295_v12 = vcombine.low %v19690_v11, %v19690_v11 }
  0x89   : > { %5327 = vmatprep.mubr.bf16.mxu0 %v14296_v13  ;;  %5860 = vmatprep.mubr.bf16.mxu1 %v14296_v13  ;;  %v16712_v13 = vld [vmem:[%s25026_s5 + $0x608] ss:$16 sps:$4 sm:$0xff]  }
  0x8b   : > { %5298 = vmatpush1.bf16.msra.mxu0 %v16617_v14  ;;  %5831 = vmatpush1.bf16.msra.mxu1 %v16620_v15  ;;  %v19886_v14 = vld [vmem:[%s19412_s26 + $0x18] sm:$0xff]  ;;  %v16717_v15 = vld [vmem:[%s25026_s5 + $0x624] ss:$16 sps:$4 sm:$0xff]  }
  0x8c   : > { %5299 = vmatprep.subr.bf16.mxu0 %v16625_v16  ;;  %5832 = vmatprep.subr.bf16.mxu1 %v16628_v17  ;;  %v16720_v16 = vld [vmem:[%s25026_s5 + $0x62c] ss:$16 sps:$4 sm:$0xff]   ;;  %v14298_v11 = vcombine.high %v19886_v14, %v19886_v14  ;;  %v16715_v17 = vld [vmem:[%s25026_s5 + $0x620] ss:$16 sps:$4 sm:$0xff]  }
  0x8f   : > { %5300 = vmatpush1.bf16.msra.mxu0 %v16623_v18  ;;  %5833 = vmatpush1.bf16.msra.mxu1 %v16626_v19  ;;  %v16718_v18 = vld [vmem:[%s25026_s5 + $0x628] ss:$16 sps:$4 sm:$0xff]   ;;  %v16723_v19 = vld [vmem:[%s25026_s5 + $0x644] ss:$16 sps:$4 sm:$0xff]  }
  0x90   : > { %5301 = vmatprep.subr.bf16.mxu0 %v16631_v20  ;;  %5834 = vmatprep.subr.bf16.mxu1 %v16634_v21  ;;  %v16726_v20 = vld [vmem:[%s25026_s5 + $0x64c] ss:$16 sps:$4 sm:$0xff]   ;;  %v16721_v21 = vld [vmem:[%s25026_s5 + $0x640] ss:$16 sps:$4 sm:$0xff]  }
  0x93   : > { %5302 = vmatpush1.bf16.msra.mxu0 %v16629_v22  ;;  %5835 = vmatpush1.bf16.msra.mxu1 %v16632_v23  ;;  %v16724_v22 = vld [vmem:[%s25026_s5 + $0x648] ss:$16 sps:$4 sm:$0xff]   ;;  %v16729_v23 = vld [vmem:[%s25026_s5 + $0x664] ss:$16 sps:$4 sm:$0xff]  }
  0x94   : > { %5303 = vmatprep.subr.bf16.mxu0 %v16637_v24  ;;  %5836 = vmatprep.subr.bf16.mxu1 %v16640_v25  ;;  %v16732_v24 = vld [vmem:[%s25026_s5 + $0x66c] ss:$16 sps:$4 sm:$0xff]   ;;  %v16727_v25 = vld [vmem:[%s25026_s5 + $0x660] ss:$16 sps:$4 sm:$0xff]  }
  0x97   : > { %5304 = vmatpush1.bf16.msra.mxu0 %v16635_v26  ;;  %5837 = vmatpush1.bf16.msra.mxu1 %v16638_v27  ;;  %v16730_v26 = vld [vmem:[%s25026_s5 + $0x668] ss:$16 sps:$4 sm:$0xff]   ;;  %v16735_v27 = vld [vmem:[%s25026_s5 + $0x684] ss:$16 sps:$4 sm:$0xff]  }
  0x98   : > { %5305 = vmatprep.subr.bf16.mxu0 %v16643_v28  ;;  %5838 = vmatprep.subr.bf16.mxu1 %v16646_v29  ;;  %v16738_v28 = vld [vmem:[%s25026_s5 + $0x68c] ss:$16 sps:$4 sm:$0xff]   ;;  %v16733_v29 = vld [vmem:[%s25026_s5 + $0x680] ss:$16 sps:$4 sm:$0xff]  }
  0x9b   : > { %5306 = vmatpush1.bf16.msra.mxu0 %v16641_v30  ;;  %5839 = vmatpush1.bf16.msra.mxu1 %v16644_v31  ;;  %v16736_v30 = vld [vmem:[%s25026_s5 + $0x688] ss:$16 sps:$4 sm:$0xff]   ;;  %v16741_v31 = vld [vmem:[%s25026_s5 + $0x6a4] ss:$16 sps:$4 sm:$0xff]  }
  0x9c   : > { %5307 = vmatprep.subr.bf16.mxu0 %v16649_v32  ;;  %5840 = vmatprep.subr.bf16.mxu1 %v16652_v33  ;;  %v16744_v32 = vld [vmem:[%s25026_s5 + $0x6ac] ss:$16 sps:$4 sm:$0xff]   ;;  %v16739_v33 = vld [vmem:[%s25026_s5 + $0x6a0] ss:$16 sps:$4 sm:$0xff]  }
  0x9f   : > { %5308 = vmatpush1.bf16.msra.mxu0 %v16647_v34  ;;  %5841 = vmatpush1.bf16.msra.mxu1 %v16650_v35  ;;  %v16742_v34 = vld [vmem:[%s25026_s5 + $0x6a8] ss:$16 sps:$4 sm:$0xff]   ;;  %v16747_v35 = vld [vmem:[%s25026_s5 + $0x6c4] ss:$16 sps:$4 sm:$0xff]  }
  0xa0   : > { %5309 = vmatprep.subr.bf16.mxu0 %v16655_v36  ;;  %5842 = vmatprep.subr.bf16.mxu1 %v16658_v37  ;;  %v16750_v36 = vld [vmem:[%s25026_s5 + $0x6cc] ss:$16 sps:$4 sm:$0xff]   ;;  %v16745_v37 = vld [vmem:[%s25026_s5 + $0x6c0] ss:$16 sps:$4 sm:$0xff]  }
  0xa3   : > { %5310 = vmatpush1.bf16.msra.mxu0 %v16653_v38  ;;  %5843 = vmatpush1.bf16.msra.mxu1 %v16656_v39  ;;  %v16748_v38 = vld [vmem:[%s25026_s5 + $0x6c8] ss:$16 sps:$4 sm:$0xff]   ;;  %v16753_v39 = vld [vmem:[%s25026_s5 + $0x6e4] ss:$16 sps:$4 sm:$0xff]  }
  0xa4   : > { %5311 = vmatprep.subr.bf16.mxu0 %v16661_v40  ;;  %5844 = vmatprep.subr.bf16.mxu1 %v16664_v41  ;;  %v16756_v40 = vld [vmem:[%s25026_s5 + $0x6ec] ss:$16 sps:$4 sm:$0xff]   ;;  %v16751_v41 = vld [vmem:[%s25026_s5 + $0x6e0] ss:$16 sps:$4 sm:$0xff]  }
  0xa7   : > { %5312 = vmatpush1.bf16.msra.mxu0 %v16659_v42  ;;  %5845 = vmatpush1.bf16.msra.mxu1 %v16662_v43  ;;  %v16754_v42 = vld [vmem:[%s25026_s5 + $0x6e8] ss:$16 sps:$4 sm:$0xff]   ;;  %v16759_v43 = vld [vmem:[%s25026_s5 + $0x704] ss:$16 sps:$4 sm:$0xff]  }
  0xa8   : > { %5313 = vmatprep.subr.bf16.mxu0 %v16667_v44  ;;  %5846 = vmatprep.subr.bf16.mxu1 %v16670_v45  ;;  %v16762_v44 = vld [vmem:[%s25026_s5 + $0x70c] ss:$16 sps:$4 sm:$0xff]   ;;  %v16757_v45 = vld [vmem:[%s25026_s5 + $0x700] ss:$16 sps:$4 sm:$0xff]  }
  0xab   : > { %5314 = vmatpush1.bf16.msra.mxu0 %v16665_v46  ;;  %5847 = vmatpush1.bf16.msra.mxu1 %v16668_v47  ;;  %v16760_v46 = vld [vmem:[%s25026_s5 + $0x708] ss:$16 sps:$4 sm:$0xff]   ;;  %v16765_v47 = vld [vmem:[%s25026_s5 + $0x724] ss:$16 sps:$4 sm:$0xff]  }
  0xac   : > { %5315 = vmatprep.subr.bf16.mxu0 %v16673_v48  ;;  %5848 = vmatprep.subr.bf16.mxu1 %v16676_v49  ;;  %v16768_v48 = vld [vmem:[%s25026_s5 + $0x72c] ss:$16 sps:$4 sm:$0xff]   ;;  %v16763_v49 = vld [vmem:[%s25026_s5 + $0x720] ss:$16 sps:$4 sm:$0xff]  }
  0xaf   : > { %5316 = vmatpush1.bf16.msra.mxu0 %v16671_v50  ;;  %5849 = vmatpush1.bf16.msra.mxu1 %v16674_v51  ;;  %v16766_v50 = vld [vmem:[%s25026_s5 + $0x728] ss:$16 sps:$4 sm:$0xff]   ;;  %v16771_v51 = vld [vmem:[%s25026_s5 + $0x744] ss:$16 sps:$4 sm:$0xff]  }
  0xb0   : > { %5317 = vmatprep.subr.bf16.mxu0 %v16679_v52  ;;  %5850 = vmatprep.subr.bf16.mxu1 %v16682_v53  ;;  %v16774_v52 = vld [vmem:[%s25026_s5 + $0x74c] ss:$16 sps:$4 sm:$0xff]   ;;  %v16769_v53 = vld [vmem:[%s25026_s5 + $0x740] ss:$16 sps:$4 sm:$0xff]  }
  0xb3   : > { %5318 = vmatpush1.bf16.msra.mxu0 %v16677_v54  ;;  %5851 = vmatpush1.bf16.msra.mxu1 %v16680_v55  ;;  %v16772_v54 = vld [vmem:[%s25026_s5 + $0x748] ss:$16 sps:$4 sm:$0xff]   ;;  %v16777_v55 = vld [vmem:[%s25026_s5 + $0x764] ss:$16 sps:$4 sm:$0xff]  }
  0xb4   : > { %5319 = vmatprep.subr.bf16.mxu0 %v16685_v56  ;;  %5852 = vmatprep.subr.bf16.mxu1 %v16688_v57  ;;  %v16780_v56 = vld [vmem:[%s25026_s5 + $0x76c] ss:$16 sps:$4 sm:$0xff]   ;;  %v16775_v57 = vld [vmem:[%s25026_s5 + $0x760] ss:$16 sps:$4 sm:$0xff]  }
  0xb7   : > { %5320 = vmatpush1.bf16.msra.mxu0 %v16683_v58  ;;  %5853 = vmatpush1.bf16.msra.mxu1 %v16686_v59  ;;  %v16778_v58 = vld [vmem:[%s25026_s5 + $0x768] ss:$16 sps:$4 sm:$0xff]   ;;  %v16783_v59 = vld [vmem:[%s25026_s5 + $0x784] ss:$16 sps:$4 sm:$0xff]  }
  0xb8   : > { %5321 = vmatprep.subr.bf16.mxu0 %v16691_v60  ;;  %5854 = vmatprep.subr.bf16.mxu1 %v16694_v61  ;;  %v16786_v60 = vld [vmem:[%s25026_s5 + $0x78c] ss:$16 sps:$4 sm:$0xff]   ;;  %v16781_v61 = vld [vmem:[%s25026_s5 + $0x780] ss:$16 sps:$4 sm:$0xff]  }
  0xbb   : > { %5322 = vmatpush1.bf16.msra.mxu0 %v16689_v62  ;;  %5855 = vmatpush1.bf16.msra.mxu1 %v16692_v63  ;;  %v16784_v62 = vld [vmem:[%s25026_s5 + $0x788] ss:$16 sps:$4 sm:$0xff]   ;;  %v16789_v63 = vld [vmem:[%s25026_s5 + $0x7a4] ss:$16 sps:$4 sm:$0xff]  }
  0xbc   : > { %5323 = vmatprep.subr.bf16.mxu0 %v16697_v0  ;;  %5856 = vmatprep.subr.bf16.mxu1 %v16700_v1  ;;  %v16792_v0 = vld [vmem:[%s25026_s5 + $0x7ac] ss:$16 sps:$4 sm:$0xff]   ;;  %v16787_v1 = vld [vmem:[%s25026_s5 + $0x7a0] ss:$16 sps:$4 sm:$0xff]  }
  0xbf   : > { %5324 = vmatpush1.bf16.msra.mxu0 %v16695_v2  ;;  %5857 = vmatpush1.bf16.msra.mxu1 %v16698_v3  ;;  %v16790_v2 = vld [vmem:[%s25026_s5 + $0x7a8] ss:$16 sps:$4 sm:$0xff]   ;;  %v16795_v3 = vld [vmem:[%s25026_s5 + $0x7c4] ss:$16 sps:$4 sm:$0xff]  }
  0xc0   : > { %5325 = vmatprep.subr.bf16.mxu0 %v16703_v4  ;;  %5858 = vmatprep.subr.bf16.mxu1 %v16706_v5  ;;  %v16798_v4 = vld [vmem:[%s25026_s5 + $0x7cc] ss:$16 sps:$4 sm:$0xff]   ;;  %v16793_v5 = vld [vmem:[%s25026_s5 + $0x7c0] ss:$16 sps:$4 sm:$0xff]  }
  0xc3   : > { %5326 = vmatpush1.bf16.msra.mxu0 %v16701_v6  ;;  %5859 = vmatpush1.bf16.msra.mxu1 %v16704_v7  ;;  %v16796_v6 = vld [vmem:[%s25026_s5 + $0x7c8] ss:$16 sps:$4 sm:$0xff]   ;;  %v16801_v7 = vld [vmem:[%s25026_s5 + $0x7e4] ss:$16 sps:$4 sm:$0xff]  }
  0xc4   : > { %5336 = vmatprep.subr.bf16.mxu0 %v16711_v8  ;;  %5869 = vmatprep.subr.bf16.mxu1 %v16714_v9  ;;  %v16804_v8 = vld [vmem:[%s25026_s5 + $0x7ec] ss:$16 sps:$4 sm:$0xff]   ;;  %v16799_v9 = vld [vmem:[%s25026_s5 + $0x7e0] ss:$16 sps:$4 sm:$0xff]  }
  0xc6   : > { %5328 = vmatmul.mubr.bf16.vlgmr.msra.gmra.mrb[0].mxu0 %v14295_v12  ;;  %5861 = vmatmul.mubr.bf16.vlgmr.msra.gmra.mrb[0].mxu1 %v14295_v12  ;;  %v16809_v12 = vld [vmem:[%s25026_s5 + $0x804] ss:$16 sps:$4 sm:$0xff]  }
  0xc7   : > { %5337 = vmatpush1.bf16.msra.mxu0 %v16709_v10  ;;  %5870 = vmatpush1.bf16.msra.mxu1 %v16712_v13  ;;  %v16802_v10 = vld [vmem:[%s25026_s5 + $0x7e8] ss:$16 sps:$4 sm:$0xff]   ;;  %v16812_v13 = vld [vmem:[%s25026_s5 + $0x80c] ss:$16 sps:$4 sm:$0xff]  }
  0xc8   : > { %5338 = vmatprep.subr.bf16.mxu0 %v16717_v15  ;;  %5871 = vmatprep.subr.bf16.mxu1 %v16720_v16  ;;  %v16807_v15 = vld [vmem:[%s25026_s5 + $0x800] ss:$16 sps:$4 sm:$0xff]   ;;  %v14297_v16 = vcombine.low %v19886_v14, %v19886_v14 }
  0xc9   : > { %5368 = vmatprep.mubr.bf16.mxu0 %v14298_v11  ;;  %5901 = vmatprep.mubr.bf16.mxu1 %v14298_v11  ;;  %v20082_v11 = vld [vmem:[%s19412_s26 + $0x20] sm:$0xff] }
  0xca   : > { %v14300_v14 = vcombine.high %v20082_v11, %v20082_v11 }
  0xcb   : > { %5339 = vmatpush1.bf16.msra.mxu0 %v16715_v17  ;;  %5872 = vmatpush1.bf16.msra.mxu1 %v16718_v18  ;;  %v16810_v17 = vld [vmem:[%s25026_s5 + $0x808] ss:$16 sps:$4 sm:$0xff]   ;;  %v16815_v18 = vld [vmem:[%s25026_s5 + $0x824] ss:$16 sps:$4 sm:$0xff]  }
  0xcc   : > { %5340 = vmatprep.subr.bf16.mxu0 %v16723_v19  ;;  %5873 = vmatprep.subr.bf16.mxu1 %v16726_v20  ;;  %v16818_v19 = vld [vmem:[%s25026_s5 + $0x82c] ss:$16 sps:$4 sm:$0xff]   ;;  %v16813_v20 = vld [vmem:[%s25026_s5 + $0x820] ss:$16 sps:$4 sm:$0xff]  }
  0xcf   : > { %5341 = vmatpush1.bf16.msra.mxu0 %v16721_v21  ;;  %5874 = vmatpush1.bf16.msra.mxu1 %v16724_v22  ;;  %v16816_v21 = vld [vmem:[%s25026_s5 + $0x828] ss:$16 sps:$4 sm:$0xff]   ;;  %v16821_v22 = vld [vmem:[%s25026_s5 + $0x844] ss:$16 sps:$4 sm:$0xff]  }
  0xd0   : > { %5342 = vmatprep.subr.bf16.mxu0 %v16729_v23  ;;  %5875 = vmatprep.subr.bf16.mxu1 %v16732_v24  ;;  %v16824_v23 = vld [vmem:[%s25026_s5 + $0x84c] ss:$16 sps:$4 sm:$0xff]   ;;  %v16819_v24 = vld [vmem:[%s25026_s5 + $0x840] ss:$16 sps:$4 sm:$0xff]  }
  0xd3   : > { %5343 = vmatpush1.bf16.msra.mxu0 %v16727_v25  ;;  %5876 = vmatpush1.bf16.msra.mxu1 %v16730_v26  ;;  %v16822_v25 = vld [vmem:[%s25026_s5 + $0x848] ss:$16 sps:$4 sm:$0xff]   ;;  %v16827_v26 = vld [vmem:[%s25026_s5 + $0x864] ss:$16 sps:$4 sm:$0xff]  }
  0xd4   : > { %5344 = vmatprep.subr.bf16.mxu0 %v16735_v27  ;;  %5877 = vmatprep.subr.bf16.mxu1 %v16738_v28  ;;  %v16830_v27 = vld [vmem:[%s25026_s5 + $0x86c] ss:$16 sps:$4 sm:$0xff]   ;;  %v16825_v28 = vld [vmem:[%s25026_s5 + $0x860] ss:$16 sps:$4 sm:$0xff]  }
  0xd7   : > { %5345 = vmatpush1.bf16.msra.mxu0 %v16733_v29  ;;  %5878 = vmatpush1.bf16.msra.mxu1 %v16736_v30  ;;  %v16828_v29 = vld [vmem:[%s25026_s5 + $0x868] ss:$16 sps:$4 sm:$0xff]   ;;  %v16833_v30 = vld [vmem:[%s25026_s5 + $0x884] ss:$16 sps:$4 sm:$0xff]  }
  0xd8   : > { %5346 = vmatprep.subr.bf16.mxu0 %v16741_v31  ;;  %5879 = vmatprep.subr.bf16.mxu1 %v16744_v32  ;;  %v16836_v31 = vld [vmem:[%s25026_s5 + $0x88c] ss:$16 sps:$4 sm:$0xff]   ;;  %v16831_v32 = vld [vmem:[%s25026_s5 + $0x880] ss:$16 sps:$4 sm:$0xff]  }
  0xdb   : > { %5347 = vmatpush1.bf16.msra.mxu0 %v16739_v33  ;;  %5880 = vmatpush1.bf16.msra.mxu1 %v16742_v34  ;;  %v16834_v33 = vld [vmem:[%s25026_s5 + $0x888] ss:$16 sps:$4 sm:$0xff]   ;;  %v16839_v34 = vld [vmem:[%s25026_s5 + $0x8a4] ss:$16 sps:$4 sm:$0xff]  }
  0xdc   : > { %5348 = vmatprep.subr.bf16.mxu0 %v16747_v35  ;;  %5881 = vmatprep.subr.bf16.mxu1 %v16750_v36  ;;  %v16842_v35 = vld [vmem:[%s25026_s5 + $0x8ac] ss:$16 sps:$4 sm:$0xff]   ;;  %v16837_v36 = vld [vmem:[%s25026_s5 + $0x8a0] ss:$16 sps:$4 sm:$0xff]  }
  0xdf   : > { %5349 = vmatpush1.bf16.msra.mxu0 %v16745_v37  ;;  %5882 = vmatpush1.bf16.msra.mxu1 %v16748_v38  ;;  %v16840_v37 = vld [vmem:[%s25026_s5 + $0x8a8] ss:$16 sps:$4 sm:$0xff]   ;;  %v16845_v38 = vld [vmem:[%s25026_s5 + $0x8c4] ss:$16 sps:$4 sm:$0xff]  }
  0xe0   : > { %5350 = vmatprep.subr.bf16.mxu0 %v16753_v39  ;;  %5883 = vmatprep.subr.bf16.mxu1 %v16756_v40  ;;  %v16848_v39 = vld [vmem:[%s25026_s5 + $0x8cc] ss:$16 sps:$4 sm:$0xff]   ;;  %v16843_v40 = vld [vmem:[%s25026_s5 + $0x8c0] ss:$16 sps:$4 sm:$0xff]  }
  0xe3   : > { %5351 = vmatpush1.bf16.msra.mxu0 %v16751_v41  ;;  %5884 = vmatpush1.bf16.msra.mxu1 %v16754_v42  ;;  %v16846_v41 = vld [vmem:[%s25026_s5 + $0x8c8] ss:$16 sps:$4 sm:$0xff]   ;;  %v16851_v42 = vld [vmem:[%s25026_s5 + $0x8e4] ss:$16 sps:$4 sm:$0xff]  }
  0xe4   : > { %5352 = vmatprep.subr.bf16.mxu0 %v16759_v43  ;;  %5885 = vmatprep.subr.bf16.mxu1 %v16762_v44  ;;  %v16854_v43 = vld [vmem:[%s25026_s5 + $0x8ec] ss:$16 sps:$4 sm:$0xff]   ;;  %v16849_v44 = vld [vmem:[%s25026_s5 + $0x8e0] ss:$16 sps:$4 sm:$0xff]  }
  0xe7   : > { %5353 = vmatpush1.bf16.msra.mxu0 %v16757_v45  ;;  %5886 = vmatpush1.bf16.msra.mxu1 %v16760_v46  ;;  %v16852_v45 = vld [vmem:[%s25026_s5 + $0x8e8] ss:$16 sps:$4 sm:$0xff]   ;;  %v16857_v46 = vld [vmem:[%s25026_s5 + $0x904] ss:$16 sps:$4 sm:$0xff]  }
  0xe8   : > { %5354 = vmatprep.subr.bf16.mxu0 %v16765_v47  ;;  %5887 = vmatprep.subr.bf16.mxu1 %v16768_v48  ;;  %v16860_v47 = vld [vmem:[%s25026_s5 + $0x90c] ss:$16 sps:$4 sm:$0xff]   ;;  %v16855_v48 = vld [vmem:[%s25026_s5 + $0x900] ss:$16 sps:$4 sm:$0xff]  }
  0xeb   : > { %5355 = vmatpush1.bf16.msra.mxu0 %v16763_v49  ;;  %5888 = vmatpush1.bf16.msra.mxu1 %v16766_v50  ;;  %v16858_v49 = vld [vmem:[%s25026_s5 + $0x908] ss:$16 sps:$4 sm:$0xff]   ;;  %v16863_v50 = vld [vmem:[%s25026_s5 + $0x924] ss:$16 sps:$4 sm:$0xff]  }
  0xec   : > { %5356 = vmatprep.subr.bf16.mxu0 %v16771_v51  ;;  %5889 = vmatprep.subr.bf16.mxu1 %v16774_v52  ;;  %v16866_v51 = vld [vmem:[%s25026_s5 + $0x92c] ss:$16 sps:$4 sm:$0xff]   ;;  %v16861_v52 = vld [vmem:[%s25026_s5 + $0x920] ss:$16 sps:$4 sm:$0xff]  }
  0xef   : > { %5357 = vmatpush1.bf16.msra.mxu0 %v16769_v53  ;;  %5890 = vmatpush1.bf16.msra.mxu1 %v16772_v54  ;;  %v16864_v53 = vld [vmem:[%s25026_s5 + $0x928] ss:$16 sps:$4 sm:$0xff]   ;;  %v16869_v54 = vld [vmem:[%s25026_s5 + $0x944] ss:$16 sps:$4 sm:$0xff]  }
  0xf0   : > { %5358 = vmatprep.subr.bf16.mxu0 %v16777_v55  ;;  %5891 = vmatprep.subr.bf16.mxu1 %v16780_v56  ;;  %v16872_v55 = vld [vmem:[%s25026_s5 + $0x94c] ss:$16 sps:$4 sm:$0xff]   ;;  %v16867_v56 = vld [vmem:[%s25026_s5 + $0x940] ss:$16 sps:$4 sm:$0xff]  }
  0xf3   : > { %5359 = vmatpush1.bf16.msra.mxu0 %v16775_v57  ;;  %5892 = vmatpush1.bf16.msra.mxu1 %v16778_v58  ;;  %v16870_v57 = vld [vmem:[%s25026_s5 + $0x948] ss:$16 sps:$4 sm:$0xff]   ;;  %v16875_v58 = vld [vmem:[%s25026_s5 + $0x964] ss:$16 sps:$4 sm:$0xff]  }
  0xf4   : > { %5360 = vmatprep.subr.bf16.mxu0 %v16783_v59  ;;  %5893 = vmatprep.subr.bf16.mxu1 %v16786_v60  ;;  %v16878_v59 = vld [vmem:[%s25026_s5 + $0x96c] ss:$16 sps:$4 sm:$0xff]   ;;  %v16873_v60 = vld [vmem:[%s25026_s5 + $0x960] ss:$16 sps:$4 sm:$0xff]  }
  0xf7   : > { %5361 = vmatpush1.bf16.msra.mxu0 %v16781_v61  ;;  %5894 = vmatpush1.bf16.msra.mxu1 %v16784_v62  ;;  %v16876_v61 = vld [vmem:[%s25026_s5 + $0x968] ss:$16 sps:$4 sm:$0xff]   ;;  %v16881_v62 = vld [vmem:[%s25026_s5 + $0x984] ss:$16 sps:$4 sm:$0xff]  }
  0xf8   : > { %5362 = vmatprep.subr.bf16.mxu0 %v16789_v63  ;;  %5895 = vmatprep.subr.bf16.mxu1 %v16792_v0  ;;  %v16884_v63 = vld [vmem:[%s25026_s5 + $0x98c] ss:$16 sps:$4 sm:$0xff]   ;;  %v16879_v0 = vld [vmem:[%s25026_s5 + $0x980] ss:$16 sps:$4 sm:$0xff]  }
  0xfb   : > { %5363 = vmatpush1.bf16.msra.mxu0 %v16787_v1  ;;  %5896 = vmatpush1.bf16.msra.mxu1 %v16790_v2  ;;  %v16882_v1 = vld [vmem:[%s25026_s5 + $0x988] ss:$16 sps:$4 sm:$0xff]   ;;  %v16887_v2 = vld [vmem:[%s25026_s5 + $0x9a4] ss:$16 sps:$4 sm:$0xff]  }
  0xfc   : > { %5364 = vmatprep.subr.bf16.mxu0 %v16795_v3  ;;  %5897 = vmatprep.subr.bf16.mxu1 %v16798_v4  ;;  %v16890_v3 = vld [vmem:[%s25026_s5 + $0x9ac] ss:$16 sps:$4 sm:$0xff]   ;;  %v16885_v4 = vld [vmem:[%s25026_s5 + $0x9a0] ss:$16 sps:$4 sm:$0xff]  }
  0xff   : > { %5365 = vmatpush1.bf16.msra.mxu0 %v16793_v5  ;;  %5898 = vmatpush1.bf16.msra.mxu1 %v16796_v6  ;;  %v16888_v5 = vld [vmem:[%s25026_s5 + $0x9a8] ss:$16 sps:$4 sm:$0xff]   ;;  %v16893_v6 = vld [vmem:[%s25026_s5 + $0x9c4] ss:$16 sps:$4 sm:$0xff]  }
 0x100   : > { %5366 = vmatprep.subr.bf16.mxu0 %v16801_v7  ;;  %5899 = vmatprep.subr.bf16.mxu1 %v16804_v8  ;;  %v16896_v7 = vld [vmem:[%s25026_s5 + $0x9cc] ss:$16 sps:$4 sm:$0xff]   ;;  %v16891_v8 = vld [vmem:[%s25026_s5 + $0x9c0] ss:$16 sps:$4 sm:$0xff]  }
 0x103   : > { %5367 = vmatpush1.bf16.msra.mxu0 %v16799_v9  ;;  %5900 = vmatpush1.bf16.msra.mxu1 %v16802_v10  ;;  %v16894_v9 = vld [vmem:[%s25026_s5 + $0x9c8] ss:$16 sps:$4 sm:$0xff]   ;;  %v16899_v10 = vld [vmem:[%s25026_s5 + $0x9e4] ss:$16 sps:$4 sm:$0xff]  }
 0x104   : > { %5377 = vmatprep.subr.bf16.mxu0 %v16809_v12  ;;  %5910 = vmatprep.subr.bf16.mxu1 %v16812_v13  ;;  %v16902_v12 = vld [vmem:[%s25026_s5 + $0x9ec] ss:$16 sps:$4 sm:$0xff]   ;;  %v16897_v13 = vld [vmem:[%s25026_s5 + $0x9e0] ss:$16 sps:$4 sm:$0xff]  }
 0x106   : > { %5369 = vmatmul.mubr.bf16.vlgmr.msra.gmra.mrb[0].mxu0 %v14297_v16  ;;  %5902 = vmatmul.mubr.bf16.vlgmr.msra.gmra.mrb[0].mxu1 %v14297_v16  ;;  %v16907_v16 = vld [vmem:[%s25026_s5 + $0xa04] ss:$16 sps:$4 sm:$0xff]  }
 0x107   : > { %5378 = vmatpush1.bf16.msra.mxu0 %v16807_v15  ;;  %5911 = vmatpush1.bf16.msra.mxu1 %v16810_v17  ;;  %v16900_v15 = vld [vmem:[%s25026_s5 + $0x9e8] ss:$16 sps:$4 sm:$0xff]   ;;  %v16910_v17 = vld [vmem:[%s25026_s5 + $0xa0c] ss:$16 sps:$4 sm:$0xff]  }
 0x108   : > { %5379 = vmatprep.subr.bf16.mxu0 %v16815_v18  ;;  %5912 = vmatprep.subr.bf16.mxu1 %v16818_v19  ;;  %v20276_v18 = vld [vmem:[%s19412_s26 + $0x28] sm:$0xff]  ;;  %v14299_v19 = vcombine.low %v20082_v11, %v20082_v11 }
 0x109   : > { %5409 = vmatprep.mubr.bf16.mxu0 %v14300_v14  ;;  %5942 = vmatprep.mubr.bf16.mxu1 %v14300_v14  ;;  %v16905_v14 = vld [vmem:[%s25026_s5 + $0xa00] ss:$16 sps:$4 sm:$0xff]   ;;  %v16916_v11 = vld [vmem:[%s25026_s5 + $0xa2c] ss:$16 sps:$4 sm:$0xff]  }
 0x10b   : > { %5380 = vmatpush1.bf16.msra.mxu0 %v16813_v20  ;;  %5913 = vmatpush1.bf16.msra.mxu1 %v16816_v21  ;;  %v16908_v20 = vld [vmem:[%s25026_s5 + $0xa08] ss:$16 sps:$4 sm:$0xff]   ;;  %v16913_v21 = vld [vmem:[%s25026_s5 + $0xa24] ss:$16 sps:$4 sm:$0xff]  }
 0x10c   : > { %5381 = vmatprep.subr.bf16.mxu0 %v16821_v22  ;;  %5914 = vmatprep.subr.bf16.mxu1 %v16824_v23  ;;  %v14302_v22 = vcombine.high %v20276_v18, %v20276_v18  ;;  %v16911_v23 = vld [vmem:[%s25026_s5 + $0xa20] ss:$16 sps:$4 sm:$0xff]  }
 0x10f   : > { %5382 = vmatpush1.bf16.msra.mxu0 %v16819_v24  ;;  %5915 = vmatpush1.bf16.msra.mxu1 %v16822_v25  ;;  %v16914_v24 = vld [vmem:[%s25026_s5 + $0xa28] ss:$16 sps:$4 sm:$0xff]   ;;  %v16919_v25 = vld [vmem:[%s25026_s5 + $0xa44] ss:$16 sps:$4 sm:$0xff]  }
 0x110   : > { %5383 = vmatprep.subr.bf16.mxu0 %v16827_v26  ;;  %5916 = vmatprep.subr.bf16.mxu1 %v16830_v27  ;;  %v16922_v26 = vld [vmem:[%s25026_s5 + $0xa4c] ss:$16 sps:$4 sm:$0xff]   ;;  %v16917_v27 = vld [vmem:[%s25026_s5 + $0xa40] ss:$16 sps:$4 sm:$0xff]  }
 0x113   : > { %5384 = vmatpush1.bf16.msra.mxu0 %v16825_v28  ;;  %5917 = vmatpush1.bf16.msra.mxu1 %v16828_v29  ;;  %v16920_v28 = vld [vmem:[%s25026_s5 + $0xa48] ss:$16 sps:$4 sm:$0xff]   ;;  %v16925_v29 = vld [vmem:[%s25026_s5 + $0xa64] ss:$16 sps:$4 sm:$0xff]  }
 0x114   : > { %5385 = vmatprep.subr.bf16.mxu0 %v16833_v30  ;;  %5918 = vmatprep.subr.bf16.mxu1 %v16836_v31  ;;  %v16928_v30 = vld [vmem:[%s25026_s5 + $0xa6c] ss:$16 sps:$4 sm:$0xff]   ;;  %v16923_v31 = vld [vmem:[%s25026_s5 + $0xa60] ss:$16 sps:$4 sm:$0xff]  }
 0x117   : > { %5386 = vmatpush1.bf16.msra.mxu0 %v16831_v32  ;;  %5919 = vmatpush1.bf16.msra.mxu1 %v16834_v33  ;;  %v16926_v32 = vld [vmem:[%s25026_s5 + $0xa68] ss:$16 sps:$4 sm:$0xff]   ;;  %v16931_v33 = vld [vmem:[%s25026_s5 + $0xa84] ss:$16 sps:$4 sm:$0xff]  }
 0x118   : > { %5387 = vmatprep.subr.bf16.mxu0 %v16839_v34  ;;  %5920 = vmatprep.subr.bf16.mxu1 %v16842_v35  ;;  %v16934_v34 = vld [vmem:[%s25026_s5 + $0xa8c] ss:$16 sps:$4 sm:$0xff]   ;;  %v16929_v35 = vld [vmem:[%s25026_s5 + $0xa80] ss:$16 sps:$4 sm:$0xff]  }
 0x11b   : > { %5388 = vmatpush1.bf16.msra.mxu0 %v16837_v36  ;;  %5921 = vmatpush1.bf16.msra.mxu1 %v16840_v37  ;;  %v16932_v36 = vld [vmem:[%s25026_s5 + $0xa88] ss:$16 sps:$4 sm:$0xff]   ;;  %v16937_v37 = vld [vmem:[%s25026_s5 + $0xaa4] ss:$16 sps:$4 sm:$0xff]  }
 0x11c   : > { %5389 = vmatprep.subr.bf16.mxu0 %v16845_v38  ;;  %5922 = vmatprep.subr.bf16.mxu1 %v16848_v39  ;;  %v16940_v38 = vld [vmem:[%s25026_s5 + $0xaac] ss:$16 sps:$4 sm:$0xff]   ;;  %v16935_v39 = vld [vmem:[%s25026_s5 + $0xaa0] ss:$16 sps:$4 sm:$0xff]  }
 0x11f   : > { %5390 = vmatpush1.bf16.msra.mxu0 %v16843_v40  ;;  %5923 = vmatpush1.bf16.msra.mxu1 %v16846_v41  ;;  %v16938_v40 = vld [vmem:[%s25026_s5 + $0xaa8] ss:$16 sps:$4 sm:$0xff]   ;;  %v16943_v41 = vld [vmem:[%s25026_s5 + $0xac4] ss:$16 sps:$4 sm:$0xff]  }
 0x120   : > { %5391 = vmatprep.subr.bf16.mxu0 %v16851_v42  ;;  %5924 = vmatprep.subr.bf16.mxu1 %v16854_v43  ;;  %v16946_v42 = vld [vmem:[%s25026_s5 + $0xacc] ss:$16 sps:$4 sm:$0xff]   ;;  %v16941_v43 = vld [vmem:[%s25026_s5 + $0xac0] ss:$16 sps:$4 sm:$0xff]  }
 0x123   : > { %5392 = vmatpush1.bf16.msra.mxu0 %v16849_v44  ;;  %5925 = vmatpush1.bf16.msra.mxu1 %v16852_v45  ;;  %v16944_v44 = vld [vmem:[%s25026_s5 + $0xac8] ss:$16 sps:$4 sm:$0xff]   ;;  %v16949_v45 = vld [vmem:[%s25026_s5 + $0xae4] ss:$16 sps:$4 sm:$0xff]  }
 0x124   : > { %5393 = vmatprep.subr.bf16.mxu0 %v16857_v46  ;;  %5926 = vmatprep.subr.bf16.mxu1 %v16860_v47  ;;  %v16952_v46 = vld [vmem:[%s25026_s5 + $0xaec] ss:$16 sps:$4 sm:$0xff]   ;;  %v16947_v47 = vld [vmem:[%s25026_s5 + $0xae0] ss:$16 sps:$4 sm:$0xff]  }
 0x127   : > { %5394 = vmatpush1.bf16.msra.mxu0 %v16855_v48  ;;  %5927 = vmatpush1.bf16.msra.mxu1 %v16858_v49  ;;  %v16950_v48 = vld [vmem:[%s25026_s5 + $0xae8] ss:$16 sps:$4 sm:$0xff]   ;;  %v16955_v49 = vld [vmem:[%s25026_s5 + $0xb04] ss:$16 sps:$4 sm:$0xff]  }
 0x128   : > { %5395 = vmatprep.subr.bf16.mxu0 %v16863_v50  ;;  %5928 = vmatprep.subr.bf16.mxu1 %v16866_v51  ;;  %v16958_v50 = vld [vmem:[%s25026_s5 + $0xb0c] ss:$16 sps:$4 sm:$0xff]   ;;  %v16953_v51 = vld [vmem:[%s25026_s5 + $0xb00] ss:$16 sps:$4 sm:$0xff]  }
 0x12b   : > { %5396 = vmatpush1.bf16.msra.mxu0 %v16861_v52  ;;  %5929 = vmatpush1.bf16.msra.mxu1 %v16864_v53  ;;  %v16956_v52 = vld [vmem:[%s25026_s5 + $0xb08] ss:$16 sps:$4 sm:$0xff]   ;;  %v16961_v53 = vld [vmem:[%s25026_s5 + $0xb24] ss:$16 sps:$4 sm:$0xff]  }
 0x12c   : > { %5397 = vmatprep.subr.bf16.mxu0 %v16869_v54  ;;  %5930 = vmatprep.subr.bf16.mxu1 %v16872_v55  ;;  %v16964_v54 = vld [vmem:[%s25026_s5 + $0xb2c] ss:$16 sps:$4 sm:$0xff]   ;;  %v16959_v55 = vld [vmem:[%s25026_s5 + $0xb20] ss:$16 sps:$4 sm:$0xff]  }
 0x12f   : > { %5398 = vmatpush1.bf16.msra.mxu0 %v16867_v56  ;;  %5931 = vmatpush1.bf16.msra.mxu1 %v16870_v57  ;;  %v16962_v56 = vld [vmem:[%s25026_s5 + $0xb28] ss:$16 sps:$4 sm:$0xff]   ;;  %v16967_v57 = vld [vmem:[%s25026_s5 + $0xb44] ss:$16 sps:$4 sm:$0xff]  }
 0x130   : > { %5399 = vmatprep.subr.bf16.mxu0 %v16875_v58  ;;  %5932 = vmatprep.subr.bf16.mxu1 %v16878_v59  ;;  %v16970_v58 = vld [vmem:[%s25026_s5 + $0xb4c] ss:$16 sps:$4 sm:$0xff]   ;;  %v16965_v59 = vld [vmem:[%s25026_s5 + $0xb40] ss:$16 sps:$4 sm:$0xff]  }
 0x133   : > { %5400 = vmatpush1.bf16.msra.mxu0 %v16873_v60  ;;  %5933 = vmatpush1.bf16.msra.mxu1 %v16876_v61  ;;  %v16968_v60 = vld [vmem:[%s25026_s5 + $0xb48] ss:$16 sps:$4 sm:$0xff]   ;;  %v16973_v61 = vld [vmem:[%s25026_s5 + $0xb64] ss:$16 sps:$4 sm:$0xff]  }
 0x134   : > { %5401 = vmatprep.subr.bf16.mxu0 %v16881_v62  ;;  %5934 = vmatprep.subr.bf16.mxu1 %v16884_v63  ;;  %v16976_v62 = vld [vmem:[%s25026_s5 + $0xb6c] ss:$16 sps:$4 sm:$0xff]   ;;  %v16971_v63 = vld [vmem:[%s25026_s5 + $0xb60] ss:$16 sps:$4 sm:$0xff]  }
 0x137   : > { %5402 = vmatpush1.bf16.msra.mxu0 %v16879_v0  ;;  %5935 = vmatpush1.bf16.msra.mxu1 %v16882_v1  ;;  %v16974_v0 = vld [vmem:[%s25026_s5 + $0xb68] ss:$16 sps:$4 sm:$0xff]   ;;  %v16979_v1 = vld [vmem:[%s25026_s5 + $0xb84] ss:$16 sps:$4 sm:$0xff]  }
 0x138   : > { %5403 = vmatprep.subr.bf16.mxu0 %v16887_v2  ;;  %5936 = vmatprep.subr.bf16.mxu1 %v16890_v3  ;;  %v16982_v2 = vld [vmem:[%s25026_s5 + $0xb8c] ss:$16 sps:$4 sm:$0xff]   ;;  %v16977_v3 = vld [vmem:[%s25026_s5 + $0xb80] ss:$16 sps:$4 sm:$0xff]  }
 0x13b   : > { %5404 = vmatpush1.bf16.msra.mxu0 %v16885_v4  ;;  %5937 = vmatpush1.bf16.msra.mxu1 %v16888_v5  ;;  %v16980_v4 = vld [vmem:[%s25026_s5 + $0xb88] ss:$16 sps:$4 sm:$0xff]   ;;  %v16985_v5 = vld [vmem:[%s25026_s5 + $0xba4] ss:$16 sps:$4 sm:$0xff]  }
 0x13c   : > { %5405 = vmatprep.subr.bf16.mxu0 %v16893_v6  ;;  %5938 = vmatprep.subr.bf16.mxu1 %v16896_v7  ;;  %v16988_v6 = vld [vmem:[%s25026_s5 + $0xbac] ss:$16 sps:$4 sm:$0xff]   ;;  %v16983_v7 = vld [vmem:[%s25026_s5 + $0xba0] ss:$16 sps:$4 sm:$0xff]  }
 0x13f   : > { %5406 = vmatpush1.bf16.msra.mxu0 %v16891_v8  ;;  %5939 = vmatpush1.bf16.msra.mxu1 %v16894_v9  ;;  %v16986_v8 = vld [vmem:[%s25026_s5 + $0xba8] ss:$16 sps:$4 sm:$0xff]   ;;  %v16991_v9 = vld [vmem:[%s25026_s5 + $0xbc4] ss:$16 sps:$4 sm:$0xff]  }
 0x140   : > { %5407 = vmatprep.subr.bf16.mxu0 %v16899_v10  ;;  %5940 = vmatprep.subr.bf16.mxu1 %v16902_v12  ;;  %v16994_v10 = vld [vmem:[%s25026_s5 + $0xbcc] ss:$16 sps:$4 sm:$0xff]   ;;  %v16989_v12 = vld [vmem:[%s25026_s5 + $0xbc0] ss:$16 sps:$4 sm:$0xff]  }
 0x143   : > { %5408 = vmatpush1.bf16.msra.mxu0 %v16897_v13  ;;  %5941 = vmatpush1.bf16.msra.mxu1 %v16900_v15  ;;  %v16992_v13 = vld [vmem:[%s25026_s5 + $0xbc8] ss:$16 sps:$4 sm:$0xff]   ;;  %v16997_v15 = vld [vmem:[%s25026_s5 + $0xbe4] ss:$16 sps:$4 sm:$0xff]  }
 0x144   : > { %5418 = vmatprep.subr.bf16.mxu0 %v16907_v16  ;;  %5951 = vmatprep.subr.bf16.mxu1 %v16910_v17  ;;  %v17000_v16 = vld [vmem:[%s25026_s5 + $0xbec] ss:$16 sps:$4 sm:$0xff]   ;;  %v16995_v17 = vld [vmem:[%s25026_s5 + $0xbe0] ss:$16 sps:$4 sm:$0xff]  }
 0x146   : > { %5410 = vmatmul.mubr.bf16.vlgmr.msra.gmra.mrb[0].mxu0 %v14299_v19  ;;  %5943 = vmatmul.mubr.bf16.vlgmr.msra.gmra.mrb[0].mxu1 %v14299_v19  ;;  %v16998_v19 = vld [vmem:[%s25026_s5 + $0xbe8] ss:$16 sps:$4 sm:$0xff]  }
 0x147   : > { %5419 = vmatpush1.bf16.msra.mxu0 %v16905_v14  ;;  %5952 = vmatpush1.bf16.msra.mxu1 %v16908_v20  ;;  %v17005_v14 = vld [vmem:[%s25026_s5 + $0xc04] ss:$16 sps:$4 sm:$0xff]   ;;  %v17008_v20 = vld [vmem:[%s25026_s5 + $0xc0c] ss:$16 sps:$4 sm:$0xff]  }
 0x148   : > { %5420 = vmatprep.subr.bf16.mxu0 %v16913_v21  ;;  %5953 = vmatprep.subr.bf16.mxu1 %v16916_v11  ;;  %v20475_v21 = vld [vmem:[%s19412_s26 + $0x30] sm:$0xff]  ;;  %v14301_v11 = vcombine.low %v20276_v18, %v20276_v18  ;;  %v17014_v18 = vld [vmem:[%s25026_s5 + $0xc2c] ss:$16 sps:$4 sm:$0xff]  }
 0x149   : > { %5450 = vmatprep.mubr.bf16.mxu0 %v14302_v22  ;;  %5983 = vmatprep.mubr.bf16.mxu1 %v14302_v22  ;;  %v17003_v22 = vld [vmem:[%s25026_s5 + $0xc00] ss:$16 sps:$4 sm:$0xff]  }
 0x14b   : > { %5421 = vmatpush1.bf16.msra.mxu0 %v16911_v23  ;;  %5954 = vmatpush1.bf16.msra.mxu1 %v16914_v24  ;;  %v17006_v23 = vld [vmem:[%s25026_s5 + $0xc08] ss:$16 sps:$4 sm:$0xff]   ;;  %v17011_v24 = vld [vmem:[%s25026_s5 + $0xc24] ss:$16 sps:$4 sm:$0xff]  }
 0x14c   : > { %5422 = vmatprep.subr.bf16.mxu0 %v16919_v25  ;;  %5955 = vmatprep.subr.bf16.mxu1 %v16922_v26  ;;  %v14304_v25 = vcombine.high %v20475_v21, %v20475_v21  ;;  %v17009_v26 = vld [vmem:[%s25026_s5 + $0xc20] ss:$16 sps:$4 sm:$0xff]  }
 0x14f   : > { %5423 = vmatpush1.bf16.msra.mxu0 %v16917_v27  ;;  %5956 = vmatpush1.bf16.msra.mxu1 %v16920_v28  ;;  %v17012_v27 = vld [vmem:[%s25026_s5 + $0xc28] ss:$16 sps:$4 sm:$0xff]   ;;  %v17017_v28 = vld [vmem:[%s25026_s5 + $0xc44] ss:$16 sps:$4 sm:$0xff]  }
 0x150   : > { %5424 = vmatprep.subr.bf16.mxu0 %v16925_v29  ;;  %5957 = vmatprep.subr.bf16.mxu1 %v16928_v30  ;;  %v17020_v29 = vld [vmem:[%s25026_s5 + $0xc4c] ss:$16 sps:$4 sm:$0xff]   ;;  %v17015_v30 = vld [vmem:[%s25026_s5 + $0xc40] ss:$16 sps:$4 sm:$0xff]  }
 0x153   : > { %5425 = vmatpush1.bf16.msra.mxu0 %v16923_v31  ;;  %5958 = vmatpush1.bf16.msra.mxu1 %v16926_v32  ;;  %v17018_v31 = vld [vmem:[%s25026_s5 + $0xc48] ss:$16 sps:$4 sm:$0xff]   ;;  %v17023_v32 = vld [vmem:[%s25026_s5 + $0xc64] ss:$16 sps:$4 sm:$0xff]  }
 0x154   : > { %5426 = vmatprep.subr.bf16.mxu0 %v16931_v33  ;;  %5959 = vmatprep.subr.bf16.mxu1 %v16934_v34  ;;  %v17026_v33 = vld [vmem:[%s25026_s5 + $0xc6c] ss:$16 sps:$4 sm:$0xff]   ;;  %v17021_v34 = vld [vmem:[%s25026_s5 + $0xc60] ss:$16 sps:$4 sm:$0xff]  }
 0x157   : > { %5427 = vmatpush1.bf16.msra.mxu0 %v16929_v35  ;;  %5960 = vmatpush1.bf16.msra.mxu1 %v16932_v36  ;;  %v17024_v35 = vld [vmem:[%s25026_s5 + $0xc68] ss:$16 sps:$4 sm:$0xff]   ;;  %v17029_v36 = vld [vmem:[%s25026_s5 + $0xc84] ss:$16 sps:$4 sm:$0xff]  }
 0x158   : > { %5428 = vmatprep.subr.bf16.mxu0 %v16937_v37  ;;  %5961 = vmatprep.subr.bf16.mxu1 %v16940_v38  ;;  %v17032_v37 = vld [vmem:[%s25026_s5 + $0xc8c] ss:$16 sps:$4 sm:$0xff]   ;;  %v17027_v38 = vld [vmem:[%s25026_s5 + $0xc80] ss:$16 sps:$4 sm:$0xff]  }
 0x15b   : > { %5429 = vmatpush1.bf16.msra.mxu0 %v16935_v39  ;;  %5962 = vmatpush1.bf16.msra.mxu1 %v16938_v40  ;;  %v17030_v39 = vld [vmem:[%s25026_s5 + $0xc88] ss:$16 sps:$4 sm:$0xff]   ;;  %v17035_v40 = vld [vmem:[%s25026_s5 + $0xca4] ss:$16 sps:$4 sm:$0xff]  }
 0x15c   : > { %5430 = vmatprep.subr.bf16.mxu0 %v16943_v41  ;;  %5963 = vmatprep.subr.bf16.mxu1 %v16946_v42  ;;  %v17038_v41 = vld [vmem:[%s25026_s5 + $0xcac] ss:$16 sps:$4 sm:$0xff]   ;;  %v17033_v42 = vld [vmem:[%s25026_s5 + $0xca0] ss:$16 sps:$4 sm:$0xff]  }
 0x15f   : > { %5431 = vmatpush1.bf16.msra.mxu0 %v16941_v43  ;;  %5964 = vmatpush1.bf16.msra.mxu1 %v16944_v44  ;;  %v17036_v43 = vld [vmem:[%s25026_s5 + $0xca8] ss:$16 sps:$4 sm:$0xff]   ;;  %v17041_v44 = vld [vmem:[%s25026_s5 + $0xcc4] ss:$16 sps:$4 sm:$0xff]  }
 0x160   : > { %5432 = vmatprep.subr.bf16.mxu0 %v16949_v45  ;;  %5965 = vmatprep.subr.bf16.mxu1 %v16952_v46  ;;  %v17044_v45 = vld [vmem:[%s25026_s5 + $0xccc] ss:$16 sps:$4 sm:$0xff]   ;;  %v17039_v46 = vld [vmem:[%s25026_s5 + $0xcc0] ss:$16 sps:$4 sm:$0xff]  }
 0x163   : > { %5433 = vmatpush1.bf16.msra.mxu0 %v16947_v47  ;;  %5966 = vmatpush1.bf16.msra.mxu1 %v16950_v48  ;;  %v17042_v47 = vld [vmem:[%s25026_s5 + $0xcc8] ss:$16 sps:$4 sm:$0xff]   ;;  %v17047_v48 = vld [vmem:[%s25026_s5 + $0xce4] ss:$16 sps:$4 sm:$0xff]  }
 0x164   : > { %5434 = vmatprep.subr.bf16.mxu0 %v16955_v49  ;;  %5967 = vmatprep.subr.bf16.mxu1 %v16958_v50  ;;  %v17050_v49 = vld [vmem:[%s25026_s5 + $0xcec] ss:$16 sps:$4 sm:$0xff]   ;;  %v17045_v50 = vld [vmem:[%s25026_s5 + $0xce0] ss:$16 sps:$4 sm:$0xff]  }
 0x167   : > { %5435 = vmatpush1.bf16.msra.mxu0 %v16953_v51  ;;  %5968 = vmatpush1.bf16.msra.mxu1 %v16956_v52  ;;  %v17048_v51 = vld [vmem:[%s25026_s5 + $0xce8] ss:$16 sps:$4 sm:$0xff]   ;;  %v17053_v52 = vld [vmem:[%s25026_s5 + $0xd04] ss:$16 sps:$4 sm:$0xff]  }
 0x168   : > { %5436 = vmatprep.subr.bf16.mxu0 %v16961_v53  ;;  %5969 = vmatprep.subr.bf16.mxu1 %v16964_v54  ;;  %v17056_v53 = vld [vmem:[%s25026_s5 + $0xd0c] ss:$16 sps:$4 sm:$0xff]   ;;  %v17051_v54 = vld [vmem:[%s25026_s5 + $0xd00] ss:$16 sps:$4 sm:$0xff]  }
 0x16b   : > { %5437 = vmatpush1.bf16.msra.mxu0 %v16959_v55  ;;  %5970 = vmatpush1.bf16.msra.mxu1 %v16962_v56  ;;  %v17054_v55 = vld [vmem:[%s25026_s5 + $0xd08] ss:$16 sps:$4 sm:$0xff]   ;;  %v17059_v56 = vld [vmem:[%s25026_s5 + $0xd24] ss:$16 sps:$4 sm:$0xff]  }
 0x16c   : > { %5438 = vmatprep.subr.bf16.mxu0 %v16967_v57  ;;  %5971 = vmatprep.subr.bf16.mxu1 %v16970_v58  ;;  %v17062_v57 = vld [vmem:[%s25026_s5 + $0xd2c] ss:$16 sps:$4 sm:$0xff]   ;;  %v17057_v58 = vld [vmem:[%s25026_s5 + $0xd20] ss:$16 sps:$4 sm:$0xff]  }
 0x16f   : > { %5439 = vmatpush1.bf16.msra.mxu0 %v16965_v59  ;;  %5972 = vmatpush1.bf16.msra.mxu1 %v16968_v60  ;;  %v17060_v59 = vld [vmem:[%s25026_s5 + $0xd28] ss:$16 sps:$4 sm:$0xff]   ;;  %v17065_v60 = vld [vmem:[%s25026_s5 + $0xd44] ss:$16 sps:$4 sm:$0xff]  }
 0x170   : > { %5440 = vmatprep.subr.bf16.mxu0 %v16973_v61  ;;  %5973 = vmatprep.subr.bf16.mxu1 %v16976_v62  ;;  %v17068_v61 = vld [vmem:[%s25026_s5 + $0xd4c] ss:$16 sps:$4 sm:$0xff]   ;;  %v17063_v62 = vld [vmem:[%s25026_s5 + $0xd40] ss:$16 sps:$4 sm:$0xff]  }
 0x173   : > { %5441 = vmatpush1.bf16.msra.mxu0 %v16971_v63  ;;  %5974 = vmatpush1.bf16.msra.mxu1 %v16974_v0  ;;  %v17066_v63 = vld [vmem:[%s25026_s5 + $0xd48] ss:$16 sps:$4 sm:$0xff]   ;;  %v17071_v0 = vld [vmem:[%s25026_s5 + $0xd64] ss:$16 sps:$4 sm:$0xff]  }
 0x174   : > { %5442 = vmatprep.subr.bf16.mxu0 %v16979_v1  ;;  %5975 = vmatprep.subr.bf16.mxu1 %v16982_v2  ;;  %v17074_v1 = vld [vmem:[%s25026_s5 + $0xd6c] ss:$16 sps:$4 sm:$0xff]   ;;  %v17069_v2 = vld [vmem:[%s25026_s5 + $0xd60] ss:$16 sps:$4 sm:$0xff]  }
 0x177   : > { %5443 = vmatpush1.bf16.msra.mxu0 %v16977_v3  ;;  %5976 = vmatpush1.bf16.msra.mxu1 %v16980_v4  ;;  %v17072_v3 = vld [vmem:[%s25026_s5 + $0xd68] ss:$16 sps:$4 sm:$0xff]   ;;  %v17077_v4 = vld [vmem:[%s25026_s5 + $0xd84] ss:$16 sps:$4 sm:$0xff]  }
 0x178   : > { %5444 = vmatprep.subr.bf16.mxu0 %v16985_v5  ;;  %5977 = vmatprep.subr.bf16.mxu1 %v16988_v6  ;;  %v17080_v5 = vld [vmem:[%s25026_s5 + $0xd8c] ss:$16 sps:$4 sm:$0xff]   ;;  %v17075_v6 = vld [vmem:[%s25026_s5 + $0xd80] ss:$16 sps:$4 sm:$0xff]  }
 0x17b   : > { %5445 = vmatpush1.bf16.msra.mxu0 %v16983_v7  ;;  %5978 = vmatpush1.bf16.msra.mxu1 %v16986_v8  ;;  %v17078_v7 = vld [vmem:[%s25026_s5 + $0xd88] ss:$16 sps:$4 sm:$0xff]   ;;  %v17083_v8 = vld [vmem:[%s25026_s5 + $0xda4] ss:$16 sps:$4 sm:$0xff]  }
 0x17c   : > { %5446 = vmatprep.subr.bf16.mxu0 %v16991_v9  ;;  %5979 = vmatprep.subr.bf16.mxu1 %v16994_v10  ;;  %v17086_v9 = vld [vmem:[%s25026_s5 + $0xdac] ss:$16 sps:$4 sm:$0xff]   ;;  %v17081_v10 = vld [vmem:[%s25026_s5 + $0xda0] ss:$16 sps:$4 sm:$0xff]  }
 0x17f   : > { %5447 = vmatpush1.bf16.msra.mxu0 %v16989_v12  ;;  %5980 = vmatpush1.bf16.msra.mxu1 %v16992_v13  ;;  %v17084_v12 = vld [vmem:[%s25026_s5 + $0xda8] ss:$16 sps:$4 sm:$0xff]   ;;  %v17089_v13 = vld [vmem:[%s25026_s5 + $0xdc4] ss:$16 sps:$4 sm:$0xff]  }
 0x180   : > { %5448 = vmatprep.subr.bf16.mxu0 %v16997_v15  ;;  %5981 = vmatprep.subr.bf16.mxu1 %v17000_v16  ;;  %v17092_v15 = vld [vmem:[%s25026_s5 + $0xdcc] ss:$16 sps:$4 sm:$0xff]   ;;  %v17087_v16 = vld [vmem:[%s25026_s5 + $0xdc0] ss:$16 sps:$4 sm:$0xff]  }
 0x183   : > { %5449 = vmatpush1.bf16.msra.mxu0 %v16995_v17  ;;  %5982 = vmatpush1.bf16.msra.mxu1 %v16998_v19  ;;  %v17090_v17 = vld [vmem:[%s25026_s5 + $0xdc8] ss:$16 sps:$4 sm:$0xff]   ;;  %v17095_v19 = vld [vmem:[%s25026_s5 + $0xde4] ss:$16 sps:$4 sm:$0xff]  }
 0x184   : > { %5459 = vmatprep.subr.bf16.mxu0 %v17005_v14  ;;  %5992 = vmatprep.subr.bf16.mxu1 %v17008_v20  ;;  %v17098_v14 = vld [vmem:[%s25026_s5 + $0xdec] ss:$16 sps:$4 sm:$0xff]   ;;  %v17093_v20 = vld [vmem:[%s25026_s5 + $0xde0] ss:$16 sps:$4 sm:$0xff]  }
 0x186   : > { %5451 = vmatmul.mubr.bf16.vlgmr.msra.gmra.mrb[0].mxu0 %v14301_v11  ;;  %5984 = vmatmul.mubr.bf16.vlgmr.msra.gmra.mrb[0].mxu1 %v14301_v11  ;;  %v17096_v11 = vld [vmem:[%s25026_s5 + $0xde8] ss:$16 sps:$4 sm:$0xff]  }
 0x187   : > { %5460 = vmatpush1.bf16.msra.mxu0 %v17003_v22  ;;  %5993 = vmatpush1.bf16.msra.mxu1 %v17006_v23  ;;  %v17103_v22 = vld [vmem:[%s25026_s5 + $0xe04] ss:$16 sps:$4 sm:$0xff]   ;;  %v17106_v23 = vld [vmem:[%s25026_s5 + $0xe0c] ss:$16 sps:$4 sm:$0xff]  }
 0x188   : > { %5461 = vmatprep.subr.bf16.mxu0 %v17011_v24  ;;  %5994 = vmatprep.subr.bf16.mxu1 %v17014_v18  ;;  %v20674_v24 = vld [vmem:[%s19412_s26 + $0x38] sm:$0xff]  ;;  %v14303_v18 = vcombine.low %v20475_v21, %v20475_v21 }
 0x189   : > { %5491 = vmatprep.mubr.bf16.mxu0 %v14304_v25  ;;  %6024 = vmatprep.mubr.bf16.mxu1 %v14304_v25  ;;  %v17101_v25 = vld [vmem:[%s25026_s5 + $0xe00] ss:$16 sps:$4 sm:$0xff]   ;;  %v17112_v21 = vld [vmem:[%s25026_s5 + $0xe2c] ss:$16 sps:$4 sm:$0xff]  }
 0x18b   : > { %5462 = vmatpush1.bf16.msra.mxu0 %v17009_v26  ;;  %5995 = vmatpush1.bf16.msra.mxu1 %v17012_v27  ;;  %v17104_v26 = vld [vmem:[%s25026_s5 + $0xe08] ss:$16 sps:$4 sm:$0xff]   ;;  %v17109_v27 = vld [vmem:[%s25026_s5 + $0xe24] ss:$16 sps:$4 sm:$0xff]  }
 0x18c   : > { %5463 = vmatprep.subr.bf16.mxu0 %v17017_v28  ;;  %5996 = vmatprep.subr.bf16.mxu1 %v17020_v29  ;;  %v14306_v28 = vcombine.high %v20674_v24, %v20674_v24  ;;  %v17107_v29 = vld [vmem:[%s25026_s5 + $0xe20] ss:$16 sps:$4 sm:$0xff]  }
 0x18f   : > { %5464 = vmatpush1.bf16.msra.mxu0 %v17015_v30  ;;  %5997 = vmatpush1.bf16.msra.mxu1 %v17018_v31  ;;  %v17110_v30 = vld [vmem:[%s25026_s5 + $0xe28] ss:$16 sps:$4 sm:$0xff]   ;;  %v17115_v31 = vld [vmem:[%s25026_s5 + $0xe44] ss:$16 sps:$4 sm:$0xff]  }
 0x190   : > { %5465 = vmatprep.subr.bf16.mxu0 %v17023_v32  ;;  %5998 = vmatprep.subr.bf16.mxu1 %v17026_v33  ;;  %v17118_v32 = vld [vmem:[%s25026_s5 + $0xe4c] ss:$16 sps:$4 sm:$0xff]   ;;  %v17113_v33 = vld [vmem:[%s25026_s5 + $0xe40] ss:$16 sps:$4 sm:$0xff]  }
 0x193   : > { %5466 = vmatpush1.bf16.msra.mxu0 %v17021_v34  ;;  %5999 = vmatpush1.bf16.msra.mxu1 %v17024_v35  ;;  %v17116_v34 = vld [vmem:[%s25026_s5 + $0xe48] ss:$16 sps:$4 sm:$0xff]   ;;  %v17121_v35 = vld [vmem:[%s25026_s5 + $0xe64] ss:$16 sps:$4 sm:$0xff]  }
 0x194   : > { %5467 = vmatprep.subr.bf16.mxu0 %v17029_v36  ;;  %6000 = vmatprep.subr.bf16.mxu1 %v17032_v37  ;;  %v17124_v36 = vld [vmem:[%s25026_s5 + $0xe6c] ss:$16 sps:$4 sm:$0xff]   ;;  %v17119_v37 = vld [vmem:[%s25026_s5 + $0xe60] ss:$16 sps:$4 sm:$0xff]  }
 0x197   : > { %5468 = vmatpush1.bf16.msra.mxu0 %v17027_v38  ;;  %6001 = vmatpush1.bf16.msra.mxu1 %v17030_v39  ;;  %v17122_v38 = vld [vmem:[%s25026_s5 + $0xe68] ss:$16 sps:$4 sm:$0xff]   ;;  %v17127_v39 = vld [vmem:[%s25026_s5 + $0xe84] ss:$16 sps:$4 sm:$0xff]  }
 0x198   : > { %5469 = vmatprep.subr.bf16.mxu0 %v17035_v40  ;;  %6002 = vmatprep.subr.bf16.mxu1 %v17038_v41  ;;  %v17130_v40 = vld [vmem:[%s25026_s5 + $0xe8c] ss:$16 sps:$4 sm:$0xff]   ;;  %v17125_v41 = vld [vmem:[%s25026_s5 + $0xe80] ss:$16 sps:$4 sm:$0xff]  }
 0x19b   : > { %5470 = vmatpush1.bf16.msra.mxu0 %v17033_v42  ;;  %6003 = vmatpush1.bf16.msra.mxu1 %v17036_v43  ;;  %v17128_v42 = vld [vmem:[%s25026_s5 + $0xe88] ss:$16 sps:$4 sm:$0xff]   ;;  %v17133_v43 = vld [vmem:[%s25026_s5 + $0xea4] ss:$16 sps:$4 sm:$0xff]  }
 0x19c   : > { %5471 = vmatprep.subr.bf16.mxu0 %v17041_v44  ;;  %6004 = vmatprep.subr.bf16.mxu1 %v17044_v45  ;;  %v17136_v44 = vld [vmem:[%s25026_s5 + $0xeac] ss:$16 sps:$4 sm:$0xff]   ;;  %v17131_v45 = vld [vmem:[%s25026_s5 + $0xea0] ss:$16 sps:$4 sm:$0xff]  }
 0x19f   : > { %5472 = vmatpush1.bf16.msra.mxu0 %v17039_v46  ;;  %6005 = vmatpush1.bf16.msra.mxu1 %v17042_v47  ;;  %v17134_v46 = vld [vmem:[%s25026_s5 + $0xea8] ss:$16 sps:$4 sm:$0xff]   ;;  %v17139_v47 = vld [vmem:[%s25026_s5 + $0xec4] ss:$16 sps:$4 sm:$0xff]  }
 0x1a0   : > { %5473 = vmatprep.subr.bf16.mxu0 %v17047_v48  ;;  %6006 = vmatprep.subr.bf16.mxu1 %v17050_v49  ;;  %v17142_v48 = vld [vmem:[%s25026_s5 + $0xecc] ss:$16 sps:$4 sm:$0xff]   ;;  %v17137_v49 = vld [vmem:[%s25026_s5 + $0xec0] ss:$16 sps:$4 sm:$0xff]  }
 0x1a3   : > { %5474 = vmatpush1.bf16.msra.mxu0 %v17045_v50  ;;  %6007 = vmatpush1.bf16.msra.mxu1 %v17048_v51  ;;  %v17140_v50 = vld [vmem:[%s25026_s5 + $0xec8] ss:$16 sps:$4 sm:$0xff]   ;;  %v17145_v51 = vld [vmem:[%s25026_s5 + $0xee4] ss:$16 sps:$4 sm:$0xff]  }
 0x1a4   : > { %5475 = vmatprep.subr.bf16.mxu0 %v17053_v52  ;;  %6008 = vmatprep.subr.bf16.mxu1 %v17056_v53  ;;  %v17148_v52 = vld [vmem:[%s25026_s5 + $0xeec] ss:$16 sps:$4 sm:$0xff]   ;;  %v17143_v53 = vld [vmem:[%s25026_s5 + $0xee0] ss:$16 sps:$4 sm:$0xff]  }
 0x1a7   : > { %5476 = vmatpush1.bf16.msra.mxu0 %v17051_v54  ;;  %6009 = vmatpush1.bf16.msra.mxu1 %v17054_v55  ;;  %v17146_v54 = vld [vmem:[%s25026_s5 + $0xee8] ss:$16 sps:$4 sm:$0xff]   ;;  %v17151_v55 = vld [vmem:[%s25026_s5 + $0xf04] ss:$16 sps:$4 sm:$0xff]  }
 0x1a8   : > { %5477 = vmatprep.subr.bf16.mxu0 %v17059_v56  ;;  %6010 = vmatprep.subr.bf16.mxu1 %v17062_v57  ;;  %v17154_v56 = vld [vmem:[%s25026_s5 + $0xf0c] ss:$16 sps:$4 sm:$0xff]   ;;  %v17149_v57 = vld [vmem:[%s25026_s5 + $0xf00] ss:$16 sps:$4 sm:$0xff]  }
 0x1ab   : > { %5478 = vmatpush1.bf16.msra.mxu0 %v17057_v58  ;;  %6011 = vmatpush1.bf16.msra.mxu1 %v17060_v59  ;;  %v17152_v58 = vld [vmem:[%s25026_s5 + $0xf08] ss:$16 sps:$4 sm:$0xff]   ;;  %v17157_v59 = vld [vmem:[%s25026_s5 + $0xf24] ss:$16 sps:$4 sm:$0xff]  }
 0x1ac   : > { %5479 = vmatprep.subr.bf16.mxu0 %v17065_v60  ;;  %6012 = vmatprep.subr.bf16.mxu1 %v17068_v61  ;;  %v17160_v60 = vld [vmem:[%s25026_s5 + $0xf2c] ss:$16 sps:$4 sm:$0xff]   ;;  %v17155_v61 = vld [vmem:[%s25026_s5 + $0xf20] ss:$16 sps:$4 sm:$0xff]  }
 0x1af   : > { %5480 = vmatpush1.bf16.msra.mxu0 %v17063_v62  ;;  %6013 = vmatpush1.bf16.msra.mxu1 %v17066_v63  ;;  %v17158_v62 = vld [vmem:[%s25026_s5 + $0xf28] ss:$16 sps:$4 sm:$0xff]   ;;  %v17163_v63 = vld [vmem:[%s25026_s5 + $0xf44] ss:$16 sps:$4 sm:$0xff]  }
 0x1b0   : > { %5481 = vmatprep.subr.bf16.mxu0 %v17071_v0  ;;  %6014 = vmatprep.subr.bf16.mxu1 %v17074_v1  ;;  %v17166_v0 = vld [vmem:[%s25026_s5 + $0xf4c] ss:$16 sps:$4 sm:$0xff]   ;;  %v17161_v1 = vld [vmem:[%s25026_s5 + $0xf40] ss:$16 sps:$4 sm:$0xff]  }
 0x1b3   : > { %5482 = vmatpush1.bf16.msra.mxu0 %v17069_v2  ;;  %6015 = vmatpush1.bf16.msra.mxu1 %v17072_v3  ;;  %v17164_v2 = vld [vmem:[%s25026_s5 + $0xf48] ss:$16 sps:$4 sm:$0xff]   ;;  %v17169_v3 = vld [vmem:[%s25026_s5 + $0xf64] ss:$16 sps:$4 sm:$0xff]  }
 0x1b4   : > { %5483 = vmatprep.subr.bf16.mxu0 %v17077_v4  ;;  %6016 = vmatprep.subr.bf16.mxu1 %v17080_v5  ;;  %v17172_v4 = vld [vmem:[%s25026_s5 + $0xf6c] ss:$16 sps:$4 sm:$0xff]   ;;  %v17167_v5 = vld [vmem:[%s25026_s5 + $0xf60] ss:$16 sps:$4 sm:$0xff]  }
 0x1b7   : > { %5484 = vmatpush1.bf16.msra.mxu0 %v17075_v6  ;;  %6017 = vmatpush1.bf16.msra.mxu1 %v17078_v7  ;;  %v17170_v6 = vld [vmem:[%s25026_s5 + $0xf68] ss:$16 sps:$4 sm:$0xff]   ;;  %v17175_v7 = vld [vmem:[%s25026_s5 + $0xf84] ss:$16 sps:$4 sm:$0xff]  }
 0x1b8   : > { %5485 = vmatprep.subr.bf16.mxu0 %v17083_v8  ;;  %6018 = vmatprep.subr.bf16.mxu1 %v17086_v9  ;;  %v17178_v8 = vld [vmem:[%s25026_s5 + $0xf8c] ss:$16 sps:$4 sm:$0xff]   ;;  %v17173_v9 = vld [vmem:[%s25026_s5 + $0xf80] ss:$16 sps:$4 sm:$0xff]  }
 0x1bb   : > { %5486 = vmatpush1.bf16.msra.mxu0 %v17081_v10  ;;  %6019 = vmatpush1.bf16.msra.mxu1 %v17084_v12  ;;  %v17176_v10 = vld [vmem:[%s25026_s5 + $0xf88] ss:$16 sps:$4 sm:$0xff]   ;;  %v17181_v12 = vld [vmem:[%s25026_s5 + $0xfa4] ss:$16 sps:$4 sm:$0xff]  }
 0x1bc   : > { %5487 = vmatprep.subr.bf16.mxu0 %v17089_v13  ;;  %6020 = vmatprep.subr.bf16.mxu1 %v17092_v15  ;;  %v17184_v13 = vld [vmem:[%s25026_s5 + $0xfac] ss:$16 sps:$4 sm:$0xff]   ;;  %v17179_v15 = vld [vmem:[%s25026_s5 + $0xfa0] ss:$16 sps:$4 sm:$0xff]  }
 0x1bf   : > { %5488 = vmatpush1.bf16.msra.mxu0 %v17087_v16  ;;  %6021 = vmatpush1.bf16.msra.mxu1 %v17090_v17  ;;  %v17182_v16 = vld [vmem:[%s25026_s5 + $0xfa8] ss:$16 sps:$4 sm:$0xff]   ;;  %v17187_v17 = vld [vmem:[%s25026_s5 + $0xfc4] ss:$16 sps:$4 sm:$0xff]  }
 0x1c0   : > { %5489 = vmatprep.subr.bf16.mxu0 %v17095_v19  ;;  %6022 = vmatprep.subr.bf16.mxu1 %v17098_v14  ;;  %v17190_v19 = vld [vmem:[%s25026_s5 + $0xfcc] ss:$16 sps:$4 sm:$0xff]   ;;  %v17185_v14 = vld [vmem:[%s25026_s5 + $0xfc0] ss:$16 sps:$4 sm:$0xff]  }
 0x1c3   : > { %5490 = vmatpush1.bf16.msra.mxu0 %v17093_v20  ;;  %6023 = vmatpush1.bf16.msra.mxu1 %v17096_v11  ;;  %v17188_v20 = vld [vmem:[%s25026_s5 + $0xfc8] ss:$16 sps:$4 sm:$0xff]   ;;  %v17193_v11 = vld [vmem:[%s25026_s5 + $0xfe4] ss:$16 sps:$4 sm:$0xff]  }
 0x1c4   : > { %5500 = vmatprep.subr.bf16.mxu0 %v17103_v22  ;;  %6033 = vmatprep.subr.bf16.mxu1 %v17106_v23  ;;  %v17196_v22 = vld [vmem:[%s25026_s5 + $0xfec] ss:$16 sps:$4 sm:$0xff]   ;;  %v17191_v23 = vld [vmem:[%s25026_s5 + $0xfe0] ss:$16 sps:$4 sm:$0xff]  }
 0x1c6   : > { %5492 = vmatmul.mubr.bf16.vlgmr.msra.gmra.mrb[0].mxu0 %v14303_v18  ;;  %6025 = vmatmul.mubr.bf16.vlgmr.msra.gmra.mrb[0].mxu1 %v14303_v18  ;;  %v17194_v18 = vld [vmem:[%s25026_s5 + $0xfe8] ss:$16 sps:$4 sm:$0xff]  }
 0x1c7   : > { %5501 = vmatpush1.bf16.msra.mxu0 %v17101_v25  ;;  %6034 = vmatpush1.bf16.msra.mxu1 %v17104_v26  ;;  %v17201_v25 = vld [vmem:[%s25026_s5 + $0x1004] ss:$16 sps:$4 sm:$0xff]   ;;  %v17204_v26 = vld [vmem:[%s25026_s5 + $0x100c] ss:$16 sps:$4 sm:$0xff]  }
 0x1c8   : > { %5502 = vmatprep.subr.bf16.mxu0 %v17109_v27  ;;  %6035 = vmatprep.subr.bf16.mxu1 %v17112_v21  ;;  %v20873_v27 = vld [vmem:[%s19412_s26 + $0x40] sm:$0xff]  ;;  %v14305_v21 = vcombine.low %v20674_v24, %v20674_v24  ;;  %v17210_v24 = vld [vmem:[%s25026_s5 + $0x102c] ss:$16 sps:$4 sm:$0xff]  }
 0x1c9   : > { %5532 = vmatprep.mubr.bf16.mxu0 %v14306_v28  ;;  %6065 = vmatprep.mubr.bf16.mxu1 %v14306_v28  ;;  %v17199_v28 = vld [vmem:[%s25026_s5 + $0x1000] ss:$16 sps:$4 sm:$0xff]  }
 0x1cb   : > { %5503 = vmatpush1.bf16.msra.mxu0 %v17107_v29  ;;  %6036 = vmatpush1.bf16.msra.mxu1 %v17110_v30  ;;  %v17202_v29 = vld [vmem:[%s25026_s5 + $0x1008] ss:$16 sps:$4 sm:$0xff]   ;;  %v17207_v30 = vld [vmem:[%s25026_s5 + $0x1024] ss:$16 sps:$4 sm:$0xff]  }
 0x1cc   : > { %5504 = vmatprep.subr.bf16.mxu0 %v17115_v31  ;;  %6037 = vmatprep.subr.bf16.mxu1 %v17118_v32  ;;  %v14308_v31 = vcombine.high %v20873_v27, %v20873_v27  ;;  %v17205_v32 = vld [vmem:[%s25026_s5 + $0x1020] ss:$16 sps:$4 sm:$0xff]  }
 0x1cf   : > { %5505 = vmatpush1.bf16.msra.mxu0 %v17113_v33  ;;  %6038 = vmatpush1.bf16.msra.mxu1 %v17116_v34  ;;  %v17208_v33 = vld [vmem:[%s25026_s5 + $0x1028] ss:$16 sps:$4 sm:$0xff]   ;;  %v17213_v34 = vld [vmem:[%s25026_s5 + $0x1044] ss:$16 sps:$4 sm:$0xff]  }
 0x1d0   : > { %5506 = vmatprep.subr.bf16.mxu0 %v17121_v35  ;;  %6039 = vmatprep.subr.bf16.mxu1 %v17124_v36  ;;  %v17216_v35 = vld [vmem:[%s25026_s5 + $0x104c] ss:$16 sps:$4 sm:$0xff]   ;;  %v17211_v36 = vld [vmem:[%s25026_s5 + $0x1040] ss:$16 sps:$4 sm:$0xff]  }
 0x1d3   : > { %5507 = vmatpush1.bf16.msra.mxu0 %v17119_v37  ;;  %6040 = vmatpush1.bf16.msra.mxu1 %v17122_v38  ;;  %v17214_v37 = vld [vmem:[%s25026_s5 + $0x1048] ss:$16 sps:$4 sm:$0xff]   ;;  %v17219_v38 = vld [vmem:[%s25026_s5 + $0x1064] ss:$16 sps:$4 sm:$0xff]  }
 0x1d4   : > { %5508 = vmatprep.subr.bf16.mxu0 %v17127_v39  ;;  %6041 = vmatprep.subr.bf16.mxu1 %v17130_v40  ;;  %v17222_v39 = vld [vmem:[%s25026_s5 + $0x106c] ss:$16 sps:$4 sm:$0xff]   ;;  %v17217_v40 = vld [vmem:[%s25026_s5 + $0x1060] ss:$16 sps:$4 sm:$0xff]  }
 0x1d7   : > { %5509 = vmatpush1.bf16.msra.mxu0 %v17125_v41  ;;  %6042 = vmatpush1.bf16.msra.mxu1 %v17128_v42  ;;  %v17220_v41 = vld [vmem:[%s25026_s5 + $0x1068] ss:$16 sps:$4 sm:$0xff]   ;;  %v17225_v42 = vld [vmem:[%s25026_s5 + $0x1084] ss:$16 sps:$4 sm:$0xff]  }
 0x1d8   : > { %5510 = vmatprep.subr.bf16.mxu0 %v17133_v43  ;;  %6043 = vmatprep.subr.bf16.mxu1 %v17136_v44  ;;  %v17228_v43 = vld [vmem:[%s25026_s5 + $0x108c] ss:$16 sps:$4 sm:$0xff]   ;;  %v17223_v44 = vld [vmem:[%s25026_s5 + $0x1080] ss:$16 sps:$4 sm:$0xff]  }
 0x1db   : > { %5511 = vmatpush1.bf16.msra.mxu0 %v17131_v45  ;;  %6044 = vmatpush1.bf16.msra.mxu1 %v17134_v46  ;;  %v17226_v45 = vld [vmem:[%s25026_s5 + $0x1088] ss:$16 sps:$4 sm:$0xff]   ;;  %v17231_v46 = vld [vmem:[%s25026_s5 + $0x10a4] ss:$16 sps:$4 sm:$0xff]  }
 0x1dc   : > { %5512 = vmatprep.subr.bf16.mxu0 %v17139_v47  ;;  %6045 = vmatprep.subr.bf16.mxu1 %v17142_v48  ;;  %v17234_v47 = vld [vmem:[%s25026_s5 + $0x10ac] ss:$16 sps:$4 sm:$0xff]   ;;  %v17229_v48 = vld [vmem:[%s25026_s5 + $0x10a0] ss:$16 sps:$4 sm:$0xff]  }
 0x1df   : > { %5513 = vmatpush1.bf16.msra.mxu0 %v17137_v49  ;;  %6046 = vmatpush1.bf16.msra.mxu1 %v17140_v50  ;;  %v17232_v49 = vld [vmem:[%s25026_s5 + $0x10a8] ss:$16 sps:$4 sm:$0xff]   ;;  %v17237_v50 = vld [vmem:[%s25026_s5 + $0x10c4] ss:$16 sps:$4 sm:$0xff]  }
 0x1e0   : > { %5514 = vmatprep.subr.bf16.mxu0 %v17145_v51  ;;  %6047 = vmatprep.subr.bf16.mxu1 %v17148_v52  ;;  %v17240_v51 = vld [vmem:[%s25026_s5 + $0x10cc] ss:$16 sps:$4 sm:$0xff]   ;;  %v17235_v52 = vld [vmem:[%s25026_s5 + $0x10c0] ss:$16 sps:$4 sm:$0xff]  }
 0x1e3   : > { %5515 = vmatpush1.bf16.msra.mxu0 %v17143_v53  ;;  %6048 = vmatpush1.bf16.msra.mxu1 %v17146_v54  ;;  %v17238_v53 = vld [vmem:[%s25026_s5 + $0x10c8] ss:$16 sps:$4 sm:$0xff]   ;;  %v17243_v54 = vld [vmem:[%s25026_s5 + $0x10e4] ss:$16 sps:$4 sm:$0xff]  }
 0x1e4   : > { %5516 = vmatprep.subr.bf16.mxu0 %v17151_v55  ;;  %6049 = vmatprep.subr.bf16.mxu1 %v17154_v56  ;;  %v17246_v55 = vld [vmem:[%s25026_s5 + $0x10ec] ss:$16 sps:$4 sm:$0xff]   ;;  %v17241_v56 = vld [vmem:[%s25026_s5 + $0x10e0] ss:$16 sps:$4 sm:$0xff]  }
 0x1e7   : > { %5517 = vmatpush1.bf16.msra.mxu0 %v17149_v57  ;;  %6050 = vmatpush1.bf16.msra.mxu1 %v17152_v58  ;;  %v17244_v57 = vld [vmem:[%s25026_s5 + $0x10e8] ss:$16 sps:$4 sm:$0xff]   ;;  %v17249_v58 = vld [vmem:[%s25026_s5 + $0x1104] ss:$16 sps:$4 sm:$0xff]  }
 0x1e8   : > { %5518 = vmatprep.subr.bf16.mxu0 %v17157_v59  ;;  %6051 = vmatprep.subr.bf16.mxu1 %v17160_v60  ;;  %v17252_v59 = vld [vmem:[%s25026_s5 + $0x110c] ss:$16 sps:$4 sm:$0xff]   ;;  %v17247_v60 = vld [vmem:[%s25026_s5 + $0x1100] ss:$16 sps:$4 sm:$0xff]  }
 0x1eb   : > { %5519 = vmatpush1.bf16.msra.mxu0 %v17155_v61  ;;  %6052 = vmatpush1.bf16.msra.mxu1 %v17158_v62  ;;  %v17250_v61 = vld [vmem:[%s25026_s5 + $0x1108] ss:$16 sps:$4 sm:$0xff]   ;;  %v17255_v62 = vld [vmem:[%s25026_s5 + $0x1124] ss:$16 sps:$4 sm:$0xff]  }
 0x1ec   : > { %5520 = vmatprep.subr.bf16.mxu0 %v17163_v63  ;;  %6053 = vmatprep.subr.bf16.mxu1 %v17166_v0  ;;  %v17258_v63 = vld [vmem:[%s25026_s5 + $0x112c] ss:$16 sps:$4 sm:$0xff]   ;;  %v17253_v0 = vld [vmem:[%s25026_s5 + $0x1120] ss:$16 sps:$4 sm:$0xff]  }
 0x1ef   : > { %5521 = vmatpush1.bf16.msra.mxu0 %v17161_v1  ;;  %6054 = vmatpush1.bf16.msra.mxu1 %v17164_v2  ;;  %v17256_v1 = vld [vmem:[%s25026_s5 + $0x1128] ss:$16 sps:$4 sm:$0xff]   ;;  %v17261_v2 = vld [vmem:[%s25026_s5 + $0x1144] ss:$16 sps:$4 sm:$0xff]  }
 0x1f0   : > { %5522 = vmatprep.subr.bf16.mxu0 %v17169_v3  ;;  %6055 = vmatprep.subr.bf16.mxu1 %v17172_v4  ;;  %v17264_v3 = vld [vmem:[%s25026_s5 + $0x114c] ss:$16 sps:$4 sm:$0xff]   ;;  %v17259_v4 = vld [vmem:[%s25026_s5 + $0x1140] ss:$16 sps:$4 sm:$0xff]  }
 0x1f3   : > { %5523 = vmatpush1.bf16.msra.mxu0 %v17167_v5  ;;  %6056 = vmatpush1.bf16.msra.mxu1 %v17170_v6  ;;  %v17262_v5 = vld [vmem:[%s25026_s5 + $0x1148] ss:$16 sps:$4 sm:$0xff]   ;;  %v17267_v6 = vld [vmem:[%s25026_s5 + $0x1164] ss:$16 sps:$4 sm:$0xff]  }
 0x1f4   : > { %5524 = vmatprep.subr.bf16.mxu0 %v17175_v7  ;;  %6057 = vmatprep.subr.bf16.mxu1 %v17178_v8  ;;  %v17270_v7 = vld [vmem:[%s25026_s5 + $0x116c] ss:$16 sps:$4 sm:$0xff]   ;;  %v17265_v8 = vld [vmem:[%s25026_s5 + $0x1160] ss:$16 sps:$4 sm:$0xff]  }
 0x1f7   : > { %5525 = vmatpush1.bf16.msra.mxu0 %v17173_v9  ;;  %6058 = vmatpush1.bf16.msra.mxu1 %v17176_v10  ;;  %v17268_v9 = vld [vmem:[%s25026_s5 + $0x1168] ss:$16 sps:$4 sm:$0xff]   ;;  %v17273_v10 = vld [vmem:[%s25026_s5 + $0x1184] ss:$16 sps:$4 sm:$0xff]  }
 0x1f8   : > { %5526 = vmatprep.subr.bf16.mxu0 %v17181_v12  ;;  %6059 = vmatprep.subr.bf16.mxu1 %v17184_v13  ;;  %v17276_v12 = vld [vmem:[%s25026_s5 + $0x118c] ss:$16 sps:$4 sm:$0xff]   ;;  %v17271_v13 = vld [vmem:[%s25026_s5 + $0x1180] ss:$16 sps:$4 sm:$0xff]  }
 0x1fb   : > { %5527 = vmatpush1.bf16.msra.mxu0 %v17179_v15  ;;  %6060 = vmatpush1.bf16.msra.mxu1 %v17182_v16  ;;  %v17274_v15 = vld [vmem:[%s25026_s5 + $0x1188] ss:$16 sps:$4 sm:$0xff]   ;;  %v17279_v16 = vld [vmem:[%s25026_s5 + $0x11a4] ss:$16 sps:$4 sm:$0xff]  }
 0x1fc   : > { %5528 = vmatprep.subr.bf16.mxu0 %v17187_v17  ;;  %6061 = vmatprep.subr.bf16.mxu1 %v17190_v19  ;;  %v17282_v17 = vld [vmem:[%s25026_s5 + $0x11ac] ss:$16 sps:$4 sm:$0xff]   ;;  %v17277_v19 = vld [vmem:[%s25026_s5 + $0x11a0] ss:$16 sps:$4 sm:$0xff]  }
 0x1ff   : > { %5529 = vmatpush1.bf16.msra.mxu0 %v17185_v14  ;;  %6062 = vmatpush1.bf16.msra.mxu1 %v17188_v20  ;;  %v17280_v14 = vld [vmem:[%s25026_s5 + $0x11a8] ss:$16 sps:$4 sm:$0xff]   ;;  %v17285_v20 = vld [vmem:[%s25026_s5 + $0x11c4] ss:$16 sps:$4 sm:$0xff]  }
 0x200   : > { %5530 = vmatprep.subr.bf16.mxu0 %v17193_v11  ;;  %6063 = vmatprep.subr.bf16.mxu1 %v17196_v22  ;;  %v17288_v11 = vld [vmem:[%s25026_s5 + $0x11cc] ss:$16 sps:$4 sm:$0xff]   ;;  %v17283_v22 = vld [vmem:[%s25026_s5 + $0x11c0] ss:$16 sps:$4 sm:$0xff]  }
 0x203   : > { %5531 = vmatpush1.bf16.msra.mxu0 %v17191_v23  ;;  %6064 = vmatpush1.bf16.msra.mxu1 %v17194_v18  ;;  %v17286_v23 = vld [vmem:[%s25026_s5 + $0x11c8] ss:$16 sps:$4 sm:$0xff]   ;;  %v17291_v18 = vld [vmem:[%s25026_s5 + $0x11e4] ss:$16 sps:$4 sm:$0xff]  }
 0x204   : > { %5541 = vmatprep.subr.bf16.mxu0 %v17201_v25  ;;  %6074 = vmatprep.subr.bf16.mxu1 %v17204_v26  ;;  %v17294_v25 = vld [vmem:[%s25026_s5 + $0x11ec] ss:$16 sps:$4 sm:$0xff]   ;;  %v17289_v26 = vld [vmem:[%s25026_s5 + $0x11e0] ss:$16 sps:$4 sm:$0xff]  }
 0x206   : > { %5533 = vmatmul.mubr.bf16.vlgmr.msra.gmra.mrb[0].mxu0 %v14305_v21  ;;  %6066 = vmatmul.mubr.bf16.vlgmr.msra.gmra.mrb[0].mxu1 %v14305_v21  ;;  %v17292_v21 = vld [vmem:[%s25026_s5 + $0x11e8] ss:$16 sps:$4 sm:$0xff]  }
 0x207   : > { %5542 = vmatpush1.bf16.msra.mxu0 %v17199_v28  ;;  %6075 = vmatpush1.bf16.msra.mxu1 %v17202_v29  ;;  %v17299_v28 = vld [vmem:[%s25026_s5 + $0x1204] ss:$16 sps:$4 sm:$0xff]   ;;  %v17302_v29 = vld [vmem:[%s25026_s5 + $0x120c] ss:$16 sps:$4 sm:$0xff]  }
 0x208   : > { %5543 = vmatprep.subr.bf16.mxu0 %v17207_v30  ;;  %6076 = vmatprep.subr.bf16.mxu1 %v17210_v24  ;;  %v21072_v30 = vld [vmem:[%s19412_s26 + $0x48] sm:$0xff]  ;;  %v14307_v24 = vcombine.low %v20873_v27, %v20873_v27 }
 0x209   : > { %5573 = vmatprep.mubr.bf16.mxu0 %v14308_v31  ;;  %6106 = vmatprep.mubr.bf16.mxu1 %v14308_v31  ;;  %v17297_v31 = vld [vmem:[%s25026_s5 + $0x1200] ss:$16 sps:$4 sm:$0xff]   ;;  %v17308_v27 = vld [vmem:[%s25026_s5 + $0x122c] ss:$16 sps:$4 sm:$0xff]  }
 0x20b   : > { %5544 = vmatpush1.bf16.msra.mxu0 %v17205_v32  ;;  %6077 = vmatpush1.bf16.msra.mxu1 %v17208_v33  ;;  %v17300_v32 = vld [vmem:[%s25026_s5 + $0x1208] ss:$16 sps:$4 sm:$0xff]   ;;  %v17305_v33 = vld [vmem:[%s25026_s5 + $0x1224] ss:$16 sps:$4 sm:$0xff]  }
 0x20c   : > { %5545 = vmatprep.subr.bf16.mxu0 %v17213_v34  ;;  %6078 = vmatprep.subr.bf16.mxu1 %v17216_v35  ;;  %v14310_v34 = vcombine.high %v21072_v30, %v21072_v30  ;;  %v17303_v35 = vld [vmem:[%s25026_s5 + $0x1220] ss:$16 sps:$4 sm:$0xff]  }
 0x20f   : > { %5546 = vmatpush1.bf16.msra.mxu0 %v17211_v36  ;;  %6079 = vmatpush1.bf16.msra.mxu1 %v17214_v37  ;;  %v17306_v36 = vld [vmem:[%s25026_s5 + $0x1228] ss:$16 sps:$4 sm:$0xff]   ;;  %v17311_v37 = vld [vmem:[%s25026_s5 + $0x1244] ss:$16 sps:$4 sm:$0xff]  }
 0x210   : > { %5547 = vmatprep.subr.bf16.mxu0 %v17219_v38  ;;  %6080 = vmatprep.subr.bf16.mxu1 %v17222_v39  ;;  %v17314_v38 = vld [vmem:[%s25026_s5 + $0x124c] ss:$16 sps:$4 sm:$0xff]   ;;  %v17309_v39 = vld [vmem:[%s25026_s5 + $0x1240] ss:$16 sps:$4 sm:$0xff]  }
 0x213   : > { %5548 = vmatpush1.bf16.msra.mxu0 %v17217_v40  ;;  %6081 = vmatpush1.bf16.msra.mxu1 %v17220_v41  ;;  %v17312_v40 = vld [vmem:[%s25026_s5 + $0x1248] ss:$16 sps:$4 sm:$0xff]   ;;  %v17317_v41 = vld [vmem:[%s25026_s5 + $0x1264] ss:$16 sps:$4 sm:$0xff]  }
 0x214   : > { %5549 = vmatprep.subr.bf16.mxu0 %v17225_v42  ;;  %6082 = vmatprep.subr.bf16.mxu1 %v17228_v43  ;;  %v17320_v42 = vld [vmem:[%s25026_s5 + $0x126c] ss:$16 sps:$4 sm:$0xff]   ;;  %v17315_v43 = vld [vmem:[%s25026_s5 + $0x1260] ss:$16 sps:$4 sm:$0xff]  }
 0x217   : > { %5550 = vmatpush1.bf16.msra.mxu0 %v17223_v44  ;;  %6083 = vmatpush1.bf16.msra.mxu1 %v17226_v45  ;;  %v17318_v44 = vld [vmem:[%s25026_s5 + $0x1268] ss:$16 sps:$4 sm:$0xff]   ;;  %v17323_v45 = vld [vmem:[%s25026_s5 + $0x1284] ss:$16 sps:$4 sm:$0xff]  }
 0x218   : > { %5551 = vmatprep.subr.bf16.mxu0 %v17231_v46  ;;  %6084 = vmatprep.subr.bf16.mxu1 %v17234_v47  ;;  %v17326_v46 = vld [vmem:[%s25026_s5 + $0x128c] ss:$16 sps:$4 sm:$0xff]   ;;  %v17321_v47 = vld [vmem:[%s25026_s5 + $0x1280] ss:$16 sps:$4 sm:$0xff]  }
 0x21b   : > { %5552 = vmatpush1.bf16.msra.mxu0 %v17229_v48  ;;  %6085 = vmatpush1.bf16.msra.mxu1 %v17232_v49  ;;  %v17324_v48 = vld [vmem:[%s25026_s5 + $0x1288] ss:$16 sps:$4 sm:$0xff]   ;;  %v17329_v49 = vld [vmem:[%s25026_s5 + $0x12a4] ss:$16 sps:$4 sm:$0xff]  }
 0x21c   : > { %5553 = vmatprep.subr.bf16.mxu0 %v17237_v50  ;;  %6086 = vmatprep.subr.bf16.mxu1 %v17240_v51  ;;  %v17332_v50 = vld [vmem:[%s25026_s5 + $0x12ac] ss:$16 sps:$4 sm:$0xff]   ;;  %v17327_v51 = vld [vmem:[%s25026_s5 + $0x12a0] ss:$16 sps:$4 sm:$0xff]  }
 0x21f   : > { %5554 = vmatpush1.bf16.msra.mxu0 %v17235_v52  ;;  %6087 = vmatpush1.bf16.msra.mxu1 %v17238_v53  ;;  %v17330_v52 = vld [vmem:[%s25026_s5 + $0x12a8] ss:$16 sps:$4 sm:$0xff]   ;;  %v17335_v53 = vld [vmem:[%s25026_s5 + $0x12c4] ss:$16 sps:$4 sm:$0xff]  }
 0x220   : > { %5555 = vmatprep.subr.bf16.mxu0 %v17243_v54  ;;  %6088 = vmatprep.subr.bf16.mxu1 %v17246_v55  ;;  %v17338_v54 = vld [vmem:[%s25026_s5 + $0x12cc] ss:$16 sps:$4 sm:$0xff]   ;;  %v17333_v55 = vld [vmem:[%s25026_s5 + $0x12c0] ss:$16 sps:$4 sm:$0xff]  }
 0x223   : > { %5556 = vmatpush1.bf16.msra.mxu0 %v17241_v56  ;;  %6089 = vmatpush1.bf16.msra.mxu1 %v17244_v57  ;;  %v17336_v56 = vld [vmem:[%s25026_s5 + $0x12c8] ss:$16 sps:$4 sm:$0xff]   ;;  %v17341_v57 = vld [vmem:[%s25026_s5 + $0x12e4] ss:$16 sps:$4 sm:$0xff]  }
 0x224   : > { %5557 = vmatprep.subr.bf16.mxu0 %v17249_v58  ;;  %6090 = vmatprep.subr.bf16.mxu1 %v17252_v59  ;;  %v17344_v58 = vld [vmem:[%s25026_s5 + $0x12ec] ss:$16 sps:$4 sm:$0xff]   ;;  %v17339_v59 = vld [vmem:[%s25026_s5 + $0x12e0] ss:$16 sps:$4 sm:$0xff]  }
 0x227   : > { %5558 = vmatpush1.bf16.msra.mxu0 %v17247_v60  ;;  %6091 = vmatpush1.bf16.msra.mxu1 %v17250_v61  ;;  %v17342_v60 = vld [vmem:[%s25026_s5 + $0x12e8] ss:$16 sps:$4 sm:$0xff]   ;;  %v17347_v61 = vld [vmem:[%s25026_s5 + $0x1304] ss:$16 sps:$4 sm:$0xff]  }
 0x228   : > { %5559 = vmatprep.subr.bf16.mxu0 %v17255_v62  ;;  %6092 = vmatprep.subr.bf16.mxu1 %v17258_v63  ;;  %v17350_v62 = vld [vmem:[%s25026_s5 + $0x130c] ss:$16 sps:$4 sm:$0xff]   ;;  %v17345_v63 = vld [vmem:[%s25026_s5 + $0x1300] ss:$16 sps:$4 sm:$0xff]  }
 0x22b   : > { %5560 = vmatpush1.bf16.msra.mxu0 %v17253_v0  ;;  %6093 = vmatpush1.bf16.msra.mxu1 %v17256_v1  ;;  %v17348_v0 = vld [vmem:[%s25026_s5 + $0x1308] ss:$16 sps:$4 sm:$0xff]   ;;  %v17353_v1 = vld [vmem:[%s25026_s5 + $0x1324] ss:$16 sps:$4 sm:$0xff]  }
 0x22c   : > { %5561 = vmatprep.subr.bf16.mxu0 %v17261_v2  ;;  %6094 = vmatprep.subr.bf16.mxu1 %v17264_v3  ;;  %v17356_v2 = vld [vmem:[%s25026_s5 + $0x132c] ss:$16 sps:$4 sm:$0xff]   ;;  %v17351_v3 = vld [vmem:[%s25026_s5 + $0x1320] ss:$16 sps:$4 sm:$0xff]  }
 0x22f   : > { %5562 = vmatpush1.bf16.msra.mxu0 %v17259_v4  ;;  %6095 = vmatpush1.bf16.msra.mxu1 %v17262_v5  ;;  %v17354_v4 = vld [vmem:[%s25026_s5 + $0x1328] ss:$16 sps:$4 sm:$0xff]   ;;  %v17359_v5 = vld [vmem:[%s25026_s5 + $0x1344] ss:$16 sps:$4 sm:$0xff]  }
 0x230   : > { %5563 = vmatprep.subr.bf16.mxu0 %v17267_v6  ;;  %6096 = vmatprep.subr.bf16.mxu1 %v17270_v7  ;;  %v17362_v6 = vld [vmem:[%s25026_s5 + $0x134c] ss:$16 sps:$4 sm:$0xff]   ;;  %v17357_v7 = vld [vmem:[%s25026_s5 + $0x1340] ss:$16 sps:$4 sm:$0xff]  }
 0x233   : > { %5564 = vmatpush1.bf16.msra.mxu0 %v17265_v8  ;;  %6097 = vmatpush1.bf16.msra.mxu1 %v17268_v9  ;;  %v17360_v8 = vld [vmem:[%s25026_s5 + $0x1348] ss:$16 sps:$4 sm:$0xff]   ;;  %v17365_v9 = vld [vmem:[%s25026_s5 + $0x1364] ss:$16 sps:$4 sm:$0xff]  }
 0x234   : > { %5565 = vmatprep.subr.bf16.mxu0 %v17273_v10  ;;  %6098 = vmatprep.subr.bf16.mxu1 %v17276_v12  ;;  %v17368_v10 = vld [vmem:[%s25026_s5 + $0x136c] ss:$16 sps:$4 sm:$0xff]   ;;  %v17363_v12 = vld [vmem:[%s25026_s5 + $0x1360] ss:$16 sps:$4 sm:$0xff]  }
 0x237   : > { %5566 = vmatpush1.bf16.msra.mxu0 %v17271_v13  ;;  %6099 = vmatpush1.bf16.msra.mxu1 %v17274_v15  ;;  %v17366_v13 = vld [vmem:[%s25026_s5 + $0x1368] ss:$16 sps:$4 sm:$0xff]   ;;  %v17371_v15 = vld [vmem:[%s25026_s5 + $0x1384] ss:$16 sps:$4 sm:$0xff]  }
 0x238   : > { %5567 = vmatprep.subr.bf16.mxu0 %v17279_v16  ;;  %6100 = vmatprep.subr.bf16.mxu1 %v17282_v17  ;;  %v17374_v16 = vld [vmem:[%s25026_s5 + $0x138c] ss:$16 sps:$4 sm:$0xff]   ;;  %v17369_v17 = vld [vmem:[%s25026_s5 + $0x1380] ss:$16 sps:$4 sm:$0xff]  }
 0x23b   : > { %5568 = vmatpush1.bf16.msra.mxu0 %v17277_v19  ;;  %6101 = vmatpush1.bf16.msra.mxu1 %v17280_v14  ;;  %v17372_v19 = vld [vmem:[%s25026_s5 + $0x1388] ss:$16 sps:$4 sm:$0xff]   ;;  %v17377_v14 = vld [vmem:[%s25026_s5 + $0x13a4] ss:$16 sps:$4 sm:$0xff]  }
 0x23c   : > { %5569 = vmatprep.subr.bf16.mxu0 %v17285_v20  ;;  %6102 = vmatprep.subr.bf16.mxu1 %v17288_v11  ;;  %v17380_v20 = vld [vmem:[%s25026_s5 + $0x13ac] ss:$16 sps:$4 sm:$0xff]   ;;  %v17375_v11 = vld [vmem:[%s25026_s5 + $0x13a0] ss:$16 sps:$4 sm:$0xff]  }
 0x23f   : > { %5570 = vmatpush1.bf16.msra.mxu0 %v17283_v22  ;;  %6103 = vmatpush1.bf16.msra.mxu1 %v17286_v23  ;;  %v17378_v22 = vld [vmem:[%s25026_s5 + $0x13a8] ss:$16 sps:$4 sm:$0xff]   ;;  %v17383_v23 = vld [vmem:[%s25026_s5 + $0x13c4] ss:$16 sps:$4 sm:$0xff]  }
 0x240   : > { %5571 = vmatprep.subr.bf16.mxu0 %v17291_v18  ;;  %6104 = vmatprep.subr.bf16.mxu1 %v17294_v25  ;;  %v17386_v18 = vld [vmem:[%s25026_s5 + $0x13cc] ss:$16 sps:$4 sm:$0xff]   ;;  %v17381_v25 = vld [vmem:[%s25026_s5 + $0x13c0] ss:$16 sps:$4 sm:$0xff]  }
 0x243   : > { %5572 = vmatpush1.bf16.msra.mxu0 %v17289_v26  ;;  %6105 = vmatpush1.bf16.msra.mxu1 %v17292_v21  ;;  %v17384_v26 = vld [vmem:[%s25026_s5 + $0x13c8] ss:$16 sps:$4 sm:$0xff]   ;;  %v17389_v21 = vld [vmem:[%s25026_s5 + $0x13e4] ss:$16 sps:$4 sm:$0xff]  }
 0x244   : > { %5582 = vmatprep.subr.bf16.mxu0 %v17299_v28  ;;  %6115 = vmatprep.subr.bf16.mxu1 %v17302_v29  ;;  %v17392_v28 = vld [vmem:[%s25026_s5 + $0x13ec] ss:$16 sps:$4 sm:$0xff]   ;;  %v17387_v29 = vld [vmem:[%s25026_s5 + $0x13e0] ss:$16 sps:$4 sm:$0xff]  }
 0x246   : > { %5574 = vmatmul.mubr.bf16.vlgmr.msra.gmra.mrb[0].mxu0 %v14307_v24  ;;  %6107 = vmatmul.mubr.bf16.vlgmr.msra.gmra.mrb[0].mxu1 %v14307_v24  ;;  %v17390_v24 = vld [vmem:[%s25026_s5 + $0x13e8] ss:$16 sps:$4 sm:$0xff]  }
 0x247   : > { %5583 = vmatpush1.bf16.msra.mxu0 %v17297_v31  ;;  %6116 = vmatpush1.bf16.msra.mxu1 %v17300_v32  ;;  %v17397_v31 = vld [vmem:[%s25026_s5 + $0x1404] ss:$16 sps:$4 sm:$0xff]   ;;  %v17400_v32 = vld [vmem:[%s25026_s5 + $0x140c] ss:$16 sps:$4 sm:$0xff]  }
 0x248   : > { %5584 = vmatprep.subr.bf16.mxu0 %v17305_v33  ;;  %6117 = vmatprep.subr.bf16.mxu1 %v17308_v27  ;;  %v21271_v33 = vld [vmem:[%s19412_s26 + $0x50] sm:$0xff]  ;;  %v14309_v27 = vcombine.low %v21072_v30, %v21072_v30  ;;  %v17406_v30 = vld [vmem:[%s25026_s5 + $0x142c] ss:$16 sps:$4 sm:$0xff]  }
 0x249   : > { %5614 = vmatprep.mubr.bf16.mxu0 %v14310_v34  ;;  %6147 = vmatprep.mubr.bf16.mxu1 %v14310_v34  ;;  %v17395_v34 = vld [vmem:[%s25026_s5 + $0x1400] ss:$16 sps:$4 sm:$0xff]  }
 0x24b   : > { %5585 = vmatpush1.bf16.msra.mxu0 %v17303_v35  ;;  %6118 = vmatpush1.bf16.msra.mxu1 %v17306_v36  ;;  %v17398_v35 = vld [vmem:[%s25026_s5 + $0x1408] ss:$16 sps:$4 sm:$0xff]   ;;  %v17403_v36 = vld [vmem:[%s25026_s5 + $0x1424] ss:$16 sps:$4 sm:$0xff]  }
 0x24c   : > { %5586 = vmatprep.subr.bf16.mxu0 %v17311_v37  ;;  %6119 = vmatprep.subr.bf16.mxu1 %v17314_v38  ;;  %v14312_v37 = vcombine.high %v21271_v33, %v21271_v33  ;;  %v17401_v38 = vld [vmem:[%s25026_s5 + $0x1420] ss:$16 sps:$4 sm:$0xff]  }
 0x24f   : > { %5587 = vmatpush1.bf16.msra.mxu0 %v17309_v39  ;;  %6120 = vmatpush1.bf16.msra.mxu1 %v17312_v40  ;;  %v17404_v39 = vld [vmem:[%s25026_s5 + $0x1428] ss:$16 sps:$4 sm:$0xff]   ;;  %v17409_v40 = vld [vmem:[%s25026_s5 + $0x1444] ss:$16 sps:$4 sm:$0xff]  }
 0x250   : > { %5588 = vmatprep.subr.bf16.mxu0 %v17317_v41  ;;  %6121 = vmatprep.subr.bf16.mxu1 %v17320_v42  ;;  %v17412_v41 = vld [vmem:[%s25026_s5 + $0x144c] ss:$16 sps:$4 sm:$0xff]   ;;  %v17407_v42 = vld [vmem:[%s25026_s5 + $0x1440] ss:$16 sps:$4 sm:$0xff]  }
 0x253   : > { %5589 = vmatpush1.bf16.msra.mxu0 %v17315_v43  ;;  %6122 = vmatpush1.bf16.msra.mxu1 %v17318_v44  ;;  %v17410_v43 = vld [vmem:[%s25026_s5 + $0x1448] ss:$16 sps:$4 sm:$0xff]   ;;  %v17415_v44 = vld [vmem:[%s25026_s5 + $0x1464] ss:$16 sps:$4 sm:$0xff]  }
 0x254   : > { %5590 = vmatprep.subr.bf16.mxu0 %v17323_v45  ;;  %6123 = vmatprep.subr.bf16.mxu1 %v17326_v46  ;;  %v17418_v45 = vld [vmem:[%s25026_s5 + $0x146c] ss:$16 sps:$4 sm:$0xff]   ;;  %v17413_v46 = vld [vmem:[%s25026_s5 + $0x1460] ss:$16 sps:$4 sm:$0xff]  }
 0x257   : > { %5591 = vmatpush1.bf16.msra.mxu0 %v17321_v47  ;;  %6124 = vmatpush1.bf16.msra.mxu1 %v17324_v48  ;;  %v17416_v47 = vld [vmem:[%s25026_s5 + $0x1468] ss:$16 sps:$4 sm:$0xff]   ;;  %v17421_v48 = vld [vmem:[%s25026_s5 + $0x1484] ss:$16 sps:$4 sm:$0xff]  }
 0x258   : > { %5592 = vmatprep.subr.bf16.mxu0 %v17329_v49  ;;  %6125 = vmatprep.subr.bf16.mxu1 %v17332_v50  ;;  %v17424_v49 = vld [vmem:[%s25026_s5 + $0x148c] ss:$16 sps:$4 sm:$0xff]   ;;  %v17419_v50 = vld [vmem:[%s25026_s5 + $0x1480] ss:$16 sps:$4 sm:$0xff]  }
 0x25b   : > { %5593 = vmatpush1.bf16.msra.mxu0 %v17327_v51  ;;  %6126 = vmatpush1.bf16.msra.mxu1 %v17330_v52  ;;  %v17422_v51 = vld [vmem:[%s25026_s5 + $0x1488] ss:$16 sps:$4 sm:$0xff]   ;;  %v17427_v52 = vld [vmem:[%s25026_s5 + $0x14a4] ss:$16 sps:$4 sm:$0xff]  }
 0x25c   : > { %5594 = vmatprep.subr.bf16.mxu0 %v17335_v53  ;;  %6127 = vmatprep.subr.bf16.mxu1 %v17338_v54  ;;  %v17430_v53 = vld [vmem:[%s25026_s5 + $0x14ac] ss:$16 sps:$4 sm:$0xff]   ;;  %v17425_v54 = vld [vmem:[%s25026_s5 + $0x14a0] ss:$16 sps:$4 sm:$0xff]  }
 0x25f   : > { %5595 = vmatpush1.bf16.msra.mxu0 %v17333_v55  ;;  %6128 = vmatpush1.bf16.msra.mxu1 %v17336_v56  ;;  %v17428_v55 = vld [vmem:[%s25026_s5 + $0x14a8] ss:$16 sps:$4 sm:$0xff]   ;;  %v17433_v56 = vld [vmem:[%s25026_s5 + $0x14c4] ss:$16 sps:$4 sm:$0xff]  }
 0x260   : > { %5596 = vmatprep.subr.bf16.mxu0 %v17341_v57  ;;  %6129 = vmatprep.subr.bf16.mxu1 %v17344_v58  ;;  %v17436_v57 = vld [vmem:[%s25026_s5 + $0x14cc] ss:$16 sps:$4 sm:$0xff]   ;;  %v17431_v58 = vld [vmem:[%s25026_s5 + $0x14c0] ss:$16 sps:$4 sm:$0xff]  }
 0x263   : > { %5597 = vmatpush1.bf16.msra.mxu0 %v17339_v59  ;;  %6130 = vmatpush1.bf16.msra.mxu1 %v17342_v60  ;;  %v17434_v59 = vld [vmem:[%s25026_s5 + $0x14c8] ss:$16 sps:$4 sm:$0xff]   ;;  %v17439_v60 = vld [vmem:[%s25026_s5 + $0x14e4] ss:$16 sps:$4 sm:$0xff]  }
 0x264   : > { %5598 = vmatprep.subr.bf16.mxu0 %v17347_v61  ;;  %6131 = vmatprep.subr.bf16.mxu1 %v17350_v62  ;;  %v17442_v61 = vld [vmem:[%s25026_s5 + $0x14ec] ss:$16 sps:$4 sm:$0xff]   ;;  %v17437_v62 = vld [vmem:[%s25026_s5 + $0x14e0] ss:$16 sps:$4 sm:$0xff]  }
 0x267   : > { %5599 = vmatpush1.bf16.msra.mxu0 %v17345_v63  ;;  %6132 = vmatpush1.bf16.msra.mxu1 %v17348_v0  ;;  %v17440_v63 = vld [vmem:[%s25026_s5 + $0x14e8] ss:$16 sps:$4 sm:$0xff]   ;;  %v17445_v0 = vld [vmem:[%s25026_s5 + $0x1504] ss:$16 sps:$4 sm:$0xff]  }
 0x268   : > { %5600 = vmatprep.subr.bf16.mxu0 %v17353_v1  ;;  %6133 = vmatprep.subr.bf16.mxu1 %v17356_v2  ;;  %v17448_v1 = vld [vmem:[%s25026_s5 + $0x150c] ss:$16 sps:$4 sm:$0xff]   ;;  %v17443_v2 = vld [vmem:[%s25026_s5 + $0x1500] ss:$16 sps:$4 sm:$0xff]  }
 0x26b   : > { %5601 = vmatpush1.bf16.msra.mxu0 %v17351_v3  ;;  %6134 = vmatpush1.bf16.msra.mxu1 %v17354_v4  ;;  %v17446_v3 = vld [vmem:[%s25026_s5 + $0x1508] ss:$16 sps:$4 sm:$0xff]   ;;  %v17451_v4 = vld [vmem:[%s25026_s5 + $0x1524] ss:$16 sps:$4 sm:$0xff]  }
 0x26c   : > { %5602 = vmatprep.subr.bf16.mxu0 %v17359_v5  ;;  %6135 = vmatprep.subr.bf16.mxu1 %v17362_v6  ;;  %v17454_v5 = vld [vmem:[%s25026_s5 + $0x152c] ss:$16 sps:$4 sm:$0xff]   ;;  %v17449_v6 = vld [vmem:[%s25026_s5 + $0x1520] ss:$16 sps:$4 sm:$0xff]  }
 0x26f   : > { %5603 = vmatpush1.bf16.msra.mxu0 %v17357_v7  ;;  %6136 = vmatpush1.bf16.msra.mxu1 %v17360_v8  ;;  %v17452_v7 = vld [vmem:[%s25026_s5 + $0x1528] ss:$16 sps:$4 sm:$0xff]   ;;  %v17457_v8 = vld [vmem:[%s25026_s5 + $0x1544] ss:$16 sps:$4 sm:$0xff]  }
 0x270   : > { %5604 = vmatprep.subr.bf16.mxu0 %v17365_v9  ;;  %6137 = vmatprep.subr.bf16.mxu1 %v17368_v10  ;;  %v17460_v9 = vld [vmem:[%s25026_s5 + $0x154c] ss:$16 sps:$4 sm:$0xff]   ;;  %v17455_v10 = vld [vmem:[%s25026_s5 + $0x1540] ss:$16 sps:$4 sm:$0xff]  }
 0x273   : > { %5605 = vmatpush1.bf16.msra.mxu0 %v17363_v12  ;;  %6138 = vmatpush1.bf16.msra.mxu1 %v17366_v13  ;;  %v17458_v12 = vld [vmem:[%s25026_s5 + $0x1548] ss:$16 sps:$4 sm:$0xff]   ;;  %v17463_v13 = vld [vmem:[%s25026_s5 + $0x1564] ss:$16 sps:$4 sm:$0xff]  }
 0x274   : > { %5606 = vmatprep.subr.bf16.mxu0 %v17371_v15  ;;  %6139 = vmatprep.subr.bf16.mxu1 %v17374_v16  ;;  %v17466_v15 = vld [vmem:[%s25026_s5 + $0x156c] ss:$16 sps:$4 sm:$0xff]   ;;  %v17461_v16 = vld [vmem:[%s25026_s5 + $0x1560] ss:$16 sps:$4 sm:$0xff]  }
 0x277   : > { %5607 = vmatpush1.bf16.msra.mxu0 %v17369_v17  ;;  %6140 = vmatpush1.bf16.msra.mxu1 %v17372_v19  ;;  %v17464_v17 = vld [vmem:[%s25026_s5 + $0x1568] ss:$16 sps:$4 sm:$0xff]   ;;  %v17469_v19 = vld [vmem:[%s25026_s5 + $0x1584] ss:$16 sps:$4 sm:$0xff]  }
 0x278   : > { %5608 = vmatprep.subr.bf16.mxu0 %v17377_v14  ;;  %6141 = vmatprep.subr.bf16.mxu1 %v17380_v20  ;;  %v17472_v14 = vld [vmem:[%s25026_s5 + $0x158c] ss:$16 sps:$4 sm:$0xff]   ;;  %v17467_v20 = vld [vmem:[%s25026_s5 + $0x1580] ss:$16 sps:$4 sm:$0xff]  }
 0x27b   : > { %5609 = vmatpush1.bf16.msra.mxu0 %v17375_v11  ;;  %6142 = vmatpush1.bf16.msra.mxu1 %v17378_v22  ;;  %v17470_v11 = vld [vmem:[%s25026_s5 + $0x1588] ss:$16 sps:$4 sm:$0xff]   ;;  %v17475_v22 = vld [vmem:[%s25026_s5 + $0x15a4] ss:$16 sps:$4 sm:$0xff]  }
 0x27c   : > { %5610 = vmatprep.subr.bf16.mxu0 %v17383_v23  ;;  %6143 = vmatprep.subr.bf16.mxu1 %v17386_v18  ;;  %v17478_v23 = vld [vmem:[%s25026_s5 + $0x15ac] ss:$16 sps:$4 sm:$0xff]   ;;  %v17473_v18 = vld [vmem:[%s25026_s5 + $0x15a0] ss:$16 sps:$4 sm:$0xff]  }
 0x27f   : > { %5611 = vmatpush1.bf16.msra.mxu0 %v17381_v25  ;;  %6144 = vmatpush1.bf16.msra.mxu1 %v17384_v26  ;;  %v17476_v25 = vld [vmem:[%s25026_s5 + $0x15a8] ss:$16 sps:$4 sm:$0xff]   ;;  %v17481_v26 = vld [vmem:[%s25026_s5 + $0x15c4] ss:$16 sps:$4 sm:$0xff]  }
 0x280   : > { %5612 = vmatprep.subr.bf16.mxu0 %v17389_v21  ;;  %6145 = vmatprep.subr.bf16.mxu1 %v17392_v28  ;;  %v17484_v21 = vld [vmem:[%s25026_s5 + $0x15cc] ss:$16 sps:$4 sm:$0xff]   ;;  %v17479_v28 = vld [vmem:[%s25026_s5 + $0x15c0] ss:$16 sps:$4 sm:$0xff]  }
 0x283   : > { %5613 = vmatpush1.bf16.msra.mxu0 %v17387_v29  ;;  %6146 = vmatpush1.bf16.msra.mxu1 %v17390_v24  ;;  %v17482_v29 = vld [vmem:[%s25026_s5 + $0x15c8] ss:$16 sps:$4 sm:$0xff]   ;;  %v17487_v24 = vld [vmem:[%s25026_s5 + $0x15e4] ss:$16 sps:$4 sm:$0xff]  }
 0x284   : > { %5623 = vmatprep.subr.bf16.mxu0 %v17397_v31  ;;  %6156 = vmatprep.subr.bf16.mxu1 %v17400_v32  ;;  %v17490_v31 = vld [vmem:[%s25026_s5 + $0x15ec] ss:$16 sps:$4 sm:$0xff]   ;;  %v17485_v32 = vld [vmem:[%s25026_s5 + $0x15e0] ss:$16 sps:$4 sm:$0xff]  }
 0x286   : > { %5615 = vmatmul.mubr.bf16.vlgmr.msra.gmra.mrb[0].mxu0 %v14309_v27  ;;  %6148 = vmatmul.mubr.bf16.vlgmr.msra.gmra.mrb[0].mxu1 %v14309_v27  ;;  %v17488_v27 = vld [vmem:[%s25026_s5 + $0x15e8] ss:$16 sps:$4 sm:$0xff]  }
 0x287   : > { %5624 = vmatpush1.bf16.msra.mxu0 %v17395_v34  ;;  %6157 = vmatpush1.bf16.msra.mxu1 %v17398_v35  ;;  %v17495_v34 = vld [vmem:[%s25026_s5 + $0x1604] ss:$16 sps:$4 sm:$0xff]   ;;  %v17498_v35 = vld [vmem:[%s25026_s5 + $0x160c] ss:$16 sps:$4 sm:$0xff]  }
 0x288   : > { %5625 = vmatprep.subr.bf16.mxu0 %v17403_v36  ;;  %6158 = vmatprep.subr.bf16.mxu1 %v17406_v30  ;;  %v21470_v36 = vld [vmem:[%s19412_s26 + $0x58] sm:$0xff]  ;;  %v14311_v30 = vcombine.low %v21271_v33, %v21271_v33 }
 0x289   : > { %5655 = vmatprep.mubr.bf16.mxu0 %v14312_v37  ;;  %6188 = vmatprep.mubr.bf16.mxu1 %v14312_v37  ;;  %v17493_v37 = vld [vmem:[%s25026_s5 + $0x1600] ss:$16 sps:$4 sm:$0xff]   ;;  %v17504_v33 = vld [vmem:[%s25026_s5 + $0x162c] ss:$16 sps:$4 sm:$0xff]  }
 0x28b   : > { %5626 = vmatpush1.bf16.msra.mxu0 %v17401_v38  ;;  %6159 = vmatpush1.bf16.msra.mxu1 %v17404_v39  ;;  %v17496_v38 = vld [vmem:[%s25026_s5 + $0x1608] ss:$16 sps:$4 sm:$0xff]   ;;  %v17501_v39 = vld [vmem:[%s25026_s5 + $0x1624] ss:$16 sps:$4 sm:$0xff]  }
 0x28c   : > { %5627 = vmatprep.subr.bf16.mxu0 %v17409_v40  ;;  %6160 = vmatprep.subr.bf16.mxu1 %v17412_v41  ;;  %v14314_v40 = vcombine.high %v21470_v36, %v21470_v36  ;;  %v17499_v41 = vld [vmem:[%s25026_s5 + $0x1620] ss:$16 sps:$4 sm:$0xff]  }
 0x28f   : > { %5628 = vmatpush1.bf16.msra.mxu0 %v17407_v42  ;;  %6161 = vmatpush1.bf16.msra.mxu1 %v17410_v43  ;;  %v17502_v42 = vld [vmem:[%s25026_s5 + $0x1628] ss:$16 sps:$4 sm:$0xff]   ;;  %v17507_v43 = vld [vmem:[%s25026_s5 + $0x1644] ss:$16 sps:$4 sm:$0xff]  }
 0x290   : > { %5629 = vmatprep.subr.bf16.mxu0 %v17415_v44  ;;  %6162 = vmatprep.subr.bf16.mxu1 %v17418_v45  ;;  %v17510_v44 = vld [vmem:[%s25026_s5 + $0x164c] ss:$16 sps:$4 sm:$0xff]   ;;  %v17505_v45 = vld [vmem:[%s25026_s5 + $0x1640] ss:$16 sps:$4 sm:$0xff]  }
 0x293   : > { %5630 = vmatpush1.bf16.msra.mxu0 %v17413_v46  ;;  %6163 = vmatpush1.bf16.msra.mxu1 %v17416_v47  ;;  %v17508_v46 = vld [vmem:[%s25026_s5 + $0x1648] ss:$16 sps:$4 sm:$0xff]   ;;  %v17513_v47 = vld [vmem:[%s25026_s5 + $0x1664] ss:$16 sps:$4 sm:$0xff]  }
 0x294   : > { %5631 = vmatprep.subr.bf16.mxu0 %v17421_v48  ;;  %6164 = vmatprep.subr.bf16.mxu1 %v17424_v49  ;;  %v17516_v48 = vld [vmem:[%s25026_s5 + $0x166c] ss:$16 sps:$4 sm:$0xff]   ;;  %v17511_v49 = vld [vmem:[%s25026_s5 + $0x1660] ss:$16 sps:$4 sm:$0xff]  }
 0x297   : > { %5632 = vmatpush1.bf16.msra.mxu0 %v17419_v50  ;;  %6165 = vmatpush1.bf16.msra.mxu1 %v17422_v51  ;;  %v17514_v50 = vld [vmem:[%s25026_s5 + $0x1668] ss:$16 sps:$4 sm:$0xff]   ;;  %v17519_v51 = vld [vmem:[%s25026_s5 + $0x1684] ss:$16 sps:$4 sm:$0xff]  }
 0x298   : > { %5633 = vmatprep.subr.bf16.mxu0 %v17427_v52  ;;  %6166 = vmatprep.subr.bf16.mxu1 %v17430_v53  ;;  %v17522_v52 = vld [vmem:[%s25026_s5 + $0x168c] ss:$16 sps:$4 sm:$0xff]   ;;  %v17517_v53 = vld [vmem:[%s25026_s5 + $0x1680] ss:$16 sps:$4 sm:$0xff]  }
 0x29b   : > { %5634 = vmatpush1.bf16.msra.mxu0 %v17425_v54  ;;  %6167 = vmatpush1.bf16.msra.mxu1 %v17428_v55  ;;  %v17520_v54 = vld [vmem:[%s25026_s5 + $0x1688] ss:$16 sps:$4 sm:$0xff]   ;;  %v17525_v55 = vld [vmem:[%s25026_s5 + $0x16a4] ss:$16 sps:$4 sm:$0xff]  }
 0x29c   : > { %5635 = vmatprep.subr.bf16.mxu0 %v17433_v56  ;;  %6168 = vmatprep.subr.bf16.mxu1 %v17436_v57  ;;  %v17528_v56 = vld [vmem:[%s25026_s5 + $0x16ac] ss:$16 sps:$4 sm:$0xff]   ;;  %v17523_v57 = vld [vmem:[%s25026_s5 + $0x16a0] ss:$16 sps:$4 sm:$0xff]  }
 0x29f   : > { %5636 = vmatpush1.bf16.msra.mxu0 %v17431_v58  ;;  %6169 = vmatpush1.bf16.msra.mxu1 %v17434_v59  ;;  %v17526_v58 = vld [vmem:[%s25026_s5 + $0x16a8] ss:$16 sps:$4 sm:$0xff]   ;;  %v17531_v59 = vld [vmem:[%s25026_s5 + $0x16c4] ss:$16 sps:$4 sm:$0xff]  }
 0x2a0   : > { %5637 = vmatprep.subr.bf16.mxu0 %v17439_v60  ;;  %6170 = vmatprep.subr.bf16.mxu1 %v17442_v61  ;;  %v17534_v60 = vld [vmem:[%s25026_s5 + $0x16cc] ss:$16 sps:$4 sm:$0xff]   ;;  %v17529_v61 = vld [vmem:[%s25026_s5 + $0x16c0] ss:$16 sps:$4 sm:$0xff]  }
 0x2a3   : > { %5638 = vmatpush1.bf16.msra.mxu0 %v17437_v62  ;;  %6171 = vmatpush1.bf16.msra.mxu1 %v17440_v63  ;;  %v17532_v62 = vld [vmem:[%s25026_s5 + $0x16c8] ss:$16 sps:$4 sm:$0xff]   ;;  %v17537_v63 = vld [vmem:[%s25026_s5 + $0x16e4] ss:$16 sps:$4 sm:$0xff]  }
 0x2a4   : > { %5639 = vmatprep.subr.bf16.mxu0 %v17445_v0  ;;  %6172 = vmatprep.subr.bf16.mxu1 %v17448_v1  ;;  %v17540_v0 = vld [vmem:[%s25026_s5 + $0x16ec] ss:$16 sps:$4 sm:$0xff]   ;;  %v17535_v1 = vld [vmem:[%s25026_s5 + $0x16e0] ss:$16 sps:$4 sm:$0xff]  }
 0x2a7   : > { %5640 = vmatpush1.bf16.msra.mxu0 %v17443_v2  ;;  %6173 = vmatpush1.bf16.msra.mxu1 %v17446_v3  ;;  %v17538_v2 = vld [vmem:[%s25026_s5 + $0x16e8] ss:$16 sps:$4 sm:$0xff]   ;;  %v17543_v3 = vld [vmem:[%s25026_s5 + $0x1704] ss:$16 sps:$4 sm:$0xff]  }
 0x2a8   : > { %5641 = vmatprep.subr.bf16.mxu0 %v17451_v4  ;;  %6174 = vmatprep.subr.bf16.mxu1 %v17454_v5  ;;  %v17546_v4 = vld [vmem:[%s25026_s5 + $0x170c] ss:$16 sps:$4 sm:$0xff]   ;;  %v17541_v5 = vld [vmem:[%s25026_s5 + $0x1700] ss:$16 sps:$4 sm:$0xff]  }
 0x2ab   : > { %5642 = vmatpush1.bf16.msra.mxu0 %v17449_v6  ;;  %6175 = vmatpush1.bf16.msra.mxu1 %v17452_v7  ;;  %v17544_v6 = vld [vmem:[%s25026_s5 + $0x1708] ss:$16 sps:$4 sm:$0xff]   ;;  %v17549_v7 = vld [vmem:[%s25026_s5 + $0x1724] ss:$16 sps:$4 sm:$0xff]  }
 0x2ac   : > { %5643 = vmatprep.subr.bf16.mxu0 %v17457_v8  ;;  %6176 = vmatprep.subr.bf16.mxu1 %v17460_v9  ;;  %v17552_v8 = vld [vmem:[%s25026_s5 + $0x172c] ss:$16 sps:$4 sm:$0xff]   ;;  %v17547_v9 = vld [vmem:[%s25026_s5 + $0x1720] ss:$16 sps:$4 sm:$0xff]  }
 0x2af   : > { %5644 = vmatpush1.bf16.msra.mxu0 %v17455_v10  ;;  %6177 = vmatpush1.bf16.msra.mxu1 %v17458_v12  ;;  %v17550_v10 = vld [vmem:[%s25026_s5 + $0x1728] ss:$16 sps:$4 sm:$0xff]   ;;  %v17555_v12 = vld [vmem:[%s25026_s5 + $0x1744] ss:$16 sps:$4 sm:$0xff]  }
 0x2b0   : > { %5645 = vmatprep.subr.bf16.mxu0 %v17463_v13  ;;  %6178 = vmatprep.subr.bf16.mxu1 %v17466_v15  ;;  %v17558_v13 = vld [vmem:[%s25026_s5 + $0x174c] ss:$16 sps:$4 sm:$0xff]   ;;  %v17553_v15 = vld [vmem:[%s25026_s5 + $0x1740] ss:$16 sps:$4 sm:$0xff]  }
 0x2b3   : > { %5646 = vmatpush1.bf16.msra.mxu0 %v17461_v16  ;;  %6179 = vmatpush1.bf16.msra.mxu1 %v17464_v17  ;;  %v17556_v16 = vld [vmem:[%s25026_s5 + $0x1748] ss:$16 sps:$4 sm:$0xff]   ;;  %v17561_v17 = vld [vmem:[%s25026_s5 + $0x1764] ss:$16 sps:$4 sm:$0xff]  }
 0x2b4   : > { %5647 = vmatprep.subr.bf16.mxu0 %v17469_v19  ;;  %6180 = vmatprep.subr.bf16.mxu1 %v17472_v14  ;;  %v17564_v19 = vld [vmem:[%s25026_s5 + $0x176c] ss:$16 sps:$4 sm:$0xff]   ;;  %v17559_v14 = vld [vmem:[%s25026_s5 + $0x1760] ss:$16 sps:$4 sm:$0xff]  }
 0x2b7   : > { %5648 = vmatpush1.bf16.msra.mxu0 %v17467_v20  ;;  %6181 = vmatpush1.bf16.msra.mxu1 %v17470_v11  ;;  %v17562_v20 = vld [vmem:[%s25026_s5 + $0x1768] ss:$16 sps:$4 sm:$0xff]   ;;  %v17567_v11 = vld [vmem:[%s25026_s5 + $0x1784] ss:$16 sps:$4 sm:$0xff]  }
 0x2b8   : > { %5649 = vmatprep.subr.bf16.mxu0 %v17475_v22  ;;  %6182 = vmatprep.subr.bf16.mxu1 %v17478_v23  ;;  %v17570_v22 = vld [vmem:[%s25026_s5 + $0x178c] ss:$16 sps:$4 sm:$0xff]   ;;  %v17565_v23 = vld [vmem:[%s25026_s5 + $0x1780] ss:$16 sps:$4 sm:$0xff]  }
 0x2bb   : > { %5650 = vmatpush1.bf16.msra.mxu0 %v17473_v18  ;;  %6183 = vmatpush1.bf16.msra.mxu1 %v17476_v25  ;;  %v17568_v18 = vld [vmem:[%s25026_s5 + $0x1788] ss:$16 sps:$4 sm:$0xff]   ;;  %v17573_v25 = vld [vmem:[%s25026_s5 + $0x17a4] ss:$16 sps:$4 sm:$0xff]  }
 0x2bc   : > { %5651 = vmatprep.subr.bf16.mxu0 %v17481_v26  ;;  %6184 = vmatprep.subr.bf16.mxu1 %v17484_v21  ;;  %v17576_v26 = vld [vmem:[%s25026_s5 + $0x17ac] ss:$16 sps:$4 sm:$0xff]   ;;  %v17571_v21 = vld [vmem:[%s25026_s5 + $0x17a0] ss:$16 sps:$4 sm:$0xff]  }
 0x2bf   : > { %5652 = vmatpush1.bf16.msra.mxu0 %v17479_v28  ;;  %6185 = vmatpush1.bf16.msra.mxu1 %v17482_v29  ;;  %v17574_v28 = vld [vmem:[%s25026_s5 + $0x17a8] ss:$16 sps:$4 sm:$0xff]   ;;  %v17579_v29 = vld [vmem:[%s25026_s5 + $0x17c4] ss:$16 sps:$4 sm:$0xff]  }
 0x2c0   : > { %5653 = vmatprep.subr.bf16.mxu0 %v17487_v24  ;;  %6186 = vmatprep.subr.bf16.mxu1 %v17490_v31  ;;  %v17582_v24 = vld [vmem:[%s25026_s5 + $0x17cc] ss:$16 sps:$4 sm:$0xff]   ;;  %v17577_v31 = vld [vmem:[%s25026_s5 + $0x17c0] ss:$16 sps:$4 sm:$0xff]  }
 0x2c3   : > { %5654 = vmatpush1.bf16.msra.mxu0 %v17485_v32  ;;  %6187 = vmatpush1.bf16.msra.mxu1 %v17488_v27  ;;  %v17580_v32 = vld [vmem:[%s25026_s5 + $0x17c8] ss:$16 sps:$4 sm:$0xff]   ;;  %v17585_v27 = vld [vmem:[%s25026_s5 + $0x17e4] ss:$16 sps:$4 sm:$0xff]  }
 0x2c4   : > { %5664 = vmatprep.subr.bf16.mxu0 %v17495_v34  ;;  %6197 = vmatprep.subr.bf16.mxu1 %v17498_v35  ;;  %v17588_v34 = vld [vmem:[%s25026_s5 + $0x17ec] ss:$16 sps:$4 sm:$0xff]   ;;  %v17583_v35 = vld [vmem:[%s25026_s5 + $0x17e0] ss:$16 sps:$4 sm:$0xff]  }
 0x2c6   : > { %5656 = vmatmul.mubr.bf16.vlgmr.msra.gmra.mrb[0].mxu0 %v14311_v30  ;;  %6189 = vmatmul.mubr.bf16.vlgmr.msra.gmra.mrb[0].mxu1 %v14311_v30  ;;  %v17586_v30 = vld [vmem:[%s25026_s5 + $0x17e8] ss:$16 sps:$4 sm:$0xff]  }
 0x2c7   : > { %5665 = vmatpush1.bf16.msra.mxu0 %v17493_v37  ;;  %6198 = vmatpush1.bf16.msra.mxu1 %v17496_v38  ;;  %v17593_v37 = vld [vmem:[%s25026_s5 + $0x1804] ss:$16 sps:$4 sm:$0xff]   ;;  %v17596_v38 = vld [vmem:[%s25026_s5 + $0x180c] ss:$16 sps:$4 sm:$0xff]  }
 0x2c8   : > { %5666 = vmatprep.subr.bf16.mxu0 %v17501_v39  ;;  %6199 = vmatprep.subr.bf16.mxu1 %v17504_v33  ;;  %v14313_v39 = vcombine.low %v21470_v36, %v21470_v36  ;;  %v17591_v33 = vld [vmem:[%s25026_s5 + $0x1800] ss:$16 sps:$4 sm:$0xff]   ;;  %v17602_v36 = vld [vmem:[%s25026_s5 + $0x182c] ss:$16 sps:$4 sm:$0xff]  }
 0x2c9   : > { %5696 = vmatprep.mubr.bf16.mxu0 %v14314_v40  ;;  %6229 = vmatprep.mubr.bf16.mxu1 %v14314_v40  ;;  %v17594_v40 = vld [vmem:[%s25026_s5 + $0x1808] ss:$16 sps:$4 sm:$0xff]  }
 0x2cb   : > { %5667 = vmatpush1.bf16.msra.mxu0 %v17499_v41  ;;  %6200 = vmatpush1.bf16.msra.mxu1 %v17502_v42  ;;  %v17599_v41 = vld [vmem:[%s25026_s5 + $0x1824] ss:$16 sps:$4 sm:$0xff]   ;;  %v17597_v42 = vld [vmem:[%s25026_s5 + $0x1820] ss:$16 sps:$4 sm:$0xff]  }
 0x2cc   : > { %5668 = vmatprep.subr.bf16.mxu0 %v17507_v43  ;;  %6201 = vmatprep.subr.bf16.mxu1 %v17510_v44  ;;  %v17600_v43 = vld [vmem:[%s25026_s5 + $0x1828] ss:$16 sps:$4 sm:$0xff]   ;;  %v17605_v44 = vld [vmem:[%s25026_s5 + $0x1844] ss:$16 sps:$4 sm:$0xff]  }
 0x2cf   : > { %5669 = vmatpush1.bf16.msra.mxu0 %v17505_v45  ;;  %6202 = vmatpush1.bf16.msra.mxu1 %v17508_v46  ;;  %v17608_v45 = vld [vmem:[%s25026_s5 + $0x184c] ss:$16 sps:$4 sm:$0xff]   ;;  %v19209_v46 = vmov 0  }
 0x2d0   : > { %5670 = vmatprep.subr.bf16.mxu0 %v17513_v47  ;;  %6203 = vmatprep.subr.bf16.mxu1 %v17516_v48  ;;  %v17603_v47 = vld [vmem:[%s25026_s5 + $0x1840] ss:$16 sps:$4 sm:$0xff]   ;;  %v17606_v48 = vld [vmem:[%s25026_s5 + $0x1848] ss:$16 sps:$4 sm:$0xff]  }
 0x2d3   : > { %5671 = vmatpush1.bf16.msra.mxu0 %v17511_v49  ;;  %6204 = vmatpush1.bf16.msra.mxu1 %v17514_v50  ;;  %v17611_v49 = vld [vmem:[%s25026_s5 + $0x1864] ss:$16 sps:$4 sm:$0xff]   ;;  %v17614_v50 = vld [vmem:[%s25026_s5 + $0x186c] ss:$16 sps:$4 sm:$0xff]  }
 0x2d4   : > { %5672 = vmatprep.subr.bf16.mxu0 %v17519_v51  ;;  %6205 = vmatprep.subr.bf16.mxu1 %v17522_v52  ;;  %v17609_v51 = vld [vmem:[%s25026_s5 + $0x1860] ss:$16 sps:$4 sm:$0xff]   ;;  %v17612_v52 = vld [vmem:[%s25026_s5 + $0x1868] ss:$16 sps:$4 sm:$0xff]  }
 0x2d7   : > { %5673 = vmatpush1.bf16.msra.mxu0 %v17517_v53  ;;  %6206 = vmatpush1.bf16.msra.mxu1 %v17520_v54  ;;  %v17618_v53 = vld [vmem:[%s25023_s2 + $0x4] ss:$16 sps:$4 sm:$0xff]   ;;  %v17615_v54 = vld [vmem:[%s19412_s26 + $0x60] ss:$0 sps:$4 sm:$0xff]  }
 0x2d8   : > { %5674 = vmatprep.subr.bf16.mxu0 %v17525_v55  ;;  %6207 = vmatprep.subr.bf16.mxu1 %v17528_v56  ;;  %v17621_v55 = vld [vmem:[%s25023_s2 + $0xc] ss:$16 sps:$4 sm:$0xff]   ;;  %v21729_v56 = vld [vmem:[%s21716_s28] sm:$0xff] }
 0x2db   : > { %5675 = vmatpush1.bf16.msra.mxu0 %v17523_v57  ;;  %6208 = vmatpush1.bf16.msra.mxu1 %v17526_v58  ;;  %v17616_v57 = vld [vmem:[%s25023_s2] ss:$16 sps:$4 sm:$0xff]   ;;  %v17619_v58 = vld [vmem:[%s25023_s2 + $0x8] ss:$16 sps:$4 sm:$0xff]  }
 0x2dc   : > { %5676 = vmatprep.subr.bf16.mxu0 %v17531_v59  ;;  %6209 = vmatprep.subr.bf16.mxu1 %v17534_v60  ;;  %v17624_v59 = vld [vmem:[%s25023_s2 + $0x24] ss:$16 sps:$4 sm:$0xff]   ;;  %v17627_v60 = vld [vmem:[%s25023_s2 + $0x2c] ss:$16 sps:$4 sm:$0xff]  }
 0x2df   : > { %5677 = vmatpush1.bf16.msra.mxu0 %v17529_v61  ;;  %6210 = vmatpush1.bf16.msra.mxu1 %v17532_v62  ;;  %v15103_v61 = vcombine.high %v21729_v56, %v21729_v56  ;;  %v17622_v62 = vld [vmem:[%s25023_s2 + $0x20] ss:$16 sps:$4 sm:$0xff]  }
 0x2e0   : > { %5678 = vmatprep.subr.bf16.mxu0 %v17537_v63  ;;  %6211 = vmatprep.subr.bf16.mxu1 %v17540_v0  ;;  %v17625_v63 = vld [vmem:[%s25023_s2 + $0x28] ss:$16 sps:$4 sm:$0xff]   ;;  %v17630_v0 = vld [vmem:[%s25023_s2 + $0x44] ss:$16 sps:$4 sm:$0xff]  }
 0x2e3   : > { %5679 = vmatpush1.bf16.msra.mxu0 %v17535_v1  ;;  %6212 = vmatpush1.bf16.msra.mxu1 %v17538_v2  ;;  %v17633_v1 = vld [vmem:[%s25023_s2 + $0x4c] ss:$16 sps:$4 sm:$0xff]   ;;  %v17628_v2 = vld [vmem:[%s25023_s2 + $0x40] ss:$16 sps:$4 sm:$0xff]  }
 0x2e4   : > { %5680 = vmatprep.subr.bf16.mxu0 %v17543_v3  ;;  %6213 = vmatprep.subr.bf16.mxu1 %v17546_v4  ;;  %v17631_v3 = vld [vmem:[%s25023_s2 + $0x48] ss:$16 sps:$4 sm:$0xff]   ;;  %v17636_v4 = vld [vmem:[%s25023_s2 + $0x64] ss:$16 sps:$4 sm:$0xff]  }
 0x2e7   : > { %5681 = vmatpush1.bf16.msra.mxu0 %v17541_v5  ;;  %6214 = vmatpush1.bf16.msra.mxu1 %v17544_v6  ;;  %v17639_v5 = vld [vmem:[%s25023_s2 + $0x6c] ss:$16 sps:$4 sm:$0xff]   ;;  %v17634_v6 = vld [vmem:[%s25023_s2 + $0x60] ss:$16 sps:$4 sm:$0xff]  }
 0x2e8   : > { %5682 = vmatprep.subr.bf16.mxu0 %v17549_v7  ;;  %6215 = vmatprep.subr.bf16.mxu1 %v17552_v8  ;;  %v17637_v7 = vld [vmem:[%s25023_s2 + $0x68] ss:$16 sps:$4 sm:$0xff]   ;;  %v17642_v8 = vld [vmem:[%s25023_s2 + $0x84] ss:$16 sps:$4 sm:$0xff]  }
 0x2eb   : > { %5683 = vmatpush1.bf16.msra.mxu0 %v17547_v9  ;;  %6216 = vmatpush1.bf16.msra.mxu1 %v17550_v10  ;;  %v17645_v9 = vld [vmem:[%s25023_s2 + $0x8c] ss:$16 sps:$4 sm:$0xff]   ;;  %v17640_v10 = vld [vmem:[%s25023_s2 + $0x80] ss:$16 sps:$4 sm:$0xff]  }
 0x2ec   : > { %5684 = vmatprep.subr.bf16.mxu0 %v17555_v12  ;;  %6217 = vmatprep.subr.bf16.mxu1 %v17558_v13  ;;  %v17643_v12 = vld [vmem:[%s25023_s2 + $0x88] ss:$16 sps:$4 sm:$0xff]   ;;  %v17648_v13 = vld [vmem:[%s25023_s2 + $0xa4] ss:$16 sps:$4 sm:$0xff]  }
 0x2ef   : > { %5685 = vmatpush1.bf16.msra.mxu0 %v17553_v15  ;;  %6218 = vmatpush1.bf16.msra.mxu1 %v17556_v16  ;;  %v17651_v15 = vld [vmem:[%s25023_s2 + $0xac] ss:$16 sps:$4 sm:$0xff]   ;;  %v17646_v16 = vld [vmem:[%s25023_s2 + $0xa0] ss:$16 sps:$4 sm:$0xff]  }
 0x2f0   : > { %5686 = vmatprep.subr.bf16.mxu0 %v17561_v17  ;;  %6219 = vmatprep.subr.bf16.mxu1 %v17564_v19  ;;  %v17649_v17 = vld [vmem:[%s25023_s2 + $0xa8] ss:$16 sps:$4 sm:$0xff]   ;;  %v17654_v19 = vld [vmem:[%s25023_s2 + $0xc4] ss:$16 sps:$4 sm:$0xff]  }
 0x2f3   : > { %5687 = vmatpush1.bf16.msra.mxu0 %v17559_v14  ;;  %6220 = vmatpush1.bf16.msra.mxu1 %v17562_v20  ;;  %v17657_v14 = vld [vmem:[%s25023_s2 + $0xcc] ss:$16 sps:$4 sm:$0xff]   ;;  %v17652_v20 = vld [vmem:[%s25023_s2 + $0xc0] ss:$16 sps:$4 sm:$0xff]  }
 0x2f4   : > { %5688 = vmatprep.subr.bf16.mxu0 %v17567_v11  ;;  %6221 = vmatprep.subr.bf16.mxu1 %v17570_v22  ;;  %v17655_v11 = vld [vmem:[%s25023_s2 + $0xc8] ss:$16 sps:$4 sm:$0xff]   ;;  %v17660_v22 = vld [vmem:[%s25023_s2 + $0xe4] ss:$16 sps:$4 sm:$0xff]  }
 0x2f7   : > { %5689 = vmatpush1.bf16.msra.mxu0 %v17565_v23  ;;  %6222 = vmatpush1.bf16.msra.mxu1 %v17568_v18  ;;  %v17663_v23 = vld [vmem:[%s25023_s2 + $0xec] ss:$16 sps:$4 sm:$0xff]   ;;  %v17658_v18 = vld [vmem:[%s25023_s2 + $0xe0] ss:$16 sps:$4 sm:$0xff]  }
 0x2f8   : > { %5690 = vmatprep.subr.bf16.mxu0 %v17573_v25  ;;  %6223 = vmatprep.subr.bf16.mxu1 %v17576_v26  ;;  %v17661_v25 = vld [vmem:[%s25023_s2 + $0xe8] ss:$16 sps:$4 sm:$0xff]   ;;  %v17666_v26 = vld [vmem:[%s25023_s2 + $0x104] ss:$16 sps:$4 sm:$0xff]  }
 0x2fb   : > { %5691 = vmatpush1.bf16.msra.mxu0 %v17571_v21  ;;  %6224 = vmatpush1.bf16.msra.mxu1 %v17574_v28  ;;  %v17669_v21 = vld [vmem:[%s25023_s2 + $0x10c] ss:$16 sps:$4 sm:$0xff]   ;;  %v17664_v28 = vld [vmem:[%s25023_s2 + $0x100] ss:$16 sps:$4 sm:$0xff]  }
 0x2fc   : > { %5692 = vmatprep.subr.bf16.mxu0 %v17579_v29  ;;  %6225 = vmatprep.subr.bf16.mxu1 %v17582_v24  ;;  %v17667_v29 = vld [vmem:[%s25023_s2 + $0x108] ss:$16 sps:$4 sm:$0xff]   ;;  %v17672_v24 = vld [vmem:[%s25023_s2 + $0x124] ss:$16 sps:$4 sm:$0xff]  }
 0x2ff   : > { %5693 = vmatpush1.bf16.msra.mxu0 %v17577_v31  ;;  %6226 = vmatpush1.bf16.msra.mxu1 %v17580_v32  ;;  %v17675_v31 = vld [vmem:[%s25023_s2 + $0x12c] ss:$16 sps:$4 sm:$0xff]   ;;  %v17670_v32 = vld [vmem:[%s25023_s2 + $0x120] ss:$16 sps:$4 sm:$0xff]  }
 0x300   : > { %5694 = vmatprep.subr.bf16.mxu0 %v17585_v27  ;;  %6227 = vmatprep.subr.bf16.mxu1 %v17588_v34  ;;  %v17673_v27 = vld [vmem:[%s25023_s2 + $0x128] ss:$16 sps:$4 sm:$0xff]   ;;  %v17678_v34 = vld [vmem:[%s25023_s2 + $0x144] ss:$16 sps:$4 sm:$0xff]  }
 0x303   : > { %5695 = vmatpush1.bf16.msra.mxu0 %v17583_v35  ;;  %6228 = vmatpush1.bf16.msra.mxu1 %v17586_v30  ;;  %v17681_v35 = vld [vmem:[%s25023_s2 + $0x14c] ss:$16 sps:$4 sm:$0xff]   ;;  %v17676_v30 = vld [vmem:[%s25023_s2 + $0x140] ss:$16 sps:$4 sm:$0xff]  }
 0x304   : > { %5705 = vmatprep.subr.bf16.mxu0 %v17593_v37  ;;  %6238 = vmatprep.subr.bf16.mxu1 %v17596_v38  ;;  %v17679_v37 = vld [vmem:[%s25023_s2 + $0x148] ss:$16 sps:$4 sm:$0xff]   ;;  %v17684_v38 = vld [vmem:[%s25023_s2 + $0x164] ss:$16 sps:$4 sm:$0xff]  }
 0x306   : > { %5697 = vmatmul.mubr.bf16.vlgmr.msra.gmra.mrb[0].mxu0 %v14313_v39  ;;  %6230 = vmatmul.mubr.bf16.vlgmr.msra.gmra.mrb[0].mxu1 %v14313_v39  ;;  %v17687_v39 = vld [vmem:[%s25023_s2 + $0x16c] ss:$16 sps:$4 sm:$0xff]  }
 0x307   : > { %5706 = vmatpush1.bf16.msra.mxu0 %v17591_v33  ;;  %6239 = vmatpush1.bf16.msra.mxu1 %v17594_v40  ;;  %v17682_v33 = vld [vmem:[%s25023_s2 + $0x160] ss:$16 sps:$4 sm:$0xff]   ;;  %v17685_v40 = vld [vmem:[%s25023_s2 + $0x168] ss:$16 sps:$4 sm:$0xff]  }
 0x308   : > { %5707 = vmatprep.subr.bf16.mxu0 %v17599_v41  ;;  %6240 = vmatprep.subr.bf16.mxu1 %v17602_v36  ;;  %v17690_v41 = vld [vmem:[%s25023_s2 + $0x184] ss:$16 sps:$4 sm:$0xff]   ;;  %v17693_v36 = vld [vmem:[%s25023_s2 + $0x18c] ss:$16 sps:$4 sm:$0xff]  }
 0x309   : > { %5737 = vmatprep.mubr.bf16.mxu0 %v19209_v46  ;;  %6270 = vmatprep.mubr.bf16.mxu1 %v19209_v46 }
 0x30b   : > { %5708 = vmatpush1.bf16.msra.mxu0 %v17597_v42  ;;  %6241 = vmatpush1.bf16.msra.mxu1 %v17600_v43  ;;  %v17688_v42 = vld [vmem:[%s25023_s2 + $0x180] ss:$16 sps:$4 sm:$0xff]   ;;  %v17691_v43 = vld [vmem:[%s25023_s2 + $0x188] ss:$16 sps:$4 sm:$0xff]  }
 0x30c   : > { %5709 = vmatprep.subr.bf16.mxu0 %v17605_v44  ;;  %6242 = vmatprep.subr.bf16.mxu1 %v17608_v45  ;;  %v17696_v44 = vld [vmem:[%s25023_s2 + $0x1a4] ss:$16 sps:$4 sm:$0xff]   ;;  %v17699_v45 = vld [vmem:[%s25023_s2 + $0x1ac] ss:$16 sps:$4 sm:$0xff]  }
 0x30f   : > { %5710 = vmatpush1.bf16.msra.mxu0 %v17603_v47  ;;  %6243 = vmatpush1.bf16.msra.mxu1 %v17606_v48  ;;  %v17694_v47 = vld [vmem:[%s25023_s2 + $0x1a0] ss:$16 sps:$4 sm:$0xff]   ;;  %v17697_v48 = vld [vmem:[%s25023_s2 + $0x1a8] ss:$16 sps:$4 sm:$0xff]  }
 0x310   : > { %5711 = vmatprep.subr.bf16.mxu0 %v17611_v49  ;;  %6244 = vmatprep.subr.bf16.mxu1 %v17614_v50  ;;  %v17702_v49 = vld [vmem:[%s25023_s2 + $0x1c4] ss:$16 sps:$4 sm:$0xff]   ;;  %v17705_v50 = vld [vmem:[%s25023_s2 + $0x1cc] ss:$16 sps:$4 sm:$0xff]  }
 0x313   : > { %5712 = vmatpush1.bf16.msra.mxu0 %v17609_v51  ;;  %6245 = vmatpush1.bf16.msra.mxu1 %v17612_v52  ;;  %v17700_v51 = vld [vmem:[%s25023_s2 + $0x1c0] ss:$16 sps:$4 sm:$0xff]   ;;  %v17703_v52 = vld [vmem:[%s25023_s2 + $0x1c8] ss:$16 sps:$4 sm:$0xff]  }
 0x314   : > { %11107 = vmatprep.subr.bf16.mxu0 %v17618_v53  ;;  %11640 = vmatprep.subr.bf16.mxu1 %v17621_v55  ;;  %v17708_v53 = vld [vmem:[%s25023_s2 + $0x1e4] ss:$16 sps:$4 sm:$0xff]   ;;  %v17706_v55 = vld [vmem:[%s25023_s2 + $0x1e0] ss:$16 sps:$4 sm:$0xff]  }
 0x316   : > { %15100 = vmatmul.mubr.msk.bf16.vlgmr.msra.gmra.mrb[0].mxu0 %vm5209_vm0, %v17615_v54  ;;  %15101 = vmatmul.mubr.msk.bf16.vlgmr.msra.gmra.mrb[0].mxu1 %vm5209_vm0, %v17615_v54  ;;  %v17711_v54 = vld [vmem:[%s25023_s2 + $0x1ec] ss:$16 sps:$4 sm:$0xff]  }
 0x317   : > { %11108 = vmatpush1.bf16.msra.mxu0 %v17616_v57  ;;  %11641 = vmatpush1.bf16.msra.mxu1 %v17619_v58  ;;  %v17709_v57 = vld [vmem:[%s25023_s2 + $0x1e8] ss:$16 sps:$4 sm:$0xff]   ;;  %v17716_v58 = vld [vmem:[%s25023_s2 + $0x204] ss:$16 sps:$4 sm:$0xff]  }
 0x318   : > { %11109 = vmatprep.subr.bf16.mxu0 %v17624_v59  ;;  %11642 = vmatprep.subr.bf16.mxu1 %v17627_v60  ;;  %v17719_v59 = vld [vmem:[%s25023_s2 + $0x20c] ss:$16 sps:$4 sm:$0xff]  }
 0x319   : > { %11139 = vmatprep.mubr.bf16.mxu0 %v15103_v61  ;;  %11672 = vmatprep.mubr.bf16.mxu1 %v15103_v61  ;;  %v21928_v60 = vld [vmem:[%s21716_s28 + $0x8] sm:$0xff]  ;;  %v15102_v61 = vcombine.low %v21729_v56, %v21729_v56 }
 0x31a   : > { %v17725_v56 = vld [vmem:[%s25023_s2 + $0x22c] ss:$16 sps:$4 sm:$0xff]  }
 0x31b   : > { %11110 = vmatpush1.bf16.msra.mxu0 %v17622_v62  ;;  %11643 = vmatpush1.bf16.msra.mxu1 %v17625_v63  ;;  %v17714_v62 = vld [vmem:[%s25023_s2 + $0x200] ss:$16 sps:$4 sm:$0xff]   ;;  %v17717_v63 = vld [vmem:[%s25023_s2 + $0x208] ss:$16 sps:$4 sm:$0xff]  }
 0x31c   : > { %11111 = vmatprep.subr.bf16.mxu0 %v17630_v0  ;;  %11644 = vmatprep.subr.bf16.mxu1 %v17633_v1  ;;  %v17722_v0 = vld [vmem:[%s25023_s2 + $0x224] ss:$16 sps:$4 sm:$0xff]   ;;  %v15105_v1 = vcombine.high %v21928_v60, %v21928_v60 }
 0x31f   : > { %11112 = vmatpush1.bf16.msra.mxu0 %v17628_v2  ;;  %11645 = vmatpush1.bf16.msra.mxu1 %v17631_v3  ;;  %v17720_v2 = vld [vmem:[%s25023_s2 + $0x220] ss:$16 sps:$4 sm:$0xff]   ;;  %v17723_v3 = vld [vmem:[%s25023_s2 + $0x228] ss:$16 sps:$4 sm:$0xff]  }
 0x320   : > { %11113 = vmatprep.subr.bf16.mxu0 %v17636_v4  ;;  %11646 = vmatprep.subr.bf16.mxu1 %v17639_v5  ;;  %v17728_v4 = vld [vmem:[%s25023_s2 + $0x244] ss:$16 sps:$4 sm:$0xff]   ;;  %v17731_v5 = vld [vmem:[%s25023_s2 + $0x24c] ss:$16 sps:$4 sm:$0xff]  }
 0x323   : > { %11114 = vmatpush1.bf16.msra.mxu0 %v17634_v6  ;;  %11647 = vmatpush1.bf16.msra.mxu1 %v17637_v7  ;;  %v17726_v6 = vld [vmem:[%s25023_s2 + $0x240] ss:$16 sps:$4 sm:$0xff]   ;;  %v17729_v7 = vld [vmem:[%s25023_s2 + $0x248] ss:$16 sps:$4 sm:$0xff]  }
 0x324   : > { %11115 = vmatprep.subr.bf16.mxu0 %v17642_v8  ;;  %11648 = vmatprep.subr.bf16.mxu1 %v17645_v9  ;;  %v17734_v8 = vld [vmem:[%s25023_s2 + $0x264] ss:$16 sps:$4 sm:$0xff]   ;;  %v17737_v9 = vld [vmem:[%s25023_s2 + $0x26c] ss:$16 sps:$4 sm:$0xff]  }
 0x327   : > { %11116 = vmatpush1.bf16.msra.mxu0 %v17640_v10  ;;  %11649 = vmatpush1.bf16.msra.mxu1 %v17643_v12  ;;  %v17732_v10 = vld [vmem:[%s25023_s2 + $0x260] ss:$16 sps:$4 sm:$0xff]   ;;  %v17735_v12 = vld [vmem:[%s25023_s2 + $0x268] ss:$16 sps:$4 sm:$0xff]  }
 0x328   : > { %11117 = vmatprep.subr.bf16.mxu0 %v17648_v13  ;;  %11650 = vmatprep.subr.bf16.mxu1 %v17651_v15  ;;  %v17740_v13 = vld [vmem:[%s25023_s2 + $0x284] ss:$16 sps:$4 sm:$0xff]   ;;  %v17743_v15 = vld [vmem:[%s25023_s2 + $0x28c] ss:$16 sps:$4 sm:$0xff]  }
 0x32b   : > { %11118 = vmatpush1.bf16.msra.mxu0 %v17646_v16  ;;  %11651 = vmatpush1.bf16.msra.mxu1 %v17649_v17  ;;  %v17738_v16 = vld [vmem:[%s25023_s2 + $0x280] ss:$16 sps:$4 sm:$0xff]   ;;  %v17741_v17 = vld [vmem:[%s25023_s2 + $0x288] ss:$16 sps:$4 sm:$0xff]  }
 0x32c   : > { %11119 = vmatprep.subr.bf16.mxu0 %v17654_v19  ;;  %11652 = vmatprep.subr.bf16.mxu1 %v17657_v14  ;;  %v17746_v19 = vld [vmem:[%s25023_s2 + $0x2a4] ss:$16 sps:$4 sm:$0xff]   ;;  %v17749_v14 = vld [vmem:[%s25023_s2 + $0x2ac] ss:$16 sps:$4 sm:$0xff]  }
 0x32f   : > { %11120 = vmatpush1.bf16.msra.mxu0 %v17652_v20  ;;  %11653 = vmatpush1.bf16.msra.mxu1 %v17655_v11  ;;  %v17744_v20 = vld [vmem:[%s25023_s2 + $0x2a0] ss:$16 sps:$4 sm:$0xff]   ;;  %v17747_v11 = vld [vmem:[%s25023_s2 + $0x2a8] ss:$16 sps:$4 sm:$0xff]  }
 0x330   : > { %11121 = vmatprep.subr.bf16.mxu0 %v17660_v22  ;;  %11654 = vmatprep.subr.bf16.mxu1 %v17663_v23  ;;  %v17752_v22 = vld [vmem:[%s25023_s2 + $0x2c4] ss:$16 sps:$4 sm:$0xff]   ;;  %v17755_v23 = vld [vmem:[%s25023_s2 + $0x2cc] ss:$16 sps:$4 sm:$0xff]  }
 0x333   : > { %11122 = vmatpush1.bf16.msra.mxu0 %v17658_v18  ;;  %11655 = vmatpush1.bf16.msra.mxu1 %v17661_v25  ;;  %v17750_v18 = vld [vmem:[%s25023_s2 + $0x2c0] ss:$16 sps:$4 sm:$0xff]   ;;  %v17753_v25 = vld [vmem:[%s25023_s2 + $0x2c8] ss:$16 sps:$4 sm:$0xff]  }
 0x334   : > { %11123 = vmatprep.subr.bf16.mxu0 %v17666_v26  ;;  %11656 = vmatprep.subr.bf16.mxu1 %v17669_v21  ;;  %v17758_v26 = vld [vmem:[%s25023_s2 + $0x2e4] ss:$16 sps:$4 sm:$0xff]   ;;  %v17761_v21 = vld [vmem:[%s25023_s2 + $0x2ec] ss:$16 sps:$4 sm:$0xff]  }
 0x337   : > { %11124 = vmatpush1.bf16.msra.mxu0 %v17664_v28  ;;  %11657 = vmatpush1.bf16.msra.mxu1 %v17667_v29  ;;  %v17756_v28 = vld [vmem:[%s25023_s2 + $0x2e0] ss:$16 sps:$4 sm:$0xff]   ;;  %v17759_v29 = vld [vmem:[%s25023_s2 + $0x2e8] ss:$16 sps:$4 sm:$0xff]  }
 0x338   : > { %11125 = vmatprep.subr.bf16.mxu0 %v17672_v24  ;;  %11658 = vmatprep.subr.bf16.mxu1 %v17675_v31  ;;  %v17764_v24 = vld [vmem:[%s25023_s2 + $0x304] ss:$16 sps:$4 sm:$0xff]   ;;  %v17767_v31 = vld [vmem:[%s25023_s2 + $0x30c] ss:$16 sps:$4 sm:$0xff]  }
 0x33b   : > { %11126 = vmatpush1.bf16.msra.mxu0 %v17670_v32  ;;  %11659 = vmatpush1.bf16.msra.mxu1 %v17673_v27  ;;  %v17762_v32 = vld [vmem:[%s25023_s2 + $0x300] ss:$16 sps:$4 sm:$0xff]   ;;  %v17765_v27 = vld [vmem:[%s25023_s2 + $0x308] ss:$16 sps:$4 sm:$0xff]  }
 0x33c   : > { %11127 = vmatprep.subr.bf16.mxu0 %v17678_v34  ;;  %11660 = vmatprep.subr.bf16.mxu1 %v17681_v35  ;;  %v17770_v34 = vld [vmem:[%s25023_s2 + $0x324] ss:$16 sps:$4 sm:$0xff]   ;;  %v17773_v35 = vld [vmem:[%s25023_s2 + $0x32c] ss:$16 sps:$4 sm:$0xff]  }
 0x33f   : > { %11128 = vmatpush1.bf16.msra.mxu0 %v17676_v30  ;;  %11661 = vmatpush1.bf16.msra.mxu1 %v17679_v37  ;;  %v17768_v30 = vld [vmem:[%s25023_s2 + $0x320] ss:$16 sps:$4 sm:$0xff]   ;;  %v17771_v37 = vld [vmem:[%s25023_s2 + $0x328] ss:$16 sps:$4 sm:$0xff]  }
 0x340   : > { %11129 = vmatprep.subr.bf16.mxu0 %v17684_v38  ;;  %11662 = vmatprep.subr.bf16.mxu1 %v17687_v39  ;;  %v17776_v38 = vld [vmem:[%s25023_s2 + $0x344] ss:$16 sps:$4 sm:$0xff]   ;;  %v17779_v39 = vld [vmem:[%s25023_s2 + $0x34c] ss:$16 sps:$4 sm:$0xff]  }
 0x343   : > { %11130 = vmatpush1.bf16.msra.mxu0 %v17682_v33  ;;  %11663 = vmatpush1.bf16.msra.mxu1 %v17685_v40  ;;  %v17774_v33 = vld [vmem:[%s25023_s2 + $0x340] ss:$16 sps:$4 sm:$0xff]   ;;  %v17777_v40 = vld [vmem:[%s25023_s2 + $0x348] ss:$16 sps:$4 sm:$0xff]  }
 0x344   : > { %11131 = vmatprep.subr.bf16.mxu0 %v17690_v41  ;;  %11664 = vmatprep.subr.bf16.mxu1 %v17693_v36  ;;  %v17782_v41 = vld [vmem:[%s25023_s2 + $0x364] ss:$16 sps:$4 sm:$0xff]   ;;  %v17785_v36 = vld [vmem:[%s25023_s2 + $0x36c] ss:$16 sps:$4 sm:$0xff]  }
 0x347   : > { %11132 = vmatpush1.bf16.msra.mxu0 %v17688_v42  ;;  %11665 = vmatpush1.bf16.msra.mxu1 %v17691_v43  ;;  %v17780_v42 = vld [vmem:[%s25023_s2 + $0x360] ss:$16 sps:$4 sm:$0xff]   ;;  %v17783_v43 = vld [vmem:[%s25023_s2 + $0x368] ss:$16 sps:$4 sm:$0xff]  }
 0x348   : > { %11133 = vmatprep.subr.bf16.mxu0 %v17696_v44  ;;  %11666 = vmatprep.subr.bf16.mxu1 %v17699_v45  ;;  %v17788_v44 = vld [vmem:[%s25023_s2 + $0x384] ss:$16 sps:$4 sm:$0xff]   ;;  %v17791_v45 = vld [vmem:[%s25023_s2 + $0x38c] ss:$16 sps:$4 sm:$0xff]  }
 0x34b   : > { %11134 = vmatpush1.bf16.msra.mxu0 %v17694_v47  ;;  %11667 = vmatpush1.bf16.msra.mxu1 %v17697_v48  ;;  %v17786_v47 = vld [vmem:[%s25023_s2 + $0x380] ss:$16 sps:$4 sm:$0xff]   ;;  %v17789_v48 = vld [vmem:[%s25023_s2 + $0x388] ss:$16 sps:$4 sm:$0xff]  }
 0x34c   : > { %11135 = vmatprep.subr.bf16.mxu0 %v17702_v49  ;;  %11668 = vmatprep.subr.bf16.mxu1 %v17705_v50  ;;  %v17794_v49 = vld [vmem:[%s25023_s2 + $0x3a4] ss:$16 sps:$4 sm:$0xff]   ;;  %v17797_v50 = vld [vmem:[%s25023_s2 + $0x3ac] ss:$16 sps:$4 sm:$0xff]  }
 0x34f   : > { %11136 = vmatpush1.bf16.msra.mxu0 %v17700_v51  ;;  %11669 = vmatpush1.bf16.msra.mxu1 %v17703_v52  ;;  %v17792_v51 = vld [vmem:[%s25023_s2 + $0x3a0] ss:$16 sps:$4 sm:$0xff]   ;;  %v17795_v52 = vld [vmem:[%s25023_s2 + $0x3a8] ss:$16 sps:$4 sm:$0xff]  }
 0x350   : > { %11137 = vmatprep.subr.bf16.mxu0 %v17708_v53  ;;  %11670 = vmatprep.subr.bf16.mxu1 %v17711_v54  ;;  %v17800_v53 = vld [vmem:[%s25023_s2 + $0x3c4] ss:$16 sps:$4 sm:$0xff]   ;;  %v17803_v54 = vld [vmem:[%s25023_s2 + $0x3cc] ss:$16 sps:$4 sm:$0xff]  }
 0x353   : > { %11138 = vmatpush1.bf16.msra.mxu0 %v17706_v55  ;;  %11671 = vmatpush1.bf16.msra.mxu1 %v17709_v57  ;;  %v17798_v55 = vld [vmem:[%s25023_s2 + $0x3c0] ss:$16 sps:$4 sm:$0xff]   ;;  %v17801_v57 = vld [vmem:[%s25023_s2 + $0x3c8] ss:$16 sps:$4 sm:$0xff]  }
 0x354   : > { %11148 = vmatprep.subr.bf16.mxu0 %v17716_v58  ;;  %11681 = vmatprep.subr.bf16.mxu1 %v17719_v59  ;;  %v17806_v58 = vld [vmem:[%s25023_s2 + $0x3e4] ss:$16 sps:$4 sm:$0xff]   ;;  %v17809_v59 = vld [vmem:[%s25023_s2 + $0x3ec] ss:$16 sps:$4 sm:$0xff]  }
 0x356   : > { %11140 = vmatmul.mubr.bf16.vlgmr.msra.gmra.mrb[4].mxu0 %v15102_v61  ;;  %11673 = vmatmul.mubr.bf16.vlgmr.msra.gmra.mrb[4].mxu1 %v15102_v61  ;;  %v17804_v61 = vld [vmem:[%s25023_s2 + $0x3e0] ss:$16 sps:$4 sm:$0xff]  }
 0x357   : > { %11149 = vmatpush1.bf16.msra.mxu0 %v17714_v62  ;;  %11682 = vmatpush1.bf16.msra.mxu1 %v17717_v63  ;;  %v17807_v62 = vld [vmem:[%s25023_s2 + $0x3e8] ss:$16 sps:$4 sm:$0xff]   ;;  %v17814_v63 = vld [vmem:[%s25023_s2 + $0x404] ss:$16 sps:$4 sm:$0xff]  }
 0x358   : > { %11150 = vmatprep.subr.bf16.mxu0 %v17722_v0  ;;  %11683 = vmatprep.subr.bf16.mxu1 %v17725_v56  ;;  %v17817_v0 = vld [vmem:[%s25023_s2 + $0x40c] ss:$16 sps:$4 sm:$0xff]   ;;  %v22127_v56 = vld [vmem:[%s21716_s28 + $0x10] sm:$0xff] }
 0x359   : > { %11180 = vmatprep.mubr.bf16.mxu0 %v15105_v1  ;;  %11713 = vmatprep.mubr.bf16.mxu1 %v15105_v1  ;;  %v15104_v1 = vcombine.low %v21928_v60, %v21928_v60  ;;  %v17823_v60 = vld [vmem:[%s25023_s2 + $0x42c] ss:$16 sps:$4 sm:$0xff]  }
 0x35b   : > { %11151 = vmatpush1.bf16.msra.mxu0 %v17720_v2  ;;  %11684 = vmatpush1.bf16.msra.mxu1 %v17723_v3  ;;  %v17812_v2 = vld [vmem:[%s25023_s2 + $0x400] ss:$16 sps:$4 sm:$0xff]   ;;  %v17815_v3 = vld [vmem:[%s25023_s2 + $0x408] ss:$16 sps:$4 sm:$0xff]  }
 0x35c   : > { %11152 = vmatprep.subr.bf16.mxu0 %v17728_v4  ;;  %11685 = vmatprep.subr.bf16.mxu1 %v17731_v5  ;;  %v17820_v4 = vld [vmem:[%s25023_s2 + $0x424] ss:$16 sps:$4 sm:$0xff]   ;;  %v15107_v5 = vcombine.high %v22127_v56, %v22127_v56 }
 0x35f   : > { %11153 = vmatpush1.bf16.msra.mxu0 %v17726_v6  ;;  %11686 = vmatpush1.bf16.msra.mxu1 %v17729_v7  ;;  %v17818_v6 = vld [vmem:[%s25023_s2 + $0x420] ss:$16 sps:$4 sm:$0xff]   ;;  %v17821_v7 = vld [vmem:[%s25023_s2 + $0x428] ss:$16 sps:$4 sm:$0xff]  }
 0x360   : > { %11154 = vmatprep.subr.bf16.mxu0 %v17734_v8  ;;  %11687 = vmatprep.subr.bf16.mxu1 %v17737_v9  ;;  %v17826_v8 = vld [vmem:[%s25023_s2 + $0x444] ss:$16 sps:$4 sm:$0xff]   ;;  %v17829_v9 = vld [vmem:[%s25023_s2 + $0x44c] ss:$16 sps:$4 sm:$0xff]  }
 0x363   : > { %11155 = vmatpush1.bf16.msra.mxu0 %v17732_v10  ;;  %11688 = vmatpush1.bf16.msra.mxu1 %v17735_v12  ;;  %v17824_v10 = vld [vmem:[%s25023_s2 + $0x440] ss:$16 sps:$4 sm:$0xff]   ;;  %v17827_v12 = vld [vmem:[%s25023_s2 + $0x448] ss:$16 sps:$4 sm:$0xff]  }
 0x364   : > { %11156 = vmatprep.subr.bf16.mxu0 %v17740_v13  ;;  %11689 = vmatprep.subr.bf16.mxu1 %v17743_v15  ;;  %v17832_v13 = vld [vmem:[%s25023_s2 + $0x464] ss:$16 sps:$4 sm:$0xff]   ;;  %v17835_v15 = vld [vmem:[%s25023_s2 + $0x46c] ss:$16 sps:$4 sm:$0xff]  }
 0x367   : > { %11157 = vmatpush1.bf16.msra.mxu0 %v17738_v16  ;;  %11690 = vmatpush1.bf16.msra.mxu1 %v17741_v17  ;;  %v17830_v16 = vld [vmem:[%s25023_s2 + $0x460] ss:$16 sps:$4 sm:$0xff]   ;;  %v17833_v17 = vld [vmem:[%s25023_s2 + $0x468] ss:$16 sps:$4 sm:$0xff]  }
 0x368   : > { %11158 = vmatprep.subr.bf16.mxu0 %v17746_v19  ;;  %11691 = vmatprep.subr.bf16.mxu1 %v17749_v14  ;;  %v17838_v19 = vld [vmem:[%s25023_s2 + $0x484] ss:$16 sps:$4 sm:$0xff]   ;;  %v17841_v14 = vld [vmem:[%s25023_s2 + $0x48c] ss:$16 sps:$4 sm:$0xff]  }
 0x36b   : > { %11159 = vmatpush1.bf16.msra.mxu0 %v17744_v20  ;;  %11692 = vmatpush1.bf16.msra.mxu1 %v17747_v11  ;;  %v17836_v20 = vld [vmem:[%s25023_s2 + $0x480] ss:$16 sps:$4 sm:$0xff]   ;;  %v17839_v11 = vld [vmem:[%s25023_s2 + $0x488] ss:$16 sps:$4 sm:$0xff]  }
 0x36c   : > { %11160 = vmatprep.subr.bf16.mxu0 %v17752_v22  ;;  %11693 = vmatprep.subr.bf16.mxu1 %v17755_v23  ;;  %v17844_v22 = vld [vmem:[%s25023_s2 + $0x4a4] ss:$16 sps:$4 sm:$0xff]   ;;  %v17847_v23 = vld [vmem:[%s25023_s2 + $0x4ac] ss:$16 sps:$4 sm:$0xff]  }
 0x36f   : > { %11161 = vmatpush1.bf16.msra.mxu0 %v17750_v18  ;;  %11694 = vmatpush1.bf16.msra.mxu1 %v17753_v25  ;;  %v17842_v18 = vld [vmem:[%s25023_s2 + $0x4a0] ss:$16 sps:$4 sm:$0xff]   ;;  %v17845_v25 = vld [vmem:[%s25023_s2 + $0x4a8] ss:$16 sps:$4 sm:$0xff]  }
 0x370   : > { %11162 = vmatprep.subr.bf16.mxu0 %v17758_v26  ;;  %11695 = vmatprep.subr.bf16.mxu1 %v17761_v21  ;;  %v17850_v26 = vld [vmem:[%s25023_s2 + $0x4c4] ss:$16 sps:$4 sm:$0xff]   ;;  %v17853_v21 = vld [vmem:[%s25023_s2 + $0x4cc] ss:$16 sps:$4 sm:$0xff]  }
 0x373   : > { %11163 = vmatpush1.bf16.msra.mxu0 %v17756_v28  ;;  %11696 = vmatpush1.bf16.msra.mxu1 %v17759_v29  ;;  %v17848_v28 = vld [vmem:[%s25023_s2 + $0x4c0] ss:$16 sps:$4 sm:$0xff]   ;;  %v17851_v29 = vld [vmem:[%s25023_s2 + $0x4c8] ss:$16 sps:$4 sm:$0xff]  }
 0x374   : > { %11164 = vmatprep.subr.bf16.mxu0 %v17764_v24  ;;  %11697 = vmatprep.subr.bf16.mxu1 %v17767_v31  ;;  %v17856_v24 = vld [vmem:[%s25023_s2 + $0x4e4] ss:$16 sps:$4 sm:$0xff]   ;;  %v17859_v31 = vld [vmem:[%s25023_s2 + $0x4ec] ss:$16 sps:$4 sm:$0xff]  }
 0x377   : > { %11165 = vmatpush1.bf16.msra.mxu0 %v17762_v32  ;;  %11698 = vmatpush1.bf16.msra.mxu1 %v17765_v27  ;;  %v17854_v32 = vld [vmem:[%s25023_s2 + $0x4e0] ss:$16 sps:$4 sm:$0xff]   ;;  %v17857_v27 = vld [vmem:[%s25023_s2 + $0x4e8] ss:$16 sps:$4 sm:$0xff]  }
 0x378   : > { %11166 = vmatprep.subr.bf16.mxu0 %v17770_v34  ;;  %11699 = vmatprep.subr.bf16.mxu1 %v17773_v35  ;;  %v17862_v34 = vld [vmem:[%s25023_s2 + $0x504] ss:$16 sps:$4 sm:$0xff]   ;;  %v17865_v35 = vld [vmem:[%s25023_s2 + $0x50c] ss:$16 sps:$4 sm:$0xff]  }
 0x37b   : > { %11167 = vmatpush1.bf16.msra.mxu0 %v17768_v30  ;;  %11700 = vmatpush1.bf16.msra.mxu1 %v17771_v37  ;;  %v17860_v30 = vld [vmem:[%s25023_s2 + $0x500] ss:$16 sps:$4 sm:$0xff]   ;;  %v17863_v37 = vld [vmem:[%s25023_s2 + $0x508] ss:$16 sps:$4 sm:$0xff]  }
 0x37c   : > { %11168 = vmatprep.subr.bf16.mxu0 %v17776_v38  ;;  %11701 = vmatprep.subr.bf16.mxu1 %v17779_v39  ;;  %v17868_v38 = vld [vmem:[%s25023_s2 + $0x524] ss:$16 sps:$4 sm:$0xff]   ;;  %v17871_v39 = vld [vmem:[%s25023_s2 + $0x52c] ss:$16 sps:$4 sm:$0xff]  }
 0x37f   : > { %11169 = vmatpush1.bf16.msra.mxu0 %v17774_v33  ;;  %11702 = vmatpush1.bf16.msra.mxu1 %v17777_v40  ;;  %v17866_v33 = vld [vmem:[%s25023_s2 + $0x520] ss:$16 sps:$4 sm:$0xff]   ;;  %v17869_v40 = vld [vmem:[%s25023_s2 + $0x528] ss:$16 sps:$4 sm:$0xff]  }
 0x380   : > { %11170 = vmatprep.subr.bf16.mxu0 %v17782_v41  ;;  %11703 = vmatprep.subr.bf16.mxu1 %v17785_v36  ;;  %v17874_v41 = vld [vmem:[%s25023_s2 + $0x544] ss:$16 sps:$4 sm:$0xff]   ;;  %v17877_v36 = vld [vmem:[%s25023_s2 + $0x54c] ss:$16 sps:$4 sm:$0xff]  }
 0x383   : > { %11171 = vmatpush1.bf16.msra.mxu0 %v17780_v42  ;;  %11704 = vmatpush1.bf16.msra.mxu1 %v17783_v43  ;;  %v17872_v42 = vld [vmem:[%s25023_s2 + $0x540] ss:$16 sps:$4 sm:$0xff]   ;;  %v17875_v43 = vld [vmem:[%s25023_s2 + $0x548] ss:$16 sps:$4 sm:$0xff]  }
 0x384   : > { %11172 = vmatprep.subr.bf16.mxu0 %v17788_v44  ;;  %11705 = vmatprep.subr.bf16.mxu1 %v17791_v45  ;;  %v17880_v44 = vld [vmem:[%s25023_s2 + $0x564] ss:$16 sps:$4 sm:$0xff]   ;;  %v17883_v45 = vld [vmem:[%s25023_s2 + $0x56c] ss:$16 sps:$4 sm:$0xff]  }
 0x387   : > { %11173 = vmatpush1.bf16.msra.mxu0 %v17786_v47  ;;  %11706 = vmatpush1.bf16.msra.mxu1 %v17789_v48  ;;  %v17878_v47 = vld [vmem:[%s25023_s2 + $0x560] ss:$16 sps:$4 sm:$0xff]   ;;  %v17881_v48 = vld [vmem:[%s25023_s2 + $0x568] ss:$16 sps:$4 sm:$0xff]  }
 0x388   : > { %11174 = vmatprep.subr.bf16.mxu0 %v17794_v49  ;;  %11707 = vmatprep.subr.bf16.mxu1 %v17797_v50  ;;  %v17886_v49 = vld [vmem:[%s25023_s2 + $0x584] ss:$16 sps:$4 sm:$0xff]   ;;  %v17889_v50 = vld [vmem:[%s25023_s2 + $0x58c] ss:$16 sps:$4 sm:$0xff]  }
 0x38b   : > { %11175 = vmatpush1.bf16.msra.mxu0 %v17792_v51  ;;  %11708 = vmatpush1.bf16.msra.mxu1 %v17795_v52  ;;  %v17884_v51 = vld [vmem:[%s25023_s2 + $0x580] ss:$16 sps:$4 sm:$0xff]   ;;  %v17887_v52 = vld [vmem:[%s25023_s2 + $0x588] ss:$16 sps:$4 sm:$0xff]  }
 0x38c   : > { %11176 = vmatprep.subr.bf16.mxu0 %v17800_v53  ;;  %11709 = vmatprep.subr.bf16.mxu1 %v17803_v54  ;;  %v17892_v53 = vld [vmem:[%s25023_s2 + $0x5a4] ss:$16 sps:$4 sm:$0xff]   ;;  %v17895_v54 = vld [vmem:[%s25023_s2 + $0x5ac] ss:$16 sps:$4 sm:$0xff]  }
 0x38f   : > { %11177 = vmatpush1.bf16.msra.mxu0 %v17798_v55  ;;  %11710 = vmatpush1.bf16.msra.mxu1 %v17801_v57  ;;  %v17890_v55 = vld [vmem:[%s25023_s2 + $0x5a0] ss:$16 sps:$4 sm:$0xff]   ;;  %v17893_v57 = vld [vmem:[%s25023_s2 + $0x5a8] ss:$16 sps:$4 sm:$0xff]  }
 0x390   : > { %11178 = vmatprep.subr.bf16.mxu0 %v17806_v58  ;;  %11711 = vmatprep.subr.bf16.mxu1 %v17809_v59  ;;  %v17898_v58 = vld [vmem:[%s25023_s2 + $0x5c4] ss:$16 sps:$4 sm:$0xff]   ;;  %v17901_v59 = vld [vmem:[%s25023_s2 + $0x5cc] ss:$16 sps:$4 sm:$0xff]  }
 0x393   : > { %11179 = vmatpush1.bf16.msra.mxu0 %v17804_v61  ;;  %11712 = vmatpush1.bf16.msra.mxu1 %v17807_v62  ;;  %v17896_v61 = vld [vmem:[%s25023_s2 + $0x5c0] ss:$16 sps:$4 sm:$0xff]   ;;  %v17899_v62 = vld [vmem:[%s25023_s2 + $0x5c8] ss:$16 sps:$4 sm:$0xff]  }
 0x394   : > { %11189 = vmatprep.subr.bf16.mxu0 %v17814_v63  ;;  %11722 = vmatprep.subr.bf16.mxu1 %v17817_v0  ;;  %v17904_v63 = vld [vmem:[%s25023_s2 + $0x5e4] ss:$16 sps:$4 sm:$0xff]   ;;  %v17907_v0 = vld [vmem:[%s25023_s2 + $0x5ec] ss:$16 sps:$4 sm:$0xff]  }
 0x396   : > { %11181 = vmatmul.mubr.bf16.vlgmr.msra.gmra.mrb[4].mxu0 %v15104_v1  ;;  %11714 = vmatmul.mubr.bf16.vlgmr.msra.gmra.mrb[4].mxu1 %v15104_v1  ;;  %v17902_v1 = vld [vmem:[%s25023_s2 + $0x5e0] ss:$16 sps:$4 sm:$0xff]  }
 0x397   : > { %11190 = vmatpush1.bf16.msra.mxu0 %v17812_v2  ;;  %11723 = vmatpush1.bf16.msra.mxu1 %v17815_v3  ;;  %v17905_v2 = vld [vmem:[%s25023_s2 + $0x5e8] ss:$16 sps:$4 sm:$0xff]   ;;  %v17912_v3 = vld [vmem:[%s25023_s2 + $0x604] ss:$16 sps:$4 sm:$0xff]  }
 0x398   : > { %11191 = vmatprep.subr.bf16.mxu0 %v17820_v4  ;;  %11724 = vmatprep.subr.bf16.mxu1 %v17823_v60  ;;  %v17915_v4 = vld [vmem:[%s25023_s2 + $0x60c] ss:$16 sps:$4 sm:$0xff]  }
 0x399   : > { %11221 = vmatprep.mubr.bf16.mxu0 %v15107_v5  ;;  %11754 = vmatprep.mubr.bf16.mxu1 %v15107_v5  ;;  %v22326_v60 = vld [vmem:[%s21716_s28 + $0x18] sm:$0xff]  ;;  %v15106_v5 = vcombine.low %v22127_v56, %v22127_v56 }
 0x39a   : > { %v17921_v56 = vld [vmem:[%s25023_s2 + $0x62c] ss:$16 sps:$4 sm:$0xff]  }
 0x39b   : > { %11192 = vmatpush1.bf16.msra.mxu0 %v17818_v6  ;;  %11725 = vmatpush1.bf16.msra.mxu1 %v17821_v7  ;;  %v17910_v6 = vld [vmem:[%s25023_s2 + $0x600] ss:$16 sps:$4 sm:$0xff]   ;;  %v17913_v7 = vld [vmem:[%s25023_s2 + $0x608] ss:$16 sps:$4 sm:$0xff]  }
 0x39c   : > { %11193 = vmatprep.subr.bf16.mxu0 %v17826_v8  ;;  %11726 = vmatprep.subr.bf16.mxu1 %v17829_v9  ;;  %v17918_v8 = vld [vmem:[%s25023_s2 + $0x624] ss:$16 sps:$4 sm:$0xff]   ;;  %v15109_v9 = vcombine.high %v22326_v60, %v22326_v60 }
 0x39f   : > { %11194 = vmatpush1.bf16.msra.mxu0 %v17824_v10  ;;  %11727 = vmatpush1.bf16.msra.mxu1 %v17827_v12  ;;  %v17916_v10 = vld [vmem:[%s25023_s2 + $0x620] ss:$16 sps:$4 sm:$0xff]   ;;  %v17919_v12 = vld [vmem:[%s25023_s2 + $0x628] ss:$16 sps:$4 sm:$0xff]  }
 0x3a0   : > { %11195 = vmatprep.subr.bf16.mxu0 %v17832_v13  ;;  %11728 = vmatprep.subr.bf16.mxu1 %v17835_v15  ;;  %v17924_v13 = vld [vmem:[%s25023_s2 + $0x644] ss:$16 sps:$4 sm:$0xff]   ;;  %v17927_v15 = vld [vmem:[%s25023_s2 + $0x64c] ss:$16 sps:$4 sm:$0xff]  }
 0x3a3   : > { %11196 = vmatpush1.bf16.msra.mxu0 %v17830_v16  ;;  %11729 = vmatpush1.bf16.msra.mxu1 %v17833_v17  ;;  %v1182_v16 = vlaneseq  ;;  %v17922_v17 = vld [vmem:[%s25023_s2 + $0x640] ss:$16 sps:$4 sm:$0xff]  }
 0x3a4   : > { %11197 = vmatprep.subr.bf16.mxu0 %v17838_v19  ;;  %11730 = vmatprep.subr.bf16.mxu1 %v17841_v14  ;;  %v17925_v19 = vld [vmem:[%s25023_s2 + $0x648] ss:$16 sps:$4 sm:$0xff]   ;;  %v17930_v14 = vld [vmem:[%s25023_s2 + $0x664] ss:$16 sps:$4 sm:$0xff]  }
 0x3a7   : > { %11198 = vmatpush1.bf16.msra.mxu0 %v17836_v20  ;;  %11731 = vmatpush1.bf16.msra.mxu1 %v17839_v11  ;;  %v17933_v20 = vld [vmem:[%s25023_s2 + $0x66c] ss:$16 sps:$4 sm:$0xff]   ;;  %v1183_v11 = vshrl.u32 %v1182_v16, 7  ;;  %v17979_v16 = vld [vmem:[%s25023_s2 + $0x768] ss:$16 sps:$4 sm:$0xff]  }
 0x3a8   : > { %11199 = vmatprep.subr.bf16.mxu0 %v17844_v22  ;;  %11732 = vmatprep.subr.bf16.mxu1 %v17847_v23  ;;  %v17928_v22 = vld [vmem:[%s25023_s2 + $0x660] ss:$16 sps:$4 sm:$0xff]   ;;  %v17931_v23 = vld [vmem:[%s25023_s2 + $0x668] ss:$16 sps:$4 sm:$0xff]  }
 0x3ab   : > { %11200 = vmatpush1.bf16.msra.mxu0 %v17842_v18  ;;  %11733 = vmatpush1.bf16.msra.mxu1 %v17845_v25  ;;  %v17936_v18 = vld [vmem:[%s25023_s2 + $0x684] ss:$16 sps:$4 sm:$0xff]   ;;  %v17939_v25 = vld [vmem:[%s25023_s2 + $0x68c] ss:$16 sps:$4 sm:$0xff]  }
 0x3ac   : > { %11201 = vmatprep.subr.bf16.mxu0 %v17850_v26  ;;  %11734 = vmatprep.subr.bf16.mxu1 %v17853_v21  ;;  %v17934_v26 = vld [vmem:[%s25023_s2 + $0x680] ss:$16 sps:$4 sm:$0xff]   ;;  %v17937_v21 = vld [vmem:[%s25023_s2 + $0x688] ss:$16 sps:$4 sm:$0xff]  }
 0x3af   : > { %11202 = vmatpush1.bf16.msra.mxu0 %v17848_v28  ;;  %11735 = vmatpush1.bf16.msra.mxu1 %v17851_v29  ;;  %v22386_v28 = vsub.s32 0, %v1183_v11  ;;  %v22388_v29 = vsub.s32 2, %v1183_v11 }
 0x3b0   : > { %11203 = vmatprep.subr.bf16.mxu0 %v17856_v24  ;;  %11736 = vmatprep.subr.bf16.mxu1 %v17859_v31  ;;  %v14290_v24 = vld [vmem:[%s25027_s6 + $0x3] ss:$4 sm:$0xf]  ;;  %v22393_v31 = vsub.s32 1, %v1183_v11 }
 0x3b3   : > { %11204 = vmatpush1.bf16.msra.mxu0 %v17854_v32  ;;  %11737 = vmatpush1.bf16.msra.mxu1 %v17857_v27  ;;  %v22395_v32 = vsub.s32 3, %v1183_v11  ;;  %v17942_v27 = vld [vmem:[%s25023_s2 + $0x6a4] ss:$16 sps:$4 sm:$0xff]  }
 0x3b4   : > { %11205 = vmatprep.subr.bf16.mxu0 %v17862_v34  ;;  %11738 = vmatprep.subr.bf16.mxu1 %v17865_v35  ;;  %v17945_v34 = vld [vmem:[%s25023_s2 + $0x6ac] ss:$16 sps:$4 sm:$0xff]   ;;  %v1185_v35 = vrot.slane %v14290_v24, %v22386_v28  ;;  %v17990_v11 = vld [vmem:[%s25023_s2 + $0x7a4] ss:$16 sps:$4 sm:$0xff]  }
 0x3b7   : > { %11206 = vmatpush1.bf16.msra.mxu0 %v17860_v30  ;;  %11739 = vmatpush1.bf16.msra.mxu1 %v17863_v37  ;;  %v1193_v30 = vrot.slane %v14290_v24, %v22388_v29  ;;  %v1189_v37 = vrot.slane %v14290_v24, %v22393_v31 }
 0x3b8   : > { %11207 = vmatprep.subr.bf16.mxu0 %v17868_v38  ;;  %11740 = vmatprep.subr.bf16.mxu1 %v17871_v39  ;;  %v1197_v38 = vrot.slane %v14290_v24, %v22395_v32  ;;  %v17940_v39 = vld [vmem:[%s25023_s2 + $0x6a0] ss:$16 sps:$4 sm:$0xff]   ;;  %v17997_v24 = vld [vmem:[%s25023_s2 + $0x7c8] ss:$16 sps:$4 sm:$0xff]  }
 0x3bb   : > { %11208 = vmatpush1.bf16.msra.mxu0 %v17866_v33  ;;  %11741 = vmatpush1.bf16.msra.mxu1 %v17869_v40  ;;  %v17943_v33 = vld [vmem:[%s25023_s2 + $0x6a8] ss:$16 sps:$4 sm:$0xff]   ;;  %v17948_v40 = vld [vmem:[%s25023_s2 + $0x6c4] ss:$16 sps:$4 sm:$0xff]  }
 0x3bc   : > { %11209 = vmatprep.subr.bf16.mxu0 %v17874_v41  ;;  %11742 = vmatprep.subr.bf16.mxu1 %v17877_v36  ;;  %v17951_v41 = vld [vmem:[%s25023_s2 + $0x6cc] ss:$16 sps:$4 sm:$0xff]  }
 0x3bf   : > { %11210 = vmatpush1.bf16.msra.mxu0 %v17872_v42  ;;  %11743 = vmatpush1.bf16.msra.mxu1 %v17875_v43 }
 0x3c0   : > { %11211 = vmatprep.subr.bf16.mxu0 %v17880_v44  ;;  %11744 = vmatprep.subr.bf16.mxu1 %v17883_v45 }
 0x3c3   : > { %11212 = vmatpush1.bf16.msra.mxu0 %v17878_v47  ;;  %11745 = vmatpush1.bf16.msra.mxu1 %v17881_v48 }
 0x3c4   : > { %11213 = vmatprep.subr.bf16.mxu0 %v17886_v49  ;;  %11746 = vmatprep.subr.bf16.mxu1 %v17889_v50 }
 0x3c7   : > { %11214 = vmatpush1.bf16.msra.mxu0 %v17884_v51  ;;  %11747 = vmatpush1.bf16.msra.mxu1 %v17887_v52  ;;  %v17946_v52 = vld [vmem:[%s25023_s2 + $0x6c0] ss:$16 sps:$4 sm:$0xff]  }
 0x3c8   : > { %11215 = vmatprep.subr.bf16.mxu0 %v17892_v53  ;;  %11748 = vmatprep.subr.bf16.mxu1 %v17895_v54  ;;  %v17949_v53 = vld [vmem:[%s25023_s2 + $0x6c8] ss:$16 sps:$4 sm:$0xff]  }
 0x3cb   : > { %11216 = vmatpush1.bf16.msra.mxu0 %v17890_v55  ;;  %11749 = vmatpush1.bf16.msra.mxu1 %v17893_v57  ;;  %v17954_v57 = vld [vmem:[%s25023_s2 + $0x6e4] ss:$16 sps:$4 sm:$0xff]  }
 0x3cc   : > { %11217 = vmatprep.subr.bf16.mxu0 %v17898_v58  ;;  %11750 = vmatprep.subr.bf16.mxu1 %v17901_v59  ;;  %v17957_v58 = vld [vmem:[%s25023_s2 + $0x6ec] ss:$16 sps:$4 sm:$0xff]  }
 0x3cf   : > { %11218 = vmatpush1.bf16.msra.mxu0 %v17896_v61  ;;  %11751 = vmatpush1.bf16.msra.mxu1 %v17899_v62  ;;  %v17952_v62 = vld [vmem:[%s25023_s2 + $0x6e0] ss:$16 sps:$4 sm:$0xff]  }
 0x3d0   : > { %11219 = vmatprep.subr.bf16.mxu0 %v17904_v63  ;;  %11752 = vmatprep.subr.bf16.mxu1 %v17907_v0  ;;  %v17955_v63 = vld [vmem:[%s25023_s2 + $0x6e8] ss:$16 sps:$4 sm:$0xff]   ;;  %v17960_v0 = vld [vmem:[%s25023_s2 + $0x704] ss:$16 sps:$4 sm:$0xff]  }
 0x3d3   : > { %11220 = vmatpush1.bf16.msra.mxu0 %v17902_v1  ;;  %11753 = vmatpush1.bf16.msra.mxu1 %v17905_v2  ;;  %v17963_v1 = vld [vmem:[%s25023_s2 + $0x70c] ss:$16 sps:$4 sm:$0xff]   ;;  %v17958_v2 = vld [vmem:[%s25023_s2 + $0x700] ss:$16 sps:$4 sm:$0xff]  }
 0x3d4   : > { %11230 = vmatprep.subr.bf16.mxu0 %v17912_v3  ;;  %11763 = vmatprep.subr.bf16.mxu1 %v17915_v4  ;;  %v17961_v3 = vld [vmem:[%s25023_s2 + $0x708] ss:$16 sps:$4 sm:$0xff]   ;;  %v17966_v4 = vld [vmem:[%s25023_s2 + $0x724] ss:$16 sps:$4 sm:$0xff]  }
 0x3d6   : > { %11222 = vmatmul.mubr.bf16.vlgmr.msra.gmra.mrb[4].mxu0 %v15106_v5  ;;  %11755 = vmatmul.mubr.bf16.vlgmr.msra.gmra.mrb[4].mxu1 %v15106_v5  ;;  %v17969_v5 = vld [vmem:[%s25023_s2 + $0x72c] ss:$16 sps:$4 sm:$0xff]  }
 0x3d7   : > { %11231 = vmatpush1.bf16.msra.mxu0 %v17910_v6  ;;  %11764 = vmatpush1.bf16.msra.mxu1 %v17913_v7  ;;  %v17964_v6 = vld [vmem:[%s25023_s2 + $0x720] ss:$16 sps:$4 sm:$0xff]   ;;  %v17967_v7 = vld [vmem:[%s25023_s2 + $0x728] ss:$16 sps:$4 sm:$0xff]  }
 0x3d8   : > { %11232 = vmatprep.subr.bf16.mxu0 %v17918_v8  ;;  %11765 = vmatprep.subr.bf16.mxu1 %v17921_v56  ;;  %v17972_v8 = vld [vmem:[%s25023_s2 + $0x744] ss:$16 sps:$4 sm:$0xff]   ;;  %v17975_v56 = vld [vmem:[%s25023_s2 + $0x74c] ss:$16 sps:$4 sm:$0xff]  }
 0x3d9   : > { %11262 = vmatprep.mubr.bf16.mxu0 %v15109_v9  ;;  %11795 = vmatprep.mubr.bf16.mxu1 %v15109_v9  ;;  %v17970_v9 = vld [vmem:[%s25023_s2 + $0x740] ss:$16 sps:$4 sm:$0xff]  }
 0x3db   : > { %11233 = vmatpush1.bf16.msra.mxu0 %v17916_v10  ;;  %11766 = vmatpush1.bf16.msra.mxu1 %v17919_v12  ;;  %v17973_v10 = vld [vmem:[%s25023_s2 + $0x748] ss:$16 sps:$4 sm:$0xff]   ;;  %v17978_v12 = vld [vmem:[%s25023_s2 + $0x764] ss:$16 sps:$4 sm:$0xff]  }
 0x3dc   : > { %11234 = vmatprep.subr.bf16.mxu0 %v17924_v13  ;;  %11767 = vmatprep.subr.bf16.mxu1 %v17927_v15  ;;  %v17981_v13 = vld [vmem:[%s25023_s2 + $0x76c] ss:$16 sps:$4 sm:$0xff]   ;;  %v17976_v15 = vld [vmem:[%s25023_s2 + $0x760] ss:$16 sps:$4 sm:$0xff]  }
 0x3df   : > { %11235 = vmatpush1.bf16.msra.mxu0 %v17922_v17  ;;  %11768 = vmatpush1.bf16.msra.mxu1 %v17925_v19  ;;  %v17984_v17 = vld [vmem:[%s25023_s2 + $0x784] ss:$16 sps:$4 sm:$0xff]   ;;  %v17987_v19 = vld [vmem:[%s25023_s2 + $0x78c] ss:$16 sps:$4 sm:$0xff]  }
 0x3e0   : > { %11236 = vmatprep.subr.bf16.mxu0 %v17930_v14  ;;  %11769 = vmatprep.subr.bf16.mxu1 %v17933_v20  ;;  %v17982_v14 = vld [vmem:[%s25023_s2 + $0x780] ss:$16 sps:$4 sm:$0xff]   ;;  %v17985_v20 = vld [vmem:[%s25023_s2 + $0x788] ss:$16 sps:$4 sm:$0xff]  }
 0x3e3   : > { %11237 = vmatpush1.bf16.msra.mxu0 %v17928_v22  ;;  %11770 = vmatpush1.bf16.msra.mxu1 %v17931_v23  ;;  %v17993_v22 = vld [vmem:[%s25023_s2 + $0x7ac] ss:$16 sps:$4 sm:$0xff]   ;;  %v17988_v23 = vld [vmem:[%s25023_s2 + $0x7a0] ss:$16 sps:$4 sm:$0xff]  }
 0x3e4   : > { %11238 = vmatprep.subr.bf16.mxu0 %v17936_v18  ;;  %11771 = vmatprep.subr.bf16.mxu1 %v17939_v25  ;;  %v17991_v18 = vld [vmem:[%s25023_s2 + $0x7a8] ss:$16 sps:$4 sm:$0xff]   ;;  %v17996_v25 = vld [vmem:[%s25023_s2 + $0x7c4] ss:$16 sps:$4 sm:$0xff]  }
 0x3e7   : > { %11239 = vmatpush1.bf16.msra.mxu0 %v17934_v26  ;;  %11772 = vmatpush1.bf16.msra.mxu1 %v17937_v21  ;;  %v17999_v26 = vld [vmem:[%s25023_s2 + $0x7cc] ss:$16 sps:$4 sm:$0xff]   ;;  %v17994_v21 = vld [vmem:[%s25023_s2 + $0x7c0] ss:$16 sps:$4 sm:$0xff]  }
 0x3e8   : > { %11240 = vmatprep.subr.bf16.mxu0 %v17942_v27  ;;  %11773 = vmatprep.subr.bf16.mxu1 %v17945_v34  ;;  %v18002_v27 = vld [vmem:[%s25023_s2 + $0x7e4] ss:$16 sps:$4 sm:$0xff]   ;;  %v18005_v34 = vld [vmem:[%s25023_s2 + $0x7ec] ss:$16 sps:$4 sm:$0xff]  }
 0x3e9   : > { %v5739_v36 = vpop.f32.mrb[0].mxu0  ;;  %v6272_v42 = vpop.f32.mrb[0].mxu1 }
 0x3ea   : > { %v22420_v43 = vadd.f32 %v5739_v36, %v1185_v35  ;;  %v22422_v44 = vadd.f32 %v6272_v42, %v1193_v30  ;;  %v5741_v45 = vpop.f32.mrb[1].mxu0  ;;  %v6274_v47 = vpop.f32.mrb[1].mxu1  ;;  %v18000_v35 = vld [vmem:[%s25023_s2 + $0x7e0] ss:$16 sps:$4 sm:$0xff]   ;;  %v18003_v30 = vld [vmem:[%s25023_s2 + $0x7e8] ss:$16 sps:$4 sm:$0xff]  }
 0x3eb   : > { %v22424_v48 = vadd.f32 %v5741_v45, %v1189_v37  ;;  %v22426_v49 = vadd.f32 %v6274_v47, %v1197_v38  ;;  %v5743_v50 = vpop.f32.mrb[2].mxu0  ;;  %v6276_v51 = vpop.f32.mrb[2].mxu1  ;;  %11241 = vmatpush1.bf16.msra.mxu0 %v17940_v39  ;;  %11774 = vmatpush1.bf16.msra.mxu1 %v17943_v33  ;;  %v18010_v37 = vld [vmem:[%s25023_s2 + $0x804] ss:$16 sps:$4 sm:$0xff]   ;;  %v18013_v38 = vld [vmem:[%s25023_s2 + $0x80c] ss:$16 sps:$4 sm:$0xff]   ;;  %v15108_v39 = vcombine.low %v22326_v60, %v22326_v60 }
 0x3ec   : > { %v5744_v54 = vpop.f32.mrb[3].mxu0  ;;  %v6277_v55 = vpop.f32.mrb[3].mxu1  ;;  %11242 = vmatprep.subr.bf16.mxu0 %v17948_v40  ;;  %11775 = vmatprep.subr.bf16.mxu1 %v17951_v41  ;;  %v22560_v33 = vld [vmem:[%s21716_s28 + $0x20] sm:$0xff]  ;;  %v18011_v41 = vld [vmem:[%s25023_s2 + $0x808] ss:$16 sps:$4 sm:$0xff]  }
 0x3ed   : > { %v16179_v59 = vpack.c.bf16 %v22424_v48, %v22420_v43  ;;  %v16180_v61 = vpack.c.bf16 %v22426_v49, %v22422_v44  ;;  %v18008_v40 = vld [vmem:[%s25023_s2 + $0x800] ss:$16 sps:$4 sm:$0xff]   ;;  %v18016_v36 = vld [vmem:[%s25023_s2 + $0x824] ss:$16 sps:$4 sm:$0xff]   ;;  %v18019_v60 = vld [vmem:[%s25023_s2 + $0x82c] ss:$16 sps:$4 sm:$0xff]   ;;  %v15111_v42 = vcombine.high %v22560_v33, %v22560_v33 }
 0x3ee   : > { %v18014_v45 = vld [vmem:[%s25023_s2 + $0x820] ss:$16 sps:$4 sm:$0xff]   ;;  %v18017_v47 = vld [vmem:[%s25023_s2 + $0x828] ss:$16 sps:$4 sm:$0xff]   ;;  %v18022_v50 = vld [vmem:[%s25023_s2 + $0x844] ss:$16 sps:$4 sm:$0xff]  }
 0x3ef   : > { %14129 = vst [vmem:[%s371_s24] sm:$0xff] %v16179_v59  ;;  %14130 = vst [vmem:[%s371_s24 + $0x8] sm:$0xff] %v16180_v61  ;;  %11243 = vmatpush1.bf16.msra.mxu0 %v17946_v52  ;;  %11776 = vmatpush1.bf16.msra.mxu1 %v17949_v53  ;;  %v18025_v51 = vld [vmem:[%s25023_s2 + $0x84c] ss:$16 sps:$4 sm:$0xff]   ;;  %v18020_v52 = vld [vmem:[%s25023_s2 + $0x840] ss:$16 sps:$4 sm:$0xff]  }
 0x3f0   : > { %11244 = vmatprep.subr.bf16.mxu0 %v17954_v57  ;;  %11777 = vmatprep.subr.bf16.mxu1 %v17957_v58  ;;  %v18023_v53 = vld [vmem:[%s25023_s2 + $0x848] ss:$16 sps:$4 sm:$0xff]   ;;  %v18028_v54 = vld [vmem:[%s25023_s2 + $0x864] ss:$16 sps:$4 sm:$0xff]   ;;  %v18031_v55 = vld [vmem:[%s25023_s2 + $0x86c] ss:$16 sps:$4 sm:$0xff]  }
 0x3f1   : > { %v18026_v57 = vld [vmem:[%s25023_s2 + $0x860] ss:$16 sps:$4 sm:$0xff]   ;;  %v18029_v58 = vld [vmem:[%s25023_s2 + $0x868] ss:$16 sps:$4 sm:$0xff]   ;;  %v18034_v59 = vld [vmem:[%s25023_s2 + $0x884] ss:$16 sps:$4 sm:$0xff]  }
 0x3f2   : > { %v18037_v61 = vld [vmem:[%s25023_s2 + $0x88c] ss:$16 sps:$4 sm:$0xff]  }
 0x3f3   : > { %11245 = vmatpush1.bf16.msra.mxu0 %v17952_v62  ;;  %11778 = vmatpush1.bf16.msra.mxu1 %v17955_v63  ;;  %v18032_v62 = vld [vmem:[%s25023_s2 + $0x880] ss:$16 sps:$4 sm:$0xff]   ;;  %v18035_v63 = vld [vmem:[%s25023_s2 + $0x888] ss:$16 sps:$4 sm:$0xff]  }
 0x3f4   : > { %11246 = vmatprep.subr.bf16.mxu0 %v17960_v0  ;;  %11779 = vmatprep.subr.bf16.mxu1 %v17963_v1  ;;  %v18040_v0 = vld [vmem:[%s25023_s2 + $0x8a4] ss:$16 sps:$4 sm:$0xff]   ;;  %v18043_v1 = vld [vmem:[%s25023_s2 + $0x8ac] ss:$16 sps:$4 sm:$0xff]  }
 0x3f7   : > { %11247 = vmatpush1.bf16.msra.mxu0 %v17958_v2  ;;  %11780 = vmatpush1.bf16.msra.mxu1 %v17961_v3  ;;  %v18038_v2 = vld [vmem:[%s25023_s2 + $0x8a0] ss:$16 sps:$4 sm:$0xff]   ;;  %v18041_v3 = vld [vmem:[%s25023_s2 + $0x8a8] ss:$16 sps:$4 sm:$0xff]  }
 0x3f8   : > { %11248 = vmatprep.subr.bf16.mxu0 %v17966_v4  ;;  %11781 = vmatprep.subr.bf16.mxu1 %v17969_v5  ;;  %v18046_v4 = vld [vmem:[%s25023_s2 + $0x8c4] ss:$16 sps:$4 sm:$0xff]   ;;  %v18049_v5 = vld [vmem:[%s25023_s2 + $0x8cc] ss:$16 sps:$4 sm:$0xff]  }
 0x3fb   : > { %11249 = vmatpush1.bf16.msra.mxu0 %v17964_v6  ;;  %11782 = vmatpush1.bf16.msra.mxu1 %v17967_v7  ;;  %v18044_v6 = vld [vmem:[%s25023_s2 + $0x8c0] ss:$16 sps:$4 sm:$0xff]   ;;  %v18047_v7 = vld [vmem:[%s25023_s2 + $0x8c8] ss:$16 sps:$4 sm:$0xff]  }
 0x3fc   : > { %11250 = vmatprep.subr.bf16.mxu0 %v17972_v8  ;;  %11783 = vmatprep.subr.bf16.mxu1 %v17975_v56  ;;  %v18052_v8 = vld [vmem:[%s25023_s2 + $0x8e4] ss:$16 sps:$4 sm:$0xff]   ;;  %v18055_v56 = vld [vmem:[%s25023_s2 + $0x8ec] ss:$16 sps:$4 sm:$0xff]  }
 0x3ff   : > { %11251 = vmatpush1.bf16.msra.mxu0 %v17970_v9  ;;  %11784 = vmatpush1.bf16.msra.mxu1 %v17973_v10  ;;  %v18050_v9 = vld [vmem:[%s25023_s2 + $0x8e0] ss:$16 sps:$4 sm:$0xff]   ;;  %v18053_v10 = vld [vmem:[%s25023_s2 + $0x8e8] ss:$16 sps:$4 sm:$0xff]  }
 0x400   : > { %11252 = vmatprep.subr.bf16.mxu0 %v17978_v12  ;;  %11785 = vmatprep.subr.bf16.mxu1 %v17981_v13  ;;  %v18058_v12 = vld [vmem:[%s25023_s2 + $0x904] ss:$16 sps:$4 sm:$0xff]   ;;  %v18061_v13 = vld [vmem:[%s25023_s2 + $0x90c] ss:$16 sps:$4 sm:$0xff]  }
 0x403   : > { %11253 = vmatpush1.bf16.msra.mxu0 %v17976_v15  ;;  %11786 = vmatpush1.bf16.msra.mxu1 %v17979_v16  ;;  %v18056_v15 = vld [vmem:[%s25023_s2 + $0x900] ss:$16 sps:$4 sm:$0xff]   ;;  %v18059_v16 = vld [vmem:[%s25023_s2 + $0x908] ss:$16 sps:$4 sm:$0xff]  }
 0x404   : > { %11254 = vmatprep.subr.bf16.mxu0 %v17984_v17  ;;  %11787 = vmatprep.subr.bf16.mxu1 %v17987_v19  ;;  %v18064_v17 = vld [vmem:[%s25023_s2 + $0x924] ss:$16 sps:$4 sm:$0xff]   ;;  %v18067_v19 = vld [vmem:[%s25023_s2 + $0x92c] ss:$16 sps:$4 sm:$0xff]  }
 0x407   : > { %11255 = vmatpush1.bf16.msra.mxu0 %v17982_v14  ;;  %11788 = vmatpush1.bf16.msra.mxu1 %v17985_v20  ;;  %v18062_v14 = vld [vmem:[%s25023_s2 + $0x920] ss:$16 sps:$4 sm:$0xff]   ;;  %v18065_v20 = vld [vmem:[%s25023_s2 + $0x928] ss:$16 sps:$4 sm:$0xff]  }
 0x408   : > { %11256 = vmatprep.subr.bf16.mxu0 %v17990_v11  ;;  %11789 = vmatprep.subr.bf16.mxu1 %v17993_v22  ;;  %v18070_v11 = vld [vmem:[%s25023_s2 + $0x944] ss:$16 sps:$4 sm:$0xff]   ;;  %v18073_v22 = vld [vmem:[%s25023_s2 + $0x94c] ss:$16 sps:$4 sm:$0xff]  }
 0x40b   : > { %11257 = vmatpush1.bf16.msra.mxu0 %v17988_v23  ;;  %11790 = vmatpush1.bf16.msra.mxu1 %v17991_v18  ;;  %v18068_v23 = vld [vmem:[%s25023_s2 + $0x940] ss:$16 sps:$4 sm:$0xff]   ;;  %v18071_v18 = vld [vmem:[%s25023_s2 + $0x948] ss:$16 sps:$4 sm:$0xff]  }
 0x40c   : > { %11258 = vmatprep.subr.bf16.mxu0 %v17996_v25  ;;  %11791 = vmatprep.subr.bf16.mxu1 %v17999_v26  ;;  %v18076_v25 = vld [vmem:[%s25023_s2 + $0x964] ss:$16 sps:$4 sm:$0xff]   ;;  %v18079_v26 = vld [vmem:[%s25023_s2 + $0x96c] ss:$16 sps:$4 sm:$0xff]  }
 0x40f   : > { %11259 = vmatpush1.bf16.msra.mxu0 %v17994_v21  ;;  %11792 = vmatpush1.bf16.msra.mxu1 %v17997_v24  ;;  %v18074_v21 = vld [vmem:[%s25023_s2 + $0x960] ss:$16 sps:$4 sm:$0xff]   ;;  %v18077_v24 = vld [vmem:[%s25023_s2 + $0x968] ss:$16 sps:$4 sm:$0xff]  }
 0x410   : > { %11260 = vmatprep.subr.bf16.mxu0 %v18002_v27  ;;  %11793 = vmatprep.subr.bf16.mxu1 %v18005_v34  ;;  %v18082_v27 = vld [vmem:[%s25023_s2 + $0x984] ss:$16 sps:$4 sm:$0xff]   ;;  %v18085_v34 = vld [vmem:[%s25023_s2 + $0x98c] ss:$16 sps:$4 sm:$0xff]  }
 0x413   : > { %11261 = vmatpush1.bf16.msra.mxu0 %v18000_v35  ;;  %11794 = vmatpush1.bf16.msra.mxu1 %v18003_v30  ;;  %v18080_v35 = vld [vmem:[%s25023_s2 + $0x980] ss:$16 sps:$4 sm:$0xff]   ;;  %v18083_v30 = vld [vmem:[%s25023_s2 + $0x988] ss:$16 sps:$4 sm:$0xff]  }
 0x414   : > { %11271 = vmatprep.subr.bf16.mxu0 %v18010_v37  ;;  %11804 = vmatprep.subr.bf16.mxu1 %v18013_v38  ;;  %v18088_v37 = vld [vmem:[%s25023_s2 + $0x9a4] ss:$16 sps:$4 sm:$0xff]   ;;  %v18091_v38 = vld [vmem:[%s25023_s2 + $0x9ac] ss:$16 sps:$4 sm:$0xff]  }
 0x416   : > { %11263 = vmatmul.mubr.bf16.vlgmr.msra.gmra.mrb[4].mxu0 %v15108_v39  ;;  %11796 = vmatmul.mubr.bf16.vlgmr.msra.gmra.mrb[4].mxu1 %v15108_v39  ;;  %v18086_v39 = vld [vmem:[%s25023_s2 + $0x9a0] ss:$16 sps:$4 sm:$0xff]  }
 0x417   : > { %11272 = vmatpush1.bf16.msra.mxu0 %v18008_v40  ;;  %11805 = vmatpush1.bf16.msra.mxu1 %v18011_v41  ;;  %v18089_v40 = vld [vmem:[%s25023_s2 + $0x9a8] ss:$16 sps:$4 sm:$0xff]   ;;  %v18094_v41 = vld [vmem:[%s25023_s2 + $0x9c4] ss:$16 sps:$4 sm:$0xff]  }
 0x418   : > { %11273 = vmatprep.subr.bf16.mxu0 %v18016_v36  ;;  %11806 = vmatprep.subr.bf16.mxu1 %v18019_v60  ;;  %v18097_v36 = vld [vmem:[%s25023_s2 + $0x9cc] ss:$16 sps:$4 sm:$0xff]   ;;  %v18092_v60 = vld [vmem:[%s25023_s2 + $0x9c0] ss:$16 sps:$4 sm:$0xff]  }
 0x419   : > { %11303 = vmatprep.mubr.bf16.mxu0 %v15111_v42  ;;  %11836 = vmatprep.mubr.bf16.mxu1 %v15111_v42  ;;  %v18095_v42 = vld [vmem:[%s25023_s2 + $0x9c8] ss:$16 sps:$4 sm:$0xff]  }
 0x41b   : > { %11274 = vmatpush1.bf16.msra.mxu0 %v18014_v45  ;;  %11807 = vmatpush1.bf16.msra.mxu1 %v18017_v47  ;;  %v18100_v45 = vld [vmem:[%s25023_s2 + $0x9e4] ss:$16 sps:$4 sm:$0xff]   ;;  %v18103_v47 = vld [vmem:[%s25023_s2 + $0x9ec] ss:$16 sps:$4 sm:$0xff]  }
 0x41c   : > { %11275 = vmatprep.subr.bf16.mxu0 %v18022_v50  ;;  %11808 = vmatprep.subr.bf16.mxu1 %v18025_v51  ;;  %v18098_v50 = vld [vmem:[%s25023_s2 + $0x9e0] ss:$16 sps:$4 sm:$0xff]   ;;  %v18101_v51 = vld [vmem:[%s25023_s2 + $0x9e8] ss:$16 sps:$4 sm:$0xff]  }
 0x41f   : > { %11276 = vmatpush1.bf16.msra.mxu0 %v18020_v52  ;;  %11809 = vmatpush1.bf16.msra.mxu1 %v18023_v53  ;;  %v18108_v52 = vld [vmem:[%s25023_s2 + $0xa04] ss:$16 sps:$4 sm:$0xff]   ;;  %v18111_v53 = vld [vmem:[%s25023_s2 + $0xa0c] ss:$16 sps:$4 sm:$0xff]  }
 0x420   : > { %11277 = vmatprep.subr.bf16.mxu0 %v18028_v54  ;;  %11810 = vmatprep.subr.bf16.mxu1 %v18031_v55  ;;  %v15110_v54 = vcombine.low %v22560_v33, %v22560_v33  ;;  %v22759_v55 = vld [vmem:[%s21716_s28 + $0x28] sm:$0xff] }
 0x421   : > { %v18117_v33 = vld [vmem:[%s25023_s2 + $0xa2c] ss:$16 sps:$4 sm:$0xff]  }
 0x423   : > { %11278 = vmatpush1.bf16.msra.mxu0 %v18026_v57  ;;  %11811 = vmatpush1.bf16.msra.mxu1 %v18029_v58  ;;  %v18106_v57 = vld [vmem:[%s25023_s2 + $0xa00] ss:$16 sps:$4 sm:$0xff]   ;;  %v18109_v58 = vld [vmem:[%s25023_s2 + $0xa08] ss:$16 sps:$4 sm:$0xff]  }
 0x424   : > { %11279 = vmatprep.subr.bf16.mxu0 %v18034_v59  ;;  %11812 = vmatprep.subr.bf16.mxu1 %v18037_v61  ;;  %v18114_v59 = vld [vmem:[%s25023_s2 + $0xa24] ss:$16 sps:$4 sm:$0xff]   ;;  %v15113_v61 = vcombine.high %v22759_v55, %v22759_v55 }
 0x427   : > { %11280 = vmatpush1.bf16.msra.mxu0 %v18032_v62  ;;  %11813 = vmatpush1.bf16.msra.mxu1 %v18035_v63  ;;  %v18112_v62 = vld [vmem:[%s25023_s2 + $0xa20] ss:$16 sps:$4 sm:$0xff]   ;;  %v18115_v63 = vld [vmem:[%s25023_s2 + $0xa28] ss:$16 sps:$4 sm:$0xff]  }
 0x428   : > { %11281 = vmatprep.subr.bf16.mxu0 %v18040_v0  ;;  %11814 = vmatprep.subr.bf16.mxu1 %v18043_v1  ;;  %v18120_v0 = vld [vmem:[%s25023_s2 + $0xa44] ss:$16 sps:$4 sm:$0xff]   ;;  %v18123_v1 = vld [vmem:[%s25023_s2 + $0xa4c] ss:$16 sps:$4 sm:$0xff]  }
 0x42b   : > { %11282 = vmatpush1.bf16.msra.mxu0 %v18038_v2  ;;  %11815 = vmatpush1.bf16.msra.mxu1 %v18041_v3  ;;  %v18118_v2 = vld [vmem:[%s25023_s2 + $0xa40] ss:$16 sps:$4 sm:$0xff]   ;;  %v18121_v3 = vld [vmem:[%s25023_s2 + $0xa48] ss:$16 sps:$4 sm:$0xff]  }
 0x42c   : > { %11283 = vmatprep.subr.bf16.mxu0 %v18046_v4  ;;  %11816 = vmatprep.subr.bf16.mxu1 %v18049_v5  ;;  %v18126_v4 = vld [vmem:[%s25023_s2 + $0xa64] ss:$16 sps:$4 sm:$0xff]   ;;  %v18129_v5 = vld [vmem:[%s25023_s2 + $0xa6c] ss:$16 sps:$4 sm:$0xff]  }
 0x42f   : > { %11284 = vmatpush1.bf16.msra.mxu0 %v18044_v6  ;;  %11817 = vmatpush1.bf16.msra.mxu1 %v18047_v7  ;;  %v18124_v6 = vld [vmem:[%s25023_s2 + $0xa60] ss:$16 sps:$4 sm:$0xff]   ;;  %v18127_v7 = vld [vmem:[%s25023_s2 + $0xa68] ss:$16 sps:$4 sm:$0xff]  }
 0x430   : > { %11285 = vmatprep.subr.bf16.mxu0 %v18052_v8  ;;  %11818 = vmatprep.subr.bf16.mxu1 %v18055_v56  ;;  %v18132_v8 = vld [vmem:[%s25023_s2 + $0xa84] ss:$16 sps:$4 sm:$0xff]   ;;  %v18135_v56 = vld [vmem:[%s25023_s2 + $0xa8c] ss:$16 sps:$4 sm:$0xff]  }
 0x433   : > { %11286 = vmatpush1.bf16.msra.mxu0 %v18050_v9  ;;  %11819 = vmatpush1.bf16.msra.mxu1 %v18053_v10  ;;  %v18130_v9 = vld [vmem:[%s25023_s2 + $0xa80] ss:$16 sps:$4 sm:$0xff]   ;;  %v18133_v10 = vld [vmem:[%s25023_s2 + $0xa88] ss:$16 sps:$4 sm:$0xff]  }
 0x434   : > { %11287 = vmatprep.subr.bf16.mxu0 %v18058_v12  ;;  %11820 = vmatprep.subr.bf16.mxu1 %v18061_v13  ;;  %v18138_v12 = vld [vmem:[%s25023_s2 + $0xaa4] ss:$16 sps:$4 sm:$0xff]   ;;  %v18141_v13 = vld [vmem:[%s25023_s2 + $0xaac] ss:$16 sps:$4 sm:$0xff]  }
 0x437   : > { %11288 = vmatpush1.bf16.msra.mxu0 %v18056_v15  ;;  %11821 = vmatpush1.bf16.msra.mxu1 %v18059_v16  ;;  %v18136_v15 = vld [vmem:[%s25023_s2 + $0xaa0] ss:$16 sps:$4 sm:$0xff]   ;;  %v18139_v16 = vld [vmem:[%s25023_s2 + $0xaa8] ss:$16 sps:$4 sm:$0xff]  }
 0x438   : > { %11289 = vmatprep.subr.bf16.mxu0 %v18064_v17  ;;  %11822 = vmatprep.subr.bf16.mxu1 %v18067_v19  ;;  %v18144_v17 = vld [vmem:[%s25023_s2 + $0xac4] ss:$16 sps:$4 sm:$0xff]   ;;  %v18147_v19 = vld [vmem:[%s25023_s2 + $0xacc] ss:$16 sps:$4 sm:$0xff]  }
 0x43b   : > { %11290 = vmatpush1.bf16.msra.mxu0 %v18062_v14  ;;  %11823 = vmatpush1.bf16.msra.mxu1 %v18065_v20  ;;  %v18142_v14 = vld [vmem:[%s25023_s2 + $0xac0] ss:$16 sps:$4 sm:$0xff]   ;;  %v18145_v20 = vld [vmem:[%s25023_s2 + $0xac8] ss:$16 sps:$4 sm:$0xff]  }
 0x43c   : > { %11291 = vmatprep.subr.bf16.mxu0 %v18070_v11  ;;  %11824 = vmatprep.subr.bf16.mxu1 %v18073_v22  ;;  %v18150_v11 = vld [vmem:[%s25023_s2 + $0xae4] ss:$16 sps:$4 sm:$0xff]   ;;  %v18153_v22 = vld [vmem:[%s25023_s2 + $0xaec] ss:$16 sps:$4 sm:$0xff]  }
 0x43f   : > { %11292 = vmatpush1.bf16.msra.mxu0 %v18068_v23  ;;  %11825 = vmatpush1.bf16.msra.mxu1 %v18071_v18  ;;  %v18148_v23 = vld [vmem:[%s25023_s2 + $0xae0] ss:$16 sps:$4 sm:$0xff]   ;;  %v18151_v18 = vld [vmem:[%s25023_s2 + $0xae8] ss:$16 sps:$4 sm:$0xff]  }
 0x440   : > { %11293 = vmatprep.subr.bf16.mxu0 %v18076_v25  ;;  %11826 = vmatprep.subr.bf16.mxu1 %v18079_v26  ;;  %v18156_v25 = vld [vmem:[%s25023_s2 + $0xb04] ss:$16 sps:$4 sm:$0xff]   ;;  %v18159_v26 = vld [vmem:[%s25023_s2 + $0xb0c] ss:$16 sps:$4 sm:$0xff]  }
 0x443   : > { %11294 = vmatpush1.bf16.msra.mxu0 %v18074_v21  ;;  %11827 = vmatpush1.bf16.msra.mxu1 %v18077_v24  ;;  %v18154_v21 = vld [vmem:[%s25023_s2 + $0xb00] ss:$16 sps:$4 sm:$0xff]   ;;  %v18157_v24 = vld [vmem:[%s25023_s2 + $0xb08] ss:$16 sps:$4 sm:$0xff]  }
 0x444   : > { %11295 = vmatprep.subr.bf16.mxu0 %v18082_v27  ;;  %11828 = vmatprep.subr.bf16.mxu1 %v18085_v34  ;;  %v18162_v27 = vld [vmem:[%s25023_s2 + $0xb24] ss:$16 sps:$4 sm:$0xff]   ;;  %v18165_v34 = vld [vmem:[%s25023_s2 + $0xb2c] ss:$16 sps:$4 sm:$0xff]  }
 0x447   : > { %11296 = vmatpush1.bf16.msra.mxu0 %v18080_v35  ;;  %11829 = vmatpush1.bf16.msra.mxu1 %v18083_v30  ;;  %v18160_v35 = vld [vmem:[%s25023_s2 + $0xb20] ss:$16 sps:$4 sm:$0xff]   ;;  %v18163_v30 = vld [vmem:[%s25023_s2 + $0xb28] ss:$16 sps:$4 sm:$0xff]  }
 0x448   : > { %11297 = vmatprep.subr.bf16.mxu0 %v18088_v37  ;;  %11830 = vmatprep.subr.bf16.mxu1 %v18091_v38  ;;  %v18168_v37 = vld [vmem:[%s25023_s2 + $0xb44] ss:$16 sps:$4 sm:$0xff]   ;;  %v18171_v38 = vld [vmem:[%s25023_s2 + $0xb4c] ss:$16 sps:$4 sm:$0xff]  }
 0x44b   : > { %11298 = vmatpush1.bf16.msra.mxu0 %v18086_v39  ;;  %11831 = vmatpush1.bf16.msra.mxu1 %v18089_v40  ;;  %v18166_v39 = vld [vmem:[%s25023_s2 + $0xb40] ss:$16 sps:$4 sm:$0xff]   ;;  %v18169_v40 = vld [vmem:[%s25023_s2 + $0xb48] ss:$16 sps:$4 sm:$0xff]  }
 0x44c   : > { %11299 = vmatprep.subr.bf16.mxu0 %v18094_v41  ;;  %11832 = vmatprep.subr.bf16.mxu1 %v18097_v36  ;;  %v18174_v41 = vld [vmem:[%s25023_s2 + $0xb64] ss:$16 sps:$4 sm:$0xff]   ;;  %v18177_v36 = vld [vmem:[%s25023_s2 + $0xb6c] ss:$16 sps:$4 sm:$0xff]  }
 0x44f   : > { %11300 = vmatpush1.bf16.msra.mxu0 %v18092_v60  ;;  %11833 = vmatpush1.bf16.msra.mxu1 %v18095_v42  ;;  %v18172_v60 = vld [vmem:[%s25023_s2 + $0xb60] ss:$16 sps:$4 sm:$0xff]   ;;  %v18175_v42 = vld [vmem:[%s25023_s2 + $0xb68] ss:$16 sps:$4 sm:$0xff]  }
 0x450   : > { %11301 = vmatprep.subr.bf16.mxu0 %v18100_v45  ;;  %11834 = vmatprep.subr.bf16.mxu1 %v18103_v47  ;;  %v18180_v45 = vld [vmem:[%s25023_s2 + $0xb84] ss:$16 sps:$4 sm:$0xff]   ;;  %v18183_v47 = vld [vmem:[%s25023_s2 + $0xb8c] ss:$16 sps:$4 sm:$0xff]  }
 0x453   : > { %11302 = vmatpush1.bf16.msra.mxu0 %v18098_v50  ;;  %11835 = vmatpush1.bf16.msra.mxu1 %v18101_v51  ;;  %v18178_v50 = vld [vmem:[%s25023_s2 + $0xb80] ss:$16 sps:$4 sm:$0xff]   ;;  %v18181_v51 = vld [vmem:[%s25023_s2 + $0xb88] ss:$16 sps:$4 sm:$0xff]  }
 0x454   : > { %11312 = vmatprep.subr.bf16.mxu0 %v18108_v52  ;;  %11845 = vmatprep.subr.bf16.mxu1 %v18111_v53  ;;  %v18186_v52 = vld [vmem:[%s25023_s2 + $0xba4] ss:$16 sps:$4 sm:$0xff]   ;;  %v18189_v53 = vld [vmem:[%s25023_s2 + $0xbac] ss:$16 sps:$4 sm:$0xff]  }
 0x456   : > { %11304 = vmatmul.mubr.bf16.vlgmr.msra.gmra.mrb[4].mxu0 %v15110_v54  ;;  %11837 = vmatmul.mubr.bf16.vlgmr.msra.gmra.mrb[4].mxu1 %v15110_v54  ;;  %v18184_v54 = vld [vmem:[%s25023_s2 + $0xba0] ss:$16 sps:$4 sm:$0xff]  }
 0x457   : > { %11313 = vmatpush1.bf16.msra.mxu0 %v18106_v57  ;;  %11846 = vmatpush1.bf16.msra.mxu1 %v18109_v58  ;;  %v18187_v57 = vld [vmem:[%s25023_s2 + $0xba8] ss:$16 sps:$4 sm:$0xff]   ;;  %v18192_v58 = vld [vmem:[%s25023_s2 + $0xbc4] ss:$16 sps:$4 sm:$0xff]  }
 0x458   : > { %11314 = vmatprep.subr.bf16.mxu0 %v18114_v59  ;;  %11847 = vmatprep.subr.bf16.mxu1 %v18117_v33  ;;  %v18195_v59 = vld [vmem:[%s25023_s2 + $0xbcc] ss:$16 sps:$4 sm:$0xff]   ;;  %v18190_v33 = vld [vmem:[%s25023_s2 + $0xbc0] ss:$16 sps:$4 sm:$0xff]  }
 0x459   : > { %11344 = vmatprep.mubr.bf16.mxu0 %v15113_v61  ;;  %11877 = vmatprep.mubr.bf16.mxu1 %v15113_v61  ;;  %v18193_v61 = vld [vmem:[%s25023_s2 + $0xbc8] ss:$16 sps:$4 sm:$0xff]  }
 0x45b   : > { %11315 = vmatpush1.bf16.msra.mxu0 %v18112_v62  ;;  %11848 = vmatpush1.bf16.msra.mxu1 %v18115_v63  ;;  %v18198_v62 = vld [vmem:[%s25023_s2 + $0xbe4] ss:$16 sps:$4 sm:$0xff]   ;;  %v18201_v63 = vld [vmem:[%s25023_s2 + $0xbec] ss:$16 sps:$4 sm:$0xff]  }
 0x45c   : > { %11316 = vmatprep.subr.bf16.mxu0 %v18120_v0  ;;  %11849 = vmatprep.subr.bf16.mxu1 %v18123_v1  ;;  %v18196_v0 = vld [vmem:[%s25023_s2 + $0xbe0] ss:$16 sps:$4 sm:$0xff]   ;;  %v18199_v1 = vld [vmem:[%s25023_s2 + $0xbe8] ss:$16 sps:$4 sm:$0xff]  }
 0x45f   : > { %11317 = vmatpush1.bf16.msra.mxu0 %v18118_v2  ;;  %11850 = vmatpush1.bf16.msra.mxu1 %v18121_v3  ;;  %v18206_v2 = vld [vmem:[%s25023_s2 + $0xc04] ss:$16 sps:$4 sm:$0xff]   ;;  %v18209_v3 = vld [vmem:[%s25023_s2 + $0xc0c] ss:$16 sps:$4 sm:$0xff]  }
 0x460   : > { %11318 = vmatprep.subr.bf16.mxu0 %v18126_v4  ;;  %11851 = vmatprep.subr.bf16.mxu1 %v18129_v5  ;;  %v15112_v4 = vcombine.low %v22759_v55, %v22759_v55  ;;  %v22958_v5 = vld [vmem:[%s21716_s28 + $0x30] sm:$0xff]  ;;  %v18215_v55 = vld [vmem:[%s25023_s2 + $0xc2c] ss:$16 sps:$4 sm:$0xff]  }
 0x463   : > { %11319 = vmatpush1.bf16.msra.mxu0 %v18124_v6  ;;  %11852 = vmatpush1.bf16.msra.mxu1 %v18127_v7  ;;  %v18204_v6 = vld [vmem:[%s25023_s2 + $0xc00] ss:$16 sps:$4 sm:$0xff]   ;;  %v18207_v7 = vld [vmem:[%s25023_s2 + $0xc08] ss:$16 sps:$4 sm:$0xff]  }
 0x464   : > { %11320 = vmatprep.subr.bf16.mxu0 %v18132_v8  ;;  %11853 = vmatprep.subr.bf16.mxu1 %v18135_v56  ;;  %v18212_v8 = vld [vmem:[%s25023_s2 + $0xc24] ss:$16 sps:$4 sm:$0xff]   ;;  %v15115_v56 = vcombine.high %v22958_v5, %v22958_v5 }
 0x467   : > { %11321 = vmatpush1.bf16.msra.mxu0 %v18130_v9  ;;  %11854 = vmatpush1.bf16.msra.mxu1 %v18133_v10  ;;  %v18210_v9 = vld [vmem:[%s25023_s2 + $0xc20] ss:$16 sps:$4 sm:$0xff]   ;;  %v18213_v10 = vld [vmem:[%s25023_s2 + $0xc28] ss:$16 sps:$4 sm:$0xff]  }
 0x468   : > { %11322 = vmatprep.subr.bf16.mxu0 %v18138_v12  ;;  %11855 = vmatprep.subr.bf16.mxu1 %v18141_v13  ;;  %v18218_v12 = vld [vmem:[%s25023_s2 + $0xc44] ss:$16 sps:$4 sm:$0xff]   ;;  %v18221_v13 = vld [vmem:[%s25023_s2 + $0xc4c] ss:$16 sps:$4 sm:$0xff]  }
 0x46b   : > { %11323 = vmatpush1.bf16.msra.mxu0 %v18136_v15  ;;  %11856 = vmatpush1.bf16.msra.mxu1 %v18139_v16  ;;  %v18216_v15 = vld [vmem:[%s25023_s2 + $0xc40] ss:$16 sps:$4 sm:$0xff]   ;;  %v18219_v16 = vld [vmem:[%s25023_s2 + $0xc48] ss:$16 sps:$4 sm:$0xff]  }
 0x46c   : > { %11324 = vmatprep.subr.bf16.mxu0 %v18144_v17  ;;  %11857 = vmatprep.subr.bf16.mxu1 %v18147_v19  ;;  %v18224_v17 = vld [vmem:[%s25023_s2 + $0xc64] ss:$16 sps:$4 sm:$0xff]   ;;  %v18227_v19 = vld [vmem:[%s25023_s2 + $0xc6c] ss:$16 sps:$4 sm:$0xff]  }
 0x46f   : > { %11325 = vmatpush1.bf16.msra.mxu0 %v18142_v14  ;;  %11858 = vmatpush1.bf16.msra.mxu1 %v18145_v20  ;;  %v18222_v14 = vld [vmem:[%s25023_s2 + $0xc60] ss:$16 sps:$4 sm:$0xff]   ;;  %v18225_v20 = vld [vmem:[%s25023_s2 + $0xc68] ss:$16 sps:$4 sm:$0xff]  }
 0x470   : > { %11326 = vmatprep.subr.bf16.mxu0 %v18150_v11  ;;  %11859 = vmatprep.subr.bf16.mxu1 %v18153_v22  ;;  %v18230_v11 = vld [vmem:[%s25023_s2 + $0xc84] ss:$16 sps:$4 sm:$0xff]   ;;  %v18233_v22 = vld [vmem:[%s25023_s2 + $0xc8c] ss:$16 sps:$4 sm:$0xff]  }
 0x473   : > { %11327 = vmatpush1.bf16.msra.mxu0 %v18148_v23  ;;  %11860 = vmatpush1.bf16.msra.mxu1 %v18151_v18  ;;  %v18228_v23 = vld [vmem:[%s25023_s2 + $0xc80] ss:$16 sps:$4 sm:$0xff]   ;;  %v18231_v18 = vld [vmem:[%s25023_s2 + $0xc88] ss:$16 sps:$4 sm:$0xff]  }
 0x474   : > { %11328 = vmatprep.subr.bf16.mxu0 %v18156_v25  ;;  %11861 = vmatprep.subr.bf16.mxu1 %v18159_v26  ;;  %v18236_v25 = vld [vmem:[%s25023_s2 + $0xca4] ss:$16 sps:$4 sm:$0xff]   ;;  %v18239_v26 = vld [vmem:[%s25023_s2 + $0xcac] ss:$16 sps:$4 sm:$0xff]  }
 0x477   : > { %11329 = vmatpush1.bf16.msra.mxu0 %v18154_v21  ;;  %11862 = vmatpush1.bf16.msra.mxu1 %v18157_v24  ;;  %v18234_v21 = vld [vmem:[%s25023_s2 + $0xca0] ss:$16 sps:$4 sm:$0xff]   ;;  %v18237_v24 = vld [vmem:[%s25023_s2 + $0xca8] ss:$16 sps:$4 sm:$0xff]  }
 0x478   : > { %11330 = vmatprep.subr.bf16.mxu0 %v18162_v27  ;;  %11863 = vmatprep.subr.bf16.mxu1 %v18165_v34  ;;  %v18242_v27 = vld [vmem:[%s25023_s2 + $0xcc4] ss:$16 sps:$4 sm:$0xff]   ;;  %v18245_v34 = vld [vmem:[%s25023_s2 + $0xccc] ss:$16 sps:$4 sm:$0xff]  }
 0x47b   : > { %11331 = vmatpush1.bf16.msra.mxu0 %v18160_v35  ;;  %11864 = vmatpush1.bf16.msra.mxu1 %v18163_v30  ;;  %v18240_v35 = vld [vmem:[%s25023_s2 + $0xcc0] ss:$16 sps:$4 sm:$0xff]   ;;  %v18243_v30 = vld [vmem:[%s25023_s2 + $0xcc8] ss:$16 sps:$4 sm:$0xff]  }
 0x47c   : > { %11332 = vmatprep.subr.bf16.mxu0 %v18168_v37  ;;  %11865 = vmatprep.subr.bf16.mxu1 %v18171_v38  ;;  %v18248_v37 = vld [vmem:[%s25023_s2 + $0xce4] ss:$16 sps:$4 sm:$0xff]   ;;  %v18251_v38 = vld [vmem:[%s25023_s2 + $0xcec] ss:$16 sps:$4 sm:$0xff]  }
 0x47f   : > { %11333 = vmatpush1.bf16.msra.mxu0 %v18166_v39  ;;  %11866 = vmatpush1.bf16.msra.mxu1 %v18169_v40  ;;  %v18246_v39 = vld [vmem:[%s25023_s2 + $0xce0] ss:$16 sps:$4 sm:$0xff]   ;;  %v18249_v40 = vld [vmem:[%s25023_s2 + $0xce8] ss:$16 sps:$4 sm:$0xff]  }
 0x480   : > { %11334 = vmatprep.subr.bf16.mxu0 %v18174_v41  ;;  %11867 = vmatprep.subr.bf16.mxu1 %v18177_v36  ;;  %v18254_v41 = vld [vmem:[%s25023_s2 + $0xd04] ss:$16 sps:$4 sm:$0xff]   ;;  %v18257_v36 = vld [vmem:[%s25023_s2 + $0xd0c] ss:$16 sps:$4 sm:$0xff]  }
 0x483   : > { %11335 = vmatpush1.bf16.msra.mxu0 %v18172_v60  ;;  %11868 = vmatpush1.bf16.msra.mxu1 %v18175_v42  ;;  %v18252_v60 = vld [vmem:[%s25023_s2 + $0xd00] ss:$16 sps:$4 sm:$0xff]   ;;  %v18255_v42 = vld [vmem:[%s25023_s2 + $0xd08] ss:$16 sps:$4 sm:$0xff]  }
 0x484   : > { %11336 = vmatprep.subr.bf16.mxu0 %v18180_v45  ;;  %11869 = vmatprep.subr.bf16.mxu1 %v18183_v47  ;;  %v18260_v45 = vld [vmem:[%s25023_s2 + $0xd24] ss:$16 sps:$4 sm:$0xff]   ;;  %v18263_v47 = vld [vmem:[%s25023_s2 + $0xd2c] ss:$16 sps:$4 sm:$0xff]  }
 0x487   : > { %11337 = vmatpush1.bf16.msra.mxu0 %v18178_v50  ;;  %11870 = vmatpush1.bf16.msra.mxu1 %v18181_v51  ;;  %v18258_v50 = vld [vmem:[%s25023_s2 + $0xd20] ss:$16 sps:$4 sm:$0xff]   ;;  %v18261_v51 = vld [vmem:[%s25023_s2 + $0xd28] ss:$16 sps:$4 sm:$0xff]  }
 0x488   : > { %11338 = vmatprep.subr.bf16.mxu0 %v18186_v52  ;;  %11871 = vmatprep.subr.bf16.mxu1 %v18189_v53  ;;  %v18266_v52 = vld [vmem:[%s25023_s2 + $0xd44] ss:$16 sps:$4 sm:$0xff]   ;;  %v18269_v53 = vld [vmem:[%s25023_s2 + $0xd4c] ss:$16 sps:$4 sm:$0xff]  }
 0x48b   : > { %11339 = vmatpush1.bf16.msra.mxu0 %v18184_v54  ;;  %11872 = vmatpush1.bf16.msra.mxu1 %v18187_v57  ;;  %v18264_v54 = vld [vmem:[%s25023_s2 + $0xd40] ss:$16 sps:$4 sm:$0xff]   ;;  %v18267_v57 = vld [vmem:[%s25023_s2 + $0xd48] ss:$16 sps:$4 sm:$0xff]  }
 0x48c   : > { %11340 = vmatprep.subr.bf16.mxu0 %v18192_v58  ;;  %11873 = vmatprep.subr.bf16.mxu1 %v18195_v59  ;;  %v18272_v58 = vld [vmem:[%s25023_s2 + $0xd64] ss:$16 sps:$4 sm:$0xff]   ;;  %v18275_v59 = vld [vmem:[%s25023_s2 + $0xd6c] ss:$16 sps:$4 sm:$0xff]  }
 0x48f   : > { %11341 = vmatpush1.bf16.msra.mxu0 %v18190_v33  ;;  %11874 = vmatpush1.bf16.msra.mxu1 %v18193_v61  ;;  %v18270_v33 = vld [vmem:[%s25023_s2 + $0xd60] ss:$16 sps:$4 sm:$0xff]   ;;  %v18273_v61 = vld [vmem:[%s25023_s2 + $0xd68] ss:$16 sps:$4 sm:$0xff]  }
 0x490   : > { %11342 = vmatprep.subr.bf16.mxu0 %v18198_v62  ;;  %11875 = vmatprep.subr.bf16.mxu1 %v18201_v63  ;;  %v18278_v62 = vld [vmem:[%s25023_s2 + $0xd84] ss:$16 sps:$4 sm:$0xff]   ;;  %v18281_v63 = vld [vmem:[%s25023_s2 + $0xd8c] ss:$16 sps:$4 sm:$0xff]  }
 0x493   : > { %11343 = vmatpush1.bf16.msra.mxu0 %v18196_v0  ;;  %11876 = vmatpush1.bf16.msra.mxu1 %v18199_v1  ;;  %v18276_v0 = vld [vmem:[%s25023_s2 + $0xd80] ss:$16 sps:$4 sm:$0xff]   ;;  %v18279_v1 = vld [vmem:[%s25023_s2 + $0xd88] ss:$16 sps:$4 sm:$0xff]  }
 0x494   : > { %11353 = vmatprep.subr.bf16.mxu0 %v18206_v2  ;;  %11886 = vmatprep.subr.bf16.mxu1 %v18209_v3  ;;  %v18284_v2 = vld [vmem:[%s25023_s2 + $0xda4] ss:$16 sps:$4 sm:$0xff]   ;;  %v18287_v3 = vld [vmem:[%s25023_s2 + $0xdac] ss:$16 sps:$4 sm:$0xff]  }
 0x496   : > { %11345 = vmatmul.mubr.bf16.vlgmr.msra.gmra.mrb[4].mxu0 %v15112_v4  ;;  %11878 = vmatmul.mubr.bf16.vlgmr.msra.gmra.mrb[4].mxu1 %v15112_v4  ;;  %v18282_v4 = vld [vmem:[%s25023_s2 + $0xda0] ss:$16 sps:$4 sm:$0xff]  }
 0x497   : > { %11354 = vmatpush1.bf16.msra.mxu0 %v18204_v6  ;;  %11887 = vmatpush1.bf16.msra.mxu1 %v18207_v7  ;;  %v18285_v6 = vld [vmem:[%s25023_s2 + $0xda8] ss:$16 sps:$4 sm:$0xff]   ;;  %v18290_v7 = vld [vmem:[%s25023_s2 + $0xdc4] ss:$16 sps:$4 sm:$0xff]  }
 0x498   : > { %11355 = vmatprep.subr.bf16.mxu0 %v18212_v8  ;;  %11888 = vmatprep.subr.bf16.mxu1 %v18215_v55  ;;  %v18293_v8 = vld [vmem:[%s25023_s2 + $0xdcc] ss:$16 sps:$4 sm:$0xff]   ;;  %v18288_v55 = vld [vmem:[%s25023_s2 + $0xdc0] ss:$16 sps:$4 sm:$0xff]  }
 0x499   : > { %11385 = vmatprep.mubr.bf16.mxu0 %v15115_v56  ;;  %11918 = vmatprep.mubr.bf16.mxu1 %v15115_v56  ;;  %v18291_v56 = vld [vmem:[%s25023_s2 + $0xdc8] ss:$16 sps:$4 sm:$0xff]  }
 0x49b   : > { %11356 = vmatpush1.bf16.msra.mxu0 %v18210_v9  ;;  %11889 = vmatpush1.bf16.msra.mxu1 %v18213_v10  ;;  %v18296_v9 = vld [vmem:[%s25023_s2 + $0xde4] ss:$16 sps:$4 sm:$0xff]   ;;  %v18299_v10 = vld [vmem:[%s25023_s2 + $0xdec] ss:$16 sps:$4 sm:$0xff]  }
 0x49c   : > { %11357 = vmatprep.subr.bf16.mxu0 %v18218_v12  ;;  %11890 = vmatprep.subr.bf16.mxu1 %v18221_v13  ;;  %v18294_v12 = vld [vmem:[%s25023_s2 + $0xde0] ss:$16 sps:$4 sm:$0xff]   ;;  %v18297_v13 = vld [vmem:[%s25023_s2 + $0xde8] ss:$16 sps:$4 sm:$0xff]  }
 0x49f   : > { %11358 = vmatpush1.bf16.msra.mxu0 %v18216_v15  ;;  %11891 = vmatpush1.bf16.msra.mxu1 %v18219_v16  ;;  %v18304_v15 = vld [vmem:[%s25023_s2 + $0xe04] ss:$16 sps:$4 sm:$0xff]   ;;  %v18307_v16 = vld [vmem:[%s25023_s2 + $0xe0c] ss:$16 sps:$4 sm:$0xff]  }
 0x4a0   : > { %11359 = vmatprep.subr.bf16.mxu0 %v18224_v17  ;;  %11892 = vmatprep.subr.bf16.mxu1 %v18227_v19  ;;  %v15114_v17 = vcombine.low %v22958_v5, %v22958_v5  ;;  %v23157_v19 = vld [vmem:[%s21716_s28 + $0x38] sm:$0xff] }
 0x4a1   : > { %v18313_v5 = vld [vmem:[%s25023_s2 + $0xe2c] ss:$16 sps:$4 sm:$0xff]  }
 0x4a3   : > { %11360 = vmatpush1.bf16.msra.mxu0 %v18222_v14  ;;  %11893 = vmatpush1.bf16.msra.mxu1 %v18225_v20  ;;  %v18302_v14 = vld [vmem:[%s25023_s2 + $0xe00] ss:$16 sps:$4 sm:$0xff]   ;;  %v18305_v20 = vld [vmem:[%s25023_s2 + $0xe08] ss:$16 sps:$4 sm:$0xff]  }
 0x4a4   : > { %11361 = vmatprep.subr.bf16.mxu0 %v18230_v11  ;;  %11894 = vmatprep.subr.bf16.mxu1 %v18233_v22  ;;  %v18310_v11 = vld [vmem:[%s25023_s2 + $0xe24] ss:$16 sps:$4 sm:$0xff]   ;;  %v15117_v22 = vcombine.high %v23157_v19, %v23157_v19 }
 0x4a7   : > { %11362 = vmatpush1.bf16.msra.mxu0 %v18228_v23  ;;  %11895 = vmatpush1.bf16.msra.mxu1 %v18231_v18  ;;  %v18308_v23 = vld [vmem:[%s25023_s2 + $0xe20] ss:$16 sps:$4 sm:$0xff]   ;;  %v18311_v18 = vld [vmem:[%s25023_s2 + $0xe28] ss:$16 sps:$4 sm:$0xff]  }
 0x4a8   : > { %11363 = vmatprep.subr.bf16.mxu0 %v18236_v25  ;;  %11896 = vmatprep.subr.bf16.mxu1 %v18239_v26  ;;  %v18316_v25 = vld [vmem:[%s25023_s2 + $0xe44] ss:$16 sps:$4 sm:$0xff]   ;;  %v18319_v26 = vld [vmem:[%s25023_s2 + $0xe4c] ss:$16 sps:$4 sm:$0xff]  }
 0x4ab   : > { %11364 = vmatpush1.bf16.msra.mxu0 %v18234_v21  ;;  %11897 = vmatpush1.bf16.msra.mxu1 %v18237_v24  ;;  %v18314_v21 = vld [vmem:[%s25023_s2 + $0xe40] ss:$16 sps:$4 sm:$0xff]   ;;  %v18317_v24 = vld [vmem:[%s25023_s2 + $0xe48] ss:$16 sps:$4 sm:$0xff]  }
 0x4ac   : > { %11365 = vmatprep.subr.bf16.mxu0 %v18242_v27  ;;  %11898 = vmatprep.subr.bf16.mxu1 %v18245_v34  ;;  %v18322_v27 = vld [vmem:[%s25023_s2 + $0xe64] ss:$16 sps:$4 sm:$0xff]   ;;  %v18325_v34 = vld [vmem:[%s25023_s2 + $0xe6c] ss:$16 sps:$4 sm:$0xff]  }
 0x4af   : > { %11366 = vmatpush1.bf16.msra.mxu0 %v18240_v35  ;;  %11899 = vmatpush1.bf16.msra.mxu1 %v18243_v30  ;;  %v18320_v35 = vld [vmem:[%s25023_s2 + $0xe60] ss:$16 sps:$4 sm:$0xff]   ;;  %v18323_v30 = vld [vmem:[%s25023_s2 + $0xe68] ss:$16 sps:$4 sm:$0xff]  }
 0x4b0   : > { %11367 = vmatprep.subr.bf16.mxu0 %v18248_v37  ;;  %11900 = vmatprep.subr.bf16.mxu1 %v18251_v38  ;;  %v18328_v37 = vld [vmem:[%s25023_s2 + $0xe84] ss:$16 sps:$4 sm:$0xff]   ;;  %v18331_v38 = vld [vmem:[%s25023_s2 + $0xe8c] ss:$16 sps:$4 sm:$0xff]  }
 0x4b3   : > { %11368 = vmatpush1.bf16.msra.mxu0 %v18246_v39  ;;  %11901 = vmatpush1.bf16.msra.mxu1 %v18249_v40  ;;  %v18326_v39 = vld [vmem:[%s25023_s2 + $0xe80] ss:$16 sps:$4 sm:$0xff]   ;;  %v18329_v40 = vld [vmem:[%s25023_s2 + $0xe88] ss:$16 sps:$4 sm:$0xff]  }
 0x4b4   : > { %11369 = vmatprep.subr.bf16.mxu0 %v18254_v41  ;;  %11902 = vmatprep.subr.bf16.mxu1 %v18257_v36  ;;  %v18334_v41 = vld [vmem:[%s25023_s2 + $0xea4] ss:$16 sps:$4 sm:$0xff]   ;;  %v18337_v36 = vld [vmem:[%s25023_s2 + $0xeac] ss:$16 sps:$4 sm:$0xff]  }
 0x4b7   : > { %11370 = vmatpush1.bf16.msra.mxu0 %v18252_v60  ;;  %11903 = vmatpush1.bf16.msra.mxu1 %v18255_v42  ;;  %v18332_v60 = vld [vmem:[%s25023_s2 + $0xea0] ss:$16 sps:$4 sm:$0xff]   ;;  %v18335_v42 = vld [vmem:[%s25023_s2 + $0xea8] ss:$16 sps:$4 sm:$0xff]  }
 0x4b8   : > { %11371 = vmatprep.subr.bf16.mxu0 %v18260_v45  ;;  %11904 = vmatprep.subr.bf16.mxu1 %v18263_v47  ;;  %v18340_v45 = vld [vmem:[%s25023_s2 + $0xec4] ss:$16 sps:$4 sm:$0xff]   ;;  %v18343_v47 = vld [vmem:[%s25023_s2 + $0xecc] ss:$16 sps:$4 sm:$0xff]  }
 0x4bb   : > { %11372 = vmatpush1.bf16.msra.mxu0 %v18258_v50  ;;  %11905 = vmatpush1.bf16.msra.mxu1 %v18261_v51  ;;  %v18338_v50 = vld [vmem:[%s25023_s2 + $0xec0] ss:$16 sps:$4 sm:$0xff]   ;;  %v18341_v51 = vld [vmem:[%s25023_s2 + $0xec8] ss:$16 sps:$4 sm:$0xff]  }
 0x4bc   : > { %11373 = vmatprep.subr.bf16.mxu0 %v18266_v52  ;;  %11906 = vmatprep.subr.bf16.mxu1 %v18269_v53  ;;  %v18346_v52 = vld [vmem:[%s25023_s2 + $0xee4] ss:$16 sps:$4 sm:$0xff]   ;;  %v18349_v53 = vld [vmem:[%s25023_s2 + $0xeec] ss:$16 sps:$4 sm:$0xff]  }
 0x4bf   : > { %11374 = vmatpush1.bf16.msra.mxu0 %v18264_v54  ;;  %11907 = vmatpush1.bf16.msra.mxu1 %v18267_v57  ;;  %v18344_v54 = vld [vmem:[%s25023_s2 + $0xee0] ss:$16 sps:$4 sm:$0xff]   ;;  %v18347_v57 = vld [vmem:[%s25023_s2 + $0xee8] ss:$16 sps:$4 sm:$0xff]  }
 0x4c0   : > { %11375 = vmatprep.subr.bf16.mxu0 %v18272_v58  ;;  %11908 = vmatprep.subr.bf16.mxu1 %v18275_v59  ;;  %v18352_v58 = vld [vmem:[%s25023_s2 + $0xf04] ss:$16 sps:$4 sm:$0xff]   ;;  %v18355_v59 = vld [vmem:[%s25023_s2 + $0xf0c] ss:$16 sps:$4 sm:$0xff]  }
 0x4c3   : > { %11376 = vmatpush1.bf16.msra.mxu0 %v18270_v33  ;;  %11909 = vmatpush1.bf16.msra.mxu1 %v18273_v61  ;;  %v18350_v33 = vld [vmem:[%s25023_s2 + $0xf00] ss:$16 sps:$4 sm:$0xff]   ;;  %v18353_v61 = vld [vmem:[%s25023_s2 + $0xf08] ss:$16 sps:$4 sm:$0xff]  }
 0x4c4   : > { %11377 = vmatprep.subr.bf16.mxu0 %v18278_v62  ;;  %11910 = vmatprep.subr.bf16.mxu1 %v18281_v63  ;;  %v18358_v62 = vld [vmem:[%s25023_s2 + $0xf24] ss:$16 sps:$4 sm:$0xff]   ;;  %v18361_v63 = vld [vmem:[%s25023_s2 + $0xf2c] ss:$16 sps:$4 sm:$0xff]  }
 0x4c7   : > { %11378 = vmatpush1.bf16.msra.mxu0 %v18276_v0  ;;  %11911 = vmatpush1.bf16.msra.mxu1 %v18279_v1  ;;  %v18356_v0 = vld [vmem:[%s25023_s2 + $0xf20] ss:$16 sps:$4 sm:$0xff]   ;;  %v18359_v1 = vld [vmem:[%s25023_s2 + $0xf28] ss:$16 sps:$4 sm:$0xff]  }
 0x4c8   : > { %11379 = vmatprep.subr.bf16.mxu0 %v18284_v2  ;;  %11912 = vmatprep.subr.bf16.mxu1 %v18287_v3  ;;  %v18364_v2 = vld [vmem:[%s25023_s2 + $0xf44] ss:$16 sps:$4 sm:$0xff]   ;;  %v18367_v3 = vld [vmem:[%s25023_s2 + $0xf4c] ss:$16 sps:$4 sm:$0xff]  }
 0x4cb   : > { %11380 = vmatpush1.bf16.msra.mxu0 %v18282_v4  ;;  %11913 = vmatpush1.bf16.msra.mxu1 %v18285_v6  ;;  %v18362_v4 = vld [vmem:[%s25023_s2 + $0xf40] ss:$16 sps:$4 sm:$0xff]   ;;  %v18365_v6 = vld [vmem:[%s25023_s2 + $0xf48] ss:$16 sps:$4 sm:$0xff]  }
 0x4cc   : > { %11381 = vmatprep.subr.bf16.mxu0 %v18290_v7  ;;  %11914 = vmatprep.subr.bf16.mxu1 %v18293_v8  ;;  %v18370_v7 = vld [vmem:[%s25023_s2 + $0xf64] ss:$16 sps:$4 sm:$0xff]   ;;  %v18373_v8 = vld [vmem:[%s25023_s2 + $0xf6c] ss:$16 sps:$4 sm:$0xff]  }
 0x4cf   : > { %11382 = vmatpush1.bf16.msra.mxu0 %v18288_v55  ;;  %11915 = vmatpush1.bf16.msra.mxu1 %v18291_v56  ;;  %v18368_v55 = vld [vmem:[%s25023_s2 + $0xf60] ss:$16 sps:$4 sm:$0xff]   ;;  %v18371_v56 = vld [vmem:[%s25023_s2 + $0xf68] ss:$16 sps:$4 sm:$0xff]  }
 0x4d0   : > { %11383 = vmatprep.subr.bf16.mxu0 %v18296_v9  ;;  %11916 = vmatprep.subr.bf16.mxu1 %v18299_v10  ;;  %v18376_v9 = vld [vmem:[%s25023_s2 + $0xf84] ss:$16 sps:$4 sm:$0xff]   ;;  %v18379_v10 = vld [vmem:[%s25023_s2 + $0xf8c] ss:$16 sps:$4 sm:$0xff]  }
 0x4d3   : > { %11384 = vmatpush1.bf16.msra.mxu0 %v18294_v12  ;;  %11917 = vmatpush1.bf16.msra.mxu1 %v18297_v13  ;;  %v18374_v12 = vld [vmem:[%s25023_s2 + $0xf80] ss:$16 sps:$4 sm:$0xff]   ;;  %v18377_v13 = vld [vmem:[%s25023_s2 + $0xf88] ss:$16 sps:$4 sm:$0xff]  }
 0x4d4   : > { %11394 = vmatprep.subr.bf16.mxu0 %v18304_v15  ;;  %11927 = vmatprep.subr.bf16.mxu1 %v18307_v16  ;;  %v18382_v15 = vld [vmem:[%s25023_s2 + $0xfa4] ss:$16 sps:$4 sm:$0xff]   ;;  %v18385_v16 = vld [vmem:[%s25023_s2 + $0xfac] ss:$16 sps:$4 sm:$0xff]  }
 0x4d6   : > { %11386 = vmatmul.mubr.bf16.vlgmr.msra.gmra.mrb[4].mxu0 %v15114_v17  ;;  %11919 = vmatmul.mubr.bf16.vlgmr.msra.gmra.mrb[4].mxu1 %v15114_v17  ;;  %v18380_v17 = vld [vmem:[%s25023_s2 + $0xfa0] ss:$16 sps:$4 sm:$0xff]  }
 0x4d7   : > { %11395 = vmatpush1.bf16.msra.mxu0 %v18302_v14  ;;  %11928 = vmatpush1.bf16.msra.mxu1 %v18305_v20  ;;  %v18383_v14 = vld [vmem:[%s25023_s2 + $0xfa8] ss:$16 sps:$4 sm:$0xff]   ;;  %v18388_v20 = vld [vmem:[%s25023_s2 + $0xfc4] ss:$16 sps:$4 sm:$0xff]  }
 0x4d8   : > { %11396 = vmatprep.subr.bf16.mxu0 %v18310_v11  ;;  %11929 = vmatprep.subr.bf16.mxu1 %v18313_v5  ;;  %v18391_v11 = vld [vmem:[%s25023_s2 + $0xfcc] ss:$16 sps:$4 sm:$0xff]   ;;  %v18386_v5 = vld [vmem:[%s25023_s2 + $0xfc0] ss:$16 sps:$4 sm:$0xff]  }
 0x4d9   : > { %11426 = vmatprep.mubr.bf16.mxu0 %v15117_v22  ;;  %11959 = vmatprep.mubr.bf16.mxu1 %v15117_v22  ;;  %v18389_v22 = vld [vmem:[%s25023_s2 + $0xfc8] ss:$16 sps:$4 sm:$0xff]  }
 0x4db   : > { %11397 = vmatpush1.bf16.msra.mxu0 %v18308_v23  ;;  %11930 = vmatpush1.bf16.msra.mxu1 %v18311_v18  ;;  %v18394_v23 = vld [vmem:[%s25023_s2 + $0xfe4] ss:$16 sps:$4 sm:$0xff]   ;;  %v18397_v18 = vld [vmem:[%s25023_s2 + $0xfec] ss:$16 sps:$4 sm:$0xff]  }
 0x4dc   : > { %11398 = vmatprep.subr.bf16.mxu0 %v18316_v25  ;;  %11931 = vmatprep.subr.bf16.mxu1 %v18319_v26  ;;  %v18392_v25 = vld [vmem:[%s25023_s2 + $0xfe0] ss:$16 sps:$4 sm:$0xff]   ;;  %v18395_v26 = vld [vmem:[%s25023_s2 + $0xfe8] ss:$16 sps:$4 sm:$0xff]  }
 0x4df   : > { %11399 = vmatpush1.bf16.msra.mxu0 %v18314_v21  ;;  %11932 = vmatpush1.bf16.msra.mxu1 %v18317_v24  ;;  %v18402_v21 = vld [vmem:[%s25023_s2 + $0x1004] ss:$16 sps:$4 sm:$0xff]   ;;  %v18405_v24 = vld [vmem:[%s25023_s2 + $0x100c] ss:$16 sps:$4 sm:$0xff]  }
 0x4e0   : > { %11400 = vmatprep.subr.bf16.mxu0 %v18322_v27  ;;  %11933 = vmatprep.subr.bf16.mxu1 %v18325_v34  ;;  %v15116_v27 = vcombine.low %v23157_v19, %v23157_v19  ;;  %v23356_v34 = vld [vmem:[%s21716_s28 + $0x40] sm:$0xff]  ;;  %v18411_v19 = vld [vmem:[%s25023_s2 + $0x102c] ss:$16 sps:$4 sm:$0xff]  }
 0x4e3   : > { %11401 = vmatpush1.bf16.msra.mxu0 %v18320_v35  ;;  %11934 = vmatpush1.bf16.msra.mxu1 %v18323_v30  ;;  %v18400_v35 = vld [vmem:[%s25023_s2 + $0x1000] ss:$16 sps:$4 sm:$0xff]   ;;  %v18403_v30 = vld [vmem:[%s25023_s2 + $0x1008] ss:$16 sps:$4 sm:$0xff]  }
 0x4e4   : > { %11402 = vmatprep.subr.bf16.mxu0 %v18328_v37  ;;  %11935 = vmatprep.subr.bf16.mxu1 %v18331_v38  ;;  %v18408_v37 = vld [vmem:[%s25023_s2 + $0x1024] ss:$16 sps:$4 sm:$0xff]   ;;  %v15119_v38 = vcombine.high %v23356_v34, %v23356_v34 }
 0x4e7   : > { %11403 = vmatpush1.bf16.msra.mxu0 %v18326_v39  ;;  %11936 = vmatpush1.bf16.msra.mxu1 %v18329_v40  ;;  %v18406_v39 = vld [vmem:[%s25023_s2 + $0x1020] ss:$16 sps:$4 sm:$0xff]   ;;  %v18409_v40 = vld [vmem:[%s25023_s2 + $0x1028] ss:$16 sps:$4 sm:$0xff]  }
 0x4e8   : > { %11404 = vmatprep.subr.bf16.mxu0 %v18334_v41  ;;  %11937 = vmatprep.subr.bf16.mxu1 %v18337_v36  ;;  %v18414_v41 = vld [vmem:[%s25023_s2 + $0x1044] ss:$16 sps:$4 sm:$0xff]   ;;  %v18417_v36 = vld [vmem:[%s25023_s2 + $0x104c] ss:$16 sps:$4 sm:$0xff]  }
 0x4eb   : > { %11405 = vmatpush1.bf16.msra.mxu0 %v18332_v60  ;;  %11938 = vmatpush1.bf16.msra.mxu1 %v18335_v42  ;;  %v18412_v60 = vld [vmem:[%s25023_s2 + $0x1040] ss:$16 sps:$4 sm:$0xff]   ;;  %v18415_v42 = vld [vmem:[%s25023_s2 + $0x1048] ss:$16 sps:$4 sm:$0xff]  }
 0x4ec   : > { %11406 = vmatprep.subr.bf16.mxu0 %v18340_v45  ;;  %11939 = vmatprep.subr.bf16.mxu1 %v18343_v47  ;;  %v18420_v45 = vld [vmem:[%s25023_s2 + $0x1064] ss:$16 sps:$4 sm:$0xff]   ;;  %v18423_v47 = vld [vmem:[%s25023_s2 + $0x106c] ss:$16 sps:$4 sm:$0xff]  }
 0x4ef   : > { %11407 = vmatpush1.bf16.msra.mxu0 %v18338_v50  ;;  %11940 = vmatpush1.bf16.msra.mxu1 %v18341_v51  ;;  %v18418_v50 = vld [vmem:[%s25023_s2 + $0x1060] ss:$16 sps:$4 sm:$0xff]   ;;  %v18421_v51 = vld [vmem:[%s25023_s2 + $0x1068] ss:$16 sps:$4 sm:$0xff]  }
 0x4f0   : > { %11408 = vmatprep.subr.bf16.mxu0 %v18346_v52  ;;  %11941 = vmatprep.subr.bf16.mxu1 %v18349_v53  ;;  %v18426_v52 = vld [vmem:[%s25023_s2 + $0x1084] ss:$16 sps:$4 sm:$0xff]   ;;  %v18429_v53 = vld [vmem:[%s25023_s2 + $0x108c] ss:$16 sps:$4 sm:$0xff]  }
 0x4f3   : > { %11409 = vmatpush1.bf16.msra.mxu0 %v18344_v54  ;;  %11942 = vmatpush1.bf16.msra.mxu1 %v18347_v57  ;;  %v18424_v54 = vld [vmem:[%s25023_s2 + $0x1080] ss:$16 sps:$4 sm:$0xff]   ;;  %v18427_v57 = vld [vmem:[%s25023_s2 + $0x1088] ss:$16 sps:$4 sm:$0xff]  }
 0x4f4   : > { %11410 = vmatprep.subr.bf16.mxu0 %v18352_v58  ;;  %11943 = vmatprep.subr.bf16.mxu1 %v18355_v59  ;;  %v18432_v58 = vld [vmem:[%s25023_s2 + $0x10a4] ss:$16 sps:$4 sm:$0xff]   ;;  %v18435_v59 = vld [vmem:[%s25023_s2 + $0x10ac] ss:$16 sps:$4 sm:$0xff]  }
 0x4f7   : > { %11411 = vmatpush1.bf16.msra.mxu0 %v18350_v33  ;;  %11944 = vmatpush1.bf16.msra.mxu1 %v18353_v61  ;;  %v18430_v33 = vld [vmem:[%s25023_s2 + $0x10a0] ss:$16 sps:$4 sm:$0xff]   ;;  %v18433_v61 = vld [vmem:[%s25023_s2 + $0x10a8] ss:$16 sps:$4 sm:$0xff]  }
 0x4f8   : > { %11412 = vmatprep.subr.bf16.mxu0 %v18358_v62  ;;  %11945 = vmatprep.subr.bf16.mxu1 %v18361_v63  ;;  %v18438_v62 = vld [vmem:[%s25023_s2 + $0x10c4] ss:$16 sps:$4 sm:$0xff]   ;;  %v18441_v63 = vld [vmem:[%s25023_s2 + $0x10cc] ss:$16 sps:$4 sm:$0xff]  }
 0x4fb   : > { %11413 = vmatpush1.bf16.msra.mxu0 %v18356_v0  ;;  %11946 = vmatpush1.bf16.msra.mxu1 %v18359_v1  ;;  %v18436_v0 = vld [vmem:[%s25023_s2 + $0x10c0] ss:$16 sps:$4 sm:$0xff]   ;;  %v18439_v1 = vld [vmem:[%s25023_s2 + $0x10c8] ss:$16 sps:$4 sm:$0xff]  }
 0x4fc   : > { %11414 = vmatprep.subr.bf16.mxu0 %v18364_v2  ;;  %11947 = vmatprep.subr.bf16.mxu1 %v18367_v3  ;;  %v18444_v2 = vld [vmem:[%s25023_s2 + $0x10e4] ss:$16 sps:$4 sm:$0xff]   ;;  %v18447_v3 = vld [vmem:[%s25023_s2 + $0x10ec] ss:$16 sps:$4 sm:$0xff]  }
 0x4ff   : > { %11415 = vmatpush1.bf16.msra.mxu0 %v18362_v4  ;;  %11948 = vmatpush1.bf16.msra.mxu1 %v18365_v6  ;;  %v18442_v4 = vld [vmem:[%s25023_s2 + $0x10e0] ss:$16 sps:$4 sm:$0xff]   ;;  %v18445_v6 = vld [vmem:[%s25023_s2 + $0x10e8] ss:$16 sps:$4 sm:$0xff]  }
 0x500   : > { %11416 = vmatprep.subr.bf16.mxu0 %v18370_v7  ;;  %11949 = vmatprep.subr.bf16.mxu1 %v18373_v8  ;;  %v18450_v7 = vld [vmem:[%s25023_s2 + $0x1104] ss:$16 sps:$4 sm:$0xff]   ;;  %v18453_v8 = vld [vmem:[%s25023_s2 + $0x110c] ss:$16 sps:$4 sm:$0xff]  }
 0x503   : > { %11417 = vmatpush1.bf16.msra.mxu0 %v18368_v55  ;;  %11950 = vmatpush1.bf16.msra.mxu1 %v18371_v56  ;;  %v18448_v55 = vld [vmem:[%s25023_s2 + $0x1100] ss:$16 sps:$4 sm:$0xff]   ;;  %v18451_v56 = vld [vmem:[%s25023_s2 + $0x1108] ss:$16 sps:$4 sm:$0xff]  }
 0x504   : > { %11418 = vmatprep.subr.bf16.mxu0 %v18376_v9  ;;  %11951 = vmatprep.subr.bf16.mxu1 %v18379_v10  ;;  %v18456_v9 = vld [vmem:[%s25023_s2 + $0x1124] ss:$16 sps:$4 sm:$0xff]   ;;  %v18459_v10 = vld [vmem:[%s25023_s2 + $0x112c] ss:$16 sps:$4 sm:$0xff]  }
 0x507   : > { %11419 = vmatpush1.bf16.msra.mxu0 %v18374_v12  ;;  %11952 = vmatpush1.bf16.msra.mxu1 %v18377_v13  ;;  %v18454_v12 = vld [vmem:[%s25023_s2 + $0x1120] ss:$16 sps:$4 sm:$0xff]   ;;  %v18457_v13 = vld [vmem:[%s25023_s2 + $0x1128] ss:$16 sps:$4 sm:$0xff]  }
 0x508   : > { %11420 = vmatprep.subr.bf16.mxu0 %v18382_v15  ;;  %11953 = vmatprep.subr.bf16.mxu1 %v18385_v16  ;;  %v18462_v15 = vld [vmem:[%s25023_s2 + $0x1144] ss:$16 sps:$4 sm:$0xff]   ;;  %v18465_v16 = vld [vmem:[%s25023_s2 + $0x114c] ss:$16 sps:$4 sm:$0xff]  }
 0x50b   : > { %11421 = vmatpush1.bf16.msra.mxu0 %v18380_v17  ;;  %11954 = vmatpush1.bf16.msra.mxu1 %v18383_v14  ;;  %v18460_v17 = vld [vmem:[%s25023_s2 + $0x1140] ss:$16 sps:$4 sm:$0xff]   ;;  %v18463_v14 = vld [vmem:[%s25023_s2 + $0x1148] ss:$16 sps:$4 sm:$0xff]  }
 0x50c   : > { %11422 = vmatprep.subr.bf16.mxu0 %v18388_v20  ;;  %11955 = vmatprep.subr.bf16.mxu1 %v18391_v11  ;;  %v18468_v20 = vld [vmem:[%s25023_s2 + $0x1164] ss:$16 sps:$4 sm:$0xff]   ;;  %v18471_v11 = vld [vmem:[%s25023_s2 + $0x116c] ss:$16 sps:$4 sm:$0xff]  }
 0x50f   : > { %11423 = vmatpush1.bf16.msra.mxu0 %v18386_v5  ;;  %11956 = vmatpush1.bf16.msra.mxu1 %v18389_v22  ;;  %v18466_v5 = vld [vmem:[%s25023_s2 + $0x1160] ss:$16 sps:$4 sm:$0xff]   ;;  %v18469_v22 = vld [vmem:[%s25023_s2 + $0x1168] ss:$16 sps:$4 sm:$0xff]  }
 0x510   : > { %11424 = vmatprep.subr.bf16.mxu0 %v18394_v23  ;;  %11957 = vmatprep.subr.bf16.mxu1 %v18397_v18  ;;  %v18474_v23 = vld [vmem:[%s25023_s2 + $0x1184] ss:$16 sps:$4 sm:$0xff]   ;;  %v18477_v18 = vld [vmem:[%s25023_s2 + $0x118c] ss:$16 sps:$4 sm:$0xff]  }
 0x513   : > { %11425 = vmatpush1.bf16.msra.mxu0 %v18392_v25  ;;  %11958 = vmatpush1.bf16.msra.mxu1 %v18395_v26  ;;  %v18472_v25 = vld [vmem:[%s25023_s2 + $0x1180] ss:$16 sps:$4 sm:$0xff]   ;;  %v18475_v26 = vld [vmem:[%s25023_s2 + $0x1188] ss:$16 sps:$4 sm:$0xff]  }
 0x514   : > { %11435 = vmatprep.subr.bf16.mxu0 %v18402_v21  ;;  %11968 = vmatprep.subr.bf16.mxu1 %v18405_v24  ;;  %v18480_v21 = vld [vmem:[%s25023_s2 + $0x11a4] ss:$16 sps:$4 sm:$0xff]   ;;  %v18483_v24 = vld [vmem:[%s25023_s2 + $0x11ac] ss:$16 sps:$4 sm:$0xff]  }
 0x516   : > { %11427 = vmatmul.mubr.bf16.vlgmr.msra.gmra.mrb[4].mxu0 %v15116_v27  ;;  %11960 = vmatmul.mubr.bf16.vlgmr.msra.gmra.mrb[4].mxu1 %v15116_v27  ;;  %v18478_v27 = vld [vmem:[%s25023_s2 + $0x11a0] ss:$16 sps:$4 sm:$0xff]  }
 0x517   : > { %11436 = vmatpush1.bf16.msra.mxu0 %v18400_v35  ;;  %11969 = vmatpush1.bf16.msra.mxu1 %v18403_v30  ;;  %v18481_v35 = vld [vmem:[%s25023_s2 + $0x11a8] ss:$16 sps:$4 sm:$0xff]   ;;  %v18486_v30 = vld [vmem:[%s25023_s2 + $0x11c4] ss:$16 sps:$4 sm:$0xff]  }
 0x518   : > { %11437 = vmatprep.subr.bf16.mxu0 %v18408_v37  ;;  %11970 = vmatprep.subr.bf16.mxu1 %v18411_v19  ;;  %v18489_v37 = vld [vmem:[%s25023_s2 + $0x11cc] ss:$16 sps:$4 sm:$0xff]   ;;  %v18484_v19 = vld [vmem:[%s25023_s2 + $0x11c0] ss:$16 sps:$4 sm:$0xff]  }
 0x519   : > { %11467 = vmatprep.mubr.bf16.mxu0 %v15119_v38  ;;  %12000 = vmatprep.mubr.bf16.mxu1 %v15119_v38  ;;  %v18487_v38 = vld [vmem:[%s25023_s2 + $0x11c8] ss:$16 sps:$4 sm:$0xff]  }
 0x51b   : > { %11438 = vmatpush1.bf16.msra.mxu0 %v18406_v39  ;;  %11971 = vmatpush1.bf16.msra.mxu1 %v18409_v40  ;;  %v18492_v39 = vld [vmem:[%s25023_s2 + $0x11e4] ss:$16 sps:$4 sm:$0xff]   ;;  %v18495_v40 = vld [vmem:[%s25023_s2 + $0x11ec] ss:$16 sps:$4 sm:$0xff]  }
 0x51c   : > { %11439 = vmatprep.subr.bf16.mxu0 %v18414_v41  ;;  %11972 = vmatprep.subr.bf16.mxu1 %v18417_v36  ;;  %v18490_v41 = vld [vmem:[%s25023_s2 + $0x11e0] ss:$16 sps:$4 sm:$0xff]   ;;  %v18493_v36 = vld [vmem:[%s25023_s2 + $0x11e8] ss:$16 sps:$4 sm:$0xff]  }
 0x51f   : > { %11440 = vmatpush1.bf16.msra.mxu0 %v18412_v60  ;;  %11973 = vmatpush1.bf16.msra.mxu1 %v18415_v42  ;;  %v18500_v60 = vld [vmem:[%s25023_s2 + $0x1204] ss:$16 sps:$4 sm:$0xff]   ;;  %v18503_v42 = vld [vmem:[%s25023_s2 + $0x120c] ss:$16 sps:$4 sm:$0xff]  }
 0x520   : > { %11441 = vmatprep.subr.bf16.mxu0 %v18420_v45  ;;  %11974 = vmatprep.subr.bf16.mxu1 %v18423_v47  ;;  %v15118_v45 = vcombine.low %v23356_v34, %v23356_v34  ;;  %v23555_v47 = vld [vmem:[%s21716_s28 + $0x48] sm:$0xff] }
 0x521   : > { %v18509_v34 = vld [vmem:[%s25023_s2 + $0x122c] ss:$16 sps:$4 sm:$0xff]  }
 0x523   : > { %11442 = vmatpush1.bf16.msra.mxu0 %v18418_v50  ;;  %11975 = vmatpush1.bf16.msra.mxu1 %v18421_v51  ;;  %v18498_v50 = vld [vmem:[%s25023_s2 + $0x1200] ss:$16 sps:$4 sm:$0xff]   ;;  %v18501_v51 = vld [vmem:[%s25023_s2 + $0x1208] ss:$16 sps:$4 sm:$0xff]  }
 0x524   : > { %11443 = vmatprep.subr.bf16.mxu0 %v18426_v52  ;;  %11976 = vmatprep.subr.bf16.mxu1 %v18429_v53  ;;  %v18506_v52 = vld [vmem:[%s25023_s2 + $0x1224] ss:$16 sps:$4 sm:$0xff]   ;;  %v15121_v53 = vcombine.high %v23555_v47, %v23555_v47 }
 0x527   : > { %11444 = vmatpush1.bf16.msra.mxu0 %v18424_v54  ;;  %11977 = vmatpush1.bf16.msra.mxu1 %v18427_v57  ;;  %v18504_v54 = vld [vmem:[%s25023_s2 + $0x1220] ss:$16 sps:$4 sm:$0xff]   ;;  %v18507_v57 = vld [vmem:[%s25023_s2 + $0x1228] ss:$16 sps:$4 sm:$0xff]  }
 0x528   : > { %11445 = vmatprep.subr.bf16.mxu0 %v18432_v58  ;;  %11978 = vmatprep.subr.bf16.mxu1 %v18435_v59  ;;  %v18512_v58 = vld [vmem:[%s25023_s2 + $0x1244] ss:$16 sps:$4 sm:$0xff]   ;;  %v18515_v59 = vld [vmem:[%s25023_s2 + $0x124c] ss:$16 sps:$4 sm:$0xff]  }
 0x52b   : > { %11446 = vmatpush1.bf16.msra.mxu0 %v18430_v33  ;;  %11979 = vmatpush1.bf16.msra.mxu1 %v18433_v61  ;;  %v18510_v33 = vld [vmem:[%s25023_s2 + $0x1240] ss:$16 sps:$4 sm:$0xff]   ;;  %v18513_v61 = vld [vmem:[%s25023_s2 + $0x1248] ss:$16 sps:$4 sm:$0xff]  }
 0x52c   : > { %11447 = vmatprep.subr.bf16.mxu0 %v18438_v62  ;;  %11980 = vmatprep.subr.bf16.mxu1 %v18441_v63  ;;  %v18518_v62 = vld [vmem:[%s25023_s2 + $0x1264] ss:$16 sps:$4 sm:$0xff]   ;;  %v18521_v63 = vld [vmem:[%s25023_s2 + $0x126c] ss:$16 sps:$4 sm:$0xff]  }
 0x52f   : > { %11448 = vmatpush1.bf16.msra.mxu0 %v18436_v0  ;;  %11981 = vmatpush1.bf16.msra.mxu1 %v18439_v1  ;;  %v18516_v0 = vld [vmem:[%s25023_s2 + $0x1260] ss:$16 sps:$4 sm:$0xff]   ;;  %v18519_v1 = vld [vmem:[%s25023_s2 + $0x1268] ss:$16 sps:$4 sm:$0xff]  }
 0x530   : > { %11449 = vmatprep.subr.bf16.mxu0 %v18444_v2  ;;  %11982 = vmatprep.subr.bf16.mxu1 %v18447_v3  ;;  %v18524_v2 = vld [vmem:[%s25023_s2 + $0x1284] ss:$16 sps:$4 sm:$0xff]   ;;  %v18527_v3 = vld [vmem:[%s25023_s2 + $0x128c] ss:$16 sps:$4 sm:$0xff]  }
 0x533   : > { %11450 = vmatpush1.bf16.msra.mxu0 %v18442_v4  ;;  %11983 = vmatpush1.bf16.msra.mxu1 %v18445_v6  ;;  %v18522_v4 = vld [vmem:[%s25023_s2 + $0x1280] ss:$16 sps:$4 sm:$0xff]   ;;  %v18525_v6 = vld [vmem:[%s25023_s2 + $0x1288] ss:$16 sps:$4 sm:$0xff]  }
 0x534   : > { %11451 = vmatprep.subr.bf16.mxu0 %v18450_v7  ;;  %11984 = vmatprep.subr.bf16.mxu1 %v18453_v8  ;;  %v18530_v7 = vld [vmem:[%s25023_s2 + $0x12a4] ss:$16 sps:$4 sm:$0xff]   ;;  %v18533_v8 = vld [vmem:[%s25023_s2 + $0x12ac] ss:$16 sps:$4 sm:$0xff]  }
 0x537   : > { %11452 = vmatpush1.bf16.msra.mxu0 %v18448_v55  ;;  %11985 = vmatpush1.bf16.msra.mxu1 %v18451_v56  ;;  %v18528_v55 = vld [vmem:[%s25023_s2 + $0x12a0] ss:$16 sps:$4 sm:$0xff]   ;;  %v18531_v56 = vld [vmem:[%s25023_s2 + $0x12a8] ss:$16 sps:$4 sm:$0xff]  }
 0x538   : > { %11453 = vmatprep.subr.bf16.mxu0 %v18456_v9  ;;  %11986 = vmatprep.subr.bf16.mxu1 %v18459_v10  ;;  %v18536_v9 = vld [vmem:[%s25023_s2 + $0x12c4] ss:$16 sps:$4 sm:$0xff]   ;;  %v18539_v10 = vld [vmem:[%s25023_s2 + $0x12cc] ss:$16 sps:$4 sm:$0xff]  }
 0x53b   : > { %11454 = vmatpush1.bf16.msra.mxu0 %v18454_v12  ;;  %11987 = vmatpush1.bf16.msra.mxu1 %v18457_v13  ;;  %v18534_v12 = vld [vmem:[%s25023_s2 + $0x12c0] ss:$16 sps:$4 sm:$0xff]   ;;  %v18537_v13 = vld [vmem:[%s25023_s2 + $0x12c8] ss:$16 sps:$4 sm:$0xff]  }
 0x53c   : > { %11455 = vmatprep.subr.bf16.mxu0 %v18462_v15  ;;  %11988 = vmatprep.subr.bf16.mxu1 %v18465_v16  ;;  %v18542_v15 = vld [vmem:[%s25023_s2 + $0x12e4] ss:$16 sps:$4 sm:$0xff]   ;;  %v18545_v16 = vld [vmem:[%s25023_s2 + $0x12ec] ss:$16 sps:$4 sm:$0xff]  }
 0x53f   : > { %11456 = vmatpush1.bf16.msra.mxu0 %v18460_v17  ;;  %11989 = vmatpush1.bf16.msra.mxu1 %v18463_v14  ;;  %v18540_v17 = vld [vmem:[%s25023_s2 + $0x12e0] ss:$16 sps:$4 sm:$0xff]   ;;  %v18543_v14 = vld [vmem:[%s25023_s2 + $0x12e8] ss:$16 sps:$4 sm:$0xff]  }
 0x540   : > { %11457 = vmatprep.subr.bf16.mxu0 %v18468_v20  ;;  %11990 = vmatprep.subr.bf16.mxu1 %v18471_v11  ;;  %v18548_v20 = vld [vmem:[%s25023_s2 + $0x1304] ss:$16 sps:$4 sm:$0xff]   ;;  %v18551_v11 = vld [vmem:[%s25023_s2 + $0x130c] ss:$16 sps:$4 sm:$0xff]  }
 0x543   : > { %11458 = vmatpush1.bf16.msra.mxu0 %v18466_v5  ;;  %11991 = vmatpush1.bf16.msra.mxu1 %v18469_v22  ;;  %v18546_v5 = vld [vmem:[%s25023_s2 + $0x1300] ss:$16 sps:$4 sm:$0xff]   ;;  %v18549_v22 = vld [vmem:[%s25023_s2 + $0x1308] ss:$16 sps:$4 sm:$0xff]  }
 0x544   : > { %11459 = vmatprep.subr.bf16.mxu0 %v18474_v23  ;;  %11992 = vmatprep.subr.bf16.mxu1 %v18477_v18  ;;  %v18554_v23 = vld [vmem:[%s25023_s2 + $0x1324] ss:$16 sps:$4 sm:$0xff]   ;;  %v18557_v18 = vld [vmem:[%s25023_s2 + $0x132c] ss:$16 sps:$4 sm:$0xff]  }
 0x547   : > { %11460 = vmatpush1.bf16.msra.mxu0 %v18472_v25  ;;  %11993 = vmatpush1.bf16.msra.mxu1 %v18475_v26  ;;  %v18552_v25 = vld [vmem:[%s25023_s2 + $0x1320] ss:$16 sps:$4 sm:$0xff]   ;;  %v18555_v26 = vld [vmem:[%s25023_s2 + $0x1328] ss:$16 sps:$4 sm:$0xff]  }
 0x548   : > { %11461 = vmatprep.subr.bf16.mxu0 %v18480_v21  ;;  %11994 = vmatprep.subr.bf16.mxu1 %v18483_v24  ;;  %v18560_v21 = vld [vmem:[%s25023_s2 + $0x1344] ss:$16 sps:$4 sm:$0xff]   ;;  %v18563_v24 = vld [vmem:[%s25023_s2 + $0x134c] ss:$16 sps:$4 sm:$0xff]  }
 0x54b   : > { %11462 = vmatpush1.bf16.msra.mxu0 %v18478_v27  ;;  %11995 = vmatpush1.bf16.msra.mxu1 %v18481_v35  ;;  %v18558_v27 = vld [vmem:[%s25023_s2 + $0x1340] ss:$16 sps:$4 sm:$0xff]   ;;  %v18561_v35 = vld [vmem:[%s25023_s2 + $0x1348] ss:$16 sps:$4 sm:$0xff]  }
 0x54c   : > { %11463 = vmatprep.subr.bf16.mxu0 %v18486_v30  ;;  %11996 = vmatprep.subr.bf16.mxu1 %v18489_v37  ;;  %v18566_v30 = vld [vmem:[%s25023_s2 + $0x1364] ss:$16 sps:$4 sm:$0xff]   ;;  %v18569_v37 = vld [vmem:[%s25023_s2 + $0x136c] ss:$16 sps:$4 sm:$0xff]  }
 0x54f   : > { %11464 = vmatpush1.bf16.msra.mxu0 %v18484_v19  ;;  %11997 = vmatpush1.bf16.msra.mxu1 %v18487_v38  ;;  %v18564_v19 = vld [vmem:[%s25023_s2 + $0x1360] ss:$16 sps:$4 sm:$0xff]   ;;  %v18567_v38 = vld [vmem:[%s25023_s2 + $0x1368] ss:$16 sps:$4 sm:$0xff]  }
 0x550   : > { %11465 = vmatprep.subr.bf16.mxu0 %v18492_v39  ;;  %11998 = vmatprep.subr.bf16.mxu1 %v18495_v40  ;;  %v18572_v39 = vld [vmem:[%s25023_s2 + $0x1384] ss:$16 sps:$4 sm:$0xff]   ;;  %v18575_v40 = vld [vmem:[%s25023_s2 + $0x138c] ss:$16 sps:$4 sm:$0xff]  }
 0x553   : > { %11466 = vmatpush1.bf16.msra.mxu0 %v18490_v41  ;;  %11999 = vmatpush1.bf16.msra.mxu1 %v18493_v36  ;;  %v18570_v41 = vld [vmem:[%s25023_s2 + $0x1380] ss:$16 sps:$4 sm:$0xff]   ;;  %v18573_v36 = vld [vmem:[%s25023_s2 + $0x1388] ss:$16 sps:$4 sm:$0xff]  }
 0x554   : > { %11476 = vmatprep.subr.bf16.mxu0 %v18500_v60  ;;  %12009 = vmatprep.subr.bf16.mxu1 %v18503_v42  ;;  %v18578_v60 = vld [vmem:[%s25023_s2 + $0x13a4] ss:$16 sps:$4 sm:$0xff]   ;;  %v18581_v42 = vld [vmem:[%s25023_s2 + $0x13ac] ss:$16 sps:$4 sm:$0xff]  }
 0x556   : > { %11468 = vmatmul.mubr.bf16.vlgmr.msra.gmra.mrb[4].mxu0 %v15118_v45  ;;  %12001 = vmatmul.mubr.bf16.vlgmr.msra.gmra.mrb[4].mxu1 %v15118_v45  ;;  %v18576_v45 = vld [vmem:[%s25023_s2 + $0x13a0] ss:$16 sps:$4 sm:$0xff]  }
 0x557   : > { %11477 = vmatpush1.bf16.msra.mxu0 %v18498_v50  ;;  %12010 = vmatpush1.bf16.msra.mxu1 %v18501_v51  ;;  %v18579_v50 = vld [vmem:[%s25023_s2 + $0x13a8] ss:$16 sps:$4 sm:$0xff]   ;;  %v18584_v51 = vld [vmem:[%s25023_s2 + $0x13c4] ss:$16 sps:$4 sm:$0xff]  }
 0x558   : > { %11478 = vmatprep.subr.bf16.mxu0 %v18506_v52  ;;  %12011 = vmatprep.subr.bf16.mxu1 %v18509_v34  ;;  %v18587_v52 = vld [vmem:[%s25023_s2 + $0x13cc] ss:$16 sps:$4 sm:$0xff]   ;;  %v18582_v34 = vld [vmem:[%s25023_s2 + $0x13c0] ss:$16 sps:$4 sm:$0xff]  }
 0x559   : > { %11508 = vmatprep.mubr.bf16.mxu0 %v15121_v53  ;;  %12041 = vmatprep.mubr.bf16.mxu1 %v15121_v53  ;;  %v18585_v53 = vld [vmem:[%s25023_s2 + $0x13c8] ss:$16 sps:$4 sm:$0xff]  }
 0x55b   : > { %11479 = vmatpush1.bf16.msra.mxu0 %v18504_v54  ;;  %12012 = vmatpush1.bf16.msra.mxu1 %v18507_v57  ;;  %v18590_v54 = vld [vmem:[%s25023_s2 + $0x13e4] ss:$16 sps:$4 sm:$0xff]   ;;  %v18593_v57 = vld [vmem:[%s25023_s2 + $0x13ec] ss:$16 sps:$4 sm:$0xff]  }
 0x55c   : > { %11480 = vmatprep.subr.bf16.mxu0 %v18512_v58  ;;  %12013 = vmatprep.subr.bf16.mxu1 %v18515_v59  ;;  %v18588_v58 = vld [vmem:[%s25023_s2 + $0x13e0] ss:$16 sps:$4 sm:$0xff]   ;;  %v18591_v59 = vld [vmem:[%s25023_s2 + $0x13e8] ss:$16 sps:$4 sm:$0xff]  }
 0x55f   : > { %11481 = vmatpush1.bf16.msra.mxu0 %v18510_v33  ;;  %12014 = vmatpush1.bf16.msra.mxu1 %v18513_v61  ;;  %v18598_v33 = vld [vmem:[%s25023_s2 + $0x1404] ss:$16 sps:$4 sm:$0xff]   ;;  %v18601_v61 = vld [vmem:[%s25023_s2 + $0x140c] ss:$16 sps:$4 sm:$0xff]  }
 0x560   : > { %11482 = vmatprep.subr.bf16.mxu0 %v18518_v62  ;;  %12015 = vmatprep.subr.bf16.mxu1 %v18521_v63  ;;  %v15120_v62 = vcombine.low %v23555_v47, %v23555_v47  ;;  %v23754_v63 = vld [vmem:[%s21716_s28 + $0x50] sm:$0xff]  ;;  %v18607_v47 = vld [vmem:[%s25023_s2 + $0x142c] ss:$16 sps:$4 sm:$0xff]  }
 0x563   : > { %11483 = vmatpush1.bf16.msra.mxu0 %v18516_v0  ;;  %12016 = vmatpush1.bf16.msra.mxu1 %v18519_v1  ;;  %v18596_v0 = vld [vmem:[%s25023_s2 + $0x1400] ss:$16 sps:$4 sm:$0xff]   ;;  %v18599_v1 = vld [vmem:[%s25023_s2 + $0x1408] ss:$16 sps:$4 sm:$0xff]  }
 0x564   : > { %11484 = vmatprep.subr.bf16.mxu0 %v18524_v2  ;;  %12017 = vmatprep.subr.bf16.mxu1 %v18527_v3  ;;  %v18604_v2 = vld [vmem:[%s25023_s2 + $0x1424] ss:$16 sps:$4 sm:$0xff]   ;;  %v15123_v3 = vcombine.high %v23754_v63, %v23754_v63 }
 0x567   : > { %11485 = vmatpush1.bf16.msra.mxu0 %v18522_v4  ;;  %12018 = vmatpush1.bf16.msra.mxu1 %v18525_v6  ;;  %v18602_v4 = vld [vmem:[%s25023_s2 + $0x1420] ss:$16 sps:$4 sm:$0xff]   ;;  %v18605_v6 = vld [vmem:[%s25023_s2 + $0x1428] ss:$16 sps:$4 sm:$0xff]  }
 0x568   : > { %11486 = vmatprep.subr.bf16.mxu0 %v18530_v7  ;;  %12019 = vmatprep.subr.bf16.mxu1 %v18533_v8  ;;  %v18610_v7 = vld [vmem:[%s25023_s2 + $0x1444] ss:$16 sps:$4 sm:$0xff]   ;;  %v18613_v8 = vld [vmem:[%s25023_s2 + $0x144c] ss:$16 sps:$4 sm:$0xff]  }
 0x56b   : > { %11487 = vmatpush1.bf16.msra.mxu0 %v18528_v55  ;;  %12020 = vmatpush1.bf16.msra.mxu1 %v18531_v56  ;;  %v18608_v55 = vld [vmem:[%s25023_s2 + $0x1440] ss:$16 sps:$4 sm:$0xff]   ;;  %v18611_v56 = vld [vmem:[%s25023_s2 + $0x1448] ss:$16 sps:$4 sm:$0xff]  }
 0x56c   : > { %11488 = vmatprep.subr.bf16.mxu0 %v18536_v9  ;;  %12021 = vmatprep.subr.bf16.mxu1 %v18539_v10  ;;  %v18616_v9 = vld [vmem:[%s25023_s2 + $0x1464] ss:$16 sps:$4 sm:$0xff]   ;;  %v18619_v10 = vld [vmem:[%s25023_s2 + $0x146c] ss:$16 sps:$4 sm:$0xff]  }
 0x56f   : > { %11489 = vmatpush1.bf16.msra.mxu0 %v18534_v12  ;;  %12022 = vmatpush1.bf16.msra.mxu1 %v18537_v13  ;;  %v18614_v12 = vld [vmem:[%s25023_s2 + $0x1460] ss:$16 sps:$4 sm:$0xff]   ;;  %v18617_v13 = vld [vmem:[%s25023_s2 + $0x1468] ss:$16 sps:$4 sm:$0xff]  }
 0x570   : > { %11490 = vmatprep.subr.bf16.mxu0 %v18542_v15  ;;  %12023 = vmatprep.subr.bf16.mxu1 %v18545_v16  ;;  %v18622_v15 = vld [vmem:[%s25023_s2 + $0x1484] ss:$16 sps:$4 sm:$0xff]   ;;  %v18625_v16 = vld [vmem:[%s25023_s2 + $0x148c] ss:$16 sps:$4 sm:$0xff]  }
 0x573   : > { %11491 = vmatpush1.bf16.msra.mxu0 %v18540_v17  ;;  %12024 = vmatpush1.bf16.msra.mxu1 %v18543_v14  ;;  %v18620_v17 = vld [vmem:[%s25023_s2 + $0x1480] ss:$16 sps:$4 sm:$0xff]   ;;  %v18623_v14 = vld [vmem:[%s25023_s2 + $0x1488] ss:$16 sps:$4 sm:$0xff]  }
 0x574   : > { %11492 = vmatprep.subr.bf16.mxu0 %v18548_v20  ;;  %12025 = vmatprep.subr.bf16.mxu1 %v18551_v11  ;;  %v18628_v20 = vld [vmem:[%s25023_s2 + $0x14a4] ss:$16 sps:$4 sm:$0xff]   ;;  %v18631_v11 = vld [vmem:[%s25023_s2 + $0x14ac] ss:$16 sps:$4 sm:$0xff]  }
 0x577   : > { %11493 = vmatpush1.bf16.msra.mxu0 %v18546_v5  ;;  %12026 = vmatpush1.bf16.msra.mxu1 %v18549_v22  ;;  %v18626_v5 = vld [vmem:[%s25023_s2 + $0x14a0] ss:$16 sps:$4 sm:$0xff]   ;;  %v18629_v22 = vld [vmem:[%s25023_s2 + $0x14a8] ss:$16 sps:$4 sm:$0xff]  }
 0x578   : > { %11494 = vmatprep.subr.bf16.mxu0 %v18554_v23  ;;  %12027 = vmatprep.subr.bf16.mxu1 %v18557_v18  ;;  %v18634_v23 = vld [vmem:[%s25023_s2 + $0x14c4] ss:$16 sps:$4 sm:$0xff]   ;;  %v18637_v18 = vld [vmem:[%s25023_s2 + $0x14cc] ss:$16 sps:$4 sm:$0xff]  }
 0x57b   : > { %11495 = vmatpush1.bf16.msra.mxu0 %v18552_v25  ;;  %12028 = vmatpush1.bf16.msra.mxu1 %v18555_v26  ;;  %v18632_v25 = vld [vmem:[%s25023_s2 + $0x14c0] ss:$16 sps:$4 sm:$0xff]   ;;  %v18635_v26 = vld [vmem:[%s25023_s2 + $0x14c8] ss:$16 sps:$4 sm:$0xff]  }
 0x57c   : > { %11496 = vmatprep.subr.bf16.mxu0 %v18560_v21  ;;  %12029 = vmatprep.subr.bf16.mxu1 %v18563_v24  ;;  %v18640_v21 = vld [vmem:[%s25023_s2 + $0x14e4] ss:$16 sps:$4 sm:$0xff]   ;;  %v18643_v24 = vld [vmem:[%s25023_s2 + $0x14ec] ss:$16 sps:$4 sm:$0xff]  }
 0x57f   : > { %11497 = vmatpush1.bf16.msra.mxu0 %v18558_v27  ;;  %12030 = vmatpush1.bf16.msra.mxu1 %v18561_v35  ;;  %v18638_v27 = vld [vmem:[%s25023_s2 + $0x14e0] ss:$16 sps:$4 sm:$0xff]   ;;  %v18641_v35 = vld [vmem:[%s25023_s2 + $0x14e8] ss:$16 sps:$4 sm:$0xff]  }
 0x580   : > { %11498 = vmatprep.subr.bf16.mxu0 %v18566_v30  ;;  %12031 = vmatprep.subr.bf16.mxu1 %v18569_v37  ;;  %v18646_v30 = vld [vmem:[%s25023_s2 + $0x1504] ss:$16 sps:$4 sm:$0xff]   ;;  %v18649_v37 = vld [vmem:[%s25023_s2 + $0x150c] ss:$16 sps:$4 sm:$0xff]  }
 0x583   : > { %11499 = vmatpush1.bf16.msra.mxu0 %v18564_v19  ;;  %12032 = vmatpush1.bf16.msra.mxu1 %v18567_v38  ;;  %v18644_v19 = vld [vmem:[%s25023_s2 + $0x1500] ss:$16 sps:$4 sm:$0xff]   ;;  %v18647_v38 = vld [vmem:[%s25023_s2 + $0x1508] ss:$16 sps:$4 sm:$0xff]  }
 0x584   : > { %11500 = vmatprep.subr.bf16.mxu0 %v18572_v39  ;;  %12033 = vmatprep.subr.bf16.mxu1 %v18575_v40  ;;  %v18652_v39 = vld [vmem:[%s25023_s2 + $0x1524] ss:$16 sps:$4 sm:$0xff]   ;;  %v18655_v40 = vld [vmem:[%s25023_s2 + $0x152c] ss:$16 sps:$4 sm:$0xff]  }
 0x587   : > { %11501 = vmatpush1.bf16.msra.mxu0 %v18570_v41  ;;  %12034 = vmatpush1.bf16.msra.mxu1 %v18573_v36  ;;  %v18650_v41 = vld [vmem:[%s25023_s2 + $0x1520] ss:$16 sps:$4 sm:$0xff]   ;;  %v18653_v36 = vld [vmem:[%s25023_s2 + $0x1528] ss:$16 sps:$4 sm:$0xff]  }
 0x588   : > { %11502 = vmatprep.subr.bf16.mxu0 %v18578_v60  ;;  %12035 = vmatprep.subr.bf16.mxu1 %v18581_v42  ;;  %v18658_v60 = vld [vmem:[%s25023_s2 + $0x1544] ss:$16 sps:$4 sm:$0xff]   ;;  %v18661_v42 = vld [vmem:[%s25023_s2 + $0x154c] ss:$16 sps:$4 sm:$0xff]  }
 0x58b   : > { %11503 = vmatpush1.bf16.msra.mxu0 %v18576_v45  ;;  %12036 = vmatpush1.bf16.msra.mxu1 %v18579_v50  ;;  %v18656_v45 = vld [vmem:[%s25023_s2 + $0x1540] ss:$16 sps:$4 sm:$0xff]   ;;  %v18659_v50 = vld [vmem:[%s25023_s2 + $0x1548] ss:$16 sps:$4 sm:$0xff]  }
 0x58c   : > { %11504 = vmatprep.subr.bf16.mxu0 %v18584_v51  ;;  %12037 = vmatprep.subr.bf16.mxu1 %v18587_v52  ;;  %v18664_v51 = vld [vmem:[%s25023_s2 + $0x1564] ss:$16 sps:$4 sm:$0xff]   ;;  %v18667_v52 = vld [vmem:[%s25023_s2 + $0x156c] ss:$16 sps:$4 sm:$0xff]  }
 0x58f   : > { %11505 = vmatpush1.bf16.msra.mxu0 %v18582_v34  ;;  %12038 = vmatpush1.bf16.msra.mxu1 %v18585_v53  ;;  %v18662_v34 = vld [vmem:[%s25023_s2 + $0x1560] ss:$16 sps:$4 sm:$0xff]   ;;  %v18665_v53 = vld [vmem:[%s25023_s2 + $0x1568] ss:$16 sps:$4 sm:$0xff]  }
 0x590   : > { %11506 = vmatprep.subr.bf16.mxu0 %v18590_v54  ;;  %12039 = vmatprep.subr.bf16.mxu1 %v18593_v57  ;;  %v18670_v54 = vld [vmem:[%s25023_s2 + $0x1584] ss:$16 sps:$4 sm:$0xff]   ;;  %v18673_v57 = vld [vmem:[%s25023_s2 + $0x158c] ss:$16 sps:$4 sm:$0xff]  }
 0x593   : > { %11507 = vmatpush1.bf16.msra.mxu0 %v18588_v58  ;;  %12040 = vmatpush1.bf16.msra.mxu1 %v18591_v59  ;;  %v18668_v58 = vld [vmem:[%s25023_s2 + $0x1580] ss:$16 sps:$4 sm:$0xff]   ;;  %v18671_v59 = vld [vmem:[%s25023_s2 + $0x1588] ss:$16 sps:$4 sm:$0xff]  }
 0x594   : > { %11517 = vmatprep.subr.bf16.mxu0 %v18598_v33  ;;  %12050 = vmatprep.subr.bf16.mxu1 %v18601_v61  ;;  %v18676_v33 = vld [vmem:[%s25023_s2 + $0x15a4] ss:$16 sps:$4 sm:$0xff]   ;;  %v18679_v61 = vld [vmem:[%s25023_s2 + $0x15ac] ss:$16 sps:$4 sm:$0xff]  }
 0x596   : > { %11509 = vmatmul.mubr.bf16.vlgmr.msra.gmra.mrb[4].mxu0 %v15120_v62  ;;  %12042 = vmatmul.mubr.bf16.vlgmr.msra.gmra.mrb[4].mxu1 %v15120_v62  ;;  %v18674_v62 = vld [vmem:[%s25023_s2 + $0x15a0] ss:$16 sps:$4 sm:$0xff]  }
 0x597   : > { %11518 = vmatpush1.bf16.msra.mxu0 %v18596_v0  ;;  %12051 = vmatpush1.bf16.msra.mxu1 %v18599_v1  ;;  %v18677_v0 = vld [vmem:[%s25023_s2 + $0x15a8] ss:$16 sps:$4 sm:$0xff]   ;;  %v18682_v1 = vld [vmem:[%s25023_s2 + $0x15c4] ss:$16 sps:$4 sm:$0xff]  }
 0x598   : > { %11519 = vmatprep.subr.bf16.mxu0 %v18604_v2  ;;  %12052 = vmatprep.subr.bf16.mxu1 %v18607_v47  ;;  %v18685_v2 = vld [vmem:[%s25023_s2 + $0x15cc] ss:$16 sps:$4 sm:$0xff]   ;;  %v18680_v47 = vld [vmem:[%s25023_s2 + $0x15c0] ss:$16 sps:$4 sm:$0xff]  }
 0x599   : > { %11549 = vmatprep.mubr.bf16.mxu0 %v15123_v3  ;;  %12082 = vmatprep.mubr.bf16.mxu1 %v15123_v3  ;;  %v18683_v3 = vld [vmem:[%s25023_s2 + $0x15c8] ss:$16 sps:$4 sm:$0xff]  }
 0x59b   : > { %11520 = vmatpush1.bf16.msra.mxu0 %v18602_v4  ;;  %12053 = vmatpush1.bf16.msra.mxu1 %v18605_v6  ;;  %v18688_v4 = vld [vmem:[%s25023_s2 + $0x15e4] ss:$16 sps:$4 sm:$0xff]   ;;  %v18691_v6 = vld [vmem:[%s25023_s2 + $0x15ec] ss:$16 sps:$4 sm:$0xff]  }
 0x59c   : > { %11521 = vmatprep.subr.bf16.mxu0 %v18610_v7  ;;  %12054 = vmatprep.subr.bf16.mxu1 %v18613_v8  ;;  %v18686_v7 = vld [vmem:[%s25023_s2 + $0x15e0] ss:$16 sps:$4 sm:$0xff]   ;;  %v18689_v8 = vld [vmem:[%s25023_s2 + $0x15e8] ss:$16 sps:$4 sm:$0xff]  }
 0x59f   : > { %11522 = vmatpush1.bf16.msra.mxu0 %v18608_v55  ;;  %12055 = vmatpush1.bf16.msra.mxu1 %v18611_v56  ;;  %v18696_v55 = vld [vmem:[%s25023_s2 + $0x1604] ss:$16 sps:$4 sm:$0xff]   ;;  %v18699_v56 = vld [vmem:[%s25023_s2 + $0x160c] ss:$16 sps:$4 sm:$0xff]  }
 0x5a0   : > { %11523 = vmatprep.subr.bf16.mxu0 %v18616_v9  ;;  %12056 = vmatprep.subr.bf16.mxu1 %v18619_v10  ;;  %v15122_v9 = vcombine.low %v23754_v63, %v23754_v63  ;;  %v23953_v10 = vld [vmem:[%s21716_s28 + $0x58] sm:$0xff] }
 0x5a1   : > { %v18705_v63 = vld [vmem:[%s25023_s2 + $0x162c] ss:$16 sps:$4 sm:$0xff]  }
 0x5a3   : > { %11524 = vmatpush1.bf16.msra.mxu0 %v18614_v12  ;;  %12057 = vmatpush1.bf16.msra.mxu1 %v18617_v13  ;;  %v18694_v12 = vld [vmem:[%s25023_s2 + $0x1600] ss:$16 sps:$4 sm:$0xff]   ;;  %v18697_v13 = vld [vmem:[%s25023_s2 + $0x1608] ss:$16 sps:$4 sm:$0xff]  }
 0x5a4   : > { %11525 = vmatprep.subr.bf16.mxu0 %v18622_v15  ;;  %12058 = vmatprep.subr.bf16.mxu1 %v18625_v16  ;;  %v18702_v15 = vld [vmem:[%s25023_s2 + $0x1624] ss:$16 sps:$4 sm:$0xff]   ;;  %v15125_v16 = vcombine.high %v23953_v10, %v23953_v10 }
 0x5a7   : > { %11526 = vmatpush1.bf16.msra.mxu0 %v18620_v17  ;;  %12059 = vmatpush1.bf16.msra.mxu1 %v18623_v14  ;;  %v18700_v17 = vld [vmem:[%s25023_s2 + $0x1620] ss:$16 sps:$4 sm:$0xff]   ;;  %v18703_v14 = vld [vmem:[%s25023_s2 + $0x1628] ss:$16 sps:$4 sm:$0xff]  }
 0x5a8   : > { %11527 = vmatprep.subr.bf16.mxu0 %v18628_v20  ;;  %12060 = vmatprep.subr.bf16.mxu1 %v18631_v11  ;;  %v18708_v20 = vld [vmem:[%s25023_s2 + $0x1644] ss:$16 sps:$4 sm:$0xff]   ;;  %v18711_v11 = vld [vmem:[%s25023_s2 + $0x164c] ss:$16 sps:$4 sm:$0xff]  }
 0x5ab   : > { %11528 = vmatpush1.bf16.msra.mxu0 %v18626_v5  ;;  %12061 = vmatpush1.bf16.msra.mxu1 %v18629_v22  ;;  %v18706_v5 = vld [vmem:[%s25023_s2 + $0x1640] ss:$16 sps:$4 sm:$0xff]   ;;  %v18709_v22 = vld [vmem:[%s25023_s2 + $0x1648] ss:$16 sps:$4 sm:$0xff]  }
 0x5ac   : > { %11529 = vmatprep.subr.bf16.mxu0 %v18634_v23  ;;  %12062 = vmatprep.subr.bf16.mxu1 %v18637_v18  ;;  %v18714_v23 = vld [vmem:[%s25023_s2 + $0x1664] ss:$16 sps:$4 sm:$0xff]   ;;  %v18717_v18 = vld [vmem:[%s25023_s2 + $0x166c] ss:$16 sps:$4 sm:$0xff]  }
 0x5af   : > { %11530 = vmatpush1.bf16.msra.mxu0 %v18632_v25  ;;  %12063 = vmatpush1.bf16.msra.mxu1 %v18635_v26  ;;  %v18712_v25 = vld [vmem:[%s25023_s2 + $0x1660] ss:$16 sps:$4 sm:$0xff]   ;;  %v18715_v26 = vld [vmem:[%s25023_s2 + $0x1668] ss:$16 sps:$4 sm:$0xff]  }
 0x5b0   : > { %11531 = vmatprep.subr.bf16.mxu0 %v18640_v21  ;;  %12064 = vmatprep.subr.bf16.mxu1 %v18643_v24  ;;  %v18720_v21 = vld [vmem:[%s25023_s2 + $0x1684] ss:$16 sps:$4 sm:$0xff]   ;;  %v18723_v24 = vld [vmem:[%s25023_s2 + $0x168c] ss:$16 sps:$4 sm:$0xff]  }
 0x5b3   : > { %11532 = vmatpush1.bf16.msra.mxu0 %v18638_v27  ;;  %12065 = vmatpush1.bf16.msra.mxu1 %v18641_v35  ;;  %v18718_v27 = vld [vmem:[%s25023_s2 + $0x1680] ss:$16 sps:$4 sm:$0xff]   ;;  %v18721_v35 = vld [vmem:[%s25023_s2 + $0x1688] ss:$16 sps:$4 sm:$0xff]  }
 0x5b4   : > { %11533 = vmatprep.subr.bf16.mxu0 %v18646_v30  ;;  %12066 = vmatprep.subr.bf16.mxu1 %v18649_v37  ;;  %v18726_v30 = vld [vmem:[%s25023_s2 + $0x16a4] ss:$16 sps:$4 sm:$0xff]   ;;  %v18729_v37 = vld [vmem:[%s25023_s2 + $0x16ac] ss:$16 sps:$4 sm:$0xff]  }
 0x5b7   : > { %11534 = vmatpush1.bf16.msra.mxu0 %v18644_v19  ;;  %12067 = vmatpush1.bf16.msra.mxu1 %v18647_v38  ;;  %v18724_v19 = vld [vmem:[%s25023_s2 + $0x16a0] ss:$16 sps:$4 sm:$0xff]   ;;  %v18727_v38 = vld [vmem:[%s25023_s2 + $0x16a8] ss:$16 sps:$4 sm:$0xff]  }
 0x5b8   : > { %11535 = vmatprep.subr.bf16.mxu0 %v18652_v39  ;;  %12068 = vmatprep.subr.bf16.mxu1 %v18655_v40  ;;  %v18732_v39 = vld [vmem:[%s25023_s2 + $0x16c4] ss:$16 sps:$4 sm:$0xff]   ;;  %v18735_v40 = vld [vmem:[%s25023_s2 + $0x16cc] ss:$16 sps:$4 sm:$0xff]  }
 0x5bb   : > { %11536 = vmatpush1.bf16.msra.mxu0 %v18650_v41  ;;  %12069 = vmatpush1.bf16.msra.mxu1 %v18653_v36  ;;  %v18730_v41 = vld [vmem:[%s25023_s2 + $0x16c0] ss:$16 sps:$4 sm:$0xff]   ;;  %v18733_v36 = vld [vmem:[%s25023_s2 + $0x16c8] ss:$16 sps:$4 sm:$0xff]  }
 0x5bc   : > { %11537 = vmatprep.subr.bf16.mxu0 %v18658_v60  ;;  %12070 = vmatprep.subr.bf16.mxu1 %v18661_v42  ;;  %v18738_v60 = vld [vmem:[%s25023_s2 + $0x16e4] ss:$16 sps:$4 sm:$0xff]   ;;  %v18741_v42 = vld [vmem:[%s25023_s2 + $0x16ec] ss:$16 sps:$4 sm:$0xff]  }
 0x5bf   : > { %11538 = vmatpush1.bf16.msra.mxu0 %v18656_v45  ;;  %12071 = vmatpush1.bf16.msra.mxu1 %v18659_v50  ;;  %v18736_v45 = vld [vmem:[%s25023_s2 + $0x16e0] ss:$16 sps:$4 sm:$0xff]   ;;  %v18739_v50 = vld [vmem:[%s25023_s2 + $0x16e8] ss:$16 sps:$4 sm:$0xff]  }
 0x5c0   : > { %11539 = vmatprep.subr.bf16.mxu0 %v18664_v51  ;;  %12072 = vmatprep.subr.bf16.mxu1 %v18667_v52  ;;  %v18744_v51 = vld [vmem:[%s25023_s2 + $0x1704] ss:$16 sps:$4 sm:$0xff]   ;;  %v18747_v52 = vld [vmem:[%s25023_s2 + $0x170c] ss:$16 sps:$4 sm:$0xff]  }
 0x5c3   : > { %11540 = vmatpush1.bf16.msra.mxu0 %v18662_v34  ;;  %12073 = vmatpush1.bf16.msra.mxu1 %v18665_v53  ;;  %v18742_v34 = vld [vmem:[%s25023_s2 + $0x1700] ss:$16 sps:$4 sm:$0xff]   ;;  %v18745_v53 = vld [vmem:[%s25023_s2 + $0x1708] ss:$16 sps:$4 sm:$0xff]  }
 0x5c4   : > { %11541 = vmatprep.subr.bf16.mxu0 %v18670_v54  ;;  %12074 = vmatprep.subr.bf16.mxu1 %v18673_v57  ;;  %v18750_v54 = vld [vmem:[%s25023_s2 + $0x1724] ss:$16 sps:$4 sm:$0xff]   ;;  %v18753_v57 = vld [vmem:[%s25023_s2 + $0x172c] ss:$16 sps:$4 sm:$0xff]  }
 0x5c7   : > { %11542 = vmatpush1.bf16.msra.mxu0 %v18668_v58  ;;  %12075 = vmatpush1.bf16.msra.mxu1 %v18671_v59  ;;  %v18748_v58 = vld [vmem:[%s25023_s2 + $0x1720] ss:$16 sps:$4 sm:$0xff]   ;;  %v18751_v59 = vld [vmem:[%s25023_s2 + $0x1728] ss:$16 sps:$4 sm:$0xff]  }
 0x5c8   : > { %11543 = vmatprep.subr.bf16.mxu0 %v18676_v33  ;;  %12076 = vmatprep.subr.bf16.mxu1 %v18679_v61  ;;  %v18756_v33 = vld [vmem:[%s25023_s2 + $0x1744] ss:$16 sps:$4 sm:$0xff]   ;;  %v18759_v61 = vld [vmem:[%s25023_s2 + $0x174c] ss:$16 sps:$4 sm:$0xff]  }
 0x5cb   : > { %11544 = vmatpush1.bf16.msra.mxu0 %v18674_v62  ;;  %12077 = vmatpush1.bf16.msra.mxu1 %v18677_v0  ;;  %v18754_v62 = vld [vmem:[%s25023_s2 + $0x1740] ss:$16 sps:$4 sm:$0xff]   ;;  %v18757_v0 = vld [vmem:[%s25023_s2 + $0x1748] ss:$16 sps:$4 sm:$0xff]  }
 0x5cc   : > { %11545 = vmatprep.subr.bf16.mxu0 %v18682_v1  ;;  %12078 = vmatprep.subr.bf16.mxu1 %v18685_v2  ;;  %v18762_v1 = vld [vmem:[%s25023_s2 + $0x1764] ss:$16 sps:$4 sm:$0xff]   ;;  %v18765_v2 = vld [vmem:[%s25023_s2 + $0x176c] ss:$16 sps:$4 sm:$0xff]  }
 0x5cf   : > { %11546 = vmatpush1.bf16.msra.mxu0 %v18680_v47  ;;  %12079 = vmatpush1.bf16.msra.mxu1 %v18683_v3  ;;  %v18760_v47 = vld [vmem:[%s25023_s2 + $0x1760] ss:$16 sps:$4 sm:$0xff]   ;;  %v18763_v3 = vld [vmem:[%s25023_s2 + $0x1768] ss:$16 sps:$4 sm:$0xff]  }
 0x5d0   : > { %11547 = vmatprep.subr.bf16.mxu0 %v18688_v4  ;;  %12080 = vmatprep.subr.bf16.mxu1 %v18691_v6  ;;  %v18768_v4 = vld [vmem:[%s25023_s2 + $0x1784] ss:$16 sps:$4 sm:$0xff]   ;;  %v18771_v6 = vld [vmem:[%s25023_s2 + $0x178c] ss:$16 sps:$4 sm:$0xff]  }
 0x5d3   : > { %11548 = vmatpush1.bf16.msra.mxu0 %v18686_v7  ;;  %12081 = vmatpush1.bf16.msra.mxu1 %v18689_v8  ;;  %v18766_v7 = vld [vmem:[%s25023_s2 + $0x1780] ss:$16 sps:$4 sm:$0xff]   ;;  %v18769_v8 = vld [vmem:[%s25023_s2 + $0x1788] ss:$16 sps:$4 sm:$0xff]  }
 0x5d4   : > { %11558 = vmatprep.subr.bf16.mxu0 %v18696_v55  ;;  %12091 = vmatprep.subr.bf16.mxu1 %v18699_v56  ;;  %v18774_v55 = vld [vmem:[%s25023_s2 + $0x17a4] ss:$16 sps:$4 sm:$0xff]   ;;  %v18777_v56 = vld [vmem:[%s25023_s2 + $0x17ac] ss:$16 sps:$4 sm:$0xff]  }
 0x5d6   : > { %11550 = vmatmul.mubr.bf16.vlgmr.msra.gmra.mrb[4].mxu0 %v15122_v9  ;;  %12083 = vmatmul.mubr.bf16.vlgmr.msra.gmra.mrb[4].mxu1 %v15122_v9  ;;  %v18772_v9 = vld [vmem:[%s25023_s2 + $0x17a0] ss:$16 sps:$4 sm:$0xff]  }
 0x5d7   : > { %11559 = vmatpush1.bf16.msra.mxu0 %v18694_v12  ;;  %12092 = vmatpush1.bf16.msra.mxu1 %v18697_v13  ;;  %v18775_v12 = vld [vmem:[%s25023_s2 + $0x17a8] ss:$16 sps:$4 sm:$0xff]   ;;  %v18780_v13 = vld [vmem:[%s25023_s2 + $0x17c4] ss:$16 sps:$4 sm:$0xff]  }
 0x5d8   : > { %11560 = vmatprep.subr.bf16.mxu0 %v18702_v15  ;;  %12093 = vmatprep.subr.bf16.mxu1 %v18705_v63  ;;  %v18783_v15 = vld [vmem:[%s25023_s2 + $0x17cc] ss:$16 sps:$4 sm:$0xff]   ;;  %v18778_v63 = vld [vmem:[%s25023_s2 + $0x17c0] ss:$16 sps:$4 sm:$0xff]  }
 0x5d9   : > { %11590 = vmatprep.mubr.bf16.mxu0 %v15125_v16  ;;  %12123 = vmatprep.mubr.bf16.mxu1 %v15125_v16  ;;  %v18781_v16 = vld [vmem:[%s25023_s2 + $0x17c8] ss:$16 sps:$4 sm:$0xff]  }
 0x5db   : > { %11561 = vmatpush1.bf16.msra.mxu0 %v18700_v17  ;;  %12094 = vmatpush1.bf16.msra.mxu1 %v18703_v14  ;;  %v18786_v17 = vld [vmem:[%s25023_s2 + $0x17e4] ss:$16 sps:$4 sm:$0xff]   ;;  %v18789_v14 = vld [vmem:[%s25023_s2 + $0x17ec] ss:$16 sps:$4 sm:$0xff]  }
 0x5dc   : > { %11562 = vmatprep.subr.bf16.mxu0 %v18708_v20  ;;  %12095 = vmatprep.subr.bf16.mxu1 %v18711_v11  ;;  %v18784_v20 = vld [vmem:[%s25023_s2 + $0x17e0] ss:$16 sps:$4 sm:$0xff]   ;;  %v18787_v11 = vld [vmem:[%s25023_s2 + $0x17e8] ss:$16 sps:$4 sm:$0xff]  }
 0x5df   : > { %11563 = vmatpush1.bf16.msra.mxu0 %v18706_v5  ;;  %12096 = vmatpush1.bf16.msra.mxu1 %v18709_v22  ;;  %v18794_v5 = vld [vmem:[%s25023_s2 + $0x1804] ss:$16 sps:$4 sm:$0xff]   ;;  %v18797_v22 = vld [vmem:[%s25023_s2 + $0x180c] ss:$16 sps:$4 sm:$0xff]  }
 0x5e0   : > { %11564 = vmatprep.subr.bf16.mxu0 %v18714_v23  ;;  %12097 = vmatprep.subr.bf16.mxu1 %v18717_v18  ;;  %v15124_v23 = vcombine.low %v23953_v10, %v23953_v10  ;;  %v18792_v18 = vld [vmem:[%s25023_s2 + $0x1800] ss:$16 sps:$4 sm:$0xff]   ;;  %v18803_v10 = vld [vmem:[%s25023_s2 + $0x182c] ss:$16 sps:$4 sm:$0xff]  }
 0x5e3   : > { %11565 = vmatpush1.bf16.msra.mxu0 %v18712_v25  ;;  %12098 = vmatpush1.bf16.msra.mxu1 %v18715_v26  ;;  %v18795_v25 = vld [vmem:[%s25023_s2 + $0x1808] ss:$16 sps:$4 sm:$0xff]   ;;  %v18800_v26 = vld [vmem:[%s25023_s2 + $0x1824] ss:$16 sps:$4 sm:$0xff]  }
 0x5e4   : > { %11566 = vmatprep.subr.bf16.mxu0 %v18720_v21  ;;  %12099 = vmatprep.subr.bf16.mxu1 %v18723_v24  ;;  %v18798_v21 = vld [vmem:[%s25023_s2 + $0x1820] ss:$16 sps:$4 sm:$0xff]   ;;  %v18801_v24 = vld [vmem:[%s25023_s2 + $0x1828] ss:$16 sps:$4 sm:$0xff]  }
 0x5e7   : > { %11567 = vmatpush1.bf16.msra.mxu0 %v18718_v27  ;;  %12100 = vmatpush1.bf16.msra.mxu1 %v18721_v35  ;;  %v18806_v27 = vld [vmem:[%s25023_s2 + $0x1844] ss:$16 sps:$4 sm:$0xff]   ;;  %v18809_v35 = vld [vmem:[%s25023_s2 + $0x184c] ss:$16 sps:$4 sm:$0xff]  }
 0x5e8   : > { %11568 = vmatprep.subr.bf16.mxu0 %v18726_v30  ;;  %12101 = vmatprep.subr.bf16.mxu1 %v18729_v37  ;;  %v18804_v30 = vld [vmem:[%s25023_s2 + $0x1840] ss:$16 sps:$4 sm:$0xff]   ;;  %v18807_v37 = vld [vmem:[%s25023_s2 + $0x1848] ss:$16 sps:$4 sm:$0xff]  }
 0x5eb   : > { %11569 = vmatpush1.bf16.msra.mxu0 %v18724_v19  ;;  %12102 = vmatpush1.bf16.msra.mxu1 %v18727_v38  ;;  %v18812_v19 = vld [vmem:[%s25023_s2 + $0x1864] ss:$16 sps:$4 sm:$0xff]   ;;  %v18810_v38 = vld [vmem:[%s25023_s2 + $0x1860] ss:$16 sps:$4 sm:$0xff]  }
 0x5ec   : > { %11570 = vmatprep.subr.bf16.mxu0 %v18732_v39  ;;  %12103 = vmatprep.subr.bf16.mxu1 %v18735_v40  ;;  %v18813_v39 = vld [vmem:[%s25023_s2 + $0x1868] ss:$16 sps:$4 sm:$0xff]   ;;  %v18819_v40 = vld [vmem:[%s25024_s3 + $0x4] ss:$16 sps:$4 sm:$0xff]  }
 0x5ef   : > { %11571 = vmatpush1.bf16.msra.mxu0 %v18730_v41  ;;  %12104 = vmatpush1.bf16.msra.mxu1 %v18733_v36  ;;  %v18822_v41 = vld [vmem:[%s25024_s3 + $0xc] ss:$16 sps:$4 sm:$0xff]   ;;  %v18816_v36 = vld [vmem:[%s21716_s28 + $0x60] ss:$0 sps:$4 sm:$0xff]  }
 0x5f0   : > { %11572 = vmatprep.subr.bf16.mxu0 %v18738_v60  ;;  %12105 = vmatprep.subr.bf16.mxu1 %v18741_v42  ;;  %v18817_v60 = vld [vmem:[%s25024_s3] ss:$16 sps:$4 sm:$0xff]   ;;  %v18820_v42 = vld [vmem:[%s25024_s3 + $0x8] ss:$16 sps:$4 sm:$0xff]  }
 0x5f3   : > { %11573 = vmatpush1.bf16.msra.mxu0 %v18736_v45  ;;  %12106 = vmatpush1.bf16.msra.mxu1 %v18739_v50  ;;  %v18825_v45 = vld [vmem:[%s25024_s3 + $0x24] ss:$16 sps:$4 sm:$0xff]   ;;  %v18828_v50 = vld [vmem:[%s25024_s3 + $0x2c] ss:$16 sps:$4 sm:$0xff]  }
 0x5f4   : > { %11574 = vmatprep.subr.bf16.mxu0 %v18744_v51  ;;  %12107 = vmatprep.subr.bf16.mxu1 %v18747_v52  ;;  %v18823_v51 = vld [vmem:[%s25024_s3 + $0x20] ss:$16 sps:$4 sm:$0xff]   ;;  %v18826_v52 = vld [vmem:[%s25024_s3 + $0x28] ss:$16 sps:$4 sm:$0xff]  }
 0x5f7   : > { %11575 = vmatpush1.bf16.msra.mxu0 %v18742_v34  ;;  %12108 = vmatpush1.bf16.msra.mxu1 %v18745_v53  ;;  %v18831_v34 = vld [vmem:[%s25024_s3 + $0x44] ss:$16 sps:$4 sm:$0xff]   ;;  %v18834_v53 = vld [vmem:[%s25024_s3 + $0x4c] ss:$16 sps:$4 sm:$0xff]  }
 0x5f8   : > { %11576 = vmatprep.subr.bf16.mxu0 %v18750_v54  ;;  %12109 = vmatprep.subr.bf16.mxu1 %v18753_v57  ;;  %v18829_v54 = vld [vmem:[%s25024_s3 + $0x40] ss:$16 sps:$4 sm:$0xff]   ;;  %v18832_v57 = vld [vmem:[%s25024_s3 + $0x48] ss:$16 sps:$4 sm:$0xff]  }
 0x5fb   : > { %11577 = vmatpush1.bf16.msra.mxu0 %v18748_v58  ;;  %12110 = vmatpush1.bf16.msra.mxu1 %v18751_v59  ;;  %v18837_v58 = vld [vmem:[%s25024_s3 + $0x64] ss:$16 sps:$4 sm:$0xff]   ;;  %v18840_v59 = vld [vmem:[%s25024_s3 + $0x6c] ss:$16 sps:$4 sm:$0xff]  }
 0x5fc   : > { %11578 = vmatprep.subr.bf16.mxu0 %v18756_v33  ;;  %12111 = vmatprep.subr.bf16.mxu1 %v18759_v61  ;;  %v18835_v33 = vld [vmem:[%s25024_s3 + $0x60] ss:$16 sps:$4 sm:$0xff]   ;;  %v18838_v61 = vld [vmem:[%s25024_s3 + $0x68] ss:$16 sps:$4 sm:$0xff]  }
 0x5ff   : > { %11579 = vmatpush1.bf16.msra.mxu0 %v18754_v62  ;;  %12112 = vmatpush1.bf16.msra.mxu1 %v18757_v0  ;;  %v18843_v62 = vld [vmem:[%s25024_s3 + $0x84] ss:$16 sps:$4 sm:$0xff]   ;;  %v18846_v0 = vld [vmem:[%s25024_s3 + $0x8c] ss:$16 sps:$4 sm:$0xff]  }
 0x600   : > { %11580 = vmatprep.subr.bf16.mxu0 %v18762_v1  ;;  %12113 = vmatprep.subr.bf16.mxu1 %v18765_v2  ;;  %v18841_v1 = vld [vmem:[%s25024_s3 + $0x80] ss:$16 sps:$4 sm:$0xff]   ;;  %v18844_v2 = vld [vmem:[%s25024_s3 + $0x88] ss:$16 sps:$4 sm:$0xff]  }
 0x603   : > { %11581 = vmatpush1.bf16.msra.mxu0 %v18760_v47  ;;  %12114 = vmatpush1.bf16.msra.mxu1 %v18763_v3  ;;  %v18849_v47 = vld [vmem:[%s25024_s3 + $0xa4] ss:$16 sps:$4 sm:$0xff]   ;;  %v18852_v3 = vld [vmem:[%s25024_s3 + $0xac] ss:$16 sps:$4 sm:$0xff]  }
 0x604   : > { %11582 = vmatprep.subr.bf16.mxu0 %v18768_v4  ;;  %12115 = vmatprep.subr.bf16.mxu1 %v18771_v6  ;;  %v18847_v4 = vld [vmem:[%s25024_s3 + $0xa0] ss:$16 sps:$4 sm:$0xff]   ;;  %v18850_v6 = vld [vmem:[%s25024_s3 + $0xa8] ss:$16 sps:$4 sm:$0xff]  }
 0x607   : > { %11583 = vmatpush1.bf16.msra.mxu0 %v18766_v7  ;;  %12116 = vmatpush1.bf16.msra.mxu1 %v18769_v8  ;;  %v18855_v7 = vld [vmem:[%s25024_s3 + $0xc4] ss:$16 sps:$4 sm:$0xff]   ;;  %v18858_v8 = vld [vmem:[%s25024_s3 + $0xcc] ss:$16 sps:$4 sm:$0xff]  }
 0x608   : > { %11584 = vmatprep.subr.bf16.mxu0 %v18774_v55  ;;  %12117 = vmatprep.subr.bf16.mxu1 %v18777_v56  ;;  %v18853_v55 = vld [vmem:[%s25024_s3 + $0xc0] ss:$16 sps:$4 sm:$0xff]   ;;  %v18856_v56 = vld [vmem:[%s25024_s3 + $0xc8] ss:$16 sps:$4 sm:$0xff]  }
 0x60b   : > { %11585 = vmatpush1.bf16.msra.mxu0 %v18772_v9  ;;  %12118 = vmatpush1.bf16.msra.mxu1 %v18775_v12  ;;  %v18861_v9 = vld [vmem:[%s25024_s3 + $0xe4] ss:$16 sps:$4 sm:$0xff]   ;;  %v18864_v12 = vld [vmem:[%s25024_s3 + $0xec] ss:$16 sps:$4 sm:$0xff]  }
 0x60c   : > { %11586 = vmatprep.subr.bf16.mxu0 %v18780_v13  ;;  %12119 = vmatprep.subr.bf16.mxu1 %v18783_v15  ;;  %v18859_v13 = vld [vmem:[%s25024_s3 + $0xe0] ss:$16 sps:$4 sm:$0xff]   ;;  %v18862_v15 = vld [vmem:[%s25024_s3 + $0xe8] ss:$16 sps:$4 sm:$0xff]  }
 0x60f   : > { %11587 = vmatpush1.bf16.msra.mxu0 %v18778_v63  ;;  %12120 = vmatpush1.bf16.msra.mxu1 %v18781_v16  ;;  %v18867_v63 = vld [vmem:[%s25024_s3 + $0x104] ss:$16 sps:$4 sm:$0xff]   ;;  %v18870_v16 = vld [vmem:[%s25024_s3 + $0x10c] ss:$16 sps:$4 sm:$0xff]  }
 0x610   : > { %11588 = vmatprep.subr.bf16.mxu0 %v18786_v17  ;;  %12121 = vmatprep.subr.bf16.mxu1 %v18789_v14  ;;  %v18865_v17 = vld [vmem:[%s25024_s3 + $0x100] ss:$16 sps:$4 sm:$0xff]   ;;  %v18868_v14 = vld [vmem:[%s25024_s3 + $0x108] ss:$16 sps:$4 sm:$0xff]  }
 0x613   : > { %11589 = vmatpush1.bf16.msra.mxu0 %v18784_v20  ;;  %12122 = vmatpush1.bf16.msra.mxu1 %v18787_v11  ;;  %v18873_v20 = vld [vmem:[%s25024_s3 + $0x124] ss:$16 sps:$4 sm:$0xff]   ;;  %v18876_v11 = vld [vmem:[%s25024_s3 + $0x12c] ss:$16 sps:$4 sm:$0xff]  }
 0x614   : > { %11599 = vmatprep.subr.bf16.mxu0 %v18794_v5  ;;  %12132 = vmatprep.subr.bf16.mxu1 %v18797_v22  ;;  %v18871_v5 = vld [vmem:[%s25024_s3 + $0x120] ss:$16 sps:$4 sm:$0xff]   ;;  %v18874_v22 = vld [vmem:[%s25024_s3 + $0x128] ss:$16 sps:$4 sm:$0xff]  }
 0x616   : > { %11591 = vmatmul.mubr.bf16.vlgmr.msra.gmra.mrb[4].mxu0 %v15124_v23  ;;  %12124 = vmatmul.mubr.bf16.vlgmr.msra.gmra.mrb[4].mxu1 %v15124_v23  ;;  %v18879_v23 = vld [vmem:[%s25024_s3 + $0x144] ss:$16 sps:$4 sm:$0xff]  }
 0x617   : > { %11600 = vmatpush1.bf16.msra.mxu0 %v18792_v18  ;;  %12133 = vmatpush1.bf16.msra.mxu1 %v18795_v25  ;;  %v18882_v18 = vld [vmem:[%s25024_s3 + $0x14c] ss:$16 sps:$4 sm:$0xff]   ;;  %v18877_v25 = vld [vmem:[%s25024_s3 + $0x140] ss:$16 sps:$4 sm:$0xff]  }
 0x618   : > { %11601 = vmatprep.subr.bf16.mxu0 %v18800_v26  ;;  %12134 = vmatprep.subr.bf16.mxu1 %v18803_v10  ;;  %v18880_v26 = vld [vmem:[%s25024_s3 + $0x148] ss:$16 sps:$4 sm:$0xff]   ;;  %v18885_v10 = vld [vmem:[%s25024_s3 + $0x164] ss:$16 sps:$4 sm:$0xff]  }
 0x619   : > { %11631 = vmatprep.mubr.bf16.mxu0 %v19209_v46  ;;  %12164 = vmatprep.mubr.bf16.mxu1 %v19209_v46  ;;  %v18815_v46 = vld [vmem:[%s25023_s2 + $0x186c] ss:$16 sps:$4 sm:$0xff]  }
 0x61b   : > { %11602 = vmatpush1.bf16.msra.mxu0 %v18798_v21  ;;  %12135 = vmatpush1.bf16.msra.mxu1 %v18801_v24  ;;  %v18888_v21 = vld [vmem:[%s25024_s3 + $0x16c] ss:$16 sps:$4 sm:$0xff]   ;;  %v18883_v24 = vld [vmem:[%s25024_s3 + $0x160] ss:$16 sps:$4 sm:$0xff]  }
 0x61c   : > { %11603 = vmatprep.subr.bf16.mxu0 %v18806_v27  ;;  %12136 = vmatprep.subr.bf16.mxu1 %v18809_v35  ;;  %v18886_v27 = vld [vmem:[%s25024_s3 + $0x168] ss:$16 sps:$4 sm:$0xff]   ;;  %v18891_v35 = vld [vmem:[%s25024_s3 + $0x184] ss:$16 sps:$4 sm:$0xff]  }
 0x61f   : > { %11604 = vmatpush1.bf16.msra.mxu0 %v18804_v30  ;;  %12137 = vmatpush1.bf16.msra.mxu1 %v18807_v37  ;;  %v18894_v30 = vld [vmem:[%s25024_s3 + $0x18c] ss:$16 sps:$4 sm:$0xff]   ;;  %v18889_v37 = vld [vmem:[%s25024_s3 + $0x180] ss:$16 sps:$4 sm:$0xff]  }
 0x620   : > { %11605 = vmatprep.subr.bf16.mxu0 %v18812_v19  ;;  %12138 = vmatprep.subr.bf16.mxu1 %v18815_v46  ;;  %v18892_v19 = vld [vmem:[%s25024_s3 + $0x188] ss:$16 sps:$4 sm:$0xff]   ;;  %v18897_v46 = vld [vmem:[%s25024_s3 + $0x1a4] ss:$16 sps:$4 sm:$0xff]  }
 0x623   : > { %11606 = vmatpush1.bf16.msra.mxu0 %v18810_v38  ;;  %12139 = vmatpush1.bf16.msra.mxu1 %v18813_v39  ;;  %v18900_v38 = vld [vmem:[%s25024_s3 + $0x1ac] ss:$16 sps:$4 sm:$0xff]   ;;  %v18895_v39 = vld [vmem:[%s25024_s3 + $0x1a0] ss:$16 sps:$4 sm:$0xff]  }
 0x624   : > { %12970 = vmatprep.subr.bf16.mxu0 %v18819_v40  ;;  %13052 = vmatprep.subr.bf16.mxu1 %v18822_v41  ;;  %v18898_v40 = vld [vmem:[%s25024_s3 + $0x1a8] ss:$16 sps:$4 sm:$0xff]   ;;  %v18903_v41 = vld [vmem:[%s25024_s3 + $0x1c4] ss:$16 sps:$4 sm:$0xff]  }
 0x626   : > { %15911 = vmatmul.mubr.msk.bf16.vlgmr.msra.gmra.mrb[4].mxu0 %vm5209_vm0, %v18816_v36  ;;  %15912 = vmatmul.mubr.msk.bf16.vlgmr.msra.gmra.mrb[4].mxu1 %vm5209_vm0, %v18816_v36  ;;  %v18906_v36 = vld [vmem:[%s25024_s3 + $0x1cc] ss:$16 sps:$4 sm:$0xff]  }
 0x627   : > { %12971 = vmatpush1.bf16.msra.mxu0 %v18817_v60  ;;  %13053 = vmatpush1.bf16.msra.mxu1 %v18820_v42  ;;  %v18901_v60 = vld [vmem:[%s25024_s3 + $0x1c0] ss:$16 sps:$4 sm:$0xff]   ;;  %v18904_v42 = vld [vmem:[%s25024_s3 + $0x1c8] ss:$16 sps:$4 sm:$0xff]  }
 0x628   : > { %12972 = vmatprep.subr.bf16.mxu0 %v18825_v45  ;;  %13054 = vmatprep.subr.bf16.mxu1 %v18828_v50  ;;  %v18909_v45 = vld [vmem:[%s25024_s3 + $0x1e4] ss:$16 sps:$4 sm:$0xff]   ;;  %v18912_v50 = vld [vmem:[%s25024_s3 + $0x1ec] ss:$16 sps:$4 sm:$0xff]  }
 0x62b   : > { %12973 = vmatpush1.bf16.msra.mxu0 %v18823_v51  ;;  %13055 = vmatpush1.bf16.msra.mxu1 %v18826_v52  ;;  %v18907_v51 = vld [vmem:[%s25024_s3 + $0x1e0] ss:$16 sps:$4 sm:$0xff]   ;;  %v18910_v52 = vld [vmem:[%s25024_s3 + $0x1e8] ss:$16 sps:$4 sm:$0xff]  }
 0x62c   : > { %12974 = vmatprep.subr.bf16.mxu0 %v18831_v34  ;;  %13056 = vmatprep.subr.bf16.mxu1 %v18834_v53  ;;  %v18915_v34 = vld [vmem:[%s25024_s3 + $0x204] ss:$16 sps:$4 sm:$0xff]   ;;  %v18918_v53 = vld [vmem:[%s25024_s3 + $0x20c] ss:$16 sps:$4 sm:$0xff]  }
 0x62f   : > { %12975 = vmatpush1.bf16.msra.mxu0 %v18829_v54  ;;  %13057 = vmatpush1.bf16.msra.mxu1 %v18832_v57  ;;  %v24399_v54 = vld [vmem:[%s25027_s6] ss:$4 sm:$0xf] }
 0x630   : > { %12976 = vmatprep.subr.bf16.mxu0 %v18837_v58  ;;  %13058 = vmatprep.subr.bf16.mxu1 %v18840_v59  ;;  %v7080_v57 = vrot.slane %v24399_v54, %v22386_v28  ;;  %v7084_v58 = vrot.slane %v24399_v54, %v22393_v31  ;;  %v7092_v59 = vrot.slane %v24399_v54, %v22395_v32 }
 0x633   : > { %12977 = vmatpush1.bf16.msra.mxu0 %v18835_v33  ;;  %13059 = vmatpush1.bf16.msra.mxu1 %v18838_v61 }
 0x634   : > { %12978 = vmatprep.subr.bf16.mxu0 %v18843_v62  ;;  %13060 = vmatprep.subr.bf16.mxu1 %v18846_v0 }
 0x637   : > { %12979 = vmatpush1.bf16.msra.mxu0 %v18841_v1  ;;  %13061 = vmatpush1.bf16.msra.mxu1 %v18844_v2 }
 0x638   : > { %12980 = vmatprep.subr.bf16.mxu0 %v18849_v47  ;;  %13062 = vmatprep.subr.bf16.mxu1 %v18852_v3 }
 0x63b   : > { %12981 = vmatpush1.bf16.msra.mxu0 %v18847_v4  ;;  %13063 = vmatpush1.bf16.msra.mxu1 %v18850_v6 }
 0x63c   : > { %12982 = vmatprep.subr.bf16.mxu0 %v18855_v7  ;;  %13064 = vmatprep.subr.bf16.mxu1 %v18858_v8 }
 0x63f   : > { %12983 = vmatpush1.bf16.msra.mxu0 %v18853_v55  ;;  %13065 = vmatpush1.bf16.msra.mxu1 %v18856_v56 }
 0x640   : > { %12984 = vmatprep.subr.bf16.mxu0 %v18861_v9  ;;  %13066 = vmatprep.subr.bf16.mxu1 %v18864_v12  ;;  %v18913_v12 = vld [vmem:[%s25024_s3 + $0x200] ss:$16 sps:$4 sm:$0xff]  }
 0x643   : > { %12985 = vmatpush1.bf16.msra.mxu0 %v18859_v13  ;;  %13067 = vmatpush1.bf16.msra.mxu1 %v18862_v15  ;;  %v18916_v13 = vld [vmem:[%s25024_s3 + $0x208] ss:$16 sps:$4 sm:$0xff]  }
 0x644   : > { %12986 = vmatprep.subr.bf16.mxu0 %v18867_v63  ;;  %13068 = vmatprep.subr.bf16.mxu1 %v18870_v16  ;;  %v18921_v63 = vld [vmem:[%s25024_s3 + $0x224] ss:$16 sps:$4 sm:$0xff]   ;;  %v18924_v16 = vld [vmem:[%s25024_s3 + $0x22c] ss:$16 sps:$4 sm:$0xff]  }
 0x647   : > { %12987 = vmatpush1.bf16.msra.mxu0 %v18865_v17  ;;  %13069 = vmatpush1.bf16.msra.mxu1 %v18868_v14  ;;  %v18919_v14 = vld [vmem:[%s25024_s3 + $0x220] ss:$16 sps:$4 sm:$0xff]  }
 0x648   : > { %12988 = vmatprep.subr.bf16.mxu0 %v18873_v20  ;;  %13070 = vmatprep.subr.bf16.mxu1 %v18876_v11  ;;  %v18922_v20 = vld [vmem:[%s25024_s3 + $0x228] ss:$16 sps:$4 sm:$0xff]   ;;  %v18927_v11 = vld [vmem:[%s25024_s3 + $0x244] ss:$16 sps:$4 sm:$0xff]  }
 0x64b   : > { %12989 = vmatpush1.bf16.msra.mxu0 %v18871_v5  ;;  %13071 = vmatpush1.bf16.msra.mxu1 %v18874_v22  ;;  %v18930_v5 = vld [vmem:[%s25024_s3 + $0x24c] ss:$16 sps:$4 sm:$0xff]   ;;  %v18925_v22 = vld [vmem:[%s25024_s3 + $0x240] ss:$16 sps:$4 sm:$0xff]  }
 0x64c   : > { %12990 = vmatprep.subr.bf16.mxu0 %v18879_v23  ;;  %13072 = vmatprep.subr.bf16.mxu1 %v18882_v18  ;;  %v18928_v23 = vld [vmem:[%s25024_s3 + $0x248] ss:$16 sps:$4 sm:$0xff]   ;;  %v18933_v18 = vld [vmem:[%s25024_s3 + $0x264] ss:$16 sps:$4 sm:$0xff]  }
 0x64f   : > { %12991 = vmatpush1.bf16.msra.mxu0 %v18877_v25  ;;  %13073 = vmatpush1.bf16.msra.mxu1 %v18880_v26  ;;  %v18936_v25 = vld [vmem:[%s25024_s3 + $0x26c] ss:$16 sps:$4 sm:$0xff]   ;;  %v18931_v26 = vld [vmem:[%s25024_s3 + $0x260] ss:$16 sps:$4 sm:$0xff]  }
 0x650   : > { %12992 = vmatprep.subr.bf16.mxu0 %v18885_v10  ;;  %13074 = vmatprep.subr.bf16.mxu1 %v18888_v21  ;;  %v18934_v10 = vld [vmem:[%s25024_s3 + $0x268] ss:$16 sps:$4 sm:$0xff]   ;;  %v18939_v21 = vld [vmem:[%s25024_s3 + $0x284] ss:$16 sps:$4 sm:$0xff]  }
 0x653   : > { %12993 = vmatpush1.bf16.msra.mxu0 %v18883_v24  ;;  %13075 = vmatpush1.bf16.msra.mxu1 %v18886_v27  ;;  %v18942_v24 = vld [vmem:[%s25024_s3 + $0x28c] ss:$16 sps:$4 sm:$0xff]   ;;  %v18937_v27 = vld [vmem:[%s25024_s3 + $0x280] ss:$16 sps:$4 sm:$0xff]  }
 0x654   : > { %12994 = vmatprep.subr.bf16.mxu0 %v18891_v35  ;;  %13076 = vmatprep.subr.bf16.mxu1 %v18894_v30  ;;  %v18940_v35 = vld [vmem:[%s25024_s3 + $0x288] ss:$16 sps:$4 sm:$0xff]   ;;  %v18945_v30 = vld [vmem:[%s25024_s3 + $0x2a4] ss:$16 sps:$4 sm:$0xff]  }
 0x657   : > { %12995 = vmatpush1.bf16.msra.mxu0 %v18889_v37  ;;  %13077 = vmatpush1.bf16.msra.mxu1 %v18892_v19  ;;  %v18948_v37 = vld [vmem:[%s25024_s3 + $0x2ac] ss:$16 sps:$4 sm:$0xff]   ;;  %v18943_v19 = vld [vmem:[%s25024_s3 + $0x2a0] ss:$16 sps:$4 sm:$0xff]  }
 0x658   : > { %12996 = vmatprep.subr.bf16.mxu0 %v18897_v46  ;;  %13078 = vmatprep.subr.bf16.mxu1 %v18900_v38  ;;  %v18946_v46 = vld [vmem:[%s25024_s3 + $0x2a8] ss:$16 sps:$4 sm:$0xff]   ;;  %v18951_v38 = vld [vmem:[%s25024_s3 + $0x2c4] ss:$16 sps:$4 sm:$0xff]  }
 0x65b   : > { %12997 = vmatpush1.bf16.msra.mxu0 %v18895_v39  ;;  %13079 = vmatpush1.bf16.msra.mxu1 %v18898_v40  ;;  %v18954_v39 = vld [vmem:[%s25024_s3 + $0x2cc] ss:$16 sps:$4 sm:$0xff]   ;;  %v18949_v40 = vld [vmem:[%s25024_s3 + $0x2c0] ss:$16 sps:$4 sm:$0xff]  }
 0x65c   : > { %12998 = vmatprep.subr.bf16.mxu0 %v18903_v41  ;;  %13080 = vmatprep.subr.bf16.mxu1 %v18906_v36  ;;  %v18952_v41 = vld [vmem:[%s25024_s3 + $0x2c8] ss:$16 sps:$4 sm:$0xff]   ;;  %v18957_v36 = vld [vmem:[%s25024_s3 + $0x2e4] ss:$16 sps:$4 sm:$0xff]  }
 0x65f   : > { %12999 = vmatpush1.bf16.msra.mxu0 %v18901_v60  ;;  %13081 = vmatpush1.bf16.msra.mxu1 %v18904_v42  ;;  %v18960_v60 = vld [vmem:[%s25024_s3 + $0x2ec] ss:$16 sps:$4 sm:$0xff]   ;;  %v18955_v42 = vld [vmem:[%s25024_s3 + $0x2e0] ss:$16 sps:$4 sm:$0xff]  }
 0x660   : > { %13000 = vmatprep.subr.bf16.mxu0 %v18909_v45  ;;  %13082 = vmatprep.subr.bf16.mxu1 %v18912_v50  ;;  %v18958_v45 = vld [vmem:[%s25024_s3 + $0x2e8] ss:$16 sps:$4 sm:$0xff]   ;;  %v18963_v50 = vld [vmem:[%s25024_s3 + $0x304] ss:$16 sps:$4 sm:$0xff]  }
 0x663   : > { %13001 = vmatpush1.bf16.msra.mxu0 %v18907_v51  ;;  %13083 = vmatpush1.bf16.msra.mxu1 %v18910_v52  ;;  %v18966_v51 = vld [vmem:[%s25024_s3 + $0x30c] ss:$16 sps:$4 sm:$0xff]   ;;  %v18961_v52 = vld [vmem:[%s25024_s3 + $0x300] ss:$16 sps:$4 sm:$0xff]  }
 0x664   : > { %13011 = vmatprep.subr.bf16.mxu0 %v18915_v34  ;;  %13093 = vmatprep.subr.bf16.mxu1 %v18918_v53  ;;  %v18964_v34 = vld [vmem:[%s25024_s3 + $0x308] ss:$16 sps:$4 sm:$0xff]   ;;  %v18969_v53 = vld [vmem:[%s25024_s3 + $0x324] ss:$16 sps:$4 sm:$0xff]  }
 0x6f9   : > { %v11633_v33 = vpop.f32.mrb[4].mxu0  ;;  %v24407_v61 = vpop.f32.mrb[4].mxu1 }
 0x6fa   : > { %v16185_v62 = vadd.f32 %v11633_v33, %v7080_v57  ;;  %v11635_v0 = vpop.f32.mrb[5].mxu0  ;;  %v12168_v1 = vpop.f32.mrb[5].mxu1  ;;  %v18972_v57 = vld [vmem:[%s25024_s3 + $0x32c] ss:$16 sps:$4 sm:$0xff]   ;;  %v18975_v33 = vld [vmem:[%s25024_s3 + $0x344] ss:$16 sps:$4 sm:$0xff]  }
 0x6fb   : > { %v16186_v2 = vadd.f32 %v11635_v0, %v7084_v58  ;;  %v16188_v47 = vadd.f32 %v12168_v1, %v7092_v59  ;;  %v11637_v3 = vpop.f32.mrb[6].mxu0  ;;  %v12170_v4 = vpop.f32.mrb[6].mxu1  ;;  %v18967_v58 = vld [vmem:[%s25024_s3 + $0x320] ss:$16 sps:$4 sm:$0xff]   ;;  %v18970_v59 = vld [vmem:[%s25024_s3 + $0x328] ss:$16 sps:$4 sm:$0xff]  }
 0x6fc   : > { %v12173_v6 = vmax.f32 %v16185_v62, 0.0  ;;  %v11638_v7 = vpop.f32.mrb[7].mxu0  ;;  %v12171_v8 = vpop.f32.mrb[7].mxu1  ;;  %v18978_v62 = vld [vmem:[%s25024_s3 + $0x34c] ss:$16 sps:$4 sm:$0xff]  }
 0x6fd   : > { %v12174_v55 = vmax.f32 %v16186_v2, 0.0  ;;  %v12176_v56 = vmax.f32 %v16188_v47, 0.0  ;;  %v18973_v0 = vld [vmem:[%s25024_s3 + $0x340] ss:$16 sps:$4 sm:$0xff]   ;;  %v18976_v1 = vld [vmem:[%s25024_s3 + $0x348] ss:$16 sps:$4 sm:$0xff]  }
 0x6fe   : > { %v12177_v15 = vpack.c.bf16 %v12173_v6, %v12173_v6  ;;  %v18981_v2 = vld [vmem:[%s25024_s3 + $0x364] ss:$16 sps:$4 sm:$0xff]   ;;  %v18984_v47 = vld [vmem:[%s25024_s3 + $0x36c] ss:$16 sps:$4 sm:$0xff]   ;;  %v18979_v3 = vld [vmem:[%s25024_s3 + $0x360] ss:$16 sps:$4 sm:$0xff]  }
 0x6ff   : > { %v12178_v9 = vpack.c.bf16 %v12174_v55, %v12174_v55  ;;  %v12180_v17 = vpack.c.bf16 %v12176_v56, %v12176_v56  ;;  %v18982_v4 = vld [vmem:[%s25024_s3 + $0x368] ss:$16 sps:$4 sm:$0xff]   ;;  %v18987_v6 = vld [vmem:[%s25024_s3 + $0x384] ss:$16 sps:$4 sm:$0xff]   ;;  %v18990_v7 = vld [vmem:[%s25024_s3 + $0x38c] ss:$16 sps:$4 sm:$0xff]  }
 0x700   : > { %v18985_v8 = vld [vmem:[%s25024_s3 + $0x380] ss:$16 sps:$4 sm:$0xff]   ;;  %v18988_v55 = vld [vmem:[%s25024_s3 + $0x388] ss:$16 sps:$4 sm:$0xff]   ;;  %v18993_v56 = vld [vmem:[%s25024_s3 + $0x3a4] ss:$16 sps:$4 sm:$0xff]  }
 0x701   : > { %13002 = vmatprep.mubr.bf16.mxu0 %v12178_v9  ;;  %13084 = vmatprep.mubr.bf16.mxu1 %v12178_v9  ;;  %v18996_v9 = vld [vmem:[%s25024_s3 + $0x3ac] ss:$16 sps:$4 sm:$0xff]  }
 0x702   : > { %13003 = vmatmul.mubr.bf16.vlgmr.msra.gmra.mrb[8].mxu0 %v12177_v15  ;;  %13085 = vmatmul.mubr.bf16.vlgmr.msra.gmra.mrb[8].mxu1 %v12177_v15  ;;  %v7088_v15 = vrot.slane %v24399_v54, %v22388_v29  ;;  %v19000_v54 = vld [vmem:[%s25024_s3 + $0x3c8] ss:$16 sps:$4 sm:$0xff]  }
 0x703   : > { %13012 = vmatpush1.bf16.msra.mxu0 %v18913_v12  ;;  %13094 = vmatpush1.bf16.msra.mxu1 %v18916_v13  ;;  %v18991_v12 = vld [vmem:[%s25024_s3 + $0x3a0] ss:$16 sps:$4 sm:$0xff]   ;;  %v18994_v13 = vld [vmem:[%s25024_s3 + $0x3a8] ss:$16 sps:$4 sm:$0xff]  }
 0x704   : > { %13043 = vmatprep.mubr.bf16.mxu0 %v12180_v17  ;;  %13125 = vmatprep.mubr.bf16.mxu1 %v12180_v17  ;;  %v18997_v17 = vld [vmem:[%s25024_s3 + $0x3c0] ss:$16 sps:$4 sm:$0xff]  }
 0x705   : > { %13013 = vmatprep.subr.bf16.mxu0 %v18921_v63  ;;  %13095 = vmatprep.subr.bf16.mxu1 %v18924_v16  ;;  %v18999_v63 = vld [vmem:[%s25024_s3 + $0x3c4] ss:$16 sps:$4 sm:$0xff]   ;;  %v19002_v16 = vld [vmem:[%s25024_s3 + $0x3cc] ss:$16 sps:$4 sm:$0xff]  }
 0x707   : > { %13014 = vmatpush1.bf16.msra.mxu0 %v18919_v14  ;;  %13096 = vmatpush1.bf16.msra.mxu1 %v18922_v20  ;;  %v16187_v14 = vadd.f32 %v24407_v61, %v7088_v15  ;;  %v19005_v20 = vld [vmem:[%s25024_s3 + $0x3e4] ss:$16 sps:$4 sm:$0xff]   ;;  %v19006_v61 = vld [vmem:[%s25024_s3 + $0x3e8] ss:$16 sps:$4 sm:$0xff]  }
 0x708   : > { %13015 = vmatprep.subr.bf16.mxu0 %v18927_v11  ;;  %13097 = vmatprep.subr.bf16.mxu1 %v18930_v5  ;;  %v19008_v11 = vld [vmem:[%s25024_s3 + $0x3ec] ss:$16 sps:$4 sm:$0xff]   ;;  %v19003_v5 = vld [vmem:[%s25024_s3 + $0x3e0] ss:$16 sps:$4 sm:$0xff]   ;;  %v19077_v15 = vld [vmem:[%s25025_s4 + $0x164] ss:$16 sps:$4 sm:$0xff]  }
 0x70b   : > { %13016 = vmatpush1.bf16.msra.mxu0 %v18925_v22  ;;  %13098 = vmatpush1.bf16.msra.mxu1 %v18928_v23  ;;  %v12175_v22 = vmax.f32 %v16187_v14, 0.0  ;;  %v19011_v23 = vld [vmem:[%s25025_s4 + $0x4] ss:$16 sps:$4 sm:$0xff]   ;;  %v19086_v14 = vld [vmem:[%s25025_s4 + $0x18c] ss:$16 sps:$4 sm:$0xff]  }
 0x70c   : > { %13017 = vmatprep.subr.bf16.mxu0 %v18933_v18  ;;  %13099 = vmatprep.subr.bf16.mxu1 %v18936_v25  ;;  %v19014_v18 = vld [vmem:[%s25025_s4 + $0xc] ss:$16 sps:$4 sm:$0xff]   ;;  %v19009_v25 = vld [vmem:[%s25025_s4] ss:$16 sps:$4 sm:$0xff]  }
 0x70f   : > { %13018 = vmatpush1.bf16.msra.mxu0 %v18931_v26  ;;  %13100 = vmatpush1.bf16.msra.mxu1 %v18934_v10  ;;  %v19012_v26 = vld [vmem:[%s25025_s4 + $0x8] ss:$16 sps:$4 sm:$0xff]   ;;  %v12179_v10 = vpack.c.bf16 %v12175_v22, %v12175_v22  ;;  %v19087_v22 = vld [vmem:[%s25025_s4 + $0x1a0] ss:$16 sps:$4 sm:$0xff]  }
 0x710   : > { %13019 = vmatprep.subr.bf16.mxu0 %v18939_v21  ;;  %13101 = vmatprep.subr.bf16.mxu1 %v18942_v24  ;;  %v19017_v21 = vld [vmem:[%s25025_s4 + $0x24] ss:$16 sps:$4 sm:$0xff]   ;;  %v19020_v24 = vld [vmem:[%s25025_s4 + $0x2c] ss:$16 sps:$4 sm:$0xff]  }
 0x713   : > { %13020 = vmatpush1.bf16.msra.mxu0 %v18937_v27  ;;  %13102 = vmatpush1.bf16.msra.mxu1 %v18940_v35  ;;  %v19015_v27 = vld [vmem:[%s25025_s4 + $0x20] ss:$16 sps:$4 sm:$0xff]   ;;  %v19018_v35 = vld [vmem:[%s25025_s4 + $0x28] ss:$16 sps:$4 sm:$0xff]  }
 0x714   : > { %13021 = vmatprep.subr.bf16.mxu0 %v18945_v30  ;;  %13103 = vmatprep.subr.bf16.mxu1 %v18948_v37  ;;  %v19023_v30 = vld [vmem:[%s25025_s4 + $0x44] ss:$16 sps:$4 sm:$0xff]   ;;  %v19026_v37 = vld [vmem:[%s25025_s4 + $0x4c] ss:$16 sps:$4 sm:$0xff]  }
 0x717   : > { %13022 = vmatpush1.bf16.msra.mxu0 %v18943_v19  ;;  %13104 = vmatpush1.bf16.msra.mxu1 %v18946_v46  ;;  %v19021_v19 = vld [vmem:[%s25025_s4 + $0x40] ss:$16 sps:$4 sm:$0xff]   ;;  %v19024_v46 = vld [vmem:[%s25025_s4 + $0x48] ss:$16 sps:$4 sm:$0xff]  }
 0x718   : > { %13023 = vmatprep.subr.bf16.mxu0 %v18951_v38  ;;  %13105 = vmatprep.subr.bf16.mxu1 %v18954_v39  ;;  %v19029_v38 = vld [vmem:[%s25025_s4 + $0x64] ss:$16 sps:$4 sm:$0xff]   ;;  %v19032_v39 = vld [vmem:[%s25025_s4 + $0x6c] ss:$16 sps:$4 sm:$0xff]  }
 0x71b   : > { %13024 = vmatpush1.bf16.msra.mxu0 %v18949_v40  ;;  %13106 = vmatpush1.bf16.msra.mxu1 %v18952_v41  ;;  %v19027_v40 = vld [vmem:[%s25025_s4 + $0x60] ss:$16 sps:$4 sm:$0xff]   ;;  %v19030_v41 = vld [vmem:[%s25025_s4 + $0x68] ss:$16 sps:$4 sm:$0xff]  }
 0x71c   : > { %13025 = vmatprep.subr.bf16.mxu0 %v18957_v36  ;;  %13107 = vmatprep.subr.bf16.mxu1 %v18960_v60  ;;  %v19035_v36 = vld [vmem:[%s25025_s4 + $0x84] ss:$16 sps:$4 sm:$0xff]   ;;  %v19038_v60 = vld [vmem:[%s25025_s4 + $0x8c] ss:$16 sps:$4 sm:$0xff]  }
 0x71f   : > { %13026 = vmatpush1.bf16.msra.mxu0 %v18955_v42  ;;  %13108 = vmatpush1.bf16.msra.mxu1 %v18958_v45  ;;  %v19033_v42 = vld [vmem:[%s25025_s4 + $0x80] ss:$16 sps:$4 sm:$0xff]   ;;  %v19036_v45 = vld [vmem:[%s25025_s4 + $0x88] ss:$16 sps:$4 sm:$0xff]  }
 0x720   : > { %13027 = vmatprep.subr.bf16.mxu0 %v18963_v50  ;;  %13109 = vmatprep.subr.bf16.mxu1 %v18966_v51  ;;  %v19041_v50 = vld [vmem:[%s25025_s4 + $0xa4] ss:$16 sps:$4 sm:$0xff]   ;;  %v19044_v51 = vld [vmem:[%s25025_s4 + $0xac] ss:$16 sps:$4 sm:$0xff]  }
 0x723   : > { %13028 = vmatpush1.bf16.msra.mxu0 %v18961_v52  ;;  %13110 = vmatpush1.bf16.msra.mxu1 %v18964_v34  ;;  %v19039_v52 = vld [vmem:[%s25025_s4 + $0xa0] ss:$16 sps:$4 sm:$0xff]   ;;  %v19042_v34 = vld [vmem:[%s25025_s4 + $0xa8] ss:$16 sps:$4 sm:$0xff]  }
 0x724   : > { %13029 = vmatprep.subr.bf16.mxu0 %v18969_v53  ;;  %13111 = vmatprep.subr.bf16.mxu1 %v18972_v57  ;;  %v19047_v53 = vld [vmem:[%s25025_s4 + $0xc4] ss:$16 sps:$4 sm:$0xff]   ;;  %v19050_v57 = vld [vmem:[%s25025_s4 + $0xcc] ss:$16 sps:$4 sm:$0xff]  }
 0x727   : > { %13030 = vmatpush1.bf16.msra.mxu0 %v18967_v58  ;;  %13112 = vmatpush1.bf16.msra.mxu1 %v18970_v59  ;;  %v19045_v58 = vld [vmem:[%s25025_s4 + $0xc0] ss:$16 sps:$4 sm:$0xff]   ;;  %v19048_v59 = vld [vmem:[%s25025_s4 + $0xc8] ss:$16 sps:$4 sm:$0xff]  }
 0x728   : > { %13031 = vmatprep.subr.bf16.mxu0 %v18975_v33  ;;  %13113 = vmatprep.subr.bf16.mxu1 %v18978_v62  ;;  %v19053_v33 = vld [vmem:[%s25025_s4 + $0xe4] ss:$16 sps:$4 sm:$0xff]   ;;  %v19056_v62 = vld [vmem:[%s25025_s4 + $0xec] ss:$16 sps:$4 sm:$0xff]  }
 0x72b   : > { %13032 = vmatpush1.bf16.msra.mxu0 %v18973_v0  ;;  %13114 = vmatpush1.bf16.msra.mxu1 %v18976_v1  ;;  %v19051_v0 = vld [vmem:[%s25025_s4 + $0xe0] ss:$16 sps:$4 sm:$0xff]   ;;  %v19054_v1 = vld [vmem:[%s25025_s4 + $0xe8] ss:$16 sps:$4 sm:$0xff]  }
 0x72c   : > { %13033 = vmatprep.subr.bf16.mxu0 %v18981_v2  ;;  %13115 = vmatprep.subr.bf16.mxu1 %v18984_v47  ;;  %v19059_v2 = vld [vmem:[%s25025_s4 + $0x104] ss:$16 sps:$4 sm:$0xff]   ;;  %v19062_v47 = vld [vmem:[%s25025_s4 + $0x10c] ss:$16 sps:$4 sm:$0xff]  }
 0x72f   : > { %13034 = vmatpush1.bf16.msra.mxu0 %v18979_v3  ;;  %13116 = vmatpush1.bf16.msra.mxu1 %v18982_v4  ;;  %v19057_v3 = vld [vmem:[%s25025_s4 + $0x100] ss:$16 sps:$4 sm:$0xff]   ;;  %v19060_v4 = vld [vmem:[%s25025_s4 + $0x108] ss:$16 sps:$4 sm:$0xff]  }
 0x730   : > { %13035 = vmatprep.subr.bf16.mxu0 %v18987_v6  ;;  %13117 = vmatprep.subr.bf16.mxu1 %v18990_v7  ;;  %v19065_v6 = vld [vmem:[%s25025_s4 + $0x124] ss:$16 sps:$4 sm:$0xff]   ;;  %v19068_v7 = vld [vmem:[%s25025_s4 + $0x12c] ss:$16 sps:$4 sm:$0xff]  }
 0x733   : > { %13036 = vmatpush1.bf16.msra.mxu0 %v18985_v8  ;;  %13118 = vmatpush1.bf16.msra.mxu1 %v18988_v55  ;;  %v19063_v8 = vld [vmem:[%s25025_s4 + $0x120] ss:$16 sps:$4 sm:$0xff]   ;;  %v19066_v55 = vld [vmem:[%s25025_s4 + $0x128] ss:$16 sps:$4 sm:$0xff]  }
 0x734   : > { %13037 = vmatprep.subr.bf16.mxu0 %v18993_v56  ;;  %13119 = vmatprep.subr.bf16.mxu1 %v18996_v9  ;;  %v19071_v56 = vld [vmem:[%s25025_s4 + $0x144] ss:$16 sps:$4 sm:$0xff]   ;;  %v19074_v9 = vld [vmem:[%s25025_s4 + $0x14c] ss:$16 sps:$4 sm:$0xff]  }
 0x737   : > { %13038 = vmatpush1.bf16.msra.mxu0 %v18991_v12  ;;  %13120 = vmatpush1.bf16.msra.mxu1 %v18994_v13  ;;  %v19069_v12 = vld [vmem:[%s25025_s4 + $0x140] ss:$16 sps:$4 sm:$0xff]   ;;  %v19072_v13 = vld [vmem:[%s25025_s4 + $0x148] ss:$16 sps:$4 sm:$0xff]  }
 0x738   : > { %13039 = vmatprep.subr.bf16.mxu0 %v18999_v63  ;;  %13121 = vmatprep.subr.bf16.mxu1 %v19002_v16  ;;  %v19080_v63 = vld [vmem:[%s25025_s4 + $0x16c] ss:$16 sps:$4 sm:$0xff]   ;;  %v19075_v16 = vld [vmem:[%s25025_s4 + $0x160] ss:$16 sps:$4 sm:$0xff]  }
 0x73b   : > { %13040 = vmatpush1.bf16.msra.mxu0 %v18997_v17  ;;  %13122 = vmatpush1.bf16.msra.mxu1 %v19000_v54  ;;  %v19078_v17 = vld [vmem:[%s25025_s4 + $0x168] ss:$16 sps:$4 sm:$0xff]   ;;  %v19083_v54 = vld [vmem:[%s25025_s4 + $0x184] ss:$16 sps:$4 sm:$0xff]  }
 0x73c   : > { %13041 = vmatprep.subr.bf16.mxu0 %v19005_v20  ;;  %13123 = vmatprep.subr.bf16.mxu1 %v19008_v11  ;;  %v19081_v20 = vld [vmem:[%s25025_s4 + $0x180] ss:$16 sps:$4 sm:$0xff]   ;;  %v19084_v11 = vld [vmem:[%s25025_s4 + $0x188] ss:$16 sps:$4 sm:$0xff]  }
 0x73f   : > { %13042 = vmatpush1.bf16.msra.mxu0 %v19003_v5  ;;  %13124 = vmatpush1.bf16.msra.mxu1 %v19006_v61  ;;  %v19089_v5 = vld [vmem:[%s25025_s4 + $0x1a4] ss:$16 sps:$4 sm:$0xff]   ;;  %v19092_v61 = vld [vmem:[%s25025_s4 + $0x1ac] ss:$16 sps:$4 sm:$0xff]  }
 0x740   : > { %13931 = vmatprep.subr.bf16.mxu0 %v19011_v23  ;;  %14013 = vmatprep.subr.bf16.mxu1 %v19014_v18  ;;  %v19090_v23 = vld [vmem:[%s25025_s4 + $0x1a8] ss:$16 sps:$4 sm:$0xff]   ;;  %v19095_v18 = vld [vmem:[%s25025_s4 + $0x1c4] ss:$16 sps:$4 sm:$0xff]  }
 0x742   : > { %13044 = vmatmul.mubr.bf16.vlgmr.msra.gmra.mrb[8].mxu0 %v12179_v10  ;;  %13126 = vmatmul.mubr.bf16.vlgmr.msra.gmra.mrb[8].mxu1 %v12179_v10  ;;  %v19096_v10 = vld [vmem:[%s25025_s4 + $0x1c8] ss:$16 sps:$4 sm:$0xff]  }
 0x743   : > { %13932 = vmatpush1.bf16.msra.mxu0 %v19009_v25  ;;  %14014 = vmatpush1.bf16.msra.mxu1 %v19012_v26  ;;  %v19098_v25 = vld [vmem:[%s25025_s4 + $0x1cc] ss:$16 sps:$4 sm:$0xff]   ;;  %v19093_v26 = vld [vmem:[%s25025_s4 + $0x1c0] ss:$16 sps:$4 sm:$0xff]  }
 0x744   : > { %13933 = vmatprep.subr.bf16.mxu0 %v19017_v21  ;;  %14015 = vmatprep.subr.bf16.mxu1 %v19020_v24  ;;  %v19101_v21 = vld [vmem:[%s25025_s4 + $0x1e4] ss:$16 sps:$4 sm:$0xff]   ;;  %v19104_v24 = vld [vmem:[%s25025_s4 + $0x1ec] ss:$16 sps:$4 sm:$0xff]  }
 0x747   : > { %13934 = vmatpush1.bf16.msra.mxu0 %v19015_v27  ;;  %14016 = vmatpush1.bf16.msra.mxu1 %v19018_v35  ;;  %v19099_v27 = vld [vmem:[%s25025_s4 + $0x1e0] ss:$16 sps:$4 sm:$0xff]   ;;  %v19102_v35 = vld [vmem:[%s25025_s4 + $0x1e8] ss:$16 sps:$4 sm:$0xff]  }
 0x748   : > { %13935 = vmatprep.subr.bf16.mxu0 %v19023_v30  ;;  %14017 = vmatprep.subr.bf16.mxu1 %v19026_v37  ;;  %v19107_v30 = vld [vmem:[%s25025_s4 + $0x204] ss:$16 sps:$4 sm:$0xff]   ;;  %v19110_v37 = vld [vmem:[%s25025_s4 + $0x20c] ss:$16 sps:$4 sm:$0xff]  }
 0x74b   : > { %13936 = vmatpush1.bf16.msra.mxu0 %v19021_v19  ;;  %14018 = vmatpush1.bf16.msra.mxu1 %v19024_v46  ;;  %v24799_v19 = vld [vmem:[%s25027_s6 + $0x1] ss:$4 sm:$0xf] }
 0x74c   : > { %13937 = vmatprep.subr.bf16.mxu0 %v19029_v38  ;;  %14019 = vmatprep.subr.bf16.mxu1 %v19032_v39  ;;  %v12313_v46 = vrot.slane %v24799_v19, %v22386_v28  ;;  %v12317_v38 = vrot.slane %v24799_v19, %v22393_v31  ;;  %v12325_v39 = vrot.slane %v24799_v19, %v22395_v32 }
 0x74f   : > { %13938 = vmatpush1.bf16.msra.mxu0 %v19027_v40  ;;  %14020 = vmatpush1.bf16.msra.mxu1 %v19030_v41 }
 0x750   : > { %13939 = vmatprep.subr.bf16.mxu0 %v19035_v36  ;;  %14021 = vmatprep.subr.bf16.mxu1 %v19038_v60 }
 0x753   : > { %13940 = vmatpush1.bf16.msra.mxu0 %v19033_v42  ;;  %14022 = vmatpush1.bf16.msra.mxu1 %v19036_v45 }
 0x754   : > { %13941 = vmatprep.subr.bf16.mxu0 %v19041_v50  ;;  %14023 = vmatprep.subr.bf16.mxu1 %v19044_v51 }
 0x757   : > { %13942 = vmatpush1.bf16.msra.mxu0 %v19039_v52  ;;  %14024 = vmatpush1.bf16.msra.mxu1 %v19042_v34 }
 0x758   : > { %13943 = vmatprep.subr.bf16.mxu0 %v19047_v53  ;;  %14025 = vmatprep.subr.bf16.mxu1 %v19050_v57 }
 0x75b   : > { %13944 = vmatpush1.bf16.msra.mxu0 %v19045_v58  ;;  %14026 = vmatpush1.bf16.msra.mxu1 %v19048_v59 }
 0x75c   : > { %13945 = vmatprep.subr.bf16.mxu0 %v19053_v33  ;;  %14027 = vmatprep.subr.bf16.mxu1 %v19056_v62  ;;  %v19105_v62 = vld [vmem:[%s25025_s4 + $0x200] ss:$16 sps:$4 sm:$0xff]  }
 0x75f   : > { %13946 = vmatpush1.bf16.msra.mxu0 %v19051_v0  ;;  %14028 = vmatpush1.bf16.msra.mxu1 %v19054_v1  ;;  %v19108_v0 = vld [vmem:[%s25025_s4 + $0x208] ss:$16 sps:$4 sm:$0xff]  }
 0x760   : > { %13947 = vmatprep.subr.bf16.mxu0 %v19059_v2  ;;  %14029 = vmatprep.subr.bf16.mxu1 %v19062_v47  ;;  %v19113_v2 = vld [vmem:[%s25025_s4 + $0x224] ss:$16 sps:$4 sm:$0xff]   ;;  %v19116_v47 = vld [vmem:[%s25025_s4 + $0x22c] ss:$16 sps:$4 sm:$0xff]  }
 0x763   : > { %13948 = vmatpush1.bf16.msra.mxu0 %v19057_v3  ;;  %14030 = vmatpush1.bf16.msra.mxu1 %v19060_v4  ;;  %v19111_v4 = vld [vmem:[%s25025_s4 + $0x220] ss:$16 sps:$4 sm:$0xff]  }
 0x764   : > { %13949 = vmatprep.subr.bf16.mxu0 %v19065_v6  ;;  %14031 = vmatprep.subr.bf16.mxu1 %v19068_v7  ;;  %v19114_v6 = vld [vmem:[%s25025_s4 + $0x228] ss:$16 sps:$4 sm:$0xff]   ;;  %v19119_v7 = vld [vmem:[%s25025_s4 + $0x244] ss:$16 sps:$4 sm:$0xff]  }
 0x767   : > { %13950 = vmatpush1.bf16.msra.mxu0 %v19063_v8  ;;  %14032 = vmatpush1.bf16.msra.mxu1 %v19066_v55  ;;  %v19122_v8 = vld [vmem:[%s25025_s4 + $0x24c] ss:$16 sps:$4 sm:$0xff]   ;;  %v19117_v55 = vld [vmem:[%s25025_s4 + $0x240] ss:$16 sps:$4 sm:$0xff]  }
 0x768   : > { %13951 = vmatprep.subr.bf16.mxu0 %v19071_v56  ;;  %14033 = vmatprep.subr.bf16.mxu1 %v19074_v9  ;;  %v19120_v56 = vld [vmem:[%s25025_s4 + $0x248] ss:$16 sps:$4 sm:$0xff]   ;;  %v19125_v9 = vld [vmem:[%s25025_s4 + $0x264] ss:$16 sps:$4 sm:$0xff]  }
 0x76b   : > { %13952 = vmatpush1.bf16.msra.mxu0 %v19069_v12  ;;  %14034 = vmatpush1.bf16.msra.mxu1 %v19072_v13  ;;  %v19128_v12 = vld [vmem:[%s25025_s4 + $0x26c] ss:$16 sps:$4 sm:$0xff]   ;;  %v19123_v13 = vld [vmem:[%s25025_s4 + $0x260] ss:$16 sps:$4 sm:$0xff]  }
 0x76c   : > { %13953 = vmatprep.subr.bf16.mxu0 %v19077_v15  ;;  %14035 = vmatprep.subr.bf16.mxu1 %v19080_v63  ;;  %v19126_v15 = vld [vmem:[%s25025_s4 + $0x268] ss:$16 sps:$4 sm:$0xff]   ;;  %v19131_v63 = vld [vmem:[%s25025_s4 + $0x284] ss:$16 sps:$4 sm:$0xff]  }
 0x76f   : > { %13954 = vmatpush1.bf16.msra.mxu0 %v19075_v16  ;;  %14036 = vmatpush1.bf16.msra.mxu1 %v19078_v17  ;;  %v19134_v16 = vld [vmem:[%s25025_s4 + $0x28c] ss:$16 sps:$4 sm:$0xff]   ;;  %v19129_v17 = vld [vmem:[%s25025_s4 + $0x280] ss:$16 sps:$4 sm:$0xff]  }
 0x770   : > { %13955 = vmatprep.subr.bf16.mxu0 %v19083_v54  ;;  %14037 = vmatprep.subr.bf16.mxu1 %v19086_v14  ;;  %v19132_v54 = vld [vmem:[%s25025_s4 + $0x288] ss:$16 sps:$4 sm:$0xff]   ;;  %v19137_v14 = vld [vmem:[%s25025_s4 + $0x2a4] ss:$16 sps:$4 sm:$0xff]  }
 0x773   : > { %13956 = vmatpush1.bf16.msra.mxu0 %v19081_v20  ;;  %14038 = vmatpush1.bf16.msra.mxu1 %v19084_v11  ;;  %v19140_v20 = vld [vmem:[%s25025_s4 + $0x2ac] ss:$16 sps:$4 sm:$0xff]   ;;  %v19135_v11 = vld [vmem:[%s25025_s4 + $0x2a0] ss:$16 sps:$4 sm:$0xff]  }
 0x774   : > { %13957 = vmatprep.subr.bf16.mxu0 %v19089_v5  ;;  %14039 = vmatprep.subr.bf16.mxu1 %v19092_v61  ;;  %v19138_v5 = vld [vmem:[%s25025_s4 + $0x2a8] ss:$16 sps:$4 sm:$0xff]   ;;  %v19143_v61 = vld [vmem:[%s25025_s4 + $0x2c4] ss:$16 sps:$4 sm:$0xff]  }
 0x777   : > { %13958 = vmatpush1.bf16.msra.mxu0 %v19087_v22  ;;  %14040 = vmatpush1.bf16.msra.mxu1 %v19090_v23  ;;  %v19146_v22 = vld [vmem:[%s25025_s4 + $0x2cc] ss:$16 sps:$4 sm:$0xff]   ;;  %v19141_v23 = vld [vmem:[%s25025_s4 + $0x2c0] ss:$16 sps:$4 sm:$0xff]  }
 0x778   : > { %13959 = vmatprep.subr.bf16.mxu0 %v19095_v18  ;;  %14041 = vmatprep.subr.bf16.mxu1 %v19098_v25  ;;  %v19144_v18 = vld [vmem:[%s25025_s4 + $0x2c8] ss:$16 sps:$4 sm:$0xff]   ;;  %v19149_v25 = vld [vmem:[%s25025_s4 + $0x2e4] ss:$16 sps:$4 sm:$0xff]  }
 0x77b   : > { %13960 = vmatpush1.bf16.msra.mxu0 %v19093_v26  ;;  %14042 = vmatpush1.bf16.msra.mxu1 %v19096_v10  ;;  %v19152_v26 = vld [vmem:[%s25025_s4 + $0x2ec] ss:$16 sps:$4 sm:$0xff]   ;;  %v19147_v10 = vld [vmem:[%s25025_s4 + $0x2e0] ss:$16 sps:$4 sm:$0xff]  }
 0x77c   : > { %13961 = vmatprep.subr.bf16.mxu0 %v19101_v21  ;;  %14043 = vmatprep.subr.bf16.mxu1 %v19104_v24  ;;  %v19150_v21 = vld [vmem:[%s25025_s4 + $0x2e8] ss:$16 sps:$4 sm:$0xff]   ;;  %v19155_v24 = vld [vmem:[%s25025_s4 + $0x304] ss:$16 sps:$4 sm:$0xff]  }
 0x77f   : > { %13962 = vmatpush1.bf16.msra.mxu0 %v19099_v27  ;;  %14044 = vmatpush1.bf16.msra.mxu1 %v19102_v35  ;;  %v19158_v27 = vld [vmem:[%s25025_s4 + $0x30c] ss:$16 sps:$4 sm:$0xff]   ;;  %v19153_v35 = vld [vmem:[%s25025_s4 + $0x300] ss:$16 sps:$4 sm:$0xff]  }
 0x780   : > { %13972 = vmatprep.subr.bf16.mxu0 %v19107_v30  ;;  %14054 = vmatprep.subr.bf16.mxu1 %v19110_v37  ;;  %v19156_v30 = vld [vmem:[%s25025_s4 + $0x308] ss:$16 sps:$4 sm:$0xff]   ;;  %v19161_v37 = vld [vmem:[%s25025_s4 + $0x324] ss:$16 sps:$4 sm:$0xff]  }
 0x815   : > { %v13045_v40 = vpop.f32.mrb[8].mxu0  ;;  %v24807_v41 = vpop.f32.mrb[8].mxu1 }
 0x816   : > { %v16189_v36 = vadd.f32 %v13045_v40, %v12313_v46  ;;  %v13047_v60 = vpop.f32.mrb[9].mxu0  ;;  %v13129_v42 = vpop.f32.mrb[9].mxu1  ;;  %v19164_v46 = vld [vmem:[%s25025_s4 + $0x32c] ss:$16 sps:$4 sm:$0xff]   ;;  %v19167_v40 = vld [vmem:[%s25025_s4 + $0x344] ss:$16 sps:$4 sm:$0xff]  }
 0x817   : > { %v16190_v45 = vadd.f32 %v13047_v60, %v12317_v38  ;;  %v16192_v50 = vadd.f32 %v13129_v42, %v12325_v39  ;;  %v13049_v51 = vpop.f32.mrb[10].mxu0  ;;  %v13131_v52 = vpop.f32.mrb[10].mxu1  ;;  %v19159_v38 = vld [vmem:[%s25025_s4 + $0x320] ss:$16 sps:$4 sm:$0xff]   ;;  %v19162_v39 = vld [vmem:[%s25025_s4 + $0x328] ss:$16 sps:$4 sm:$0xff]  }
 0x818   : > { %v13134_v34 = vmax.f32 %v16189_v36, 0.0  ;;  %v13050_v53 = vpop.f32.mrb[11].mxu0  ;;  %v13132_v57 = vpop.f32.mrb[11].mxu1  ;;  %v19170_v36 = vld [vmem:[%s25025_s4 + $0x34c] ss:$16 sps:$4 sm:$0xff]  }
 0x819   : > { %v13135_v58 = vmax.f32 %v16190_v45, 0.0  ;;  %v13137_v59 = vmax.f32 %v16192_v50, 0.0  ;;  %v19165_v60 = vld [vmem:[%s25025_s4 + $0x340] ss:$16 sps:$4 sm:$0xff]   ;;  %v19168_v42 = vld [vmem:[%s25025_s4 + $0x348] ss:$16 sps:$4 sm:$0xff]  }
 0x81a   : > { %v13138_v1 = vpack.c.bf16 %v13134_v34, %v13134_v34  ;;  %v19173_v45 = vld [vmem:[%s25025_s4 + $0x364] ss:$16 sps:$4 sm:$0xff]   ;;  %v19176_v50 = vld [vmem:[%s25025_s4 + $0x36c] ss:$16 sps:$4 sm:$0xff]   ;;  %v19171_v51 = vld [vmem:[%s25025_s4 + $0x360] ss:$16 sps:$4 sm:$0xff]  }
 0x81b   : > { %v13139_v33 = vpack.c.bf16 %v13135_v58, %v13135_v58  ;;  %v13141_v3 = vpack.c.bf16 %v13137_v59, %v13137_v59  ;;  %v19174_v52 = vld [vmem:[%s25025_s4 + $0x368] ss:$16 sps:$4 sm:$0xff]   ;;  %v19179_v34 = vld [vmem:[%s25025_s4 + $0x384] ss:$16 sps:$4 sm:$0xff]   ;;  %v19182_v53 = vld [vmem:[%s25025_s4 + $0x38c] ss:$16 sps:$4 sm:$0xff]  }
 0x81c   : > { %v19177_v57 = vld [vmem:[%s25025_s4 + $0x380] ss:$16 sps:$4 sm:$0xff]   ;;  %v19180_v58 = vld [vmem:[%s25025_s4 + $0x388] ss:$16 sps:$4 sm:$0xff]   ;;  %v19185_v59 = vld [vmem:[%s25025_s4 + $0x3a4] ss:$16 sps:$4 sm:$0xff]  }
 0x81d   : > { %13963 = vmatprep.mubr.bf16.mxu0 %v13139_v33  ;;  %14045 = vmatprep.mubr.bf16.mxu1 %v13139_v33  ;;  %v19188_v33 = vld [vmem:[%s25025_s4 + $0x3ac] ss:$16 sps:$4 sm:$0xff]  }
 0x81e   : > { %13964 = vmatmul.mubr.bf16.vlgmr.msra.gmra.mrb[12].mxu0 %v13138_v1  ;;  %14046 = vmatmul.mubr.bf16.vlgmr.msra.gmra.mrb[12].mxu1 %v13138_v1  ;;  %v12321_v1 = vrot.slane %v24799_v19, %v22388_v29  ;;  %v19192_v19 = vld [vmem:[%s25025_s4 + $0x3c8] ss:$16 sps:$4 sm:$0xff]  }
 0x81f   : > { %13973 = vmatpush1.bf16.msra.mxu0 %v19105_v62  ;;  %14055 = vmatpush1.bf16.msra.mxu1 %v19108_v0  ;;  %v19183_v62 = vld [vmem:[%s25025_s4 + $0x3a0] ss:$16 sps:$4 sm:$0xff]   ;;  %v19186_v0 = vld [vmem:[%s25025_s4 + $0x3a8] ss:$16 sps:$4 sm:$0xff]  }
 0x820   : > { %14004 = vmatprep.mubr.bf16.mxu0 %v13141_v3  ;;  %14086 = vmatprep.mubr.bf16.mxu1 %v13141_v3  ;;  %v19189_v3 = vld [vmem:[%s25025_s4 + $0x3c0] ss:$16 sps:$4 sm:$0xff]  }
 0x821   : > { %13974 = vmatprep.subr.bf16.mxu0 %v19113_v2  ;;  %14056 = vmatprep.subr.bf16.mxu1 %v19116_v47  ;;  %v19191_v2 = vld [vmem:[%s25025_s4 + $0x3c4] ss:$16 sps:$4 sm:$0xff]   ;;  %v19194_v47 = vld [vmem:[%s25025_s4 + $0x3cc] ss:$16 sps:$4 sm:$0xff]  }
 0x823   : > { %13975 = vmatpush1.bf16.msra.mxu0 %v19111_v4  ;;  %14057 = vmatpush1.bf16.msra.mxu1 %v19114_v6  ;;  %v16191_v4 = vadd.f32 %v24807_v41, %v12321_v1  ;;  %v19197_v6 = vld [vmem:[%s25025_s4 + $0x3e4] ss:$16 sps:$4 sm:$0xff]   ;;  %v19198_v41 = vld [vmem:[%s25025_s4 + $0x3e8] ss:$16 sps:$4 sm:$0xff]  }
 0x824   : > { %13976 = vmatprep.subr.bf16.mxu0 %v19119_v7  ;;  %14058 = vmatprep.subr.bf16.mxu1 %v19122_v8  ;;  %v19200_v7 = vld [vmem:[%s25025_s4 + $0x3ec] ss:$16 sps:$4 sm:$0xff]   ;;  %v19195_v8 = vld [vmem:[%s25025_s4 + $0x3e0] ss:$16 sps:$4 sm:$0xff]  }
 0x827   : > { %13977 = vmatpush1.bf16.msra.mxu0 %v19117_v55  ;;  %14059 = vmatpush1.bf16.msra.mxu1 %v19120_v56  ;;  %v13136_v55 = vmax.f32 %v16191_v4, 0.0 }
 0x828   : > { %13978 = vmatprep.subr.bf16.mxu0 %v19125_v9  ;;  %14060 = vmatprep.subr.bf16.mxu1 %v19128_v12  ;;  %v14289_v9 = vld [vmem:[%s25027_s6 + $0x2] ss:$4 sm:$0xf] }
 0x829   : > { %v13140_v56 = vpack.c.bf16 %v13136_v55, %v13136_v55  ;;  %v13274_v12 = vrot.slane %v14289_v9, %v22386_v28 }
 0x82b   : > { %13979 = vmatpush1.bf16.msra.mxu0 %v19123_v13  ;;  %14061 = vmatpush1.bf16.msra.mxu1 %v19126_v15  ;;  %v13282_v13 = vrot.slane %v14289_v9, %v22388_v29  ;;  %v13278_v15 = vrot.slane %v14289_v9, %v22393_v31 }
 0x82c   : > { %13980 = vmatprep.subr.bf16.mxu0 %v19131_v63  ;;  %14062 = vmatprep.subr.bf16.mxu1 %v19134_v16  ;;  %v13286_v63 = vrot.slane %v14289_v9, %v22395_v32 }
 0x82f   : > { %13981 = vmatpush1.bf16.msra.mxu0 %v19129_v17  ;;  %14063 = vmatpush1.bf16.msra.mxu1 %v19132_v54 }
 0x830   : > { %13982 = vmatprep.subr.bf16.mxu0 %v19137_v14  ;;  %14064 = vmatprep.subr.bf16.mxu1 %v19140_v20 }
 0x833   : > { %13983 = vmatpush1.bf16.msra.mxu0 %v19135_v11  ;;  %14065 = vmatpush1.bf16.msra.mxu1 %v19138_v5 }
 0x834   : > { %13984 = vmatprep.subr.bf16.mxu0 %v19143_v61  ;;  %14066 = vmatprep.subr.bf16.mxu1 %v19146_v22 }
 0x837   : > { %13985 = vmatpush1.bf16.msra.mxu0 %v19141_v23  ;;  %14067 = vmatpush1.bf16.msra.mxu1 %v19144_v18 }
 0x838   : > { %13986 = vmatprep.subr.bf16.mxu0 %v19149_v25  ;;  %14068 = vmatprep.subr.bf16.mxu1 %v19152_v26 }
 0x83b   : > { %13987 = vmatpush1.bf16.msra.mxu0 %v19147_v10  ;;  %14069 = vmatpush1.bf16.msra.mxu1 %v19150_v21 }
 0x83c   : > { %13988 = vmatprep.subr.bf16.mxu0 %v19155_v24  ;;  %14070 = vmatprep.subr.bf16.mxu1 %v19158_v27 }
 0x83f   : > { %13989 = vmatpush1.bf16.msra.mxu0 %v19153_v35  ;;  %14071 = vmatpush1.bf16.msra.mxu1 %v19156_v30 }
 0x840   : > { %13990 = vmatprep.subr.bf16.mxu0 %v19161_v37  ;;  %14072 = vmatprep.subr.bf16.mxu1 %v19164_v46 }
 0x843   : > { %13991 = vmatpush1.bf16.msra.mxu0 %v19159_v38  ;;  %14073 = vmatpush1.bf16.msra.mxu1 %v19162_v39 }
 0x844   : > { %13992 = vmatprep.subr.bf16.mxu0 %v19167_v40  ;;  %14074 = vmatprep.subr.bf16.mxu1 %v19170_v36 }
 0x847   : > { %13993 = vmatpush1.bf16.msra.mxu0 %v19165_v60  ;;  %14075 = vmatpush1.bf16.msra.mxu1 %v19168_v42 }
 0x848   : > { %13994 = vmatprep.subr.bf16.mxu0 %v19173_v45  ;;  %14076 = vmatprep.subr.bf16.mxu1 %v19176_v50 }
 0x84b   : > { %13995 = vmatpush1.bf16.msra.mxu0 %v19171_v51  ;;  %14077 = vmatpush1.bf16.msra.mxu1 %v19174_v52 }
 0x84c   : > { %13996 = vmatprep.subr.bf16.mxu0 %v19179_v34  ;;  %14078 = vmatprep.subr.bf16.mxu1 %v19182_v53 }
 0x84f   : > { %13997 = vmatpush1.bf16.msra.mxu0 %v19177_v57  ;;  %14079 = vmatpush1.bf16.msra.mxu1 %v19180_v58 }
 0x850   : > { %13998 = vmatprep.subr.bf16.mxu0 %v19185_v59  ;;  %14080 = vmatprep.subr.bf16.mxu1 %v19188_v33 }
 0x853   : > { %13999 = vmatpush1.bf16.msra.mxu0 %v19183_v62  ;;  %14081 = vmatpush1.bf16.msra.mxu1 %v19186_v0 }
 0x854   : > { %14000 = vmatprep.subr.bf16.mxu0 %v19191_v2  ;;  %14082 = vmatprep.subr.bf16.mxu1 %v19194_v47 }
 0x857   : > { %14001 = vmatpush1.bf16.msra.mxu0 %v19189_v3  ;;  %14083 = vmatpush1.bf16.msra.mxu1 %v19192_v19 }
 0x858   : > { %14002 = vmatprep.subr.bf16.mxu0 %v19197_v6  ;;  %14084 = vmatprep.subr.bf16.mxu1 %v19200_v7 }
 0x85b   : > { %14003 = vmatpush1.bf16.msra.mxu0 %v19195_v8  ;;  %14085 = vmatpush1.bf16.msra.mxu1 %v19198_v41 }
 0x85e   : > { %14005 = vmatmul.mubr.bf16.vlgmr.msra.gmra.mrb[12].mxu0 %v13140_v56  ;;  %14087 = vmatmul.mubr.bf16.vlgmr.msra.gmra.mrb[12].mxu1 %v13140_v56 }
 0x931   : > { %v14006_v16 = vpop.f32.mrb[12].mxu0  ;;  %v14088_v17 = vpop.f32.mrb[12].mxu1 }
 0x932   : > { %v16193_v54 = vadd.f32 %v14006_v16, %v13274_v12  ;;  %v16195_v14 = vadd.f32 %v14088_v17, %v13282_v13  ;;  %v14008_v20 = vpop.f32.mrb[13].mxu0  ;;  %v14090_v11 = vpop.f32.mrb[13].mxu1 }
 0x933   : > { %v16194_v5 = vadd.f32 %v14008_v20, %v13278_v15  ;;  %v16196_v61 = vadd.f32 %v14090_v11, %v13286_v63  ;;  %v14010_v22 = vpop.f32.mrb[14].mxu0  ;;  %v14092_v23 = vpop.f32.mrb[14].mxu1 }
 0x934   : > { %v14131_v18 = vsub.f32 %v22420_v43, %v16193_v54  ;;  %v14011_v28 = vpop.f32.mrb[15].mxu0  ;;  %v14093_v29 = vpop.f32.mrb[15].mxu1  ;;  %v14133_v31 = vsub.f32 %v22422_v44, %v16195_v14 }
 0x935   : > { %v16177_v32 = vpack.c.bf16 %v16194_v5, %v16193_v54  ;;  %v14132_v25 = vsub.f32 %v22424_v48, %v16194_v5  ;;  %v16178_v26 = vpack.c.bf16 %v16196_v61, %v16195_v14  ;;  %v14134_v43 = vsub.f32 %v22426_v49, %v16196_v61 }
 0x936   : > { %v14135_v10 = vmul.f32 %v14131_v18, %v14131_v18  ;;  %v14137_v24 = vmul.f32 %v14133_v31, %v14133_v31 }
 0x937   : > { %14111 = vst [vmem:[%s366_s12] sm:$0xff] %v16177_v32  ;;  %v14136_v21 = vmul.f32 %v14132_v25, %v14132_v25  ;;  %14112 = vst [vmem:[%s366_s12 + $0x8] sm:$0xff] %v16178_v26  ;;  %v14138_v35 = vmul.f32 %v14134_v43, %v14134_v43 }
 0x939   : > { %v14139_v27 = vadd.f32 %v14136_v21, %v14135_v10 }
 0x93b   : > { %v14140_v30 = vadd.f32 %v14139_v27, %v14137_v24 }
 0x93d   : > { %v14141_v37 = vadd.f32 %v14140_v30, %v14138_v35 }
 0x93f   : > { %14142 = vadd.xlane.f32.xlu0 %v14141_v37 }
 0x9cc   : > { %v14143_v44 = vpop.xlane.xlu0 %14142 }
 0x9cd   : > { %14144 = vst [vmem:[%s375_s16] sm:$0xff] %v14143_v44 }
 0x9ce PF: > { %s20_s30 = sadd.s32 1, %s19207_s30  }
 0x9cf   : > { %p17_p4 = scmp.ge.s32.totalorder %s20_s30, 4  }
 0x9d1   :  { %19 = sbr.rel (!%p17_p4) target bundleno = 1 (0x1), region = 108 }

</bundles_post_ra>
